<compile_context>
chip_gen: v5e
topology: v5e:2x2
jax: 0.10.0
libtpu: 0.0.40
codegen_flags: <defaults>
</compile_context>

<pallas_src>
import jax
import jax.numpy as jnp
from jax.experimental import pallas as pl
from jax.experimental.pallas import tpu as pltpu

EPS = 1e-5      # PyTorch BatchNorm default eps
C_PAD = 128     # pad every output-channel (lane) dim to one dense lane tile


def _round_up(v, m):
    return ((v + m - 1) // m) * m


# ---------------- fused UNet-stack (+ final 1x1 conv) kernel -----------------

def _unet_stack_kernel(x0_ref, w1_ref, w2_ref, g_ref, bt_ref, fw_ref, fb_ref,
                       o_ref, pad_a, pad_b):
    blk = pl.program_id(0)
    last = pl.num_programs(0) - 1
    B, Hp, Wp, C = pad_a.shape
    H, W = Hp - 2, Wp - 2
    M = B * H * W
    K1 = w1_ref.shape[2]
    K2 = w2_ref.shape[2]

    # First grid step: zero both halo scratches once (the 1-pixel zero border
    # == conv padding=1 stays valid for all blocks because only the centre
    # window is ever rewritten) and stage the padded NHWC bf16 input.
    @pl.when(blk == 0)
    def _():
        pad_a[...] = jnp.zeros_like(pad_a)
        pad_b[...] = jnp.zeros_like(pad_b)
        pad_a[:, 1:1 + H, 1:1 + W, :] = x0_ref[...]

    def conv3x3(src_ref, w_ref, K):
        # 3x3 / pad=1 conv as 9 shifted slab matmuls on the MXU (bf16
        # operands, f32 accumulation).  Taps are read straight from the bf16
        # zero-haloed VMEM scratch; only the first K (real + sublane-pad)
        # input channels are contracted -- no 128-wide K padding walked.
        # TODO(synk): fold the 9 taps into one K-concatenated matmul once a
        # lane-aligned im2col slab layout is worked out (per review).
        acc = jnp.zeros((M, C), jnp.float32)
        for t in range(9):
            dy, dx = divmod(t, 3)
            xt = src_ref[:, dy:dy + H, dx:dx + W, :K].reshape(M, K)
            acc = acc + jnp.dot(xt, w_ref[0, t],
                                preferred_element_type=jnp.float32)
        return acc

    def bn_relu(y, gamma_row, beta_row):
        # BatchNorm2d training-mode forward: batch statistics over all B*H*W
        # rows, biased variance, single pass (E[y^2] - E[y]^2); all
        # elementwise math in f32.  (Conv biases are omitted upstream -- the
        # mean subtraction here cancels them exactly.)
        mean = jnp.mean(y, axis=0, keepdims=True)
        var = jnp.mean(y * y, axis=0, keepdims=True) - mean * mean
        yn = (y - mean) * jax.lax.rsqrt(var + EPS)
        return jnp.maximum(yn * gamma_row + beta_row, 0.0)

    gamma = g_ref[0]     # one BatchNorm2d shared by both convs of the block
    beta = bt_ref[0]

    # conv1 -> bn -> relu   (single f32->bf16 cast at the scratch store)
    a1 = bn_relu(conv3x3(pad_a, w1_ref, K1), gamma, beta)
    pad_b[:, 1:1 + H, 1:1 + W, :] = a1.astype(pad_b.dtype).reshape(B, H, W, C)

    # conv2 -> (same) bn -> relu
    a2 = bn_relu(conv3x3(pad_b, w2_ref, K2), gamma, beta)

    @pl.when(blk != last)
    def _():
        pad_a[:, 1:1 + H, 1:1 + W, :] = (
            a2.astype(pad_a.dtype).reshape(B, H, W, C))

    @pl.when(blk == last)
    def _():
        # Fused final 1x1 conv epilogue; fw is padded to (K2, 128) with only
        # column 0 real, so the output store stays 128-lane dense.
        o_ref[...] = (
            jnp.dot(a2[:, :K2].astype(jnp.bfloat16), fw_ref[...],
                    preferred_element_type=jnp.float32)
            + fb_ref[...]
        )


def pallas_unet_stack(x0, w1s, w2s, gammas, betas, fw, fb):
    B, H, W, C = x0.shape
    M = B * H * W
    n_blocks = w1s.shape[0]
    K1 = w1s.shape[2]
    K2 = w2s.shape[2]
    # TODO(synk): if B or H*W grows (or on v7x's 2 TCs), add a leading
    # 'parallel' grid axis over rows and convert BN to a two-pass
    # sum / sum-of-squares reduction.
    return pl.pallas_call(
        _unet_stack_kernel,
        out_shape=jax.ShapeDtypeStruct((M, C), jnp.float32),
        grid_spec=pltpu.PrefetchScalarGridSpec(
            num_scalar_prefetch=0,
            grid=(n_blocks,),
            in_specs=[
                # activation input: constant block index -> staged once
                pl.BlockSpec((B, H, W, C), lambda b: (0, 0, 0, 0)),
                # per-block weight / BN slabs: double-buffered by Pallas so
                # block b+1's DMA hides behind block b's compute
                pl.BlockSpec((1, 9, K1, C), lambda b: (b, 0, 0, 0)),
                pl.BlockSpec((1, 9, K2, C), lambda b: (b, 0, 0, 0)),
                pl.BlockSpec((1, 1, C), lambda b: (b, 0, 0)),
                pl.BlockSpec((1, 1, C), lambda b: (b, 0, 0)),
                # final 1x1 conv weight / bias: constant block index
                pl.BlockSpec((K2, C), lambda b: (0, 0)),
                pl.BlockSpec((1, C), lambda b: (0, 0)),
            ],
            out_specs=pl.BlockSpec((M, C), lambda b: (0, 0)),
            scratch_shapes=[
                pltpu.VMEM((B, H + 2, W + 2, C), jnp.bfloat16),   # halo ping
                pltpu.VMEM((B, H + 2, W + 2, C), jnp.bfloat16),   # halo pong
            ],
        ),
        compiler_params=pltpu.CompilerParams(
            # scratch state + resident output accumulate across the block
            # axis -> must stay sequential
            dimension_semantics=("arbitrary",),
            # explicit scoped-VMEM limit (v5e default is only 16 MiB)
            vmem_limit_bytes=32 * 1024 * 1024,
        ),
    )(x0, w1s, w2s, gammas, betas, fw, fb)


# --------------------------- parameter construction -------------------------

def init_params(key, n_in, n_out, n_blocks, depth_increase_factor, noise_dim):
    total_n_in = n_in + noise_dim
    d_lin = total_n_in * n_out ** 2
    c_final = total_n_in * depth_increase_factor ** n_blocks
    assert c_final <= C_PAD, "channel count exceeds one 128-lane tile"
    # K (contraction) padding: per-stack max, rounded to bf16 sublane quantum
    K1_pad = _round_up(total_n_in * depth_increase_factor ** (n_blocks - 1), 16)
    K2_pad = _round_up(c_final, 16)

    keys = iter(jax.random.split(key, 8 + 4 * n_blocks))

    def nrm(shape, scale=0.1):
        return scale * jax.random.normal(next(keys), shape, jnp.float32)

    params = {
        "bn1d_gamma": 1.0 + nrm((1, n_in), 0.05),
        "bn1d_beta": nrm((1, n_in), 0.05),
        "lin_w": nrm((total_n_in, d_lin)),      # (in, out) layout
        "lin_b": nrm((1, d_lin)),
    }

    def conv_taps(c_i, c_o, k_pad):
        # Conceptual torch Conv2d weight (c_o, c_i, 3, 3) -> tap slabs
        # (9, c_i, c_o), zero-padded to (9, k_pad, 128) bf16.
        w = nrm((c_o, c_i, 3, 3))
        taps = jnp.transpose(w, (2, 3, 1, 0)).reshape(9, c_i, c_o)
        taps = jnp.pad(taps, ((0, 0), (0, k_pad - c_i), (0, C_PAD - c_o)))
        return taps.astype(jnp.bfloat16)

    def pad_row(v, c, fill=0.0):
        return jnp.pad(v, ((0, 0), (0, C_PAD - c)), constant_values=fill)

    # NOTE: 3x3-conv biases are intentionally not created -- they are added
    # before training-mode BatchNorm, whose mean subtraction cancels them
    # exactly, so they are mathematically dead work.
    w1s, w2s, gammas, betas = [], [], [], []
    cin = total_n_in
    for _ in range(n_blocks):
        cout = depth_increase_factor * cin
        w1s.append(conv_taps(cin, cout, K1_pad))
        w2s.append(conv_taps(cout, cout, K2_pad))
        # single BatchNorm2d shared by both convs of the UNetModule;
        # padded lanes: gamma=1 / beta=0 so they provably stay zero.
        gammas.append(pad_row(1.0 + nrm((1, cout), 0.05), cout, fill=1.0))
        betas.append(pad_row(nrm((1, cout), 0.05), cout))
        cin = cout

    params["w1s"] = jnp.stack(w1s)          # (n_blocks, 9, K1_pad, 128) bf16
    params["w2s"] = jnp.stack(w2s)          # (n_blocks, 9, K2_pad, 128) bf16
    params["gammas"] = jnp.stack(gammas)    # (n_blocks, 1, 128) f32
    params["betas"] = jnp.stack(betas)

    # final 1x1 conv (cin -> 1), lane-padded so column 0 is the real output
    fw = nrm((cin, 1))
    params["final_w"] = jnp.pad(
        fw, ((0, K2_pad - cin), (0, C_PAD - 1))).astype(jnp.bfloat16)
    params["final_b"] = jnp.pad(nrm((1, 1)), ((0, 0), (0, C_PAD - 1)))
    return params


# -------------------------------- forward pass -------------------------------

def deconvolver_forward(params, x, noise, *, n_out):
    B = x.shape[0]
    total_n_in = x.shape[1] + noise.shape[1]

    # metos BatchNorm1d (training-mode batch stats) + concat + tiny initial
    # Linear + reshape/transpose/pad: left to XLA as one small fusion
    # (far too small to benefit from Pallas; avoids a second launch).
    # TODO(synk): fold this head into the blk==0 step of the fused kernel to
    # remove the last fusion boundary entirely.
    mean = jnp.mean(x, axis=0, keepdims=True)
    var = jnp.mean((x - mean) ** 2, axis=0, keepdims=True)
    xn = (x - mean) * jax.lax.rsqrt(var + EPS)
    xn = xn * params["bn1d_gamma"] + params["bn1d_beta"]
    xc = jnp.concatenate([xn, noise], axis=1)              # (B, total_n_in)
    h = xc @ params["lin_w"] + params["lin_b"]             # (B, C*H*W)

    # PyTorch reshape semantics (B, C, H, W) -> NHWC -> pad channels to 128
    x0 = h.reshape(B, total_n_in, n_out, n_out)
    x0 = jnp.transpose(x0, (0, 2, 3, 1))                    # (B, H, W, C)
    x0 = jnp.pad(x0, ((0, 0), (0, 0), (0, 0), (0, C_PAD - total_n_in)))
    x0 = x0.astype(jnp.bfloat16)                            # single cast

    # one fused kernel: all UNet blocks + final 1x1 conv
    out_mat = pallas_unet_stack(
        x0, params["w1s"], params["w2s"],
        params["gammas"], params["betas"],
        params["final_w"], params["final_b"])

    # column 0 of the lane-padded output is the real 1-channel result
    return out_mat[:, 0].reshape(B, 1, n_out, n_out)        # NCHW (B, 1, H, W)


# ------------------------------------ main -----------------------------------

if __name__ == "__main__":
    B, n_in, n_out = 2, 4, 8
    n_blocks, depth_increase_factor, noise_dim = 4, 2, 2

    key = jax.random.PRNGKey(0)
    kx, kn, kp = jax.random.split(key, 3)
    x = jax.random.normal(kx, (B, n_in), jnp.float32)
    noise = jax.random.normal(kn, (B, noise_dim), jnp.float32)

    params = init_params(kp, n_in, n_out, n_blocks, depth_increase_factor,
                         noise_dim)

    fwd = jax.jit(lambda p, xx, nn: deconvolver_forward(p, xx, nn, n_out=n_out))
    out = jax.block_until_ready(fwd(params, x, noise))

    assert out.shape == (B, 1, n_out, n_out), out.shape
    assert out.dtype == jnp.float32
    print("KERNEL_OK")
</pallas_src>

<mosaic_0001>
module attributes {stable_mosaic.version = 11 : i64} {
  func.func @_unet_stack_kernel(%arg0: i32, %arg1: memref<2x8x8x128xbf16, #tpu.memory_space<vmem>>, %arg2: memref<1x9x48x128xbf16, #tpu.memory_space<vmem>>, %arg3: memref<1x9x96x128xbf16, #tpu.memory_space<vmem>>, %arg4: memref<1x1x128xf32, #tpu.memory_space<vmem>>, %arg5: memref<1x1x128xf32, #tpu.memory_space<vmem>>, %arg6: memref<96x128xbf16, #tpu.memory_space<vmem>>, %arg7: memref<1x128xf32, #tpu.memory_space<vmem>>, %arg8: memref<128x128xf32, #tpu.memory_space<vmem>>, %arg9: memref<2x10x10x128xbf16, #tpu.memory_space<vmem>>, %arg10: memref<2x10x10x128xbf16, #tpu.memory_space<vmem>>) attributes {dimension_semantics = [#tpu.dimension_semantics<arbitrary>], iteration_bounds = array<i64: 4>, scalar_prefetch = 0 : i64, scratch_operands = 2 : i64, tpu.core_type = #tpu.core_type<tc>, window_params = [{pipeline_mode = #tpu.pipeline_mode<synchronous>, transform_indices = @transform_0, window_bounds = array<i64: 2, 8, 8, 128>}, {transform_indices = @transform_1, window_bounds = array<i64: 1, 9, 48, 128>}, {transform_indices = @transform_2, window_bounds = array<i64: 1, 9, 96, 128>}, {transform_indices = @transform_3, window_bounds = array<i64: 1, 1, 128>}, {transform_indices = @transform_4, window_bounds = array<i64: 1, 1, 128>}, {pipeline_mode = #tpu.pipeline_mode<synchronous>, transform_indices = @transform_5, window_bounds = array<i64: 96, 128>}, {pipeline_mode = #tpu.pipeline_mode<synchronous>, transform_indices = @transform_6, window_bounds = array<i64: 1, 128>}, {pipeline_mode = #tpu.pipeline_mode<synchronous>, transform_indices = @transform_7, window_bounds = array<i64: 128, 128>}]} {
    %c0_i32 = arith.constant 0 : i32
    %0 = arith.cmpi eq, %arg0, %c0_i32 : i32
    %1 = arith.extui %0 : i1 to i32
    %c0_i32_0 = arith.constant 0 : i32
    %2 = arith.cmpi ne, %1, %c0_i32_0 : i32
    scf.if %2 {
      %cst_180 = arith.constant 0.000000e+00 : bf16
      %174 = vector.broadcast %cst_180 : bf16 to vector<2x10x10x128xbf16>
      %c0_181 = arith.constant 0 : index
      %c0_182 = arith.constant 0 : index
      %c0_183 = arith.constant 0 : index
      %c0_184 = arith.constant 0 : index
      %175 = vector.load %arg9[%c0_181, %c0_182, %c0_183, %c0_184] : memref<2x10x10x128xbf16, #tpu.memory_space<vmem>>, vector<2x10x10x128xbf16>
      tpu.vector_store %arg9[%c0_181, %c0_182, %c0_183, %c0_184], %174 {strides = array<i32>} : memref<2x10x10x128xbf16, #tpu.memory_space<vmem>>, vector<2x10x10x128xbf16>,
      %cst_185 = arith.constant 0.000000e+00 : bf16
      %176 = vector.broadcast %cst_185 : bf16 to vector<2x10x10x128xbf16>
      %c0_186 = arith.constant 0 : index
      %c0_187 = arith.constant 0 : index
      %c0_188 = arith.constant 0 : index
      %c0_189 = arith.constant 0 : index
      %177 = vector.load %arg10[%c0_186, %c0_187, %c0_188, %c0_189] : memref<2x10x10x128xbf16, #tpu.memory_space<vmem>>, vector<2x10x10x128xbf16>
      tpu.vector_store %arg10[%c0_186, %c0_187, %c0_188, %c0_189], %176 {strides = array<i32>} : memref<2x10x10x128xbf16, #tpu.memory_space<vmem>>, vector<2x10x10x128xbf16>,
      %c0_190 = arith.constant 0 : index
      %c0_191 = arith.constant 0 : index
      %c0_192 = arith.constant 0 : index
      %c0_193 = arith.constant 0 : index
      %178 = vector.load %arg1[%c0_190, %c0_191, %c0_192, %c0_193] : memref<2x8x8x128xbf16, #tpu.memory_space<vmem>>, vector<2x8x8x128xbf16>
      %c0_194 = arith.constant 0 : index
      %c1_195 = arith.constant 1 : index
      %c1_196 = arith.constant 1 : index
      %c0_197 = arith.constant 0 : index
      %179 = vector.load %arg9[%c0_194, %c1_195, %c1_196, %c0_197] : memref<2x10x10x128xbf16, #tpu.memory_space<vmem>>, vector<2x8x8x128xbf16>
      tpu.vector_store %arg9[%c0_194, %c1_195, %c1_196, %c0_197], %178 {strides = array<i32>} : memref<2x10x10x128xbf16, #tpu.memory_space<vmem>>, vector<2x8x8x128xbf16>,
    } else {
    }
    %c0 = arith.constant 0 : index
    %c0_1 = arith.constant 0 : index
    %c0_2 = arith.constant 0 : index
    %3 = vector.load %arg4[%c0, %c0_1, %c0_2] : memref<1x1x128xf32, #tpu.memory_space<vmem>>, vector<1x1x128xf32>
    %4 = vector.shape_cast %3 : vector<1x1x128xf32> to vector<1x128xf32>
    %c0_3 = arith.constant 0 : index
    %c0_4 = arith.constant 0 : index
    %c0_5 = arith.constant 0 : index
    %5 = vector.load %arg5[%c0_3, %c0_4, %c0_5] : memref<1x1x128xf32, #tpu.memory_space<vmem>>, vector<1x1x128xf32>
    %6 = vector.shape_cast %5 : vector<1x1x128xf32> to vector<1x128xf32>
    %cst = arith.constant 0.000000e+00 : f32
    %7 = vector.broadcast %cst : f32 to vector<128x128xf32>
    %c0_6 = arith.constant 0 : index
    %c0_7 = arith.constant 0 : index
    %c0_8 = arith.constant 0 : index
    %c0_9 = arith.constant 0 : index
    %8 = vector.load %arg9[%c0_6, %c0_7, %c0_8, %c0_9] : memref<2x10x10x128xbf16, #tpu.memory_space<vmem>>, vector<2x8x8x48xbf16>
    %9 = vector.shape_cast %8 : vector<2x8x8x48xbf16> to vector<128x48xbf16>
    %c0_10 = arith.constant 0 : index
    %c0_11 = arith.constant 0 : index
    %c0_12 = arith.constant 0 : index
    %c0_13 = arith.constant 0 : index
    %10 = vector.load %arg2[%c0_10, %c0_11, %c0_12, %c0_13] : memref<1x9x48x128xbf16, #tpu.memory_space<vmem>>, vector<1x1x48x128xbf16>
    %11 = vector.shape_cast %10 : vector<1x1x48x128xbf16> to vector<48x128xbf16>
    %cst_14 = arith.constant dense<0.000000e+00> : vector<128x128xf32>
    %12 = tpu.matmul %9, %11, %cst_14 {dimension_numbers = #tpu.dot_dimension_numbers<[1], [0], [0], [1], [0, 0, 1, 1], [], []>} : vector<128x48xbf16>, vector<48x128xbf16>, vector<128x128xf32> -> vector<128x128xf32>
    %13 = arith.addf %7, %12 : vector<128x128xf32>
    %c0_15 = arith.constant 0 : index
    %c0_16 = arith.constant 0 : index
    %c1 = arith.constant 1 : index
    %c0_17 = arith.constant 0 : index
    %14 = vector.load %arg9[%c0_15, %c0_16, %c1, %c0_17] : memref<2x10x10x128xbf16, #tpu.memory_space<vmem>>, vector<2x8x8x48xbf16>
    %15 = vector.shape_cast %14 : vector<2x8x8x48xbf16> to vector<128x48xbf16>
    %c0_18 = arith.constant 0 : index
    %c1_19 = arith.constant 1 : index
    %c0_20 = arith.constant 0 : index
    %c0_21 = arith.constant 0 : index
    %16 = vector.load %arg2[%c0_18, %c1_19, %c0_20, %c0_21] : memref<1x9x48x128xbf16, #tpu.memory_space<vmem>>, vector<1x1x48x128xbf16>
    %17 = vector.shape_cast %16 : vector<1x1x48x128xbf16> to vector<48x128xbf16>
    %cst_22 = arith.constant dense<0.000000e+00> : vector<128x128xf32>
    %18 = tpu.matmul %15, %17, %cst_22 {dimension_numbers = #tpu.dot_dimension_numbers<[1], [0], [0], [1], [0, 0, 1, 1], [], []>} : vector<128x48xbf16>, vector<48x128xbf16>, vector<128x128xf32> -> vector<128x128xf32>
    %19 = arith.addf %13, %18 : vector<128x128xf32>
    %c0_23 = arith.constant 0 : index
    %c0_24 = arith.constant 0 : index
    %c2 = arith.constant 2 : index
    %c0_25 = arith.constant 0 : index
    %20 = vector.load %arg9[%c0_23, %c0_24, %c2, %c0_25] : memref<2x10x10x128xbf16, #tpu.memory_space<vmem>>, vector<2x8x8x48xbf16>
    %21 = vector.shape_cast %20 : vector<2x8x8x48xbf16> to vector<128x48xbf16>
    %c0_26 = arith.constant 0 : index
    %c2_27 = arith.constant 2 : index
    %c0_28 = arith.constant 0 : index
    %c0_29 = arith.constant 0 : index
    %22 = vector.load %arg2[%c0_26, %c2_27, %c0_28, %c0_29] : memref<1x9x48x128xbf16, #tpu.memory_space<vmem>>, vector<1x1x48x128xbf16>
    %23 = vector.shape_cast %22 : vector<1x1x48x128xbf16> to vector<48x128xbf16>
    %cst_30 = arith.constant dense<0.000000e+00> : vector<128x128xf32>
    %24 = tpu.matmul %21, %23, %cst_30 {dimension_numbers = #tpu.dot_dimension_numbers<[1], [0], [0], [1], [0, 0, 1, 1], [], []>} : vector<128x48xbf16>, vector<48x128xbf16>, vector<128x128xf32> -> vector<128x128xf32>
    %25 = arith.addf %19, %24 : vector<128x128xf32>
    %c0_31 = arith.constant 0 : index
    %c1_32 = arith.constant 1 : index
    %c0_33 = arith.constant 0 : index
    %c0_34 = arith.constant 0 : index
    %26 = vector.load %arg9[%c0_31, %c1_32, %c0_33, %c0_34] : memref<2x10x10x128xbf16, #tpu.memory_space<vmem>>, vector<2x8x8x48xbf16>
    %27 = vector.shape_cast %26 : vector<2x8x8x48xbf16> to vector<128x48xbf16>
    %c0_35 = arith.constant 0 : index
    %c3 = arith.constant 3 : index
    %c0_36 = arith.constant 0 : index
    %c0_37 = arith.constant 0 : index
    %28 = vector.load %arg2[%c0_35, %c3, %c0_36, %c0_37] : memref<1x9x48x128xbf16, #tpu.memory_space<vmem>>, vector<1x1x48x128xbf16>
    %29 = vector.shape_cast %28 : vector<1x1x48x128xbf16> to vector<48x128xbf16>
    %cst_38 = arith.constant dense<0.000000e+00> : vector<128x128xf32>
    %30 = tpu.matmul %27, %29, %cst_38 {dimension_numbers = #tpu.dot_dimension_numbers<[1], [0], [0], [1], [0, 0, 1, 1], [], []>} : vector<128x48xbf16>, vector<48x128xbf16>, vector<128x128xf32> -> vector<128x128xf32>
    %31 = arith.addf %25, %30 : vector<128x128xf32>
    %c0_39 = arith.constant 0 : index
    %c1_40 = arith.constant 1 : index
    %c1_41 = arith.constant 1 : index
    %c0_42 = arith.constant 0 : index
    %32 = vector.load %arg9[%c0_39, %c1_40, %c1_41, %c0_42] : memref<2x10x10x128xbf16, #tpu.memory_space<vmem>>, vector<2x8x8x48xbf16>
    %33 = vector.shape_cast %32 : vector<2x8x8x48xbf16> to vector<128x48xbf16>
    %c0_43 = arith.constant 0 : index
    %c4 = arith.constant 4 : index
    %c0_44 = arith.constant 0 : index
    %c0_45 = arith.constant 0 : index
    %34 = vector.load %arg2[%c0_43, %c4, %c0_44, %c0_45] : memref<1x9x48x128xbf16, #tpu.memory_space<vmem>>, vector<1x1x48x128xbf16>
    %35 = vector.shape_cast %34 : vector<1x1x48x128xbf16> to vector<48x128xbf16>
    %cst_46 = arith.constant dense<0.000000e+00> : vector<128x128xf32>
    %36 = tpu.matmul %33, %35, %cst_46 {dimension_numbers = #tpu.dot_dimension_numbers<[1], [0], [0], [1], [0, 0, 1, 1], [], []>} : vector<128x48xbf16>, vector<48x128xbf16>, vector<128x128xf32> -> vector<128x128xf32>
    %37 = arith.addf %31, %36 : vector<128x128xf32>
    %c0_47 = arith.constant 0 : index
    %c1_48 = arith.constant 1 : index
    %c2_49 = arith.constant 2 : index
    %c0_50 = arith.constant 0 : index
    %38 = vector.load %arg9[%c0_47, %c1_48, %c2_49, %c0_50] : memref<2x10x10x128xbf16, #tpu.memory_space<vmem>>, vector<2x8x8x48xbf16>
    %39 = vector.shape_cast %38 : vector<2x8x8x48xbf16> to vector<128x48xbf16>
    %c0_51 = arith.constant 0 : index
    %c5 = arith.constant 5 : index
    %c0_52 = arith.constant 0 : index
    %c0_53 = arith.constant 0 : index
    %40 = vector.load %arg2[%c0_51, %c5, %c0_52, %c0_53] : memref<1x9x48x128xbf16, #tpu.memory_space<vmem>>, vector<1x1x48x128xbf16>
    %41 = vector.shape_cast %40 : vector<1x1x48x128xbf16> to vector<48x128xbf16>
    %cst_54 = arith.constant dense<0.000000e+00> : vector<128x128xf32>
    %42 = tpu.matmul %39, %41, %cst_54 {dimension_numbers = #tpu.dot_dimension_numbers<[1], [0], [0], [1], [0, 0, 1, 1], [], []>} : vector<128x48xbf16>, vector<48x128xbf16>, vector<128x128xf32> -> vector<128x128xf32>
    %43 = arith.addf %37, %42 : vector<128x128xf32>
    %c0_55 = arith.constant 0 : index
    %c2_56 = arith.constant 2 : index
    %c0_57 = arith.constant 0 : index
    %c0_58 = arith.constant 0 : index
    %44 = vector.load %arg9[%c0_55, %c2_56, %c0_57, %c0_58] : memref<2x10x10x128xbf16, #tpu.memory_space<vmem>>, vector<2x8x8x48xbf16>
    %45 = vector.shape_cast %44 : vector<2x8x8x48xbf16> to vector<128x48xbf16>
    %c0_59 = arith.constant 0 : index
    %c6 = arith.constant 6 : index
    %c0_60 = arith.constant 0 : index
    %c0_61 = arith.constant 0 : index
    %46 = vector.load %arg2[%c0_59, %c6, %c0_60, %c0_61] : memref<1x9x48x128xbf16, #tpu.memory_space<vmem>>, vector<1x1x48x128xbf16>
    %47 = vector.shape_cast %46 : vector<1x1x48x128xbf16> to vector<48x128xbf16>
    %cst_62 = arith.constant dense<0.000000e+00> : vector<128x128xf32>
    %48 = tpu.matmul %45, %47, %cst_62 {dimension_numbers = #tpu.dot_dimension_numbers<[1], [0], [0], [1], [0, 0, 1, 1], [], []>} : vector<128x48xbf16>, vector<48x128xbf16>, vector<128x128xf32> -> vector<128x128xf32>
    %49 = arith.addf %43, %48 : vector<128x128xf32>
    %c0_63 = arith.constant 0 : index
    %c2_64 = arith.constant 2 : index
    %c1_65 = arith.constant 1 : index
    %c0_66 = arith.constant 0 : index
    %50 = vector.load %arg9[%c0_63, %c2_64, %c1_65, %c0_66] : memref<2x10x10x128xbf16, #tpu.memory_space<vmem>>, vector<2x8x8x48xbf16>
    %51 = vector.shape_cast %50 : vector<2x8x8x48xbf16> to vector<128x48xbf16>
    %c0_67 = arith.constant 0 : index
    %c7 = arith.constant 7 : index
    %c0_68 = arith.constant 0 : index
    %c0_69 = arith.constant 0 : index
    %52 = vector.load %arg2[%c0_67, %c7, %c0_68, %c0_69] : memref<1x9x48x128xbf16, #tpu.memory_space<vmem>>, vector<1x1x48x128xbf16>
    %53 = vector.shape_cast %52 : vector<1x1x48x128xbf16> to vector<48x128xbf16>
    %cst_70 = arith.constant dense<0.000000e+00> : vector<128x128xf32>
    %54 = tpu.matmul %51, %53, %cst_70 {dimension_numbers = #tpu.dot_dimension_numbers<[1], [0], [0], [1], [0, 0, 1, 1], [], []>} : vector<128x48xbf16>, vector<48x128xbf16>, vector<128x128xf32> -> vector<128x128xf32>
    %55 = arith.addf %49, %54 : vector<128x128xf32>
    %c0_71 = arith.constant 0 : index
    %c2_72 = arith.constant 2 : index
    %c2_73 = arith.constant 2 : index
    %c0_74 = arith.constant 0 : index
    %56 = vector.load %arg9[%c0_71, %c2_72, %c2_73, %c0_74] : memref<2x10x10x128xbf16, #tpu.memory_space<vmem>>, vector<2x8x8x48xbf16>
    %57 = vector.shape_cast %56 : vector<2x8x8x48xbf16> to vector<128x48xbf16>
    %c0_75 = arith.constant 0 : index
    %c8 = arith.constant 8 : index
    %c0_76 = arith.constant 0 : index
    %c0_77 = arith.constant 0 : index
    %58 = vector.load %arg2[%c0_75, %c8, %c0_76, %c0_77] : memref<1x9x48x128xbf16, #tpu.memory_space<vmem>>, vector<1x1x48x128xbf16>
    %59 = vector.shape_cast %58 : vector<1x1x48x128xbf16> to vector<48x128xbf16>
    %cst_78 = arith.constant dense<0.000000e+00> : vector<128x128xf32>
    %60 = tpu.matmul %57, %59, %cst_78 {dimension_numbers = #tpu.dot_dimension_numbers<[1], [0], [0], [1], [0, 0, 1, 1], [], []>} : vector<128x48xbf16>, vector<48x128xbf16>, vector<128x128xf32> -> vector<128x128xf32>
    %61 = arith.addf %55, %60 : vector<128x128xf32>
    %cst_79 = arith.constant dense<0.000000e+00> : vector<128xf32>
    %62 = vector.multi_reduction <add>, %61, %cst_79 [0] : vector<128x128xf32> to vector<128xf32>
    %63 = vector.shape_cast %62 : vector<128xf32> to vector<1x128xf32>
    %cst_80 = arith.constant 1.280000e+02 : f32
    %64 = vector.broadcast %cst_80 : f32 to vector<1x128xf32>
    %65 = arith.divf %63, %64 : vector<1x128xf32>
    %66 = arith.mulf %61, %61 : vector<128x128xf32>
    %cst_81 = arith.constant dense<0.000000e+00> : vector<128xf32>
    %67 = vector.multi_reduction <add>, %66, %cst_81 [0] : vector<128x128xf32> to vector<128xf32>
    %68 = vector.shape_cast %67 : vector<128xf32> to vector<1x128xf32>
    %cst_82 = arith.constant 1.280000e+02 : f32
    %69 = vector.broadcast %cst_82 : f32 to vector<1x128xf32>
    %70 = arith.divf %68, %69 : vector<1x128xf32>
    %71 = arith.mulf %65, %65 : vector<1x128xf32>
    %72 = arith.subf %70, %71 : vector<1x128xf32>
    %73 = vector.broadcast %65 : vector<1x128xf32> to vector<128x128xf32>
    %74 = arith.subf %61, %73 : vector<128x128xf32>
    %cst_83 = arith.constant 9.99999974E-6 : f32
    %75 = vector.broadcast %cst_83 : f32 to vector<1x128xf32>
    %76 = arith.addf %72, %75 : vector<1x128xf32>
    %77 = math.rsqrt %76 : vector<1x128xf32>
    %78 = vector.broadcast %77 : vector<1x128xf32> to vector<128x128xf32>
    %79 = arith.mulf %74, %78 : vector<128x128xf32>
    %80 = vector.broadcast %4 : vector<1x128xf32> to vector<128x128xf32>
    %81 = arith.mulf %79, %80 : vector<128x128xf32>
    %82 = vector.broadcast %6 : vector<1x128xf32> to vector<128x128xf32>
    %83 = arith.addf %81, %82 : vector<128x128xf32>
    %cst_84 = arith.constant 0.000000e+00 : f32
    %84 = vector.broadcast %cst_84 : f32 to vector<128x128xf32>
    %85 = arith.maximumf %83, %84 : vector<128x128xf32>
    %86 = arith.truncf %85 : vector<128x128xf32> to vector<128x128xbf16>
    %87 = vector.shape_cast %86 : vector<128x128xbf16> to vector<2x8x8x128xbf16>
    %c0_85 = arith.constant 0 : index
    %c1_86 = arith.constant 1 : index
    %c1_87 = arith.constant 1 : index
    %c0_88 = arith.constant 0 : index
    %88 = vector.load %arg10[%c0_85, %c1_86, %c1_87, %c0_88] : memref<2x10x10x128xbf16, #tpu.memory_space<vmem>>, vector<2x8x8x128xbf16>
    tpu.vector_store %arg10[%c0_85, %c1_86, %c1_87, %c0_88], %87 {strides = array<i32>} : memref<2x10x10x128xbf16, #tpu.memory_space<vmem>>, vector<2x8x8x128xbf16>,
    %cst_89 = arith.constant 0.000000e+00 : f32
    %89 = vector.broadcast %cst_89 : f32 to vector<128x128xf32>
    %c0_90 = arith.constant 0 : index
    %c0_91 = arith.constant 0 : index
    %c0_92 = arith.constant 0 : index
    %c0_93 = arith.constant 0 : index
    %90 = vector.load %arg10[%c0_90, %c0_91, %c0_92, %c0_93] : memref<2x10x10x128xbf16, #tpu.memory_space<vmem>>, vector<2x8x8x96xbf16>
    %91 = vector.shape_cast %90 : vector<2x8x8x96xbf16> to vector<128x96xbf16>
    %c0_94 = arith.constant 0 : index
    %c0_95 = arith.constant 0 : index
    %c0_96 = arith.constant 0 : index
    %c0_97 = arith.constant 0 : index
    %92 = vector.load %arg3[%c0_94, %c0_95, %c0_96, %c0_97] : memref<1x9x96x128xbf16, #tpu.memory_space<vmem>>, vector<1x1x96x128xbf16>
    %93 = vector.shape_cast %92 : vector<1x1x96x128xbf16> to vector<96x128xbf16>
    %cst_98 = arith.constant dense<0.000000e+00> : vector<128x128xf32>
    %94 = tpu.matmul %91, %93, %cst_98 {dimension_numbers = #tpu.dot_dimension_numbers<[1], [0], [0], [1], [0, 0, 1, 1], [], []>} : vector<128x96xbf16>, vector<96x128xbf16>, vector<128x128xf32> -> vector<128x128xf32>
    %95 = arith.addf %89, %94 : vector<128x128xf32>
    %c0_99 = arith.constant 0 : index
    %c0_100 = arith.constant 0 : index
    %c1_101 = arith.constant 1 : index
    %c0_102 = arith.constant 0 : index
    %96 = vector.load %arg10[%c0_99, %c0_100, %c1_101, %c0_102] : memref<2x10x10x128xbf16, #tpu.memory_space<vmem>>, vector<2x8x8x96xbf16>
    %97 = vector.shape_cast %96 : vector<2x8x8x96xbf16> to vector<128x96xbf16>
    %c0_103 = arith.constant 0 : index
    %c1_104 = arith.constant 1 : index
    %c0_105 = arith.constant 0 : index
    %c0_106 = arith.constant 0 : index
    %98 = vector.load %arg3[%c0_103, %c1_104, %c0_105, %c0_106] : memref<1x9x96x128xbf16, #tpu.memory_space<vmem>>, vector<1x1x96x128xbf16>
    %99 = vector.shape_cast %98 : vector<1x1x96x128xbf16> to vector<96x128xbf16>
    %cst_107 = arith.constant dense<0.000000e+00> : vector<128x128xf32>
    %100 = tpu.matmul %97, %99, %cst_107 {dimension_numbers = #tpu.dot_dimension_numbers<[1], [0], [0], [1], [0, 0, 1, 1], [], []>} : vector<128x96xbf16>, vector<96x128xbf16>, vector<128x128xf32> -> vector<128x128xf32>
    %101 = arith.addf %95, %100 : vector<128x128xf32>
    %c0_108 = arith.constant 0 : index
    %c0_109 = arith.constant 0 : index
    %c2_110 = arith.constant 2 : index
    %c0_111 = arith.constant 0 : index
    %102 = vector.load %arg10[%c0_108, %c0_109, %c2_110, %c0_111] : memref<2x10x10x128xbf16, #tpu.memory_space<vmem>>, vector<2x8x8x96xbf16>
    %103 = vector.shape_cast %102 : vector<2x8x8x96xbf16> to vector<128x96xbf16>
    %c0_112 = arith.constant 0 : index
    %c2_113 = arith.constant 2 : index
    %c0_114 = arith.constant 0 : index
    %c0_115 = arith.constant 0 : index
    %104 = vector.load %arg3[%c0_112, %c2_113, %c0_114, %c0_115] : memref<1x9x96x128xbf16, #tpu.memory_space<vmem>>, vector<1x1x96x128xbf16>
    %105 = vector.shape_cast %104 : vector<1x1x96x128xbf16> to vector<96x128xbf16>
    %cst_116 = arith.constant dense<0.000000e+00> : vector<128x128xf32>
    %106 = tpu.matmul %103, %105, %cst_116 {dimension_numbers = #tpu.dot_dimension_numbers<[1], [0], [0], [1], [0, 0, 1, 1], [], []>} : vector<128x96xbf16>, vector<96x128xbf16>, vector<128x128xf32> -> vector<128x128xf32>
    %107 = arith.addf %101, %106 : vector<128x128xf32>
    %c0_117 = arith.constant 0 : index
    %c1_118 = arith.constant 1 : index
    %c0_119 = arith.constant 0 : index
    %c0_120 = arith.constant 0 : index
    %108 = vector.load %arg10[%c0_117, %c1_118, %c0_119, %c0_120] : memref<2x10x10x128xbf16, #tpu.memory_space<vmem>>, vector<2x8x8x96xbf16>
    %109 = vector.shape_cast %108 : vector<2x8x8x96xbf16> to vector<128x96xbf16>
    %c0_121 = arith.constant 0 : index
    %c3_122 = arith.constant 3 : index
    %c0_123 = arith.constant 0 : index
    %c0_124 = arith.constant 0 : index
    %110 = vector.load %arg3[%c0_121, %c3_122, %c0_123, %c0_124] : memref<1x9x96x128xbf16, #tpu.memory_space<vmem>>, vector<1x1x96x128xbf16>
    %111 = vector.shape_cast %110 : vector<1x1x96x128xbf16> to vector<96x128xbf16>
    %cst_125 = arith.constant dense<0.000000e+00> : vector<128x128xf32>
    %112 = tpu.matmul %109, %111, %cst_125 {dimension_numbers = #tpu.dot_dimension_numbers<[1], [0], [0], [1], [0, 0, 1, 1], [], []>} : vector<128x96xbf16>, vector<96x128xbf16>, vector<128x128xf32> -> vector<128x128xf32>
    %113 = arith.addf %107, %112 : vector<128x128xf32>
    %c0_126 = arith.constant 0 : index
    %c1_127 = arith.constant 1 : index
    %c1_128 = arith.constant 1 : index
    %c0_129 = arith.constant 0 : index
    %114 = vector.load %arg10[%c0_126, %c1_127, %c1_128, %c0_129] : memref<2x10x10x128xbf16, #tpu.memory_space<vmem>>, vector<2x8x8x96xbf16>
    %115 = vector.shape_cast %114 : vector<2x8x8x96xbf16> to vector<128x96xbf16>
    %c0_130 = arith.constant 0 : index
    %c4_131 = arith.constant 4 : index
    %c0_132 = arith.constant 0 : index
    %c0_133 = arith.constant 0 : index
    %116 = vector.load %arg3[%c0_130, %c4_131, %c0_132, %c0_133] : memref<1x9x96x128xbf16, #tpu.memory_space<vmem>>, vector<1x1x96x128xbf16>
    %117 = vector.shape_cast %116 : vector<1x1x96x128xbf16> to vector<96x128xbf16>
    %cst_134 = arith.constant dense<0.000000e+00> : vector<128x128xf32>
    %118 = tpu.matmul %115, %117, %cst_134 {dimension_numbers = #tpu.dot_dimension_numbers<[1], [0], [0], [1], [0, 0, 1, 1], [], []>} : vector<128x96xbf16>, vector<96x128xbf16>, vector<128x128xf32> -> vector<128x128xf32>
    %119 = arith.addf %113, %118 : vector<128x128xf32>
    %c0_135 = arith.constant 0 : index
    %c1_136 = arith.constant 1 : index
    %c2_137 = arith.constant 2 : index
    %c0_138 = arith.constant 0 : index
    %120 = vector.load %arg10[%c0_135, %c1_136, %c2_137, %c0_138] : memref<2x10x10x128xbf16, #tpu.memory_space<vmem>>, vector<2x8x8x96xbf16>
    %121 = vector.shape_cast %120 : vector<2x8x8x96xbf16> to vector<128x96xbf16>
    %c0_139 = arith.constant 0 : index
    %c5_140 = arith.constant 5 : index
    %c0_141 = arith.constant 0 : index
    %c0_142 = arith.constant 0 : index
    %122 = vector.load %arg3[%c0_139, %c5_140, %c0_141, %c0_142] : memref<1x9x96x128xbf16, #tpu.memory_space<vmem>>, vector<1x1x96x128xbf16>
    %123 = vector.shape_cast %122 : vector<1x1x96x128xbf16> to vector<96x128xbf16>
    %cst_143 = arith.constant dense<0.000000e+00> : vector<128x128xf32>
    %124 = tpu.matmul %121, %123, %cst_143 {dimension_numbers = #tpu.dot_dimension_numbers<[1], [0], [0], [1], [0, 0, 1, 1], [], []>} : vector<128x96xbf16>, vector<96x128xbf16>, vector<128x128xf32> -> vector<128x128xf32>
    %125 = arith.addf %119, %124 : vector<128x128xf32>
    %c0_144 = arith.constant 0 : index
    %c2_145 = arith.constant 2 : index
    %c0_146 = arith.constant 0 : index
    %c0_147 = arith.constant 0 : index
    %126 = vector.load %arg10[%c0_144, %c2_145, %c0_146, %c0_147] : memref<2x10x10x128xbf16, #tpu.memory_space<vmem>>, vector<2x8x8x96xbf16>
    %127 = vector.shape_cast %126 : vector<2x8x8x96xbf16> to vector<128x96xbf16>
    %c0_148 = arith.constant 0 : index
    %c6_149 = arith.constant 6 : index
    %c0_150 = arith.constant 0 : index
    %c0_151 = arith.constant 0 : index
    %128 = vector.load %arg3[%c0_148, %c6_149, %c0_150, %c0_151] : memref<1x9x96x128xbf16, #tpu.memory_space<vmem>>, vector<1x1x96x128xbf16>
    %129 = vector.shape_cast %128 : vector<1x1x96x128xbf16> to vector<96x128xbf16>
    %cst_152 = arith.constant dense<0.000000e+00> : vector<128x128xf32>
    %130 = tpu.matmul %127, %129, %cst_152 {dimension_numbers = #tpu.dot_dimension_numbers<[1], [0], [0], [1], [0, 0, 1, 1], [], []>} : vector<128x96xbf16>, vector<96x128xbf16>, vector<128x128xf32> -> vector<128x128xf32>
    %131 = arith.addf %125, %130 : vector<128x128xf32>
    %c0_153 = arith.constant 0 : index
    %c2_154 = arith.constant 2 : index
    %c1_155 = arith.constant 1 : index
    %c0_156 = arith.constant 0 : index
    %132 = vector.load %arg10[%c0_153, %c2_154, %c1_155, %c0_156] : memref<2x10x10x128xbf16, #tpu.memory_space<vmem>>, vector<2x8x8x96xbf16>
    %133 = vector.shape_cast %132 : vector<2x8x8x96xbf16> to vector<128x96xbf16>
    %c0_157 = arith.constant 0 : index
    %c7_158 = arith.constant 7 : index
    %c0_159 = arith.constant 0 : index
    %c0_160 = arith.constant 0 : index
    %134 = vector.load %arg3[%c0_157, %c7_158, %c0_159, %c0_160] : memref<1x9x96x128xbf16, #tpu.memory_space<vmem>>, vector<1x1x96x128xbf16>
    %135 = vector.shape_cast %134 : vector<1x1x96x128xbf16> to vector<96x128xbf16>
    %cst_161 = arith.constant dense<0.000000e+00> : vector<128x128xf32>
    %136 = tpu.matmul %133, %135, %cst_161 {dimension_numbers = #tpu.dot_dimension_numbers<[1], [0], [0], [1], [0, 0, 1, 1], [], []>} : vector<128x96xbf16>, vector<96x128xbf16>, vector<128x128xf32> -> vector<128x128xf32>
    %137 = arith.addf %131, %136 : vector<128x128xf32>
    %c0_162 = arith.constant 0 : index
    %c2_163 = arith.constant 2 : index
    %c2_164 = arith.constant 2 : index
    %c0_165 = arith.constant 0 : index
    %138 = vector.load %arg10[%c0_162, %c2_163, %c2_164, %c0_165] : memref<2x10x10x128xbf16, #tpu.memory_space<vmem>>, vector<2x8x8x96xbf16>
    %139 = vector.shape_cast %138 : vector<2x8x8x96xbf16> to vector<128x96xbf16>
    %c0_166 = arith.constant 0 : index
    %c8_167 = arith.constant 8 : index
    %c0_168 = arith.constant 0 : index
    %c0_169 = arith.constant 0 : index
    %140 = vector.load %arg3[%c0_166, %c8_167, %c0_168, %c0_169] : memref<1x9x96x128xbf16, #tpu.memory_space<vmem>>, vector<1x1x96x128xbf16>
    %141 = vector.shape_cast %140 : vector<1x1x96x128xbf16> to vector<96x128xbf16>
    %cst_170 = arith.constant dense<0.000000e+00> : vector<128x128xf32>
    %142 = tpu.matmul %139, %141, %cst_170 {dimension_numbers = #tpu.dot_dimension_numbers<[1], [0], [0], [1], [0, 0, 1, 1], [], []>} : vector<128x96xbf16>, vector<96x128xbf16>, vector<128x128xf32> -> vector<128x128xf32>
    %143 = arith.addf %137, %142 : vector<128x128xf32>
    %cst_171 = arith.constant dense<0.000000e+00> : vector<128xf32>
    %144 = vector.multi_reduction <add>, %143, %cst_171 [0] : vector<128x128xf32> to vector<128xf32>
    %145 = vector.shape_cast %144 : vector<128xf32> to vector<1x128xf32>
    %cst_172 = arith.constant 1.280000e+02 : f32
    %146 = vector.broadcast %cst_172 : f32 to vector<1x128xf32>
    %147 = arith.divf %145, %146 : vector<1x128xf32>
    %148 = arith.mulf %143, %143 : vector<128x128xf32>
    %cst_173 = arith.constant dense<0.000000e+00> : vector<128xf32>
    %149 = vector.multi_reduction <add>, %148, %cst_173 [0] : vector<128x128xf32> to vector<128xf32>
    %150 = vector.shape_cast %149 : vector<128xf32> to vector<1x128xf32>
    %cst_174 = arith.constant 1.280000e+02 : f32
    %151 = vector.broadcast %cst_174 : f32 to vector<1x128xf32>
    %152 = arith.divf %150, %151 : vector<1x128xf32>
    %153 = arith.mulf %147, %147 : vector<1x128xf32>
    %154 = arith.subf %152, %153 : vector<1x128xf32>
    %155 = vector.broadcast %147 : vector<1x128xf32> to vector<128x128xf32>
    %156 = arith.subf %143, %155 : vector<128x128xf32>
    %cst_175 = arith.constant 9.99999974E-6 : f32
    %157 = vector.broadcast %cst_175 : f32 to vector<1x128xf32>
    %158 = arith.addf %154, %157 : vector<1x128xf32>
    %159 = math.rsqrt %158 : vector<1x128xf32>
    %160 = vector.broadcast %159 : vector<1x128xf32> to vector<128x128xf32>
    %161 = arith.mulf %156, %160 : vector<128x128xf32>
    %162 = vector.broadcast %4 : vector<1x128xf32> to vector<128x128xf32>
    %163 = arith.mulf %161, %162 : vector<128x128xf32>
    %164 = vector.broadcast %6 : vector<1x128xf32> to vector<128x128xf32>
    %165 = arith.addf %163, %164 : vector<128x128xf32>
    %cst_176 = arith.constant 0.000000e+00 : f32
    %166 = vector.broadcast %cst_176 : f32 to vector<128x128xf32>
    %167 = arith.maximumf %165, %166 : vector<128x128xf32>
    %c3_i32 = arith.constant 3 : i32
    %168 = arith.cmpi ne, %arg0, %c3_i32 : i32
    %169 = arith.extui %168 : i1 to i32
    %c0_i32_177 = arith.constant 0 : i32
    %170 = arith.cmpi ne, %169, %c0_i32_177 : i32
    scf.if %170 {
      %174 = arith.truncf %167 : vector<128x128xf32> to vector<128x128xbf16>
      %175 = vector.shape_cast %174 : vector<128x128xbf16> to vector<2x8x8x128xbf16>
      %c0_180 = arith.constant 0 : index
      %c1_181 = arith.constant 1 : index
      %c1_182 = arith.constant 1 : index
      %c0_183 = arith.constant 0 : index
      %176 = vector.load %arg9[%c0_180, %c1_181, %c1_182, %c0_183] : memref<2x10x10x128xbf16, #tpu.memory_space<vmem>>, vector<2x8x8x128xbf16>
      tpu.vector_store %arg9[%c0_180, %c1_181, %c1_182, %c0_183], %175 {strides = array<i32>} : memref<2x10x10x128xbf16, #tpu.memory_space<vmem>>, vector<2x8x8x128xbf16>,
    } else {
    }
    %c3_i32_178 = arith.constant 3 : i32
    %171 = arith.cmpi eq, %arg0, %c3_i32_178 : i32
    %172 = arith.extui %171 : i1 to i32
    %c0_i32_179 = arith.constant 0 : i32
    %173 = arith.cmpi ne, %172, %c0_i32_179 : i32
    scf.if %173 {
      %174 = vector.extract_strided_slice %167 {offsets = [0, 0], sizes = [128, 96], strides = [1, 1]} : vector<128x128xf32> to vector<128x96xf32>
      %175 = arith.truncf %174 : vector<128x96xf32> to vector<128x96xbf16>
      %c0_180 = arith.constant 0 : index
      %c0_181 = arith.constant 0 : index
      %176 = vector.load %arg6[%c0_180, %c0_181] : memref<96x128xbf16, #tpu.memory_space<vmem>>, vector<96x128xbf16>
      %cst_182 = arith.constant dense<0.000000e+00> : vector<128x128xf32>
      %177 = tpu.matmul %175, %176, %cst_182 {dimension_numbers = #tpu.dot_dimension_numbers<[1], [0], [0], [1], [0, 0, 1, 1], [], []>} : vector<128x96xbf16>, vector<96x128xbf16>, vector<128x128xf32> -> vector<128x128xf32>
      %c0_183 = arith.constant 0 : index
      %c0_184 = arith.constant 0 : index
      %178 = vector.load %arg7[%c0_183, %c0_184] : memref<1x128xf32, #tpu.memory_space<vmem>>, vector<1x128xf32>
      %179 = vector.broadcast %178 : vector<1x128xf32> to vector<128x128xf32>
      %180 = arith.addf %177, %179 : vector<128x128xf32>
      %c0_185 = arith.constant 0 : index
      %c0_186 = arith.constant 0 : index
      %181 = vector.load %arg8[%c0_185, %c0_186] : memref<128x128xf32, #tpu.memory_space<vmem>>, vector<128x128xf32>
      tpu.vector_store %arg8[%c0_185, %c0_186], %180 {strides = array<i32>} : memref<128x128xf32, #tpu.memory_space<vmem>>, vector<128x128xf32>,
    } else {
    }
    return
  }
  func.func @transform_0(%arg0: i32) -> (i32, i32, i32, i32) {
    %c0_i32 = arith.constant 0 : i32
    %c0_i32_0 = arith.constant 0 : i32
    %c0_i32_1 = arith.constant 0 : i32
    %c0_i32_2 = arith.constant 0 : i32
    %c0_i32_3 = arith.constant 0 : i32
    return %c0_i32, %c0_i32_0, %c0_i32_1, %c0_i32_2 : i32, i32, i32, i32
  }
  func.func @transform_1(%arg0: i32) -> (i32, i32, i32, i32) {
    %c0_i32 = arith.constant 0 : i32
    %c0_i32_0 = arith.constant 0 : i32
    %c0_i32_1 = arith.constant 0 : i32
    %c0_i32_2 = arith.constant 0 : i32
    return %arg0, %c0_i32, %c0_i32_0, %c0_i32_1 : i32, i32, i32, i32
  }
  func.func @transform_2(%arg0: i32) -> (i32, i32, i32, i32) {
    %c0_i32 = arith.constant 0 : i32
    %c0_i32_0 = arith.constant 0 : i32
    %c0_i32_1 = arith.constant 0 : i32
    %c0_i32_2 = arith.constant 0 : i32
    return %arg0, %c0_i32, %c0_i32_0, %c0_i32_1 : i32, i32, i32, i32
  }
  func.func @transform_3(%arg0: i32) -> (i32, i32, i32) {
    %c0_i32 = arith.constant 0 : i32
    %c0_i32_0 = arith.constant 0 : i32
    %c0_i32_1 = arith.constant 0 : i32
    return %arg0, %c0_i32, %c0_i32_0 : i32, i32, i32
  }
  func.func @transform_4(%arg0: i32) -> (i32, i32, i32) {
    %c0_i32 = arith.constant 0 : i32
    %c0_i32_0 = arith.constant 0 : i32
    %c0_i32_1 = arith.constant 0 : i32
    return %arg0, %c0_i32, %c0_i32_0 : i32, i32, i32
  }
  func.func @transform_5(%arg0: i32) -> (i32, i32) {
    %c0_i32 = arith.constant 0 : i32
    %c0_i32_0 = arith.constant 0 : i32
    %c0_i32_1 = arith.constant 0 : i32
    return %c0_i32, %c0_i32_0 : i32, i32
  }
  func.func @transform_6(%arg0: i32) -> (i32, i32) {
    %c0_i32 = arith.constant 0 : i32
    %c0_i32_0 = arith.constant 0 : i32
    %c0_i32_1 = arith.constant 0 : i32
    return %c0_i32, %c0_i32_0 : i32, i32
  }
  func.func @transform_7(%arg0: i32) -> (i32, i32) {
    %c0_i32 = arith.constant 0 : i32
    %c0_i32_0 = arith.constant 0 : i32
    %c0_i32_1 = arith.constant 0 : i32
    return %c0_i32, %c0_i32_0 : i32, i32
  }
}

</mosaic_0001>

<bundles_post_ra>
// kernel: squeeze.1
= control target key start
LH: loop header
LB: loop body
LE: loop exit
PB: predicated region body
PF: predicated region fallthrough
CT: control target
= control target key end

     0   :  { %s202_s0 = inlined_call_operand.vmem [shape: f32[128], index: 0, kind: input, shape index: {}]   ;;  %s203_s1 = inlined_call_operand.hbm [shape: f32[2,1,8,8], index: 1, kind: output, shape index: {}]  }
   0x1   :  { %v5_v0 = vld [vmem:[%s202_s0] sm:$0x1] }
   0x2   :  { %2 = vsyncpa [#allocation1], 0  ;;  %6 = vst [vmem:[#allocation2] sm:$0x1] %v5_v0  ;;  %s154_s0 = smov 104   ;;  %s155_s8 = smov 120  }
   0x3   :  { %s156_s9 = smov 88   ;;  %s157_s10 = smov 96   ;;  %vm8_vm0 = vcmask 64512  }
   0x4   :  { %s158_s11 = smov 112   ;;  %s159_s12 = smov 80  }
   0x5   :  { %s160_s13 = smov 64   ;;  %s161_s14 = smov 72  }
   0x6   :  { %s162_s15 = smov 56   ;;  %s163_s16 = smov 40  }
   0x7   :  { %s164_s17 = smov 48   ;;  %s165_s18 = smov 32  }
   0x8   :  { %s166_s19 = smov 16   ;;  %s167_s20 = smov 24  }
   0x9   :  { %v22_v1 = vld [vmem:[#allocation2] sm:$0x1]   ;;  %s168_s21 = smov 8   ;;  %s169_s22 = smov [#allocation0]  }
   0xa   :  { %v10_v2 = vld [vmem:[#allocation2] sm:$0x1]   ;;  %23 = vrot.lane.b32.xlu1 %v22_v1, %s154_s0  ;;  %s103_s23 = sshll.u32 %s169_s22, 4  ;;  %s105_s1 = sshll.u32 %s203_s1, 4  ;;  %s104_s23 = int_to_ptr.vmem [resolvable:$true] %s103_s23  ;;  %s106_s1 = int_to_ptr.hbm [resolvable:$true] %s105_s1 }
   0xb   :  { %11 = vrot.lane.b32.xlu0 %v10_v2, %s155_s8  ;;  %v34_v3 = vld [vmem:[#allocation2] sm:$0x1]  }
   0xc   :  { %35 = vrot.lane.b32.xlu2 %v34_v3, %s156_s9  ;;  %v28_v4 = vld [vmem:[#allocation2] sm:$0x1]  }
   0xd   :  { %v16_v5 = vld [vmem:[#allocation2] sm:$0x1]  }
   0xe   :  { %v40_v6 = vld [vmem:[#allocation2] sm:$0x1]  }
   0xf   :  { %v52_v7 = vld [vmem:[#allocation2] sm:$0x1]  }
  0x10   :  { %v46_v8 = vld [vmem:[#allocation2] sm:$0x1]  }
  0x11   :  { %v58_v9 = vld [vmem:[#allocation2] sm:$0x1]  }
  0x12   :  { %29 = vrot.lane.b32.xlu1 %v28_v4, %s157_s10  ;;  %v70_v10 = vld [vmem:[#allocation2] sm:$0x1]  }
  0x13   :  { %17 = vrot.lane.b32.xlu0 %v16_v5, %s158_s11  ;;  %v64_v11 = vld [vmem:[#allocation2] sm:$0x1]  }
  0x14   :  { %41 = vrot.lane.b32.xlu2 %v40_v6, %s159_s12  ;;  %v76_v12 = vld [vmem:[#allocation2] sm:$0x1]  }
  0x15   :  { %v88_v13 = vld [vmem:[#allocation2] sm:$0x1]  }
  0x16   :  { %v82_v14 = vld [vmem:[#allocation2] sm:$0x1]  }
  0x17   :  { %v94_v15 = vld [vmem:[#allocation2] sm:$0x1]  }
  0x18   :  { %v7_v21 = vld [vmem:[#allocation2] sm:$0x1]  }
  0x19   :  { %9 = vst.msk [vmem:[#allocation0] sm:$0x1] %vm8_vm0, %v7_v21  }
  0x1a   :  { %53 = vrot.lane.b32.xlu1 %v52_v7, %s160_s13 }
  0x1b   :  { %47 = vrot.lane.b32.xlu0 %v46_v8, %s161_s14 }
  0x1c   :  { %59 = vrot.lane.b32.xlu2 %v58_v9, %s162_s15 }
  0x22   :  { %71 = vrot.lane.b32.xlu1 %v70_v10, %s163_s16 }
  0x23   :  { %65 = vrot.lane.b32.xlu0 %v64_v11, %s164_s17 }
  0x24   :  { %77 = vrot.lane.b32.xlu2 %v76_v12, %s165_s18 }
  0x2a   :  { %89 = vrot.lane.b32.xlu1 %v88_v13, %s166_s19 }
  0x2b   :  { %83 = vrot.lane.b32.xlu0 %v82_v14, %s167_s20 }
  0x2c   :  { %95 = vrot.lane.b32.xlu2 %v94_v15, %s168_s21 }
  0x66   :  { %v36_v16 = vpop.permute.xlu2 %35  }
  0x67   :  { %39 = vst.msk [vmem:[#allocation0 + $0x5] sm:$0x1] %vm8_vm0, %v36_v16  }
  0x6e   :  { %v42_v17 = vpop.permute.xlu2 %41  }
  0x6f   :  { %45 = vst.msk [vmem:[#allocation0 + $0x6] sm:$0x1] %vm8_vm0, %v42_v17  }
  0x76   :  { %v60_v18 = vpop.permute.xlu2 %59  }
  0x77   :  { %63 = vst.msk [vmem:[#allocation0 + $0x9] sm:$0x1] %vm8_vm0, %v60_v18  }
  0x7c   :  { %v24_v19 = vpop.permute.xlu1 %23  }
  0x7d   :  { %v12_v20 = vpop.permute.xlu0 %11   ;;  %27 = vst.msk [vmem:[#allocation0 + $0x3] sm:$0x1] %vm8_vm0, %v24_v19  }
  0x7e   :  { %15 = vst.msk [vmem:[#allocation0 + $0x1] sm:$0x1] %vm8_vm0, %v12_v20   ;;  %v78_v22 = vpop.permute.xlu2 %77  }
  0x7f   :  { %81 = vst.msk [vmem:[#allocation0 + $0xc] sm:$0x1] %vm8_vm0, %v78_v22  }
  0x84   :  { %v30_v23 = vpop.permute.xlu1 %29  }
  0x85   :  { %v18_v24 = vpop.permute.xlu0 %17   ;;  %33 = vst.msk [vmem:[#allocation0 + $0x4] sm:$0x1] %vm8_vm0, %v30_v23  }
  0x86   :  { %21 = vst.msk [vmem:[#allocation0 + $0x2] sm:$0x1] %vm8_vm0, %v18_v24   ;;  %v96_v25 = vpop.permute.xlu2 %95  }
  0x87   :  { %99 = vst.msk [vmem:[#allocation0 + $0xf] sm:$0x1] %vm8_vm0, %v96_v25  }
  0x8c   :  { %v54_v26 = vpop.permute.xlu1 %53  }
  0x8d   :  { %v48_v27 = vpop.permute.xlu0 %47   ;;  %57 = vst.msk [vmem:[#allocation0 + $0x8] sm:$0x1] %vm8_vm0, %v54_v26  }
  0x8e   :  { %51 = vst.msk [vmem:[#allocation0 + $0x7] sm:$0x1] %vm8_vm0, %v48_v27  }
  0x94   :  { %v72_v28 = vpop.permute.xlu1 %71  }
  0x95   :  { %v66_v29 = vpop.permute.xlu0 %65   ;;  %75 = vst.msk [vmem:[#allocation0 + $0xb] sm:$0x1] %vm8_vm0, %v72_v28  }
  0x96   :  { %69 = vst.msk [vmem:[#allocation0 + $0xa] sm:$0x1] %vm8_vm0, %v66_v29  }
  0x9c   :  { %v90_v30 = vpop.permute.xlu1 %89  }
  0x9d   :  { %v84_v31 = vpop.permute.xlu0 %83   ;;  %93 = vst.msk [vmem:[#allocation0 + $0xe] sm:$0x1] %vm8_vm0, %v90_v30  }
  0x9e   :  { %87 = vst.msk [vmem:[#allocation0 + $0xd] sm:$0x1] %vm8_vm0, %v84_v31  }
  0x9f   :  { %108 = dma.vmem_to_hbm [thread:$0]  %s104_s23, 256, %s106_s1, [#allocation1]  }
  0xa0   :  { %152 = dma.done.wait [#allocation1], 256  }
  0xa1   :  { %153 = vsyncadd [#allocation1], 4294967040 }
  0xa2   :  { %111 = vsyncpa [#allocation1], 1 }

// kernel: _lambda_.1
= control target key start
LH: loop header
LB: loop body
LE: loop exit
PB: predicated region body
PF: predicated region fallthrough
CT: control target
= control target key end

     0   :  { %s10339_s0 = inlined_call_operand.vmem [shape: bf16[2,8,8,128], index: 0, kind: input, shape index: {}]   ;;  %s10340_s1 = inlined_call_operand.hbm [shape: bf16[4,9,48,128], index: 1, kind: input, shape index: {}]   ;;  %s10341_s2 = inlined_call_operand.hbm [shape: bf16[4,9,96,128], index: 2, kind: input, shape index: {}]   ;;  %s10342_s3 = inlined_call_operand.vmem [shape: f32[4,1,128], index: 3, kind: input, shape index: {}]   ;;  %s10343_s4 = inlined_call_operand.vmem [shape: f32[4,1,128], index: 4, kind: input, shape index: {}]   ;;  %s10344_s5 = inlined_call_operand.vmem [shape: bf16[96,128], index: 5, kind: input, shape index: {}]   ;;  %s10345_s6 = inlined_call_operand.vmem [shape: f32[1,128], index: 6, kind: input, shape index: {}]   ;;  %s10346_s7 = inlined_call_operand.vmem [shape: f32[128,128], index: 7, kind: output, shape index: {}]  }
   0x1   :  { %10352 = sst [smem:[#allocation21_spill]] %s10340_s1 }
   0x2   :  { %12 = vsyncpa [#allocation5], 0 }
   0x3   :  { %14 = vsyncpa [#allocation5 + $0x1], 0 }
   0x4   :  { %15 = vsyncpa [#allocation7], 0 }
   0x5   :  { %17 = vsyncpa [#allocation7 + $0x1], 0  ;;  %s8167_s24 = smov 0   ;;  %s8169_s25 = smov 0  }
   0x6   :  { %s8171_s26 = smov 0   ;;  %s8173_s27 = smov 0  }
   0x7 LB: > { %s8186_s28 = sadd.s32 4294967295, %s8121_s27   ;;  %s8189_s29 = sadd.s32 1, %s8121_s27   ;;  %s8121_s27 = sphi %s8173_s27, %s10395_s27   ;;  %s8117_s26 = sphi %s8171_s26, %s10394_s26   ;;  %s8113_s25 = sphi %s8169_s25, %s10393_s25   ;;  %s8109_s24 = sphi %s8167_s24, %s10392_s24  }
   0x8   : > { %s48_s30 = ssub.s32 %s8121_s27, %s8189_s29  ;;  %s51_s8 = sadd.s32 1, %s8117_s26 }
   0x9   : > { %p49_p0 = scmp.eq.s32.totalorder %s48_s30, 0  ;;  %p58_p1 = scmp.ne.s32.totalorder %s8117_s26, %s8113_s25 }
   0xa   : > { %p59_p2 = scmp.eq.s32.totalorder %s8121_s27, 0  ;;  %p64_p3 = scmp.ne.s32.totalorder %s8113_s25, %s8109_s24 }
   0xb   : > { %s8199_s9 = scalar_select %p49_p0, %s8117_s26, %s51_s8  }
   0xc   : > { %p60_p4 = por %p59_p2, %p58_p1  ;;  %p65_p5 = scmp.eq.s32.totalorder %s8186_s28, 0 }
   0xd   : > { %p7961_p6 = scmp.lt.s32.totalorder %s8121_s27, 4  ;;  %s8208_s11 = sand.u32 1, %s8117_s26  }
   0xe   : > { %p8203_p7 = por %p65_p5, %p64_p3  ;;  %s7944_s12 = smul.u32 216, %s8208_s11 }
   0xf   : > { %s7945_s13 = smul.u32 216, %s8121_s27  ;;  %p8212_p8 = pnand %p7961_p6, %p60_p4 }
  0x10   : > { %s10355_s1 = sld [smem:[#allocation21_spill]]  ;;  %s242_s18 = scalar_lea.vmem [#allocation4], %s7944_s12 }
  0x11   : > { %s250_s19 = sshll.u32 %s242_s18, 4  ;;  %p6847_p9 = scmp.ge.s32.totalorder %s8121_s27, 1  ;;  %s251_s19 = int_to_ptr.vmem [resolvable:$true] %s250_s19 }
  0x12   : > { %s239_s21 = scalar_lea.sflag [#allocation5], %s8208_s11  ;;  %p8027_p11 = pneg %p8212_p8 }
  0x16   : > { %s247_s17 = scalar_lea.hbm %s10355_s1, %s7945_s13  ;;  %s8030_s8 = scalar_lea.hbm %s10355_s1, 864 }
  0x17   : > { %s248_s20 = sshll.u32 %s247_s17, 4  ;;  %s249_s20 = int_to_ptr.hbm [resolvable:$true] %s248_s20 }
  0x18   : > { %s8023_s22 = sshra.s32 %s249_s20, 4  ;;  %s8024_s22 = int_to_ptr.hbm [resolvable:$true] %s8023_s22 }
  0x19   : > { %s8025_s23 = scalar_lea.hbm %s8024_s22, 216  ;;  %p8031_p0 = scmp.lt.s32.totalorder %s8024_s22, %s10355_s1 }
  0x1a   : > { %p8026_p10 = scmp.ne.s32.totalorder %s8024_s22, %s8025_s23  ;;  %p8032_p1 = scmp.lt.s32.totalorder %s8030_s8, %s8025_s23 }
  0x1c   : > { %p8028_p12 = pnand %p8027_p11, %p8026_p10  ;;  %p8033_p2 = por %p8032_p1, %p8031_p0 }
  0x1e   : > { %p8029_p13 = pneg %p8028_p12 }
  0x20   : > { %p8034_p3 = pnand %p8033_p2, %p8029_p13 }
  0x22   : > { %8037 = shalt.err (!%p8034_p3)
}
  0x23   : > { %s10347_s15 = smov 64   ;;  %s8124_s16 = smov 4  }
  0x24   : > { %7957 = dma.hbm_to_vmem [thread:$0]  (!%p8212_p8), %s249_s20, 3456, %s251_s19, %s239_s21, %s10347_s15, %s10347_s15, %s8124_s16  }
  0x25   : > { %p292_p4 = scmp.lt.s32.totalorder %s8121_s27, 5  ;;  %s7946_s17 = smul.u32 432, %s8208_s11 }
  0x26   : > { %s7947_s22 = smul.u32 432, %s8121_s27  ;;  %s261_s1 = scalar_lea.sflag [#allocation7], %s8208_s11 }
  0x27   : > { %p8241_p5 = pnand %p6847_p9, %p292_p4  ;;  %s264_s8 = scalar_lea.vmem [#allocation6], %s7946_s17 }
  0x28   : > { %s269_s30 = scalar_lea.hbm %s10341_s2, %s7947_s22  ;;  %s272_s12 = sshll.u32 %s264_s8, 4  ;;  %s273_s12 = int_to_ptr.vmem [resolvable:$true] %s272_s12 }
  0x29   : > { %s270_s13 = sshll.u32 %s269_s30, 4  ;;  %s8060_s15 = scalar_lea.hbm %s10341_s2, 1728  ;;  %s271_s13 = int_to_ptr.hbm [resolvable:$true] %s270_s13 }
  0x2a   : > { %s8053_s19 = sshra.s32 %s271_s13, 4  ;;  %s8054_s19 = int_to_ptr.hbm [resolvable:$true] %s8053_s19 }
  0x2b   : > { %s8055_s20 = scalar_lea.hbm %s8054_s19, 432  ;;  %p8061_p12 = scmp.lt.s32.totalorder %s8054_s19, %s10341_s2 }
  0x2c   : > { %p8056_p6 = scmp.ne.s32.totalorder %s8054_s19, %s8055_s20  ;;  %p8062_p13 = scmp.lt.s32.totalorder %s8060_s15, %s8055_s20 }
  0x2e   : > { %p8058_p9 = pnand %p8056_p6, %p8027_p11  ;;  %p8063_p0 = por %p8062_p13, %p8061_p12 }
  0x30   : > { %p8059_p10 = pneg %p8058_p9 }
  0x32   : > { %p8064_p1 = pnand %p8063_p0, %p8059_p10 }
  0x34   : > { %8067 = shalt.err (!%p8064_p1)
}
  0x35   : > { %s10357_s11 = smov 64   ;;  %296 = sbr.rel (%p8241_p5) target bundleno = 1532 (0x5fc), region = 48 }
  0x36   : > { %7960 = dma.hbm_to_vmem [thread:$0]  (!%p8212_p8), %s271_s13, 6912, %s273_s12, %s261_s1, %s10357_s11, %s10357_s11, %s8124_s16  }
  0x3a   : > { %s298_s17 = sand.u32 1, %s8113_s25  }
  0x3b   : > { %s7948_s24 = smul.u32 216, %s298_s17  ;;  %s299_s30 = scalar_lea.sflag [#allocation5], %s298_s17 }
  0x3d   : > { %s8267_s8 = scalar_lea.vmem [#allocation4], %s7948_s24 }
  0x3e   : > { %8100 = dma.done.wait (%p8203_p7), %s299_s30, 3456  }
  0x3f   : > { %8102 = vsyncadd (%p8203_p7), %s299_s30, 4294963840  ;;  %s7949_s14 = smul.u32 432, %s298_s17  ;;  %s309_s15 = scalar_lea.sflag [#allocation7], %s298_s17 }
  0x41   : > { %s8273_s19 = scalar_lea.vmem [#allocation6], %s7949_s14 }
  0x42   : > { %8104 = dma.done.wait (%p8203_p7), %s309_s15, 6912  }
  0x43   : > { %8106 = vsyncadd (%p8203_p7), %s309_s15, 4294960384  ;;  %p350_p8 = scmp.lt.s32.totalorder %s8186_s28, 3  ;;  %p6848_p11 = scmp.ne.s32.totalorder %s8186_s28, 0 }
  0x45   : > { %s351_s1 = scalar_select %p350_p8, %s8186_s28, 3 }
  0x46   : > { %360 = sbr.rel (%p6848_p11) target bundleno = 188 (0xbc), region = 60 }
  0x47   : > { %s8284_s12 = scalar_lea.vmem %s10342_s3, %s351_s1  ;;  %s8289_s21 = scalar_lea.vmem %s10343_s4, %s351_s1 }
  0x4b   : > { %v8125_v0 = vmov 0   ;;  %v441_v1 = vld [vmem:[%s10339_s0] sm:$0xf]  ;;  %v442_v3 = vld [vmem:[%s10339_s0 + $0x4] sm:$0xf]  ;;  %vm618_vm1 = vcmask 1043456  }
  0x4c   : > { %363 = vst [vmem:[#allocation2 + $0x8] sm:$0xf] %v8125_v0  ;;  %v458_v2 = vshrl.u32 %v441_v1, 16  ;;  %v443_v4 = vld [vmem:[%s10339_s0 + $0x8] sm:$0xf]  ;;  %v466_v5 = vshrl.u32 %v442_v3, 16 }
  0x4d   : > { %361 = vst [vmem:[#allocation2] sm:$0xf] %v8125_v0  ;;  %v444_v6 = vld [vmem:[%s10339_s0 + $0xc] sm:$0xf]  ;;  %v461_v8 = vshll.u32 %v441_v1, 16  ;;  %v474_v9 = vshrl.u32 %v443_v4, 16 }
  0x4e   : > { %362 = vst [vmem:[#allocation2 + $0x4] sm:$0x1] %v8125_v0  ;;  %v460_v7 = vrot.slane %v458_v2, 7  ;;  %vm619_vm0 = vsmask.f32 7938  ;;  %v482_v10 = vshrl.u32 %v444_v6, 16 }
  0x4f   : > { %364 = vst [vmem:[#allocation2 + $0xc] sm:$0x1] %v8125_v0  ;;  %v445_v11 = vld [vmem:[%s10339_s0 + $0x10] sm:$0xf]  ;;  %vm624_vm2 = vcmask 1040384   ;;  %v468_v12 = vrot.slane %v466_v5, 7  ;;  %vm8387_vm4 = vmand %vm618_vm1, %vm619_vm0 }
  0x50   : > { %365 = vst [vmem:[#allocation2 + $0x10] sm:$0xf] %v8125_v0  ;;  %v469_v13 = vshll.u32 %v442_v3, 16  ;;  %v463_v14 = vor.u32 %v461_v8, %v460_v7  ;;  %vm625_vm3 = vsmask.f32 256  ;;  %v464_v17 = vrot.slane %v460_v7, 4 }
  0x51   : > { %366 = vst [vmem:[#allocation2 + $0x14] sm:$0x1] %v8125_v0  ;;  %v446_v16 = vld [vmem:[%s10339_s0 + $0x14] sm:$0xf]  ;;  %v476_v19 = vrot.slane %v474_v9, 7  ;;  %v477_v20 = vshll.u32 %v443_v4, 16  ;;  %vm8399_vm5 = vmand %vm624_vm2, %vm625_vm3 }
  0x52   : > { %367 = vst [vmem:[#allocation2 + $0x18] sm:$0xf] %v8125_v0  ;;  %v490_v21 = vshrl.u32 %v445_v11, 16  ;;  %v484_v24 = vrot.slane %v482_v10, 7  ;;  %v485_v25 = vshll.u32 %v444_v6, 16  ;;  %v471_v28 = vor.u32 %v469_v13, %v468_v12 }
  0x53   : > { %368 = vst [vmem:[#allocation2 + $0x1c] sm:$0x1] %v8125_v0  ;;  %v621_v15 = vld [vmem:[#allocation2 + $0x8] sm:$0xf]  ;;  %v8394_v26 = vld [vmem:[%s10339_s0 + $0x18] sm:$0xf]  ;;  %v479_v36 = vor.u32 %v477_v20, %v476_v19 }
  0x54   : > { %369 = vst [vmem:[#allocation2 + $0x20] sm:$0xf] %v8125_v0  ;;  %v498_v30 = vshrl.u32 %v446_v16, 16  ;;  %v472_v31 = vrot.slane %v468_v12, 4  ;;  %v493_v33 = vshll.u32 %v445_v11, 16  ;;  %v622_v35 = vsel %vm8387_vm4, %v463_v14, %v621_v15 }
  0x55   : > { %370 = vst [vmem:[#allocation2 + $0x24] sm:$0x1] %v8125_v0  ;;  %v8407_v34 = vld [vmem:[%s10339_s0 + $0x1c] sm:$0xf]  ;;  %v492_v38 = vrot.slane %v490_v21, 7  ;;  %v506_v39 = vshrl.u32 %v8394_v26, 16  ;;  %v487_v43 = vor.u32 %v485_v25, %v484_v24 }
  0x56   : > { %371 = vst [vmem:[#allocation2 + $0x28] sm:$0xf] %v8125_v0  ;;  %v627_v18 = vld [vmem:[#allocation2 + $0xc] sm:$0x1]  ;;  %v8416_v40 = vld [vmem:[%s10339_s0 + $0x20] sm:$0xf] }
  0x57   : > { %372 = vst [vmem:[#allocation2 + $0x2c] sm:$0x1] %v8125_v0  ;;  %v630_v23 = vld [vmem:[#allocation2 + $0x10] sm:$0xf]  ;;  %v628_v41 = vsel %vm8399_vm5, %v464_v17, %v627_v18  ;;  %v480_v42 = vrot.slane %v476_v19, 4  ;;  %v501_v45 = vshll.u32 %v446_v16, 16  ;;  %v495_v56 = vor.u32 %v493_v33, %v492_v38 }
  0x58   : > { %373 = vst [vmem:[#allocation2 + $0x30] sm:$0xf] %v8125_v0  ;;  %v633_v29 = vld [vmem:[#allocation2 + $0x14] sm:$0x1]  ;;  %v631_v46 = vsel %vm8387_vm4, %v471_v28, %v630_v23  ;;  %v500_v48 = vrot.slane %v498_v30, 7  ;;  %v514_v49 = vshrl.u32 %v8407_v34, 16 }
  0x59   : > { %374 = vst [vmem:[#allocation2 + $0x34] sm:$0x1] %v8125_v0  ;;  %v636_v32 = vld [vmem:[#allocation2 + $0x18] sm:$0xf]  ;;  %v8428_v50 = vld [vmem:[%s10339_s0 + $0x24] sm:$0xf]  ;;  %v634_v51 = vsel %vm8399_vm5, %v472_v31, %v633_v29 }
  0x5a   : > { %375 = vst [vmem:[#allocation2 + $0x38] sm:$0xf] %v8125_v0  ;;  %v639_v37 = vld [vmem:[#allocation2 + $0x1c] sm:$0x1]  ;;  %v488_v52 = vrot.slane %v484_v24, 4  ;;  %v522_v54 = vshrl.u32 %v8416_v40, 16  ;;  %v637_v55 = vsel %vm8387_vm4, %v479_v36, %v636_v32  ;;  %v503_v2 = vor.u32 %v501_v45, %v500_v48 }
  0x5b   : > { %376 = vst [vmem:[#allocation2 + $0x3c] sm:$0x1] %v8125_v0  ;;  %v642_v44 = vld [vmem:[#allocation2 + $0x20] sm:$0xf]  ;;  %v508_v58 = vrot.slane %v506_v39, 7  ;;  %v509_v59 = vshll.u32 %v8394_v26, 16  ;;  %v640_v60 = vsel %vm8399_vm5, %v480_v42, %v639_v37 }
  0x5c   : > { %377 = vst [vmem:[#allocation2 + $0x40] sm:$0xf] %v8125_v0  ;;  %v645_v47 = vld [vmem:[#allocation2 + $0x24] sm:$0x1]  ;;  %v643_v61 = vsel %vm8387_vm4, %v487_v43, %v642_v44  ;;  %v496_v62 = vrot.slane %v492_v38, 4  ;;  %v504_v3 = vrot.slane %v500_v48, 4 }
  0x5d   : > { %378 = vst [vmem:[#allocation2 + $0x44] sm:$0x1] %v8125_v0  ;;  %v648_v53 = vld [vmem:[#allocation2 + $0x28] sm:$0xf]  ;;  %v516_v5 = vrot.slane %v514_v49, 7  ;;  %v517_v6 = vshll.u32 %v8407_v34, 16  ;;  %v646_v7 = vsel %vm8399_vm5, %v488_v52, %v645_v47  ;;  %v511_v13 = vor.u32 %v509_v59, %v508_v58 }
  0x5e   : > { %379 = vst [vmem:[#allocation2 + $0x48] sm:$0xf] %v8125_v0  ;;  %v651_v57 = vld [vmem:[#allocation2 + $0x2c] sm:$0x1]  ;;  %v451_v1 = vld [vmem:[%s10339_s0 + $0x28] sm:$0xf]  ;;  %v649_v12 = vsel %vm8387_vm4, %v495_v56, %v648_v53 }
  0x5f   : > { %380 = vst [vmem:[#allocation2 + $0x4c] sm:$0x1] %v8125_v0  ;;  %v654_v63 = vld [vmem:[#allocation2 + $0x30] sm:$0xf]  ;;  %v524_v9 = vrot.slane %v522_v54, 7  ;;  %v525_v10 = vshll.u32 %v8416_v40, 16  ;;  %v652_v17 = vsel %vm8399_vm5, %v496_v62, %v651_v57  ;;  %v519_v24 = vor.u32 %v517_v6, %v516_v5 }
  0x60   : > { %381 = vst [vmem:[#allocation2 + $0x50] sm:$0xf] %v8125_v0  ;;  %v657_v4 = vld [vmem:[#allocation2 + $0x34] sm:$0x1]  ;;  %v452_v11 = vld [vmem:[%s10339_s0 + $0x2c] sm:$0xf]  ;;  %v655_v23 = vsel %vm8387_vm4, %v503_v2, %v654_v63 }
  0x61   : > { %382 = vst [vmem:[#allocation2 + $0x54] sm:$0x1] %v8125_v0  ;;  %v660_v8 = vld [vmem:[#allocation2 + $0x38] sm:$0xf]  ;;  %v512_v14 = vrot.slane %v508_v58, 4  ;;  %v538_v16 = vshrl.u32 %v451_v1, 16  ;;  %v658_v29 = vsel %vm8399_vm5, %v504_v3, %v657_v4  ;;  %v527_v31 = vor.u32 %v525_v10, %v524_v9 }
  0x62   : > { %383 = vst [vmem:[#allocation2 + $0x58] sm:$0xf] %v8125_v0  ;;  %v663_v15 = vld [vmem:[#allocation2 + $0x3c] sm:$0x1]  ;;  %v533_v20 = vshll.u32 %v8428_v50, 16  ;;  %v546_v28 = vshrl.u32 %v452_v11, 16  ;;  %v661_v33 = vsel %vm8387_vm4, %v511_v13, %v660_v8 }
  0x63   : > { %384 = vst [vmem:[#allocation2 + $0x5c] sm:$0x1] %v8125_v0  ;;  %v666_v18 = vld [vmem:[#allocation2 + $0x40] sm:$0xf]  ;;  %v453_v21 = vld [vmem:[%s10339_s0 + $0x30] sm:$0xf]  ;;  %v664_v39 = vsel %vm8399_vm5, %v512_v14, %v663_v15 }
  0x64   : > { %385 = vst [vmem:[#allocation2 + $0x60] sm:$0xf] %v8125_v0  ;;  %v669_v25 = vld [vmem:[#allocation2 + $0x44] sm:$0x1]  ;;  %v520_v30 = vrot.slane %v516_v5, 4  ;;  %v540_v36 = vrot.slane %v538_v16, 7  ;;  %v667_v43 = vsel %vm8387_vm4, %v519_v24, %v666_v18 }
  0x65   : > { %386 = vst [vmem:[#allocation2 + $0x64] sm:$0x1] %v8125_v0  ;;  %v454_v32 = vld [vmem:[%s10339_s0 + $0x34] sm:$0xf]  ;;  %v541_v37 = vshll.u32 %v451_v1, 16  ;;  %v554_v38 = vshrl.u32 %v453_v21, 16 }
  0x66   : > { %387 = vst [vmem:[#allocation2 + $0x68] sm:$0xf] %v8125_v0  ;;  %v528_v40 = vrot.slane %v524_v9, 4  ;;  %v455_v42 = vld [vmem:[%s10339_s0 + $0x38] sm:$0xf]  ;;  %v548_v45 = vrot.slane %v546_v28, 7  ;;  %v670_v48 = vsel %vm8399_vm5, %v520_v30, %v669_v25 }
  0x67   : > { %388 = vst [vmem:[#allocation2 + $0x6c] sm:$0x1] %v8125_v0  ;;  %v562_v47 = vshrl.u32 %v454_v32, 16  ;;  %v456_v52 = vld [vmem:[%s10339_s0 + $0x3c] sm:$0xf]  ;;  %v543_v53 = vor.u32 %v541_v37, %v540_v36  ;;  %v556_v54 = vrot.slane %v554_v38, 7 }
  0x68   : > { %389 = vst [vmem:[#allocation2 + $0x70] sm:$0xf] %v8125_v0  ;;  %v570_v56 = vshrl.u32 %v455_v42, 16  ;;  %v544_v59 = vrot.slane %v540_v36, 4  ;;  %v565_v63 = vshll.u32 %v454_v32, 16  ;;  %v552_v3 = vrot.slane %v548_v45, 4 }
  0x69   : > { %390 = vst [vmem:[#allocation2 + $0x74] sm:$0x1] %v8125_v0  ;;  %v672_v26 = vld [vmem:[#allocation2 + $0x58] sm:$0xf]  ;;  %v564_v62 = vrot.slane %v562_v47, 7  ;;  %v573_v8 = vshll.u32 %v455_v42, 16 }
  0x6a   : > { %391 = vst [vmem:[#allocation2 + $0x78] sm:$0xf] %v8125_v0  ;;  %v675_v34 = vld [vmem:[#allocation2 + $0x5c] sm:$0x1]  ;;  %v673_v49 = vsel %vm8387_vm4, %v527_v31, %v672_v26  ;;  %v581_v16 = vshll.u32 %v456_v52, 16 }
  0x6b   : > { %392 = vst [vmem:[#allocation2 + $0x7c] sm:$0x1] %v8125_v0  ;;  %v676_v57 = vsel %vm8399_vm5, %v528_v40, %v675_v34  ;;  %v567_v14 = vor.u32 %v565_v63, %v564_v62 }
  0x6c   : > { %393 = vst [vmem:[#allocation2 + $0x80] sm:$0xf] %v8125_v0  ;;  %v681_v44 = vld [vmem:[#allocation2 + $0x64] sm:$0x1] }
  0x6d   : > { %394 = vst [vmem:[#allocation2 + $0x84] sm:$0x1] %v8125_v0 }
  0x6e   : > { %395 = vst [vmem:[#allocation2 + $0x88] sm:$0xf] %v8125_v0 }
  0x6f   : > { %396 = vst [vmem:[#allocation2 + $0x8c] sm:$0x1] %v8125_v0  ;;  %v690_v2 = vld [vmem:[#allocation2 + $0x70] sm:$0xf] }
  0x70   : > { %397 = vst [vmem:[#allocation2 + $0x90] sm:$0xf] %v8125_v0  ;;  %v693_v5 = vld [vmem:[#allocation2 + $0x74] sm:$0x1] }
  0x71   : > { %398 = vst [vmem:[#allocation2 + $0x94] sm:$0x1] %v8125_v0  ;;  %v696_v10 = vld [vmem:[#allocation2 + $0x78] sm:$0xf] }
  0x72   : > { %399 = vst [vmem:[#allocation2 + $0x98] sm:$0xf] %v8125_v0  ;;  %v699_v13 = vld [vmem:[#allocation2 + $0x7c] sm:$0x1] }
  0x73   : > { %400 = vst [vmem:[#allocation2 + $0x9c] sm:$0x1] %v8125_v0  ;;  %v702_v18 = vld [vmem:[#allocation2 + $0x80] sm:$0xf] }
  0x74   : > { %401 = vst [vmem:[#allocation3] sm:$0xf] %v8125_v0  ;;  %v703_v28 = vsel %vm8387_vm4, %v567_v14, %v702_v18 }
  0x75   : > { %402 = vst [vmem:[#allocation3 + $0x4] sm:$0x1] %v8125_v0  ;;  %v708_v25 = vld [vmem:[#allocation2 + $0x88] sm:$0xf] }
  0x76   : > { %403 = vst [vmem:[#allocation3 + $0x8] sm:$0xf] %v8125_v0 }
  0x77   : > { %404 = vst [vmem:[#allocation3 + $0xc] sm:$0x1] %v8125_v0  ;;  %v714_v32 = vld [vmem:[#allocation2 + $0x90] sm:$0xf] }
  0x78   : > { %405 = vst [vmem:[#allocation3 + $0x10] sm:$0xf] %v8125_v0 }
  0x79   : > { %406 = vst [vmem:[#allocation3 + $0x14] sm:$0x1] %v8125_v0 }
  0x7a   : > { %407 = vst [vmem:[#allocation3 + $0x18] sm:$0xf] %v8125_v0 }
  0x7b   : > { %408 = vst [vmem:[#allocation3 + $0x1c] sm:$0x1] %v8125_v0 }
  0x7c   : > { %409 = vst [vmem:[#allocation3 + $0x20] sm:$0xf] %v8125_v0 }
  0x7d   : > { %410 = vst [vmem:[#allocation3 + $0x24] sm:$0x1] %v8125_v0 }
  0x7e   : > { %411 = vst [vmem:[#allocation3 + $0x28] sm:$0xf] %v8125_v0 }
  0x7f   : > { %412 = vst [vmem:[#allocation3 + $0x2c] sm:$0x1] %v8125_v0 }
  0x80   : > { %413 = vst [vmem:[#allocation3 + $0x30] sm:$0xf] %v8125_v0 }
  0x81   : > { %414 = vst [vmem:[#allocation3 + $0x34] sm:$0x1] %v8125_v0 }
  0x82   : > { %415 = vst [vmem:[#allocation3 + $0x38] sm:$0xf] %v8125_v0 }
  0x83   : > { %416 = vst [vmem:[#allocation3 + $0x3c] sm:$0x1] %v8125_v0 }
  0x84   : > { %417 = vst [vmem:[#allocation3 + $0x40] sm:$0xf] %v8125_v0 }
  0x85   : > { %418 = vst [vmem:[#allocation3 + $0x44] sm:$0x1] %v8125_v0 }
  0x86   : > { %419 = vst [vmem:[#allocation3 + $0x48] sm:$0xf] %v8125_v0 }
  0x87   : > { %420 = vst [vmem:[#allocation3 + $0x4c] sm:$0x1] %v8125_v0 }
  0x88   : > { %421 = vst [vmem:[#allocation3 + $0x50] sm:$0xf] %v8125_v0 }
  0x89   : > { %422 = vst [vmem:[#allocation3 + $0x54] sm:$0x1] %v8125_v0 }
  0x8a   : > { %423 = vst [vmem:[#allocation3 + $0x58] sm:$0xf] %v8125_v0 }
  0x8b   : > { %424 = vst [vmem:[#allocation3 + $0x5c] sm:$0x1] %v8125_v0 }
  0x8c   : > { %425 = vst [vmem:[#allocation3 + $0x60] sm:$0xf] %v8125_v0 }
  0x8d   : > { %426 = vst [vmem:[#allocation3 + $0x64] sm:$0x1] %v8125_v0 }
  0x8e   : > { %427 = vst [vmem:[#allocation3 + $0x68] sm:$0xf] %v8125_v0 }
  0x8f   : > { %428 = vst [vmem:[#allocation3 + $0x6c] sm:$0x1] %v8125_v0 }
  0x90   : > { %429 = vst [vmem:[#allocation3 + $0x70] sm:$0xf] %v8125_v0 }
  0x91   : > { %430 = vst [vmem:[#allocation3 + $0x74] sm:$0x1] %v8125_v0 }
  0x92   : > { %431 = vst [vmem:[#allocation3 + $0x78] sm:$0xf] %v8125_v0 }
  0x93   : > { %432 = vst [vmem:[#allocation3 + $0x7c] sm:$0x1] %v8125_v0 }
  0x94   : > { %433 = vst [vmem:[#allocation3 + $0x80] sm:$0xf] %v8125_v0 }
  0x95   : > { %434 = vst [vmem:[#allocation3 + $0x84] sm:$0x1] %v8125_v0 }
  0x96   : > { %435 = vst [vmem:[#allocation3 + $0x88] sm:$0xf] %v8125_v0 }
  0x97   : > { %436 = vst [vmem:[#allocation3 + $0x8c] sm:$0x1] %v8125_v0 }
  0x98   : > { %437 = vst [vmem:[#allocation3 + $0x90] sm:$0xf] %v8125_v0 }
  0x99   : > { %438 = vst [vmem:[#allocation3 + $0x94] sm:$0x1] %v8125_v0 }
  0x9a   : > { %439 = vst [vmem:[#allocation3 + $0x98] sm:$0xf] %v8125_v0 }
  0x9b   : > { %440 = vst [vmem:[#allocation3 + $0x9c] sm:$0x1] %v8125_v0  ;;  %v530_v0 = vshrl.u32 %v8428_v50, 16 }
  0x9c   : > { %623 = vst [vmem:[#allocation2 + $0x8] sm:$0xf] %v622_v35  ;;  %v678_v35 = vld [vmem:[#allocation2 + $0x60] sm:$0xf] }
  0x9d   : > { %629 = vst [vmem:[#allocation2 + $0xc] sm:$0x1] %v628_v41  ;;  %v532_v19 = vrot.slane %v530_v0, 7  ;;  %v578_v0 = vshrl.u32 %v456_v52, 16 }
  0x9e   : > { %632 = vst [vmem:[#allocation2 + $0x10] sm:$0xf] %v631_v46  ;;  %v549_v46 = vshll.u32 %v452_v11, 16  ;;  %v560_v11 = vrot.slane %v556_v54, 4 }
  0x9f   : > { %635 = vst [vmem:[#allocation2 + $0x14] sm:$0x1] %v634_v51  ;;  %v535_v41 = vor.u32 %v533_v20, %v532_v19  ;;  %v536_v50 = vrot.slane %v532_v19, 4  ;;  %v684_v51 = vld [vmem:[#allocation2 + $0x68] sm:$0xf]  ;;  %v580_v15 = vrot.slane %v578_v0, 7 }
  0xa0   : > { %638 = vst [vmem:[#allocation2 + $0x18] sm:$0xf] %v637_v55  ;;  %v557_v55 = vshll.u32 %v453_v21, 16  ;;  %v685_v4 = vsel %vm8387_vm4, %v543_v53, %v684_v51  ;;  %v568_v19 = vrot.slane %v564_v62, 4  ;;  %v705_v21 = vld [vmem:[#allocation2 + $0x84] sm:$0x1]  ;;  %v700_v24 = vsel %vm8399_vm5, %v560_v11, %v699_v13 }
  0xa1   : > { %641 = vst [vmem:[#allocation2 + $0x1c] sm:$0x1] %v640_v60  ;;  %v679_v58 = vsel %vm8387_vm4, %v535_v41, %v678_v35  ;;  %v687_v60 = vld [vmem:[#allocation2 + $0x6c] sm:$0x1]  ;;  %v682_v1 = vsel %vm8399_vm5, %v536_v50, %v681_v44  ;;  %v583_v30 = vor.u32 %v581_v16, %v580_v15  ;;  %v717_v35 = vld [vmem:[#allocation2 + $0x94] sm:$0x1] }
  0xa2   : > { %644 = vst [vmem:[#allocation2 + $0x20] sm:$0xf] %v643_v61  ;;  %v551_v61 = vor.u32 %v549_v46, %v548_v45  ;;  %v559_v6 = vor.u32 %v557_v55, %v556_v54  ;;  %v688_v9 = vsel %vm8399_vm5, %v544_v59, %v687_v60  ;;  %v706_v31 = vsel %vm8399_vm5, %v568_v19, %v705_v21 }
  0xa3   : > { %647 = vst [vmem:[#allocation2 + $0x24] sm:$0x1] %v646_v7  ;;  %v572_v7 = vrot.slane %v570_v56, 7  ;;  %v715_v37 = vsel %vm8387_vm4, %v583_v30, %v714_v32 }
  0xa4   : > { %650 = vst [vmem:[#allocation2 + $0x28] sm:$0xf] %v649_v12  ;;  %v691_v12 = vsel %vm8387_vm4, %v551_v61, %v690_v2  ;;  %v697_v20 = vsel %vm8387_vm4, %v559_v6, %v696_v10 }
  0xa5   : > { %653 = vst [vmem:[#allocation2 + $0x2c] sm:$0x1] %v652_v17  ;;  %v694_v17 = vsel %vm8399_vm5, %v552_v3, %v693_v5  ;;  %v576_v26 = vrot.slane %v572_v7, 4 }
  0xa6   : > { %656 = vst [vmem:[#allocation2 + $0x30] sm:$0xf] %v655_v23  ;;  %v575_v23 = vor.u32 %v573_v8, %v572_v7 }
  0xa7   : > { %659 = vst [vmem:[#allocation2 + $0x34] sm:$0x1] %v658_v29  ;;  %v711_v29 = vld [vmem:[#allocation2 + $0x8c] sm:$0x1] }
  0xa8   : > { %662 = vst [vmem:[#allocation2 + $0x38] sm:$0xf] %v661_v33  ;;  %v584_v33 = vrot.slane %v580_v15, 4  ;;  %v709_v34 = vsel %vm8387_vm4, %v575_v23, %v708_v25  ;;  %v712_v36 = vsel %vm8399_vm5, %v576_v26, %v711_v29 }
  0xa9   : > { %665 = vst [vmem:[#allocation2 + $0x3c] sm:$0x1] %v664_v39 }
  0xaa   : > { %668 = vst [vmem:[#allocation2 + $0x40] sm:$0xf] %v667_v43  ;;  %v718_v38 = vsel %vm8399_vm5, %v584_v33, %v717_v35 }
  0xab   : > { %671 = vst [vmem:[#allocation2 + $0x44] sm:$0x1] %v670_v48 }
  0xac   : > { %674 = vst [vmem:[#allocation2 + $0x58] sm:$0xf] %v673_v49 }
  0xad   : > { %677 = vst [vmem:[#allocation2 + $0x5c] sm:$0x1] %v676_v57 }
  0xae   : > { %680 = vst [vmem:[#allocation2 + $0x60] sm:$0xf] %v679_v58 }
  0xaf   : > { %683 = vst [vmem:[#allocation2 + $0x64] sm:$0x1] %v682_v1 }
  0xb0   : > { %686 = vst [vmem:[#allocation2 + $0x68] sm:$0xf] %v685_v4 }
  0xb1   : > { %689 = vst [vmem:[#allocation2 + $0x6c] sm:$0x1] %v688_v9 }
  0xb2   : > { %692 = vst [vmem:[#allocation2 + $0x70] sm:$0xf] %v691_v12 }
  0xb3   : > { %695 = vst [vmem:[#allocation2 + $0x74] sm:$0x1] %v694_v17 }
  0xb4   : > { %698 = vst [vmem:[#allocation2 + $0x78] sm:$0xf] %v697_v20 }
  0xb5   : > { %701 = vst [vmem:[#allocation2 + $0x7c] sm:$0x1] %v700_v24 }
  0xb6   : > { %704 = vst [vmem:[#allocation2 + $0x80] sm:$0xf] %v703_v28 }
  0xb7   : > { %707 = vst [vmem:[#allocation2 + $0x84] sm:$0x1] %v706_v31 }
  0xb8   : > { %710 = vst [vmem:[#allocation2 + $0x88] sm:$0xf] %v709_v34 }
  0xb9   : > { %713 = vst [vmem:[#allocation2 + $0x8c] sm:$0x1] %v712_v36 }
  0xba   : > { %716 = vst [vmem:[#allocation2 + $0x90] sm:$0xf] %v715_v37 }
  0xbb   : > { %719 = vst [vmem:[#allocation2 + $0x94] sm:$0x1] %v718_v38 }
  0xbc PF: > { %v7798_v39 = vld [vmem:[%s8267_s8 + $0x28] sm:$0xff]  ;;  %v7795_v40 = vld [vmem:[%s8267_s8 + $0x10] sm:$0xff]  ;;  %v7797_v41 = vld [vmem:[%s8267_s8 + $0x20] sm:$0xff]  ;;  %vm760_vm6 = vsmask.f32 3328  ;;  %v10362_v7 = vmov 0 }
  0xbd   : > { %v7794_v42 = vld [vmem:[%s8267_s8 + $0x8] sm:$0xff]  ;;  %vm761_vm7 = vsmask.f32 7440  ;;  %7920 = vmatpush.bf16.msra.mxu2 %v7798_v39  ;;  %7923 = vmatpush.bf16.msra.mxu3 %v7795_v40  ;;  %v730_v22 = vld [vmem:[#allocation2 + $0x50] sm:$0xf]  ;;  %v7793_v54 = vld [vmem:[%s8267_s8] sm:$0xff] }
  0xbe   : > { %v731_v27 = vld [vmem:[#allocation2 + $0x58] sm:$0xf]  ;;  %v752_v43 = vld [vmem:[#allocation2 + $0x54] sm:$0x1]  ;;  %1066 = vmatpush.bf16.msra.mxu0 %v7798_v39  ;;  %1197 = vmatpush.bf16.msra.mxu1 %v7795_v40  ;;  %v753_v44 = vld [vmem:[#allocation2 + $0x5c] sm:$0x1] }
  0xbf   : > { %v876_v45 = vshrl.u32 %v730_v22, 16  ;;  %v879_v46 = vshll.u32 %v730_v22, 16  ;;  %v885_v47 = vshll.u32 %v752_v43, 16  ;;  %v890_v48 = vshrl.u32 %v731_v27, 16  ;;  %v6893_v51 = vld [vmem:[#allocation2 + $0x50] sm:$0xf]  ;;  %vm8526_vm8 = vmor %vm760_vm6, %vm761_vm7 }
  0xc0   : > { %v893_v49 = vshll.u32 %v731_v27, 16  ;;  %v899_v50 = vshll.u32 %v753_v44, 16  ;;  %v7789_v52 = vld [vmem:[#allocation2 + $0x54] sm:$0xf0]  ;;  %v722_v62 = vld [vmem:[#allocation2] sm:$0xf] }
  0xc1   : > { %v7796_v53 = vld [vmem:[%s8267_s8 + $0x18] sm:$0xff]  ;;  %v878_v55 = vrot.slane %v876_v45, 4  ;;  %v881_v56 = vrot.slane %v879_v46, 5  ;;  %v887_v57 = vrot.slane %v885_v47, 5  ;;  %v892_v58 = vrot.slane %v890_v48, 4  ;;  %7921 = vmatpush.bf16.msra.mxu2 %v7797_v41  ;;  %7924 = vmatpush.bf16.msra.mxu3 %v7794_v42  ;;  %v7801_v61 = vld [vmem:[%s8267_s8 + $0x40] sm:$0xff] }
  0xc2   : > { %v895_v59 = vrot.slane %v893_v49, 5  ;;  %v901_v60 = vrot.slane %v899_v50, 5  ;;  %v723_v63 = vld [vmem:[#allocation2 + $0x8] sm:$0xf]  ;;  %v7812_v0 = vld [vmem:[%s8267_s8 + $0x58] sm:$0xff]  ;;  %1067 = vmatpush.bf16.msra.mxu0 %v7797_v41  ;;  %1198 = vmatpush.bf16.msra.mxu1 %v7794_v42  ;;  %v6894_v2 = vor.u32 %v7789_v52, %v6893_v51  ;;  %v764_v5 = vshrl.u32 %v722_v62, 16 }
  0xc3   : > { %v882_v1 = vor.u32 %v881_v56, %v878_v55  ;;  %v8520_v3 = vld [vmem:[#allocation2 + $0x4] sm:$0x1]  ;;  %v8522_v4 = vld [vmem:[#allocation2 + $0xc] sm:$0x1]  ;;  %v767_v6 = vshll.u32 %v722_v62, 16  ;;  %v10363_v7 = vsel %vm8526_vm8, 4294967295, %v10362_v7 }
  0xc4   : > { %10364 = vst [vmem:[#allocation10_spill] sm:$0xff] %v10363_v7  ;;  %v896_v8 = vor.u32 %v895_v59, %v892_v58  ;;  %v773_v9 = vshll.u32 %v8520_v3, 16  ;;  %v778_v10 = vshrl.u32 %v723_v63, 16  ;;  %v781_v11 = vshll.u32 %v723_v63, 16  ;;  %v6877_v12 = vld [vmem:[#allocation2] sm:$0xf] }
  0xc5   : > { %v7815_v13 = vld [vmem:[%s8267_s8 + $0x70] sm:$0xff]  ;;  %v883_v14 = vrot.slane %v882_v1, 4  ;;  %v766_v15 = vrot.slane %v764_v5, 4  ;;  %v769_v16 = vrot.slane %v767_v6, 5  ;;  %v787_v17 = vshll.u32 %v8522_v4, 16  ;;  %7922 = vmatpush.bf16.msra.mxu2 %v7796_v53  ;;  %7925 = vmatpush.bf16.msra.mxu3 %v7793_v54  ;;  %v7800_v34 = vld [vmem:[%s8267_s8 + $0x38] sm:$0xff] }
  0xc6   : > { %v7785_v18 = vld [vmem:[#allocation2 + $0x4] sm:$0xf0]  ;;  %v897_v19 = vrot.slane %v896_v8, 4  ;;  %vm1036_vm9 = vcmask 392192   ;;  %v780_v20 = vrot.slane %v778_v10, 4  ;;  %v783_v21 = vrot.slane %v781_v11, 5  ;;  %1068 = vmatpush.bf16.msra.mxu0 %v7796_v53  ;;  %1199 = vmatpush.bf16.msra.mxu1 %v7793_v54 }
  0xc7   : > { %v732_v23 = vld [vmem:[#allocation2 + $0x60] sm:$0xf]  ;;  %v888_v24 = vsel %vm8526_vm8, %v883_v14, %v887_v57  ;;  %v770_v25 = vor.u32 %v769_v16, %v766_v15  ;;  %v775_v26 = vrot.slane %v773_v9, 5  ;;  %v733_v28 = vld [vmem:[#allocation2 + $0x68] sm:$0xf]  ;;  %v789_v33 = vrot.slane %v787_v17, 5 }
  0xc8   : > { %v754_v29 = vld [vmem:[#allocation2 + $0x64] sm:$0x1]  ;;  %v902_v30 = vsel %vm8526_vm8, %v897_v19, %v901_v60  ;;  %v1002_v31 = vunpack.c.l.b16 %v888_v24  ;;  %v784_v32 = vor.u32 %v783_v21, %v780_v20  ;;  %6923 = vmatmul.msk.bf16.vlgmr.msra.gmra.mxu3 %vm1036_vm9, %v6894_v2  ;;  %v6878_v37 = vor.u32 %v7785_v18, %v6877_v12  ;;  %v755_v40 = vld [vmem:[#allocation2 + $0x6c] sm:$0x1]  ;;  %v724_v46 = vld [vmem:[#allocation2 + $0x10] sm:$0xf] }
  0xc9   : > { %1434 = vmatpush.bf16.msrb.mxu2 %v7801_v61  ;;  %1605 = vmatpush.bf16.msrb.mxu3 %v7812_v0  ;;  %v1003_v35 = vunpack.c.l.b16 %v902_v30  ;;  %v771_v36 = vrot.slane %v770_v25, 4  ;;  %v904_v38 = vshrl.u32 %v732_v23, 16  ;;  %v907_v41 = vshll.u32 %v732_v23, 16  ;;  %v8544_v50 = vld [vmem:[#allocation2 + $0x14] sm:$0x1]  ;;  %v7814_v15 = vld [vmem:[%s8267_s8 + $0x68] sm:$0xff] }
  0xca   : > { %1999 = vmatpush.bf16.msrb.mxu0 %v7815_v13  ;;  %v785_v39 = vrot.slane %v784_v32, 4  ;;  %v913_v42 = vshll.u32 %v754_v29, 16  ;;  %v918_v22 = vshrl.u32 %v733_v28, 16  ;;  %6919 = vmatmul.msk.bf16.vlgmr.msra.gmra.mxu1 %vm1036_vm9, %v6878_v37  ;;  %v921_v45 = vshll.u32 %v733_v28, 16  ;;  %v725_v55 = vld [vmem:[#allocation2 + $0x18] sm:$0xf] }
  0xcb   : > { %v1014_v27 = vpack.c.b16 %v1003_v35, %v1002_v31  ;;  %v776_v43 = vsel %vm8526_vm8, %v771_v36, %v775_v26  ;;  %v906_v44 = vrot.slane %v904_v38, 4  ;;  %v909_v49 = vrot.slane %v907_v41, 5  ;;  %v7811_v56 = vld [vmem:[%s8267_s8 + $0x50] sm:$0xff]  ;;  %v8548_v59 = vld [vmem:[#allocation2 + $0x1c] sm:$0x1]  ;;  %v7810_v23 = vld [vmem:[%s8267_s8 + $0x48] sm:$0xff] }
  0xcc   : > { %v790_v47 = vsel %vm8526_vm8, %v785_v39, %v789_v33  ;;  %v994_v48 = vunpack.c.l.b16 %v776_v43  ;;  %v920_v52 = vrot.slane %v918_v22, 4  ;;  %v923_v53 = vrot.slane %v921_v45, 5  ;;  %v6897_v1 = vld [vmem:[#allocation2 + $0x60] sm:$0xf]  ;;  %v7790_v2 = vld [vmem:[#allocation2 + $0x64] sm:$0xf0] }
  0xcd   : > { %1435 = vmatpush.bf16.msrb.mxu2 %v7800_v34  ;;  %v995_v51 = vunpack.c.l.b16 %v790_v47  ;;  %v927_v54 = vshll.u32 %v755_v40, 16  ;;  %v910_v57 = vor.u32 %v909_v49, %v906_v44  ;;  %v915_v58 = vrot.slane %v913_v42, 5  ;;  %1606 = vmatpush.bf16.msrb.mxu3 %v7811_v56  ;;  %v734_v11 = vld [vmem:[#allocation2 + $0x70] sm:$0xf]  ;;  %v735_v21 = vld [vmem:[#allocation2 + $0x78] sm:$0xf] }
  0xce   : > { %6871 = vmatmul.msk.bf16.vlgmr.msra.gmra.mxu2 %vm1036_vm9, %v1014_v27  ;;  %v792_v60 = vshrl.u32 %v724_v46, 16  ;;  %v795_v61 = vshll.u32 %v724_v46, 16  ;;  %v924_v63 = vor.u32 %v923_v53, %v920_v52  ;;  %v801_v5 = vshll.u32 %v8544_v50, 16  ;;  %v7799_v16 = vld [vmem:[%s8267_s8 + $0x30] sm:$0xff]  ;;  %2000 = vmatpush.bf16.msrb.mxu0 %v7814_v15  ;;  %v7786_v33 = vld [vmem:[#allocation2 + $0x14] sm:$0xf0] }
  0xcf   : > { %v1010_v62 = vpack.c.b16 %v995_v51, %v994_v48  ;;  %v929_v0 = vrot.slane %v927_v54, 5  ;;  %v911_v6 = vrot.slane %v910_v57, 4  ;;  %v806_v10 = vshrl.u32 %v725_v55, 16  ;;  %v6881_v29 = vld [vmem:[#allocation2 + $0x10] sm:$0xf]  ;;  %p7749_p7 = scmp.eq.s32.totalorder %s8186_s28, 3 }
  0xd0   : > { %v794_v8 = vrot.slane %v792_v60, 4  ;;  %v797_v9 = vrot.slane %v795_v61, 5  ;;  %v925_v12 = vrot.slane %v924_v63, 4  ;;  %v809_v13 = vshll.u32 %v725_v55, 16  ;;  %v756_v30 = vld [vmem:[#allocation2 + $0x74] sm:$0x1] }
  0xd1   : > { %6867 = vmatmul.msk.bf16.vlgmr.msra.gmra.mxu0 %vm1036_vm9, %v1010_v62  ;;  %v815_v14 = vshll.u32 %v8548_v59, 16  ;;  %v916_v17 = vsel %vm8526_vm8, %v911_v6, %v915_v58  ;;  %v803_v19 = vrot.slane %v801_v5, 5  ;;  %v808_v20 = vrot.slane %v806_v10, 4  ;;  %1436 = vmatpush.bf16.msrb.mxu2 %v7799_v16  ;;  %v757_v38 = vld [vmem:[#allocation2 + $0x7c] sm:$0x1] }
  0xd2   : > { %v798_v18 = vor.u32 %v797_v9, %v794_v8  ;;  %v930_v24 = vsel %vm8526_vm8, %v925_v12, %v929_v0  ;;  %v1004_v25 = vunpack.c.l.b16 %v916_v17  ;;  %v6898_v26 = vor.u32 %v7790_v2, %v6897_v1  ;;  %1607 = vmatpush.bf16.msrb.mxu3 %v7810_v23  ;;  %v726_v43 = vld [vmem:[#allocation2 + $0x20] sm:$0xf]  ;;  %v727_v52 = vld [vmem:[#allocation2 + $0x28] sm:$0xf]  ;;  %v8562_v53 = vld [vmem:[#allocation2 + $0x24] sm:$0x1] }
  0xd3   : > { %v811_v28 = vrot.slane %v809_v13, 5  ;;  %v1005_v31 = vunpack.c.l.b16 %v930_v24  ;;  %v932_v34 = vshrl.u32 %v734_v11, 16  ;;  %v935_v35 = vshll.u32 %v734_v11, 16  ;;  %v8568_v62 = vld [vmem:[#allocation2 + $0x2c] sm:$0x1] }
  0xd4   : > { %v799_v32 = vrot.slane %v798_v18, 4  ;;  %v817_v37 = vrot.slane %v815_v14, 5  ;;  %v946_v39 = vshrl.u32 %v735_v21, 16  ;;  %v949_v40 = vshll.u32 %v735_v21, 16  ;;  %v736_v13 = vld [vmem:[#allocation2 + $0x80] sm:$0xf] }
  0xd5   : > { %v812_v36 = vor.u32 %v811_v28, %v808_v20  ;;  %v934_v42 = vrot.slane %v932_v34, 4  ;;  %v937_v22 = vrot.slane %v935_v35, 5  ;;  %v941_v27 = vshll.u32 %v756_v30, 16  ;;  %v737_v16 = vld [vmem:[#allocation2 + $0x88] sm:$0xf]  ;;  %v7813_v30 = vld [vmem:[%s8267_s8 + $0x60] sm:$0xff] }
  0xd6   : > { %v804_v41 = vsel %vm8526_vm8, %v799_v32, %v803_v19  ;;  %v6882_v45 = vor.u32 %v7786_v33, %v6881_v29  ;;  %v948_v46 = vrot.slane %v946_v39, 4  ;;  %v1015_v47 = vpack.c.b16 %v1005_v31, %v1004_v25  ;;  %v6901_v20 = vld [vmem:[#allocation2 + $0x70] sm:$0xf]  ;;  %v7791_v21 = vld [vmem:[#allocation2 + $0x74] sm:$0xf0]  ;;  %2001 = vmatpush.bf16.msrb.mxu0 %v7813_v30 }
  0xd7   : > { %v813_v44 = vrot.slane %v812_v36, 4  ;;  %v938_v48 = vor.u32 %v937_v22, %v934_v42  ;;  %v951_v49 = vrot.slane %v949_v40, 5  ;;  %v955_v51 = vshll.u32 %v757_v38, 16  ;;  %v728_v33 = vld [vmem:[#allocation2 + $0x30] sm:$0xf] }
  0xd8   : > { %6924 = vmatmul.msk.bf16.gmra.mxu3 %vm1036_vm9, %v6898_v26  ;;  %v996_v55 = vunpack.c.l.b16 %v804_v41  ;;  %v820_v56 = vshrl.u32 %v726_v43, 16  ;;  %v823_v57 = vshll.u32 %v726_v43, 16  ;;  %v943_v60 = vrot.slane %v941_v27, 5  ;;  %v729_v34 = vld [vmem:[#allocation2 + $0x38] sm:$0xf] }
  0xd9   : > { %v818_v54 = vsel %vm8526_vm8, %v813_v44, %v817_v37  ;;  %v952_v61 = vor.u32 %v951_v49, %v948_v46  ;;  %v829_v1 = vshll.u32 %v8562_v53, 16  ;;  %v834_v2 = vshrl.u32 %v727_v52, 16  ;;  %v6885_v38 = vld [vmem:[#allocation2 + $0x20] sm:$0xf]  ;;  %v7787_v39 = vld [vmem:[#allocation2 + $0x24] sm:$0xf0] }
  0xda   : > { %v997_v58 = vunpack.c.l.b16 %v818_v54  ;;  %6920 = vmatmul.msk.bf16.gmra.mxu1 %vm1036_vm9, %v6882_v45  ;;  %v822_v63 = vrot.slane %v820_v56, 4  ;;  %v825_v0 = vrot.slane %v823_v57, 5  ;;  %v939_v5 = vrot.slane %v938_v48, 4  ;;  %v8581_v42 = vld [vmem:[#allocation2 + $0x84] sm:$0x1] }
  0xdb   : > { %v953_v6 = vrot.slane %v952_v61, 4  ;;  %v957_v8 = vrot.slane %v955_v51, 5  ;;  %v837_v9 = vshll.u32 %v727_v52, 16  ;;  %v836_v12 = vrot.slane %v834_v2, 4  ;;  %v8585_v45 = vld [vmem:[#allocation2 + $0x8c] sm:$0x1] }
  0xdc   : > { %v1011_v10 = vpack.c.b16 %v997_v58, %v996_v55  ;;  %v826_v11 = vor.u32 %v825_v0, %v822_v63  ;;  %v843_v15 = vshll.u32 %v8568_v62, 16  ;;  %v831_v17 = vrot.slane %v829_v1, 5  ;;  %v8591_v2 = vld [vmem:[#allocation2 + $0x34] sm:$0x1] }
  0xdd   : > { %v839_v14 = vrot.slane %v837_v9, 5  ;;  %v944_v18 = vsel %vm8526_vm8, %v939_v5, %v943_v60  ;;  %v958_v19 = vsel %vm8526_vm8, %v953_v6, %v957_v8  ;;  %v960_v24 = vshrl.u32 %v736_v13, 16  ;;  %v8593_v5 = vld [vmem:[#allocation2 + $0x3c] sm:$0x1] }
  0xde   : > { %6872 = vmatmul.msk.bf16.gmra.mxu2 %vm1036_vm9, %v1015_v47  ;;  %v827_v25 = vrot.slane %v826_v11, 4  ;;  %v963_v26 = vshll.u32 %v736_v13, 16  ;;  %v974_v28 = vshrl.u32 %v737_v16, 16  ;;  %v977_v29 = vshll.u32 %v737_v16, 16  ;;  %v7818_v13 = vld [vmem:[%s8267_s8 + $0x88] sm:$0xff] }
  0xdf   : > { %v840_v23 = vor.u32 %v839_v14, %v836_v12  ;;  %v845_v32 = vrot.slane %v843_v15, 5  ;;  %v1006_v35 = vunpack.c.l.b16 %v944_v18  ;;  %v1007_v36 = vunpack.c.l.b16 %v958_v19  ;;  %v7829_v12 = vld [vmem:[%s8267_s8 + $0xa0] sm:$0xff]  ;;  %2249 = vmatpush.bf16.msrb.mxu1 %v7818_v13  ;;  %v7792_v19 = vld [vmem:[#allocation2 + $0x84] sm:$0xf0] }
  0xe0   : > { %v6902_v37 = vor.u32 %v7791_v21, %v6901_v20  ;;  %v962_v40 = vrot.slane %v960_v24, 4  ;;  %v832_v41 = vsel %vm8526_vm8, %v827_v25, %v831_v17  ;;  %v965_v22 = vrot.slane %v963_v26, 5  ;;  %2420 = vmatpush.bf16.msra.mxu2 %v7829_v12  ;;  %v6905_v18 = vld [vmem:[#allocation2 + $0x80] sm:$0xf]  ;;  %v1665_v20 = vld [vmem:[#allocation2 + $0x8] sm:$0xf] }
  0xe1   : > { %6868 = vmatmul.msk.bf16.gmra.mxu0 %vm1036_vm9, %v1011_v10  ;;  %v841_v31 = vrot.slane %v840_v23, 4  ;;  %v976_v27 = vrot.slane %v974_v28, 4  ;;  %v979_v43 = vrot.slane %v977_v29, 5  ;;  %v848_v46 = vshrl.u32 %v728_v33, 16  ;;  %v1667_v24 = vld [vmem:[#allocation2 + $0x10] sm:$0xf] }
  0xe2   : > { %v851_v47 = vshll.u32 %v728_v33, 16  ;;  %v862_v48 = vshrl.u32 %v729_v34, 16  ;;  %v6886_v49 = vor.u32 %v7787_v39, %v6885_v38  ;;  %v865_v51 = vshll.u32 %v729_v34, 16  ;;  %v7832_v25 = vld [vmem:[%s8267_s8 + $0xb8] sm:$0xff]  ;;  %v7817_v26 = vld [vmem:[%s8267_s8 + $0x80] sm:$0xff] }
  0xe3   : > { %v846_v44 = vsel %vm8526_vm8, %v841_v31, %v845_v32  ;;  %v1016_v52 = vpack.c.b16 %v1007_v36, %v1006_v35  ;;  %v998_v54 = vunpack.c.l.b16 %v832_v41  ;;  %v969_v55 = vshll.u32 %v8581_v42, 16  ;;  %v7835_v32 = vld [vmem:[%s8267_s8 + $0xd0] sm:$0xff]  ;;  %2814 = vmatpush.bf16.msra.mxu3 %v7832_v25  ;;  %2250 = vmatpush.bf16.msrb.mxu1 %v7817_v26  ;;  %v7816_v33 = vld [vmem:[%s8267_s8 + $0x78] sm:$0xff] }
  0xe4   : > { %v999_v56 = vunpack.c.l.b16 %v846_v44  ;;  %v966_v57 = vor.u32 %v965_v22, %v962_v40  ;;  %v980_v58 = vor.u32 %v979_v43, %v976_v27  ;;  %v983_v60 = vshll.u32 %v8585_v45, 16  ;;  %v6889_v36 = vld [vmem:[#allocation2 + $0x30] sm:$0xf]  ;;  %3064 = vmatpush.bf16.msra.mxu0 %v7835_v32 }
  0xe5   : > { %v850_v61 = vrot.slane %v848_v46, 4  ;;  %v853_v63 = vrot.slane %v851_v47, 5  ;;  %v864_v0 = vrot.slane %v862_v48, 4  ;;  %v867_v1 = vrot.slane %v865_v51, 5  ;;  %v1666_v47 = vld [vmem:[#allocation2 + $0xc] sm:$0x1] }
  0xe6   : > { %v971_v6 = vrot.slane %v969_v55, 5  ;;  %v1012_v8 = vpack.c.b16 %v999_v56, %v998_v54  ;;  %v967_v9 = vrot.slane %v966_v57, 4  ;;  %v981_v10 = vrot.slane %v980_v58, 4  ;;  %v2059_v56 = vld [vmem:[#allocation2 + $0x8] sm:$0xe] }
  0xe7   : > { %v985_v11 = vrot.slane %v983_v60, 5  ;;  %v854_v14 = vor.u32 %v853_v63, %v850_v61  ;;  %v857_v15 = vshll.u32 %v8591_v2, 16  ;;  %v868_v16 = vor.u32 %v867_v1, %v864_v0  ;;  %2251 = vmatpush.bf16.msrb.mxu1 %v7816_v33  ;;  %v2060_v57 = vld [vmem:[#allocation2 + $0x10] sm:$0xe]  ;;  %v1241_v58 = vld [vmem:[#allocation2] sm:$0xe] }
  0xe8   : > { %6925 = vmatmul.msk.bf16.gmra.mxu3 %vm1036_vm9, %v6902_v37  ;;  %v871_v17 = vshll.u32 %v8593_v5, 16  ;;  %v972_v21 = vsel %vm8526_vm8, %v967_v9, %v971_v6  ;;  %v7788_v37 = vld [vmem:[#allocation2 + $0x34] sm:$0xf0]  ;;  %v1698_v38 = vshrl.u32 %v1665_v20, 16  ;;  %v1701_v39 = vshll.u32 %v1665_v20, 16 }
  0xe9   : > { %v986_v23 = vsel %vm8526_vm8, %v981_v10, %v985_v11  ;;  %v855_v28 = vrot.slane %v854_v14, 4  ;;  %v859_v29 = vrot.slane %v857_v15, 5  ;;  %v869_v30 = vrot.slane %v868_v16, 4  ;;  %v1668_v60 = vld [vmem:[#allocation2 + $0x14] sm:$0x1] }
  0xea   : > { %6921 = vmatmul.msk.bf16.gmra.mxu1 %vm1036_vm9, %v6886_v49  ;;  %v873_v31 = vrot.slane %v871_v17, 5  ;;  %v1008_v34 = vunpack.c.l.b16 %v972_v21  ;;  %v1009_v35 = vunpack.c.l.b16 %v986_v23  ;;  %v6906_v40 = vor.u32 %v7792_v19, %v6905_v18  ;;  %v1242_v61 = vld [vmem:[#allocation2 + $0x8] sm:$0xe] }
  0xeb   : > { %v1712_v41 = vshrl.u32 %v1667_v24, 16  ;;  %v1715_v22 = vshll.u32 %v1667_v24, 16  ;;  %v860_v27 = vsel %vm8526_vm8, %v855_v28, %v859_v29  ;;  %v6890_v44 = vor.u32 %v7788_v37, %v6889_v36  ;;  %v6977_v18 = vld [vmem:[#allocation2 + $0x8] sm:$0xf] }
  0xec   : > { %v874_v43 = vsel %vm8526_vm8, %v869_v30, %v873_v31  ;;  %v1017_v46 = vpack.c.b16 %v1009_v35, %v1008_v34  ;;  %v1700_v48 = vrot.slane %v1698_v38, 4  ;;  %v1703_v49 = vrot.slane %v1701_v39, 5  ;;  %v1669_v30 = vld [vmem:[#allocation2 + $0x18] sm:$0xf]  ;;  %v1671_v31 = vld [vmem:[#allocation2 + $0x20] sm:$0xf] }
  0xed   : > { %v1000_v51 = vunpack.c.l.b16 %v860_v27  ;;  %v1714_v54 = vrot.slane %v1712_v41, 4  ;;  %v1717_v55 = vrot.slane %v1715_v22, 5  ;;  %vm1289_vm10 = vcmask 1042432   ;;  %v1243_v22 = vld [vmem:[#allocation2 + $0x10] sm:$0xe] }
  0xee   : > { %6873 = vmatmul.msk.bf16.gmra.mxu2 %vm1036_vm9, %v1016_v52  ;;  %v1001_v52 = vunpack.c.l.b16 %v874_v43  ;;  %vm1290_vm11 = vcmask 1046532   ;;  %v1707_v63 = vshll.u32 %v1666_v47, 16  ;;  %v7053_v0 = vrot.slane %v2059_v56, 9  ;;  %v2061_v27 = vld [vmem:[#allocation2 + $0x18] sm:$0xe] }
  0xef   : > { %v2109_v1 = vrot.slane %v1666_v47, 5  ;;  %v7054_v6 = vrot.slane %v2060_v57, 9  ;;  %v1704_v10 = vor.u32 %v1703_v49, %v1700_v48  ;;  %v1718_v11 = vor.u32 %v1717_v55, %v1714_v54  ;;  %vm8620_vm12 = vmor %vm1289_vm10, %vm1290_vm11  ;;  %v1244_v47 = vld [vmem:[#allocation2 + $0x18] sm:$0xe]  ;;  %v1670_v48 = vld [vmem:[#allocation2 + $0x1c] sm:$0x1] }
  0xf0   : > { %v1013_v9 = vpack.c.b16 %v1001_v52, %v1000_v51  ;;  %v1721_v12 = vshll.u32 %v1668_v60, 16  ;;  %v1294_v13 = vrot.slane %v8520_v3, 5  ;;  %v1298_v14 = vrot.slane %v8522_v4, 5  ;;  %v7802_v3 = vld [vmem:[#allocation2 + $0xc] sm:$0xf0] }
  0xf1   : > { %6869 = vmatmul.msk.bf16.gmra.mxu0 %vm1036_vm9, %v1012_v8  ;;  %v2113_v8 = vrot.slane %v1668_v60, 5  ;;  %v6927_v15 = vrot.slane %v1241_v58, 9  ;;  %v6928_v16 = vrot.slane %v1242_v61, 9  ;;  %v10365_v17 = vmov 0  ;;  %v2062_v49 = vld [vmem:[#allocation2 + $0x20] sm:$0xe] }
  0xf2   : > { %v10366_v17 = vsel %vm8620_vm12, 4294967295, %v10365_v17  ;;  %v2110_v19 = vsel %vm8620_vm12, %v7053_v0, %v2109_v1  ;;  %v1705_v21 = vrot.slane %v1704_v10, 4  ;;  %v1709_v4 = vrot.slane %v1707_v63, 5  ;;  %v1672_v51 = vld [vmem:[#allocation2 + $0x24] sm:$0x1] }
  0xf3   : > { %10367 = vst [vmem:[#allocation11_spill] sm:$0xff] %v10366_v17  ;;  %v2114_v20 = vsel %vm8620_vm12, %v7054_v6, %v2113_v8  ;;  %v1719_v23 = vrot.slane %v1718_v11, 4  ;;  %v1723_v24 = vrot.slane %v1721_v12, 5  ;;  %v1295_v25 = vsel %vm8620_vm12, %v6927_v15, %v1294_v13  ;;  %v1675_v15 = vld [vmem:[#allocation2 + $0x30] sm:$0xf] }
  0xf4   : > { %v1299_v26 = vsel %vm8620_vm12, %v6928_v16, %v1298_v14  ;;  %v2178_v28 = vunpack.c.l.b16 %v2110_v19  ;;  %v2179_v29 = vunpack.c.l.b16 %v2114_v20  ;;  %v6978_v32 = vor.u32 %v7802_v3, %v6977_v18  ;;  %v1673_v14 = vld [vmem:[#allocation2 + $0x28] sm:$0xf]  ;;  %v6981_v18 = vld [vmem:[#allocation2 + $0x18] sm:$0xf] }
  0xf5   : > { %v1363_v33 = vunpack.c.l.b16 %v1295_v25  ;;  %v1364_v34 = vunpack.c.l.b16 %v1299_v26  ;;  %v1710_v35 = vsel %vm8526_vm8, %v1705_v21, %v1709_v4  ;;  %v1724_v36 = vsel %vm8526_vm8, %v1719_v23, %v1723_v24  ;;  %v7828_v3 = vld [vmem:[%s8267_s8 + $0x98] sm:$0xff]  ;;  %v7803_v21 = vld [vmem:[#allocation2 + $0x1c] sm:$0xf0]  ;;  %v7831_v26 = vld [vmem:[%s8267_s8 + $0xb0] sm:$0xff] }
  0xf6   : > { %v1726_v37 = vshrl.u32 %v1669_v30, 16  ;;  %v1729_v38 = vshll.u32 %v1669_v30, 16  ;;  %v1740_v39 = vshrl.u32 %v1671_v31, 16  ;;  %v2194_v41 = vpack.c.b16 %v2179_v29, %v2178_v28  ;;  %2421 = vmatpush.bf16.msra.mxu2 %v7828_v3  ;;  %2815 = vmatpush.bf16.msra.mxu3 %v7831_v26 }
  0xf7   : > { %v1379_v43 = vpack.c.b16 %v1364_v34, %v1363_v33  ;;  %v6929_v57 = vrot.slane %v1243_v22, 9  ;;  %v7055_v58 = vrot.slane %v2061_v27, 9  ;;  %v2117_v60 = vrot.slane %v1670_v48, 5  ;;  %v1674_v22 = vld [vmem:[#allocation2 + $0x2c] sm:$0x1] }
  0xf8   : > { %6926 = vmatmul.msk.bf16.gmra.mxu3 %vm1036_vm9, %v6906_v40  ;;  %v1743_v40 = vshll.u32 %v1671_v31, 16  ;;  %v1728_v52 = vrot.slane %v1726_v37, 4  ;;  %v1731_v54 = vrot.slane %v1729_v38, 5  ;;  %v1742_v55 = vrot.slane %v1740_v39, 4  ;;  %v1676_v27 = vld [vmem:[#allocation2 + $0x34] sm:$0x1] }
  0xf9   : > { %v1302_v61 = vrot.slane %v8544_v50, 5  ;;  %v6930_v63 = vrot.slane %v1244_v47, 9  ;;  %v7056_v0 = vrot.slane %v2062_v49, 9  ;;  %v2121_v1 = vrot.slane %v1672_v51, 5  ;;  %v2063_v47 = vld [vmem:[#allocation2 + $0x28] sm:$0xe] }
  0xfa   : > { %6922 = vmatmul.msk.bf16.gmra.mxu1 %vm1036_vm9, %v6890_v44  ;;  %v1928_v44 = vunpack.c.l.b16 %v1710_v35  ;;  %v1745_v56 = vrot.slane %v1743_v40, 5  ;;  %v1306_v8 = vrot.slane %v8548_v59, 5  ;;  %v1749_v10 = vshll.u32 %v1672_v51, 16  ;;  %v1245_v49 = vld [vmem:[#allocation2 + $0x20] sm:$0xe] }
  0xfb   : > { %v1732_v11 = vor.u32 %v1731_v54, %v1728_v52  ;;  %v2118_v13 = vsel %vm8620_vm12, %v7055_v58, %v2117_v60  ;;  %v2122_v50 = vsel %vm8620_vm12, %v7056_v0, %v2121_v1  ;;  %v1303_v16 = vsel %vm8620_vm12, %v6929_v57, %v1302_v61  ;;  %v1246_v51 = vld [vmem:[#allocation2 + $0x28] sm:$0xe] }
  0xfc   : > { %v1746_v12 = vor.u32 %v1745_v56, %v1742_v55  ;;  %v1307_v59 = vsel %vm8620_vm12, %v6930_v63, %v1306_v8  ;;  %v1751_v20 = vrot.slane %v1749_v10, 5  ;;  %v2180_v24 = vunpack.c.l.b16 %v2118_v13 }
  0xfd   : > { %v1733_v4 = vrot.slane %v1732_v11, 4  ;;  %v1754_v25 = vshrl.u32 %v1673_v14, 16  ;;  %v2181_v28 = vunpack.c.l.b16 %v2122_v50  ;;  %v1757_v29 = vshll.u32 %v1673_v14, 16 }
  0xfe   : > { %6874 = vmatmul.msk.bf16.gmra.mxu2 %vm1036_vm9, %v1017_v46  ;;  %v1929_v46 = vunpack.c.l.b16 %v1724_v36  ;;  %v1747_v23 = vrot.slane %v1746_v12, 4  ;;  %v1768_v30 = vshrl.u32 %v1675_v15, 16  ;;  %v1771_v31 = vshll.u32 %v1675_v15, 16  ;;  %v1677_v15 = vld [vmem:[#allocation2 + $0x38] sm:$0xf] }
  0xff   : > { %v1366_v33 = vunpack.c.l.b16 %v1307_v59  ;;  %v6982_v34 = vor.u32 %v7803_v21, %v6981_v18  ;;  %v1756_v37 = vrot.slane %v1754_v25, 4  ;;  %v2195_v38 = vpack.c.b16 %v2181_v28, %v2180_v24  ;;  %v7804_v59 = vld [vmem:[#allocation2 + $0x2c] sm:$0xf0]  ;;  %v1679_v18 = vld [vmem:[#allocation2 + $0x40] sm:$0xf] }
 0x100   : > { %v1944_v6 = vpack.c.b16 %v1929_v46, %v1928_v44  ;;  %v1752_v36 = vsel %vm8526_vm8, %v1747_v23, %v1751_v20  ;;  %v1759_v39 = vrot.slane %v1757_v29, 5  ;;  %v1770_v40 = vrot.slane %v1768_v30, 4 }
 0x101   : > { %6870 = vmatmul.msk.bf16.gmra.mxu0 %vm1036_vm9, %v1013_v9  ;;  %v1735_v9 = vshll.u32 %v1670_v48, 16  ;;  %v1931_v46 = vunpack.c.l.b16 %v1752_v36  ;;  %v2064_v48 = vld [vmem:[#allocation2 + $0x30] sm:$0xe]  ;;  %v1763_v54 = vshll.u32 %v1674_v22, 16  ;;  %v1777_v56 = vshll.u32 %v1676_v27, 16 }
 0x102   : > { %v1760_v52 = vor.u32 %v1759_v39, %v1756_v37  ;;  %v7057_v57 = vrot.slane %v2063_v47, 9  ;;  %v2125_v58 = vrot.slane %v1674_v22, 5  ;;  %v7058_v60 = vrot.slane %v2064_v48, 9  ;;  %v2066_v22 = vld [vmem:[#allocation2 + $0x40] sm:$0xe] }
 0x103   : > { %v1737_v19 = vrot.slane %v1735_v9, 5  ;;  %v2129_v61 = vrot.slane %v1676_v27, 5  ;;  %v6931_v0 = vrot.slane %v1245_v49, 9  ;;  %v1310_v1 = vrot.slane %v8562_v53, 5  ;;  %v7834_v53 = vld [vmem:[%s8267_s8 + $0xc8] sm:$0xff] }
 0x104   : > { %v1314_v8 = vrot.slane %v8568_v62, 5  ;;  %v1761_v9 = vrot.slane %v1760_v52, 4  ;;  %v1765_v10 = vrot.slane %v1763_v54, 5  ;;  %v1779_v12 = vrot.slane %v1777_v56, 5  ;;  %3065 = vmatpush.bf16.msra.mxu0 %v7834_v53 }
 0x105   : > { %v1738_v35 = vsel %vm8526_vm8, %v1733_v4, %v1737_v19  ;;  %v2126_v13 = vsel %vm8620_vm12, %v7057_v57, %v2125_v58  ;;  %v2130_v14 = vsel %vm8620_vm12, %v7058_v60, %v2129_v61  ;;  %v1311_v50 = vsel %vm8620_vm12, %v6931_v0, %v1310_v1 }
 0x106   : > { %v1930_v44 = vunpack.c.l.b16 %v1738_v35  ;;  %v1766_v19 = vsel %vm8526_vm8, %v1761_v9, %v1765_v10  ;;  %v2182_v3 = vunpack.c.l.b16 %v2126_v13  ;;  %v2183_v21 = vunpack.c.l.b16 %v2130_v14  ;;  %v1680_v35 = vld [vmem:[#allocation2 + $0x44] sm:$0x1]  ;;  %v1681_v10 = vld [vmem:[#allocation2 + $0x58] sm:$0xf]  ;;  %v1683_v13 = vld [vmem:[#allocation2 + $0x60] sm:$0xf] }
 0x107   : > { %v1367_v4 = vunpack.c.l.b16 %v1311_v50  ;;  %v1782_v23 = vshrl.u32 %v1677_v15, 16  ;;  %v1785_v24 = vshll.u32 %v1677_v15, 16  ;;  %v1796_v28 = vshrl.u32 %v1679_v18, 16 }
 0x108   : > { %7019 = vmatmul.msk.bf16.vlgmr.msrb.gmra.mxu3 %vm1036_vm9, %v6978_v32  ;;  %v1365_v32 = vunpack.c.l.b16 %v1303_v16  ;;  %v1945_v63 = vpack.c.b16 %v1931_v46, %v1930_v44  ;;  %v6985_v16 = vld [vmem:[#allocation2 + $0x28] sm:$0xf]  ;;  %v1799_v29 = vshll.u32 %v1679_v18, 16  ;;  %v1932_v30 = vunpack.c.l.b16 %v1766_v19 }
 0x109   : > { %v6986_v26 = vor.u32 %v7804_v59, %v6985_v16  ;;  %v1784_v36 = vrot.slane %v1782_v23, 4  ;;  %v1787_v37 = vrot.slane %v1785_v24, 5  ;;  %v1798_v39 = vrot.slane %v1796_v28, 4  ;;  %v2068_v23 = vld [vmem:[#allocation2 + $0x60] sm:$0xe] }
 0x10a   : > { %7087 = vmatmul.msk.bf16.vlgmr.msrb.gmra.mxu1 %vm1036_vm9, %v2194_v41  ;;  %v1773_v41 = vrot.slane %v1771_v31, 5  ;;  %v1318_v46 = vrot.slane %v8591_v2, 5  ;;  %v1805_v48 = vshll.u32 %v1680_v35, 16  ;;  %v7060_v52 = vrot.slane %v2066_v22, 9 }
 0x10b   : > { %v2137_v54 = vrot.slane %v1680_v35, 5  ;;  %v1322_v56 = vrot.slane %v8593_v5, 5  ;;  %v1788_v57 = vor.u32 %v1787_v37, %v1784_v36  ;;  %v7805_v5 = vld [vmem:[#allocation2 + $0x3c] sm:$0xf0]  ;;  %v1810_v16 = vshrl.u32 %v1681_v10, 16 }
 0x10c   : > { %v1774_v55 = vor.u32 %v1773_v41, %v1770_v40  ;;  %v1801_v40 = vrot.slane %v1799_v29, 5  ;;  %v2065_v41 = vld [vmem:[#allocation2 + $0x38] sm:$0xe]  ;;  %v1807_v61 = vrot.slane %v1805_v48, 5  ;;  %v1813_v59 = vshll.u32 %v1681_v10, 16 }
 0x10d   : > { %v7059_v49 = vrot.slane %v2065_v41, 9  ;;  %v2138_v2 = vsel %vm8620_vm12, %v7060_v52, %v2137_v54  ;;  %v1824_v18 = vshrl.u32 %v1683_v13, 16  ;;  %v1827_v19 = vshll.u32 %v1683_v13, 16  ;;  %v1685_v52 = vld [vmem:[#allocation2 + $0x68] sm:$0xf] }
 0x10e   : > { %6961 = vmatmul.msk.bf16.vlgmr.msrb.gmra.mxu2 %vm1036_vm9, %v1379_v43  ;;  %v1380_v43 = vpack.c.b16 %v1366_v33, %v1365_v32  ;;  %v1775_v11 = vrot.slane %v1774_v55, 4  ;;  %v2196_v32 = vpack.c.b16 %v2183_v21, %v2182_v3  ;;  %v1247_v33 = vld [vmem:[#allocation2 + $0x30] sm:$0xe]  ;;  %v1802_v58 = vor.u32 %v1801_v40, %v1798_v39  ;;  %v8006_v40 = vld [vmem:[#allocation2 + $0x54] sm:$0x1] }
 0x10f   : > { %v6933_v44 = vrot.slane %v1247_v33, 9  ;;  %v1812_v28 = vrot.slane %v1810_v16, 4  ;;  %v1815_v29 = vrot.slane %v1813_v59, 5  ;;  %v1829_v33 = vrot.slane %v1827_v19, 5  ;;  %v1687_v54 = vld [vmem:[#allocation2 + $0x70] sm:$0xf] }
 0x110   : > { %v1780_v20 = vsel %vm8526_vm8, %v1775_v11, %v1779_v12  ;;  %v1803_v9 = vrot.slane %v1802_v58, 4  ;;  %v2185_v12 = vunpack.c.l.b16 %v2138_v2  ;;  %v7062_v36 = vrot.slane %v2068_v23, 9 }
 0x111   : > { %7045 = vmatmul.msk.bf16.vlgmr.msrb.gmra.mxu0 %vm1036_vm9, %v1944_v6  ;;  %v6932_v6 = vrot.slane %v1246_v51, 9  ;;  %v1933_v31 = vunpack.c.l.b16 %v1780_v20  ;;  %v1319_v0 = vsel %vm8620_vm12, %v6933_v44, %v1318_v46  ;;  %v1326_v41 = vrot.slane %v8006_v40, 5  ;;  %v8008_v40 = vld [vmem:[#allocation2 + $0x64] sm:$0x1] }
 0x112   : > { %v1369_v14 = vunpack.c.l.b16 %v1319_v0  ;;  %v1816_v44 = vor.u32 %v1815_v29, %v1812_v28  ;;  %v1855_v10 = vshll.u32 %v1687_v54, 16  ;;  %v1252_v28 = vld [vmem:[#allocation2 + $0x68] sm:$0xe]  ;;  %vm3467_vm1 = vcmask 1043456  }
 0x113   : > { %v1315_v62 = vsel %vm8620_vm12, %v6932_v6, %v1314_v8  ;;  %v1946_v27 = vpack.c.b16 %v1933_v31, %v1932_v30  ;;  %v6989_v6 = vld [vmem:[#allocation2 + $0x38] sm:$0xf]  ;;  %v1789_v8 = vrot.slane %v1788_v57, 4  ;;  %v1682_v30 = vld [vmem:[#allocation2 + $0x5c] sm:$0x1]  ;;  %vm3473_vm3 = vcmask 1040384  }
 0x114   : > { %v1368_v25 = vunpack.c.l.b16 %v1315_v62  ;;  %v6990_v15 = vor.u32 %v7805_v5, %v6989_v6  ;;  %v1808_v62 = vsel %vm8526_vm8, %v1803_v9, %v1807_v61  ;;  %v1684_v31 = vld [vmem:[#allocation2 + $0x64] sm:$0x1]  ;;  %v2141_v35 = vrot.slane %v1682_v30, 5  ;;  %v6993_v61 = vld [vmem:[#allocation2 + $0x58] sm:$0xf] }
 0x115   : > { %v1935_v21 = vunpack.c.l.b16 %v1808_v62  ;;  %v2145_v37 = vrot.slane %v1684_v31, 5  ;;  %v1819_v46 = vshll.u32 %v1682_v30, 16  ;;  %v1833_v48 = vshll.u32 %v1684_v31, 16 }
 0x116   : > { %v1817_v57 = vrot.slane %v1816_v44, 4  ;;  %v1838_v5 = vshrl.u32 %v1685_v52, 16  ;;  %v1852_v9 = vshrl.u32 %v1687_v54, 16  ;;  %v1857_v59 = vrot.slane %v1855_v10, 5 }
 0x117   : > { %v1821_v58 = vrot.slane %v1819_v46, 5  ;;  %v1835_v0 = vrot.slane %v1833_v48, 5  ;;  %vm3468_vm2 = vsmask.f32 7938  ;;  %vm3474_vm4 = vsmask.f32 256 }
 0x118   : > { %7020 = vmatmul.msk.bf16.gmra.mxu3 %vm1036_vm9, %v6982_v34  ;;  %v1678_v34 = vld [vmem:[#allocation2 + $0x3c] sm:$0x1]  ;;  %v1854_v16 = vrot.slane %v1852_v9, 4  ;;  %vm9242_vm5 = vmand %vm3467_vm1, %vm3468_vm2  ;;  %vm3910_vm7 = vcmask 785408  }
 0x119   : > { %v1791_v47 = vshll.u32 %v1678_v34, 16  ;;  %v2133_v51 = vrot.slane %v1678_v34, 5  ;;  %vm9248_vm6 = vmand %vm3473_vm3, %vm3474_vm4 }
 0x11a   : > { %7088 = vmatmul.msk.bf16.gmra.mxu1 %vm1036_vm9, %v2195_v38  ;;  %v1381_v38 = vpack.c.b16 %v1368_v25, %v1367_v4  ;;  %v2067_v4 = vld [vmem:[#allocation2 + $0x58] sm:$0xe]  ;;  %v1249_v25 = vld [vmem:[#allocation2 + $0x50] sm:$0xe]  ;;  %v1858_v31 = vor.u32 %v1857_v59, %v1854_v16 }
 0x11b   : > { %v1793_v60 = vrot.slane %v1791_v47, 5  ;;  %v7061_v34 = vrot.slane %v2067_v4, 9  ;;  %v6935_v39 = vrot.slane %v1249_v25, 9  ;;  %v2070_v25 = vld [vmem:[#allocation2 + $0x70] sm:$0xe] }
 0x11c   : > { %v1859_v54 = vrot.slane %v1858_v31, 4 }
 0x11d   : > { %v1794_v53 = vsel %vm8526_vm8, %v1789_v8, %v1793_v60  ;;  %v7827_v60 = vld [vmem:[%s8267_s8 + $0x90] sm:$0xff]  ;;  %v1841_v8 = vshll.u32 %v1685_v52, 16 }
 0x11e   : > { %6962 = vmatmul.msk.bf16.gmra.mxu2 %vm1036_vm9, %v1380_v43  ;;  %v1248_v43 = vld [vmem:[#allocation2 + $0x38] sm:$0xe]  ;;  %v1934_v3 = vunpack.c.l.b16 %v1794_v53  ;;  %v1840_v53 = vrot.slane %v1838_v5, 4  ;;  %v1691_v5 = vld [vmem:[#allocation2 + $0x80] sm:$0xf] }
 0x11f   : > { %v6934_v55 = vrot.slane %v1248_v43, 9  ;;  %2422 = vmatpush.bf16.msra.mxu2 %v7827_v60  ;;  %v1843_v62 = vrot.slane %v1841_v8, 5 }
 0x121   : > { %7046 = vmatmul.msk.bf16.gmra.mxu0 %vm1036_vm9, %v1945_v63  ;;  %v2134_v63 = vsel %vm8620_vm12, %v7059_v49, %v2133_v51  ;;  %v1323_v1 = vsel %vm8620_vm12, %v6934_v55, %v1322_v56  ;;  %v2142_v49 = vsel %vm8620_vm12, %v7061_v34, %v2141_v35  ;;  %v2146_v51 = vsel %vm8620_vm12, %v7062_v36, %v2145_v37 }
 0x122   : > { %v2184_v11 = vunpack.c.l.b16 %v2134_v63  ;;  %v1370_v50 = vunpack.c.l.b16 %v1323_v1  ;;  %v1327_v55 = vsel %vm8620_vm12, %v6935_v39, %v1326_v41  ;;  %v7806_v63 = vld [vmem:[#allocation2 + $0x5c] sm:$0xf0]  ;;  %v2186_v1 = vunpack.c.l.b16 %v2142_v49 }
 0x123   : > { %v2187_v6 = vunpack.c.l.b16 %v2146_v51  ;;  %v6994_v13 = vor.u32 %v7806_v63, %v6993_v61  ;;  %v1844_v29 = vor.u32 %v1843_v62, %v1840_v53  ;;  %v7064_v36 = vrot.slane %v2070_v25, 9  ;;  %v7833_v49 = vld [vmem:[%s8267_s8 + $0xc0] sm:$0xff]  ;;  %v6997_v63 = vld [vmem:[#allocation2 + $0x68] sm:$0xf] }
 0x124   : > { %v2197_v20 = vpack.c.b16 %v2185_v12, %v2184_v11  ;;  %v1382_v24 = vpack.c.b16 %v1370_v50, %v1369_v14  ;;  %v1371_v11 = vunpack.c.l.b16 %v1327_v55  ;;  %v1822_v14 = vsel %vm8526_vm8, %v1817_v57, %v1821_v58  ;;  %3066 = vmatpush.bf16.msra.mxu0 %v7833_v49  ;;  %v2071_v25 = vld [vmem:[#allocation2 + $0x78] sm:$0xe] }
 0x125   : > { %v1936_v4 = vunpack.c.l.b16 %v1822_v14  ;;  %v1334_v41 = vrot.slane %v8008_v40, 5  ;;  %v1880_v53 = vshrl.u32 %v1691_v5, 16  ;;  %v1883_v62 = vshll.u32 %v1691_v5, 16 }
 0x127   : > { %v1885_v31 = vrot.slane %v1883_v62, 5 }
 0x128   : > { %7021 = vmatmul.msk.bf16.gmra.mxu3 %vm1036_vm9, %v6986_v26  ;;  %v1250_v26 = vld [vmem:[#allocation2 + $0x58] sm:$0xe] }
 0x129   : > { %v6936_v22 = vrot.slane %v1250_v26, 9  ;;  %v1251_v26 = vld [vmem:[#allocation2 + $0x60] sm:$0xe] }
 0x12a   : > { %7089 = vmatmul.msk.bf16.gmra.mxu1 %vm1036_vm9, %v2196_v32  ;;  %v1826_v32 = vrot.slane %v1824_v18, 4  ;;  %v7830_v18 = vld [vmem:[%s8267_s8 + $0xa8] sm:$0xff]  ;;  %v6937_v39 = vrot.slane %v1251_v26, 9 }
 0x12b   : > { %2816 = vmatpush.bf16.msra.mxu3 %v7830_v18  ;;  %v2072_v26 = vld [vmem:[#allocation2 + $0x80] sm:$0xe] }
 0x12c   : > { %v1830_v47 = vor.u32 %v1829_v33, %v1826_v32  ;;  %v1335_v60 = vsel %vm8620_vm12, %v6937_v39, %v1334_v41  ;;  %v7066_v40 = vrot.slane %v2072_v26, 9  ;;  %v1694_v26 = vld [vmem:[#allocation2 + $0x8c] sm:$0x1] }
 0x12d   : > { %v1373_v9 = vunpack.c.l.b16 %v1335_v60 }
 0x12e   : > { %6963 = vmatmul.msk.bf16.gmra.mxu2 %vm1036_vm9, %v1381_v38  ;;  %v1947_v38 = vpack.c.b16 %v1935_v21, %v1934_v3  ;;  %v1831_v2 = vrot.slane %v1830_v47, 4  ;;  %v1688_v3 = vld [vmem:[#allocation2 + $0x74] sm:$0x1]  ;;  %v1845_v47 = vrot.slane %v1844_v29, 4  ;;  %v1690_v29 = vld [vmem:[#allocation2 + $0x7c] sm:$0x1] }
 0x12f   : > { %v1861_v32 = vshll.u32 %v1688_v3, 16  ;;  %v2153_v37 = vrot.slane %v1688_v3, 5  ;;  %v1253_v3 = vld [vmem:[#allocation2 + $0x70] sm:$0xe]  ;;  %v2157_v39 = vrot.slane %v1690_v29, 5 }
 0x130   : > { %v1836_v50 = vsel %vm8526_vm8, %v1831_v2, %v1835_v0  ;;  %v7807_v2 = vld [vmem:[#allocation2 + $0x6c] sm:$0xf0]  ;;  %v1689_v0 = vld [vmem:[#allocation2 + $0x78] sm:$0xf] }
 0x131   : > { %7047 = vmatmul.msk.bf16.gmra.mxu0 %vm1036_vm9, %v1946_v27  ;;  %v8007_v27 = vld [vmem:[#allocation2 + $0x5c] sm:$0x1]  ;;  %v1937_v23 = vunpack.c.l.b16 %v1836_v50  ;;  %v1863_v55 = vrot.slane %v1861_v32, 5  ;;  %v2154_v57 = vsel %vm8620_vm12, %v7064_v36, %v2153_v37  ;;  %v1866_v14 = vshrl.u32 %v1689_v0, 16  ;;  %v1692_v36 = vld [vmem:[#allocation2 + $0x84] sm:$0x1] }
 0x132   : > { %v1330_v43 = vrot.slane %v8007_v27, 5  ;;  %v6938_v27 = vrot.slane %v1252_v28, 9  ;;  %v1869_v50 = vshll.u32 %v1689_v0, 16  ;;  %v1254_v28 = vld [vmem:[#allocation2 + $0x78] sm:$0xe]  ;;  %v2161_v41 = vrot.slane %v1692_v36, 5 }
 0x134   : > { %v1331_v56 = vsel %vm8620_vm12, %v6936_v22, %v1330_v43  ;;  %v8009_v43 = vld [vmem:[#allocation2 + $0x6c] sm:$0x1] }
 0x135   : > { %v1372_v12 = vunpack.c.l.b16 %v1331_v56  ;;  %v1338_v44 = vrot.slane %v8009_v43, 5 }
 0x137   : > { %v1383_v21 = vpack.c.b16 %v1372_v12, %v1371_v11  ;;  %v1339_v61 = vsel %vm8620_vm12, %v6938_v27, %v1338_v44  ;;  %v1864_v11 = vsel %vm8526_vm8, %v1859_v54, %v1863_v55  ;;  %v8011_v27 = vld [vmem:[#allocation2 + $0x7c] sm:$0x1] }
 0x138   : > { %7022 = vmatmul.msk.bf16.gmra.mxu3 %vm1036_vm9, %v6990_v15  ;;  %v2198_v15 = vpack.c.b16 %v2187_v6, %v2186_v1  ;;  %v2189_v6 = vunpack.c.l.b16 %v2154_v57  ;;  %v1374_v12 = vunpack.c.l.b16 %v1339_v61  ;;  %v1939_v59 = vunpack.c.l.b16 %v1864_v11  ;;  %v1695_v11 = vld [vmem:[#allocation2 + $0x90] sm:$0xf] }
 0x139   : > { %v1346_v43 = vrot.slane %v8011_v27, 5  ;;  %v2162_v61 = vsel %vm8620_vm12, %v7066_v40, %v2161_v41  ;;  %v2073_v41 = vld [vmem:[#allocation2 + $0x88] sm:$0xe]  ;;  %v1350_v27 = vrot.slane %v8581_v42, 5 }
 0x13a   : > { %7090 = vmatmul.msk.bf16.gmra.mxu1 %vm1036_vm9, %v2197_v20  ;;  %v1686_v20 = vld [vmem:[#allocation2 + $0x6c] sm:$0x1] }
 0x13b   : > { %v1847_v30 = vshll.u32 %v1686_v20, 16  ;;  %v2149_v35 = vrot.slane %v1686_v20, 5 }
 0x13d   : > { %v1849_v48 = vrot.slane %v1847_v30, 5  ;;  %v1882_v30 = vrot.slane %v1880_v53, 4 }
 0x13e   : > { %6964 = vmatmul.msk.bf16.gmra.mxu2 %vm1036_vm9, %v1382_v24  ;;  %v2069_v24 = vld [vmem:[#allocation2 + $0x68] sm:$0xe] }
 0x13f   : > { %v7063_v34 = vrot.slane %v2069_v24, 9  ;;  %v1850_v10 = vsel %vm8526_vm8, %v1845_v47, %v1849_v48  ;;  %v1871_v24 = vrot.slane %v1869_v50, 5  ;;  %v1875_v47 = vshll.u32 %v1690_v29, 16 }
 0x140   : > { %v1938_v16 = vunpack.c.l.b16 %v1850_v10  ;;  %v1886_v49 = vor.u32 %v1885_v31, %v1882_v30 }
 0x141   : > { %7048 = vmatmul.msk.bf16.gmra.mxu0 %vm1036_vm9, %v1947_v38  ;;  %v1948_v38 = vpack.c.b16 %v1937_v23, %v1936_v4  ;;  %v2150_v56 = vsel %vm8620_vm12, %v7063_v34, %v2149_v35  ;;  %v1384_v4 = vpack.c.b16 %v1374_v12, %v1373_v9  ;;  %v1868_v23 = vrot.slane %v1866_v14, 4  ;;  %v8010_v34 = vld [vmem:[#allocation2 + $0x74] sm:$0x1] }
 0x142   : > { %v2188_v1 = vunpack.c.l.b16 %v2150_v56  ;;  %v1949_v32 = vpack.c.b16 %v1939_v59, %v1938_v16  ;;  %v1342_v35 = vrot.slane %v8010_v34, 5  ;;  %v1877_v5 = vrot.slane %v1875_v47, 5 }
 0x143   : > { %v1872_v44 = vor.u32 %v1871_v24, %v1868_v23  ;;  %v1887_v9 = vrot.slane %v1886_v49, 4  ;;  %v1903_v47 = vshll.u32 %v1694_v26, 16 }
 0x144   : > { %v2199_v18 = vpack.c.b16 %v2189_v6, %v2188_v1  ;;  %v7001_v1 = vld [vmem:[#allocation2 + $0x78] sm:$0xf] }
 0x145   : > { %v1873_v6 = vrot.slane %v1872_v44, 4  ;;  %v1354_v44 = vrot.slane %v8585_v45, 5 }
 0x147   : > { %v1201_v19 = vpop.f32.mrf.mxu1 }
 0x148   : > { %7023 = vmatmul.msk.bf16.gmra.mxu3 %vm1036_vm9, %v6994_v13  ;;  %v6998_v13 = vor.u32 %v7807_v2, %v6997_v63  ;;  %v1693_v63 = vld [vmem:[#allocation2 + $0x88] sm:$0xf] }
 0x149   : > { %v1894_v14 = vshrl.u32 %v1693_v63, 16  ;;  %v1897_v50 = vshll.u32 %v1693_v63, 16  ;;  %v2165_v63 = vrot.slane %v1694_v26, 5  ;;  %v8785_v26 = vld [vmem:[#allocation2 + $0x14] sm:$0x1] }
 0x14a   : > { %7091 = vmatmul.msk.bf16.gmra.mxu1 %vm1036_vm9, %v2198_v15 }
 0x14b   : > { %v1221_v33 = vpop.f32.mrf.mxu3  ;;  %v1899_v29 = vrot.slane %v1897_v50, 5 }
 0x14e   : > { %6965 = vmatmul.msk.bf16.gmra.mxu2 %vm1036_vm9, %v1383_v21  ;;  %v1070_v22 = vpop.f32.mrf.mxu0 }
 0x14f   : > { %v8715_v46 = vadd.f32 %v1201_v19, %v1070_v22  ;;  %v8718_v52 = vpop.f32.mrf.mxu1  ;;  %v6940_v22 = vrot.slane %v1254_v28, 9  ;;  %v1896_v28 = vrot.slane %v1894_v14, 4 }
 0x151   : > { %v1090_v51 = vpop.f32.mrf.mxu2  ;;  %7049 = vmatmul.msk.bf16.gmra.mxu0 %vm1036_vm9, %v1948_v38  ;;  %v7065_v38 = vrot.slane %v2071_v25, 9  ;;  %v1347_v0 = vsel %vm8620_vm12, %v6940_v22, %v1346_v43  ;;  %v1256_v25 = vld [vmem:[#allocation2 + $0x88] sm:$0xe]  ;;  %v2074_v22 = vld [vmem:[#allocation2 + $0x90] sm:$0xe]  ;;  %v1900_v49 = vor.u32 %v1899_v29, %v1896_v28 }
 0x152   : > { %v8725_v58 = vadd.f32 %v1221_v33, %v1090_v51  ;;  %v6939_v33 = vrot.slane %v1253_v3, 9  ;;  %v1889_v51 = vshll.u32 %v1692_v36, 16  ;;  %v1376_v16 = vunpack.c.l.b16 %v1347_v0  ;;  %v2480_v36 = vld [vmem:[#allocation2 + $0x10] sm:$0xf]  ;;  %v8787_v28 = vld [vmem:[#allocation2 + $0x1c] sm:$0x1] }
 0x153   : > { %v1223_v8 = vpop.f32.mrf.mxu3  ;;  %v2158_v60 = vsel %vm8620_vm12, %v7065_v38, %v2157_v39  ;;  %v1911_v3 = vshll.u32 %v1695_v11, 16  ;;  %v6942_v43 = vrot.slane %v1256_v25, 9  ;;  %v7068_v0 = vrot.slane %v2074_v22, 9 }
 0x154   : > { %v1343_v57 = vsel %vm8620_vm12, %v6939_v33, %v1342_v35  ;;  %v1891_v10 = vrot.slane %v1889_v51, 5  ;;  %v2190_v12 = vunpack.c.l.b16 %v2158_v60  ;;  %v1696_v35 = vld [vmem:[#allocation2 + $0x94] sm:$0x1] }
 0x155   : > { %v1375_v62 = vunpack.c.l.b16 %v1343_v57  ;;  %v1913_v40 = vrot.slane %v1911_v3, 5  ;;  %v1917_v51 = vshll.u32 %v1696_v35, 16  ;;  %v2516_v57 = vshll.u32 %v2480_v36, 16  ;;  %v7809_v3 = vld [vmem:[#allocation2 + $0x8c] sm:$0xf0] }
 0x156   : > { %v8735_v15 = vpop.f32.mrf.mxu0  ;;  %v1892_v23 = vsel %vm8526_vm8, %v1887_v9, %v1891_v10  ;;  %v1355_v10 = vsel %vm8620_vm12, %v6942_v43, %v1354_v44 }
 0x157   : > { %v1206_v20 = vpop.f32.mrf.mxu1  ;;  %v1941_v38 = vunpack.c.l.b16 %v1892_v23  ;;  %v1919_v14 = vrot.slane %v1917_v51, 5 }
 0x158   : > { %7024 = vmatmul.msk.bf16.gmra.mxu3 %vm1036_vm9, %v6998_v13  ;;  %v2191_v13 = vunpack.c.l.b16 %v2162_v61  ;;  %v7067_v61 = vrot.slane %v2073_v41, 9  ;;  %v2536_v41 = vshll.u32 %v8787_v28, 16 }
 0x159   : > { %v1092_v19 = vpop.f32.mrf.mxu2 }
 0x15a   : > { %v8737_v21 = vadd.f32 %v1223_v8, %v1092_v19  ;;  %7092 = vmatmul.msk.bf16.gmra.mxu1 %vm1036_vm9, %v2199_v18  ;;  %v7808_v8 = vld [vmem:[#allocation2 + $0x7c] sm:$0xf0]  ;;  %v1878_v18 = vsel %vm8526_vm8, %v1873_v6, %v1877_v5  ;;  %v2200_v24 = vpack.c.b16 %v2191_v13, %v2190_v12  ;;  %v1901_v12 = vrot.slane %v1900_v49, 4 }
 0x15b   : > { %v1226_v37 = vpop.f32.mrf.mxu3  ;;  %v7002_v59 = vor.u32 %v7808_v8, %v7001_v1  ;;  %v1255_v19 = vld [vmem:[#allocation2 + $0x80] sm:$0xe]  ;;  %v1940_v33 = vunpack.c.l.b16 %v1878_v18  ;;  %v2169_v1 = vrot.slane %v1696_v35, 5  ;;  %v1905_v13 = vrot.slane %v1903_v47, 5 }
 0x15c   : > { %v6941_v34 = vrot.slane %v1255_v19, 9  ;;  %v2518_v19 = vrot.slane %v2516_v57, 5 }
 0x15d   : > { %v1950_v6 = vpack.c.b16 %v1941_v38, %v1940_v33  ;;  %v1378_v33 = vunpack.c.l.b16 %v1355_v10  ;;  %v1906_v35 = vsel %vm8526_vm8, %v1901_v12, %v1905_v13 }
 0x15e   : > { %6966 = vmatmul.msk.bf16.gmra.mxu2 %vm1036_vm9, %v1384_v4  ;;  %v1075_v48 = vpop.f32.mrf.mxu0  ;;  %v1351_v9 = vsel %vm8620_vm12, %v6941_v34, %v1350_v27  ;;  %v1942_v47 = vunpack.c.l.b16 %v1906_v35 }
 0x15f   : > { %v8742_v54 = vadd.f32 %v1206_v20, %v1075_v48  ;;  %v8744_v56 = vpop.f32.mrf.mxu1  ;;  %v1908_v20 = vshrl.u32 %v1695_v11, 16  ;;  %v2482_v48 = vld [vmem:[#allocation2 + $0x18] sm:$0xf]  ;;  %v1377_v29 = vunpack.c.l.b16 %v1351_v9 }
 0x160   : > { %v2527_v5 = vshrl.u32 %v2482_v48, 16  ;;  %v2530_v8 = vshll.u32 %v2482_v48, 16  ;;  %v2875_v9 = vld [vmem:[#allocation2 + $0x18] sm:$0xe] }
 0x161   : > { %v1095_v55 = vpop.f32.mrf.mxu2  ;;  %7050 = vmatmul.msk.bf16.gmra.mxu0 %vm1036_vm9, %v1949_v32  ;;  %v1385_v32 = vpack.c.b16 %v1376_v16, %v1375_v62  ;;  %v1910_v39 = vrot.slane %v1908_v20, 4  ;;  %v7005_v62 = vld [vmem:[#allocation2 + $0x88] sm:$0xf]  ;;  %v2166_v16 = vsel %vm8620_vm12, %v7067_v61, %v2165_v63  ;;  %v1386_v44 = vpack.c.b16 %v1378_v33, %v1377_v29  ;;  %v2484_v63 = vld [vmem:[#allocation2 + $0x20] sm:$0xf] }
 0x162   : > { %v8753_v2 = vadd.f32 %v1226_v37, %v1095_v55  ;;  %v2513_v55 = vshrl.u32 %v2480_v36, 16  ;;  %v2532_v25 = vrot.slane %v2530_v8, 5  ;;  %v7006_v34 = vor.u32 %v7809_v3, %v7005_v62  ;;  %v2874_v8 = vld [vmem:[#allocation2 + $0x10] sm:$0xe]  ;;  %v8815_v33 = vld [vmem:[#allocation2 + $0x2c] sm:$0x1] }
 0x163   : > { %v1228_v53 = vpop.f32.mrf.mxu3  ;;  %v1914_v42 = vor.u32 %v1913_v40, %v1910_v39  ;;  %v2522_v39 = vshll.u32 %v8785_v26, 16  ;;  %v2541_v10 = vshrl.u32 %v2484_v63, 16  ;;  %v2544_v12 = vshll.u32 %v2484_v63, 16 }
 0x164   : > { %v2515_v18 = vrot.slane %v2513_v55, 4 }
 0x165   : > { %v1915_v23 = vrot.slane %v1914_v42, 4  ;;  %v2524_v55 = vrot.slane %v2522_v39, 5  ;;  %v2546_v29 = vrot.slane %v2544_v12, 5 }
 0x166   : > { %v8759_v4 = vpop.f32.mrf.mxu0  ;;  %v2519_v36 = vor.u32 %v2518_v19, %v2515_v18  ;;  %v2924_v18 = vrot.slane %v8785_v26, 5 }
 0x167   : > { %v1211_v31 = vpop.f32.mrf.mxu1  ;;  %v1920_v38 = vsel %vm8526_vm8, %v1915_v23, %v1919_v14  ;;  %v7180_v23 = vrot.slane %v2875_v9, 9 }
 0x168   : > { %7025 = vmatmul.msk.bf16.gmra.mxu3 %vm1036_vm9, %v7002_v59  ;;  %v2170_v59 = vsel %vm8620_vm12, %v7068_v0, %v2169_v1  ;;  %v1943_v48 = vunpack.c.l.b16 %v1920_v38  ;;  %v2520_v49 = vrot.slane %v2519_v36, 4  ;;  %v2486_v0 = vld [vmem:[#allocation2 + $0x28] sm:$0xf] }
 0x169   : > { %v1097_v30 = vpop.f32.mrf.mxu2  ;;  %v2555_v13 = vshrl.u32 %v2486_v0, 16  ;;  %v2558_v14 = vshll.u32 %v2486_v0, 16 }
 0x16a   : > { %v8763_v37 = vadd.f32 %v1228_v53, %v1097_v30  ;;  %7093 = vmatmul.msk.bf16.gmra.mxu1 %vm1036_vm9, %v2200_v24  ;;  %v2529_v24 = vrot.slane %v2527_v5, 4  ;;  %v2192_v30 = vunpack.c.l.b16 %v2166_v16  ;;  %v2525_v42 = vsel %vm8526_vm8, %v2520_v49, %v2524_v55 }
 0x16b   : > { %v1231_v60 = vpop.f32.mrf.mxu3  ;;  %v2743_v16 = vunpack.c.l.b16 %v2525_v42 }
 0x16c   : > { %v2533_v40 = vor.u32 %v2532_v25, %v2529_v24  ;;  %v2928_v24 = vrot.slane %v8787_v28, 5  ;;  %v2543_v25 = vrot.slane %v2541_v10, 4  ;;  %v7103_v28 = vld [vmem:[#allocation2 + $0x10] sm:$0xf] }
 0x16e   : > { %6967 = vmatmul.msk.bf16.gmra.mxu2 %vm1036_vm9, %v1385_v32  ;;  %v1080_v45 = vpop.f32.mrf.mxu0  ;;  %v2534_v57 = vrot.slane %v2533_v40, 4  ;;  %v2929_v38 = vsel %vm8620_vm12, %v7180_v23, %v2928_v24  ;;  %v7819_v40 = vld [vmem:[#allocation2 + $0x14] sm:$0xf0] }
 0x16f   : > { %v8774_v11 = vadd.f32 %v1211_v31, %v1080_v45  ;;  %v8776_v53 = vpop.f32.mrf.mxu1  ;;  %v2193_v31 = vunpack.c.l.b16 %v2170_v59  ;;  %v7179_v59 = vrot.slane %v2874_v8, 9  ;;  %v7104_v49 = vor.u32 %v7819_v40, %v7103_v28 }
 0x170   : > { %v2936_v40 = vrot.slane %v8815_v33, 5 }
 0x171   : > { %v1100_v50 = vpop.f32.mrf.mxu2  ;;  %7051 = vmatmul.msk.bf16.gmra.mxu0 %vm1036_vm9, %v1950_v6  ;;  %v2201_v27 = vpack.c.b16 %v2193_v31, %v2192_v30  ;;  %v1951_v6 = vpack.c.b16 %v1943_v48, %v1942_v47  ;;  %v2557_v30 = vrot.slane %v2555_v13, 4  ;;  %v2560_v31 = vrot.slane %v2558_v14, 5 }
 0x172   : > { %v8783_v20 = vadd.f32 %v1231_v60, %v1100_v50  ;;  %v2538_v60 = vrot.slane %v2536_v41, 5  ;;  %v2925_v36 = vsel %vm8620_vm12, %v7179_v59, %v2924_v18  ;;  %v2547_v41 = vor.u32 %v2546_v29, %v2543_v25  ;;  %v2877_v59 = vld [vmem:[#allocation2 + $0x28] sm:$0xe] }
 0x173   : > { %v1233_v32 = vpop.f32.mrf.mxu3  ;;  %v2993_v55 = vunpack.c.l.b16 %v2925_v36  ;;  %v7182_v28 = vrot.slane %v2877_v59, 9 }
 0x174   : > { %v2539_v5 = vsel %vm8526_vm8, %v2534_v57, %v2538_v60  ;;  %v2994_v57 = vunpack.c.l.b16 %v2929_v38  ;;  %v2488_v60 = vld [vmem:[#allocation2 + $0x30] sm:$0xf]  ;;  %v2548_v63 = vrot.slane %v2547_v41, 4 }
 0x175   : > { %v2744_v3 = vunpack.c.l.b16 %v2539_v5  ;;  %v2569_v8 = vshrl.u32 %v2488_v60, 16 }
 0x176   : > { %v8795_v22 = vpop.f32.mrf.mxu0  ;;  %v3009_v12 = vpack.c.b16 %v2994_v57, %v2993_v55 }
 0x177   : > { %v1216_v61 = vpop.f32.mrf.mxu1  ;;  %v2759_v26 = vpack.c.b16 %v2744_v3, %v2743_v16  ;;  %v2876_v16 = vld [vmem:[#allocation2 + $0x20] sm:$0xe]  ;;  %v2571_v3 = vrot.slane %v2569_v8, 4 }
 0x178   : > { %7026 = vmatmul.msk.bf16.gmra.mxu3 %vm1036_vm9, %v7006_v34  ;;  %v7181_v36 = vrot.slane %v2876_v16, 9  ;;  %v2494_v16 = vld [vmem:[#allocation2 + $0x48] sm:$0xf] }
 0x179   : > { %v1102_v43 = vpop.f32.mrf.mxu2 }
 0x17a   : > { %v8797_v51 = vadd.f32 %v1233_v32, %v1102_v43  ;;  %7094 = vmatmul.msk.bf16.gmra.mxu1 %vm1036_vm9, %v2201_v27  ;;  %v8813_v32 = vld [vmem:[#allocation2 + $0x24] sm:$0x1]  ;;  %v2561_v43 = vor.u32 %v2560_v31, %v2557_v30 }
 0x17b   : > { %v1236_v1 = vpop.f32.mrf.mxu3  ;;  %v2550_v27 = vshll.u32 %v8813_v32, 16  ;;  %v2932_v38 = vrot.slane %v8813_v32, 5 }
 0x17d   : > { %v2552_v0 = vrot.slane %v2550_v27, 5  ;;  %v2933_v32 = vsel %vm8620_vm12, %v7181_v36, %v2932_v38 }
 0x17e   : > { %6968 = vmatmul.msk.bf16.gmra.mxu2 %vm1036_vm9, %v1386_v44  ;;  %v1085_v45 = vpop.f32.mrf.mxu0  ;;  %v2564_v44 = vshll.u32 %v8815_v33, 16  ;;  %v2937_v33 = vsel %vm8620_vm12, %v7182_v28, %v2936_v40 }
 0x17f   : > { %v8806_v50 = vadd.f32 %v1216_v61, %v1085_v45  ;;  %v8817_v34 = vpop.f32.mrf.mxu1  ;;  %v2490_v61 = vld [vmem:[#allocation2 + $0x38] sm:$0xf]  ;;  %v2572_v45 = vshll.u32 %v2488_v60, 16  ;;  %v2553_v14 = vsel %vm8526_vm8, %v2548_v63, %v2552_v0  ;;  %v7107_v60 = vld [vmem:[#allocation2 + $0x20] sm:$0xf]  ;;  %v1204_v0 = vadd.f32 %v8718_v52, %v8735_v15 }
 0x180   : > { %v2583_v9 = vshrl.u32 %v2490_v61, 16  ;;  %v2586_v10 = vshll.u32 %v2490_v61, 16  ;;  %v2745_v30 = vunpack.c.l.b16 %v2553_v14  ;;  %v7820_v61 = vld [vmem:[#allocation2 + $0x24] sm:$0xf0]  ;;  %v2996_v14 = vunpack.c.l.b16 %v2937_v33 }
 0x181   : > { %v1105_v62 = vpop.f32.mrf.mxu2  ;;  %7052 = vmatmul.msk.bf16.gmra.mxu0 %vm1036_vm9, %v1951_v6  ;;  %v2566_v6 = vrot.slane %v2564_v44, 5  ;;  %v2574_v23 = vrot.slane %v2572_v45, 5 }
 0x182   : > { %v8810_v19 = vadd.f32 %v1236_v1, %v1105_v62  ;;  %v2562_v1 = vrot.slane %v2561_v43, 4  ;;  %v2585_v24 = vrot.slane %v2583_v9, 4  ;;  %v2588_v25 = vrot.slane %v2586_v10, 5 }
 0x183   : > { %v1238_v35 = vpop.f32.mrf.mxu3  ;;  %v2575_v43 = vor.u32 %v2574_v23, %v2571_v3 }
 0x184   : > { %v2567_v62 = vsel %vm8526_vm8, %v2562_v1, %v2566_v6 }
 0x185   : > { %v2746_v31 = vunpack.c.l.b16 %v2567_v62  ;;  %v2492_v62 = vld [vmem:[#allocation2 + $0x40] sm:$0xf] }
 0x186   : > { %v8823_v39 = vpop.f32.mrf.mxu0  ;;  %v2597_v3 = vshrl.u32 %v2492_v62, 16  ;;  %v2600_v23 = vshll.u32 %v2492_v62, 16 }
 0x187   : > { %v2253_v5 = vpop.f32.mrf.mxu1  ;;  %v2760_v55 = vpack.c.b16 %v2746_v31, %v2745_v30  ;;  %v2611_v30 = vshrl.u32 %v2494_v16, 16  ;;  %v2614_v31 = vshll.u32 %v2494_v16, 16 }
 0x188   : > { %7171 = vmatmul.msk.bf16.vlgmr.msra.gmra.mxu3 %vm1036_vm9, %v2759_v26  ;;  %v8839_v26 = vld [vmem:[#allocation2 + $0x3c] sm:$0x1] }
 0x189   : > { %v1107_v47 = vpop.f32.mrf.mxu2 }
 0x18a   : > { %v8827_v48 = vadd.f32 %v1238_v35, %v1107_v47  ;;  %v8837_v35 = vld [vmem:[#allocation2 + $0x34] sm:$0x1]  ;;  %v2589_v47 = vor.u32 %v2588_v25, %v2585_v24 }
 0x18b   : > { %v1609_v42 = vpop.f32.mrf.mxu3  ;;  %v2578_v44 = vshll.u32 %v8837_v35, 16 }
 0x18c   : > { %10368 = vst [vmem:[#allocation12_spill] sm:$0xff] %v8827_v48  ;;  %v2590_v45 = vrot.slane %v2589_v47, 4  ;;  %v2944_v47 = vrot.slane %v8839_v26, 5 }
 0x18d   : > { %v2580_v8 = vrot.slane %v2578_v44, 5 }
 0x18e   : > { %7145 = vmatmul.msk.bf16.vlgmr.msra.gmra.mxu2 %vm1036_vm9, %v7104_v49  ;;  %v2003_v13 = vpop.f32.mrf.mxu0 }
 0x18f   : > { %v8845_v63 = vpop.f32.mrf.mxu1 }
 0x191   : > { %v1438_v18 = vpop.f32.mrf.mxu2  ;;  %7213 = vmatmul.msk.bf16.vlgmr.msra.gmra.mxu0 %vm1036_vm9, %v3009_v12  ;;  %v7108_v12 = vor.u32 %v7820_v61, %v7107_v60  ;;  %v2616_v60 = vrot.slane %v2614_v31, 5  ;;  %v8867_v61 = vld [vmem:[#allocation2 + $0x44] sm:$0x1]  ;;  %v2496_v31 = vld [vmem:[#allocation2 + $0x60] sm:$0xf] }
 0x192   : > { %v1478_v29 = vadd.f32 %v1438_v18, %v8715_v46  ;;  %v2592_v46 = vshll.u32 %v8839_v26, 16 }
 0x193   : > { %v1611_v27 = vpop.f32.mrf.mxu3 }
 0x194   : > { %v1649_v41 = vadd.f32 %v1609_v42, %v1478_v29  ;;  %v2576_v42 = vrot.slane %v2575_v43, 4  ;;  %v2594_v9 = vrot.slane %v2592_v46, 5  ;;  %v2879_v29 = vld [vmem:[#allocation2 + $0x38] sm:$0xe]  ;;  %v2599_v46 = vrot.slane %v2597_v3, 4 }
 0x195   : > { %v7184_v44 = vrot.slane %v2879_v29, 9 }
 0x196   : > { %v2043_v49 = vadd.f32 %v2003_v13, %v1649_v41  ;;  %v2005_v57 = vpop.f32.mrf.mxu0  ;;  %v2995_v13 = vunpack.c.l.b16 %v2933_v32  ;;  %v2581_v52 = vsel %vm8526_vm8, %v2576_v42, %v2580_v8  ;;  %v2595_v15 = vsel %vm8526_vm8, %v2590_v45, %v2594_v9  ;;  %v8869_v32 = vld [vmem:[#allocation2 + $0x4c] sm:$0x1]  ;;  %v7111_v45 = vld [vmem:[#allocation2 + $0x30] sm:$0xf]  ;;  %v7821_v9 = vld [vmem:[#allocation2 + $0x34] sm:$0xf0] }
 0x197   : > { %v2747_v38 = vunpack.c.l.b16 %v2581_v52  ;;  %v2748_v28 = vunpack.c.l.b16 %v2595_v15  ;;  %v2940_v41 = vrot.slane %v8837_v35, 5  ;;  %v2258_v43 = vpop.f32.mrf.mxu1  ;;  %v2945_v26 = vsel %vm8620_vm12, %v7184_v44, %v2944_v47 }
 0x198   : > { %v8853_v1 = vadd.f32 %v2253_v5, %v2043_v49  ;;  %7172 = vmatmul.msk.bf16.gmra.mxu3 %vm1036_vm9, %v2760_v55  ;;  %v2878_v5 = vld [vmem:[#allocation2 + $0x30] sm:$0xe]  ;;  %v3010_v25 = vpack.c.b16 %v2996_v14, %v2995_v13  ;;  %v2602_v49 = vrot.slane %v2600_v23, 5  ;;  %v1209_v14 = vadd.f32 %v8744_v56, %v8759_v4 }
 0x199   : > { %v1440_v6 = vpop.f32.mrf.mxu2  ;;  %v7183_v40 = vrot.slane %v2878_v5, 9  ;;  %v2761_v35 = vpack.c.b16 %v2748_v28, %v2747_v38  ;;  %v2998_v52 = vunpack.c.l.b16 %v2945_v26  ;;  %v2625_v44 = vshrl.u32 %v2496_v31, 16 }
 0x19a   : > { %v1479_v10 = vadd.f32 %v1440_v6, %v1204_v0  ;;  %v2603_v42 = vor.u32 %v2602_v49, %v2599_v46  ;;  %v2628_v47 = vshll.u32 %v2496_v31, 16  ;;  %v2952_v26 = vrot.slane %v8869_v32, 5 }
 0x19b   : > { %v1614_v18 = vpop.f32.mrf.mxu3  ;;  %v2941_v6 = vsel %vm8620_vm12, %v7183_v40, %v2940_v41  ;;  %v2880_v41 = vld [vmem:[#allocation2 + $0x40] sm:$0xe] }
 0x19c   : > { %v1650_v59 = vadd.f32 %v1611_v27, %v1479_v10  ;;  %v2604_v15 = vrot.slane %v2603_v42, 4  ;;  %v2627_v42 = vrot.slane %v2625_v44, 4 }
 0x19e   : > { %7146 = vmatmul.msk.bf16.gmra.mxu2 %vm1036_vm9, %v7108_v12  ;;  %v8861_v24 = vadd.f32 %v2005_v57, %v1650_v59  ;;  %v2008_v36 = vpop.f32.mrf.mxu0  ;;  %v2613_v57 = vrot.slane %v2611_v30, 4  ;;  %v2620_v12 = vshll.u32 %v8869_v32, 16  ;;  %v7112_v59 = vor.u32 %v7821_v9, %v7111_v45 }
 0x19f   : > { %v8882_v29 = vpop.f32.mrf.mxu1 }
 0x1a0   : > { %v2617_v10 = vor.u32 %v2616_v60, %v2613_v57  ;;  %v7185_v60 = vrot.slane %v2880_v41, 9  ;;  %v2502_v41 = vld [vmem:[#allocation2 + $0x78] sm:$0xf]  ;;  %v2294_v7 = vadd.f32 %v8845_v63, %v8861_v24 }
 0x1a1   : > { %v1443_v27 = vpop.f32.mrf.mxu2  ;;  %7214 = vmatmul.msk.bf16.gmra.mxu0 %vm1036_vm9, %v3010_v25  ;;  %v2622_v25 = vrot.slane %v2620_v12, 5  ;;  %v8897_v12 = vld [vmem:[#allocation2 + $0x6c] sm:$0x1] }
 0x1a2   : > { %v1480_v55 = vadd.f32 %v1443_v27, %v8742_v54  ;;  %v2606_v54 = vshll.u32 %v8867_v61, 16  ;;  %v2618_v23 = vrot.slane %v2617_v10, 4  ;;  %v8895_v10 = vld [vmem:[#allocation2 + $0x64] sm:$0x1] }
 0x1a3   : > { %v1616_v0 = vpop.f32.mrf.mxu3 }
 0x1a4   : > { %v1651_v33 = vadd.f32 %v1614_v18, %v1480_v55  ;;  %v2997_v18 = vunpack.c.l.b16 %v2941_v6  ;;  %v2608_v3 = vrot.slane %v2606_v54, 5  ;;  %v2623_v40 = vsel %vm8526_vm8, %v2618_v23, %v2622_v25 }
 0x1a5   : > { %v2648_v23 = vshll.u32 %v8897_v12, 16  ;;  %v1214_v25 = vadd.f32 %v8776_v53, %v8795_v22  ;;  %v2667_v53 = vshrl.u32 %v2502_v41, 16  ;;  %v2670_v22 = vshll.u32 %v2502_v41, 16 }
 0x1a6   : > { %v2045_v8 = vadd.f32 %v2008_v36, %v1651_v33  ;;  %v2010_v13 = vpop.f32.mrf.mxu0  ;;  %v2498_v36 = vld [vmem:[#allocation2 + $0x68] sm:$0xf]  ;;  %v3011_v4 = vpack.c.b16 %v2998_v52, %v2997_v18  ;;  %v2609_v28 = vsel %vm8526_vm8, %v2604_v15, %v2608_v3  ;;  %v2948_v33 = vrot.slane %v8867_v61, 5  ;;  %v7115_v18 = vld [vmem:[#allocation2 + $0x40] sm:$0xf] }
 0x1a7   : > { %v2639_v46 = vshrl.u32 %v2498_v36, 16  ;;  %v2642_v49 = vshll.u32 %v2498_v36, 16  ;;  %v2749_v57 = vunpack.c.l.b16 %v2609_v28  ;;  %v7822_v52 = vld [vmem:[#allocation2 + $0x44] sm:$0xf0]  ;;  %v1219_v41 = vadd.f32 %v8817_v34, %v8823_v39  ;;  %v2884_v39 = vld [vmem:[#allocation2 + $0x70] sm:$0xe] }
 0x1a8   : > { %v8879_v62 = vadd.f32 %v2258_v43, %v2045_v8  ;;  %7173 = vmatmul.msk.bf16.gmra.mxu3 %vm1036_vm9, %v2761_v35  ;;  %v2881_v43 = vld [vmem:[#allocation2 + $0x48] sm:$0xe]  ;;  %v2750_v35 = vunpack.c.l.b16 %v2623_v40  ;;  %v2630_v8 = vrot.slane %v2628_v47, 5  ;;  %v2500_v40 = vld [vmem:[#allocation2 + $0x70] sm:$0xf]  ;;  %v2650_v47 = vrot.slane %v2648_v23, 5 }
 0x1a9   : > { %v1445_v16 = vpop.f32.mrf.mxu2  ;;  %v7186_v6 = vrot.slane %v2881_v43, 9  ;;  %v2641_v45 = vrot.slane %v2639_v46, 4  ;;  %v2644_v9 = vrot.slane %v2642_v49, 5 }
 0x1aa   : > { %v1481_v5 = vadd.f32 %v1445_v16, %v1209_v14  ;;  %v2762_v16 = vpack.c.b16 %v2750_v35, %v2749_v57  ;;  %v2631_v15 = vor.u32 %v2630_v8, %v2627_v42  ;;  %v2656_v57 = vshll.u32 %v2500_v40, 16  ;;  %v2883_v42 = vld [vmem:[#allocation2 + $0x68] sm:$0xe] }
 0x1ab   : > { %v1619_v38 = vpop.f32.mrf.mxu3  ;;  %v2645_v3 = vor.u32 %v2644_v9, %v2641_v45 }
 0x1ac   : > { %v1652_v30 = vadd.f32 %v1616_v0, %v1481_v5  ;;  %v2634_v5 = vshll.u32 %v8895_v10, 16  ;;  %v2658_v9 = vrot.slane %v2656_v57, 5 }
 0x1ad   : > { %v2646_v44 = vrot.slane %v2645_v3, 4 }
 0x1ae   : > { %7147 = vmatmul.msk.bf16.gmra.mxu2 %vm1036_vm9, %v7112_v59  ;;  %v8885_v56 = vadd.f32 %v2010_v13, %v1652_v30  ;;  %v2013_v27 = vpop.f32.mrf.mxu0  ;;  %v2263_v13 = vpop.f32.mrf.mxu1  ;;  %v2953_v59 = vsel %vm8620_vm12, %v7186_v6, %v2952_v26  ;;  %v2636_v43 = vrot.slane %v2634_v5, 5  ;;  %v2882_v26 = vld [vmem:[#allocation2 + $0x60] sm:$0xe] }
 0x1af   : > { %v3000_v28 = vunpack.c.l.b16 %v2953_v59  ;;  %v2651_v6 = vsel %vm8526_vm8, %v2646_v44, %v2650_v47  ;;  %v8921_v59 = vld [vmem:[#allocation2 + $0x7c] sm:$0x1] }
 0x1b1   : > { %v1448_v55 = vpop.f32.mrf.mxu2  ;;  %7215 = vmatmul.msk.bf16.gmra.mxu0 %vm1036_vm9, %v3011_v4 }
 0x1b2   : > { %v1482_v0 = vadd.f32 %v1448_v55, %v8774_v11  ;;  %v2949_v11 = vsel %vm8620_vm12, %v7185_v60, %v2948_v33  ;;  %v2653_v55 = vshrl.u32 %v2500_v40, 16  ;;  %v7823_v40 = vld [vmem:[#allocation2 + $0x64] sm:$0xf0] }
 0x1b3   : > { %v1621_v14 = vpop.f32.mrf.mxu3  ;;  %v2999_v4 = vunpack.c.l.b16 %v2949_v11  ;;  %v8919_v11 = vld [vmem:[#allocation2 + $0x74] sm:$0x1] }
 0x1b4   : > { %v1653_v54 = vadd.f32 %v1619_v38, %v1482_v0  ;;  %v7116_v38 = vor.u32 %v7822_v52, %v7115_v18  ;;  %v2655_v45 = vrot.slane %v2653_v55, 4  ;;  %v2956_v18 = vrot.slane %v8895_v10, 5 }
 0x1b5   : > { %v3012_v33 = vpack.c.b16 %v3000_v28, %v2999_v4  ;;  %v7188_v52 = vrot.slane %v2883_v42, 9  ;;  %v7119_v28 = vld [vmem:[#allocation2 + $0x60] sm:$0xf] }
 0x1b6   : > { %v2047_v61 = vadd.f32 %v2013_v27, %v1653_v54  ;;  %v2015_v32 = vpop.f32.mrf.mxu0  ;;  %v2632_v27 = vrot.slane %v2631_v15, 4  ;;  %v2669_v54 = vrot.slane %v2667_v53, 4  ;;  %v2960_v15 = vrot.slane %v8897_v12, 5 }
 0x1b7   : > { %v2659_v23 = vor.u32 %v2658_v9, %v2655_v45  ;;  %v7120_v55 = vor.u32 %v7823_v40, %v7119_v28  ;;  %v2885_v9 = vld [vmem:[#allocation2 + $0x78] sm:$0xe] }
 0x1b8   : > { %v8907_v30 = vadd.f32 %v2263_v13, %v2047_v61  ;;  %7174 = vmatmul.msk.bf16.gmra.mxu3 %vm1036_vm9, %v2762_v16  ;;  %v2637_v35 = vsel %vm8526_vm8, %v2632_v27, %v2636_v43  ;;  %v2672_v13 = vrot.slane %v2670_v22, 5  ;;  %v2752_v16 = vunpack.c.l.b16 %v2651_v6  ;;  %v2504_v22 = vld [vmem:[#allocation2 + $0x80] sm:$0xf] }
 0x1b9   : > { %v1450_v31 = vpop.f32.mrf.mxu2  ;;  %v2751_v61 = vunpack.c.l.b16 %v2637_v35  ;;  %v2961_v12 = vsel %vm8620_vm12, %v7188_v52, %v2960_v15  ;;  %v2660_v43 = vrot.slane %v2659_v23, 4  ;;  %v2684_v42 = vshll.u32 %v2504_v22, 16 }
 0x1ba   : > { %v1483_v36 = vadd.f32 %v1450_v31, %v1214_v25  ;;  %v2662_v25 = vshll.u32 %v8919_v11, 16  ;;  %v2673_v31 = vor.u32 %v2672_v13, %v2669_v54  ;;  %v3002_v53 = vunpack.c.l.b16 %v2961_v12 }
 0x1bb   : > { %v1624_v49 = vpop.f32.mrf.mxu3  ;;  %v7190_v15 = vrot.slane %v2885_v9, 9  ;;  %v2686_v23 = vrot.slane %v2684_v42, 5  ;;  %v2886_v9 = vld [vmem:[#allocation2 + $0x80] sm:$0xe] }
 0x1bc   : > { %v1654_v46 = vadd.f32 %v1621_v14, %v1483_v36  ;;  %v2664_v44 = vrot.slane %v2662_v25, 5  ;;  %v2674_v47 = vrot.slane %v2673_v31, 4 }
 0x1be   : > { %7148 = vmatmul.msk.bf16.gmra.mxu2 %vm1036_vm9, %v7116_v38  ;;  %v8911_v60 = vadd.f32 %v2015_v32, %v1654_v46  ;;  %v2018_v0 = vpop.f32.mrf.mxu0  ;;  %v7187_v32 = vrot.slane %v2882_v26, 9  ;;  %v2763_v38 = vpack.c.b16 %v2752_v16, %v2751_v61  ;;  %v2665_v6 = vsel %vm8526_vm8, %v2660_v43, %v2664_v44  ;;  %v7824_v43 = vld [vmem:[#allocation2 + $0x74] sm:$0xf0] }
 0x1bf   : > { %v2681_v26 = vshrl.u32 %v2504_v22, 16  ;;  %v2753_v61 = vunpack.c.l.b16 %v2665_v6  ;;  %v2508_v6 = vld [vmem:[#allocation2 + $0x90] sm:$0xf] }
 0x1c0   : > { %v2957_v10 = vsel %vm8620_vm12, %v7187_v32, %v2956_v18  ;;  %v7189_v32 = vrot.slane %v2884_v39, 9  ;;  %v2964_v18 = vrot.slane %v8919_v11, 5 }
 0x1c1   : > { %v1453_v8 = vpop.f32.mrf.mxu2  ;;  %7216 = vmatmul.msk.bf16.gmra.mxu0 %vm1036_vm9, %v3012_v33  ;;  %v3001_v57 = vunpack.c.l.b16 %v2957_v10  ;;  %v2506_v33 = vld [vmem:[#allocation2 + $0x88] sm:$0xf] }
 0x1c2   : > { %v1484_v14 = vadd.f32 %v1453_v8, %v8806_v50  ;;  %v2676_v50 = vshll.u32 %v8921_v59, 16  ;;  %v2695_v54 = vshrl.u32 %v2506_v33, 16  ;;  %v2698_v13 = vshll.u32 %v2506_v33, 16 }
 0x1c3   : > { %v1626_v3 = vpop.f32.mrf.mxu3  ;;  %v3013_v45 = vpack.c.b16 %v3002_v53, %v3001_v57  ;;  %v2965_v11 = vsel %vm8620_vm12, %v7189_v32, %v2964_v18 }
 0x1c4   : > { %v1655_v5 = vadd.f32 %v1624_v49, %v1484_v14  ;;  %v2678_v46 = vrot.slane %v2676_v50, 5  ;;  %v2697_v31 = vrot.slane %v2695_v54, 4  ;;  %v2700_v50 = vrot.slane %v2698_v13, 5  ;;  %v2887_v13 = vld [vmem:[#allocation2 + $0x88] sm:$0xe] }
 0x1c5   : > { %v3003_v57 = vunpack.c.l.b16 %v2965_v11 }
 0x1c6   : > { %v8927_v36 = vadd.f32 %v2018_v0, %v1655_v5  ;;  %v2020_v4 = vpop.f32.mrf.mxu0  ;;  %v2679_v34 = vsel %vm8526_vm8, %v2674_v47, %v2678_v46  ;;  %v2968_v5 = vrot.slane %v8921_v59, 5  ;;  %v2701_v44 = vor.u32 %v2700_v50, %v2697_v31 }
 0x1c7   : > { %v2754_v16 = vunpack.c.l.b16 %v2679_v34  ;;  %v2510_v34 = vld [vmem:[#allocation2 + $0x98] sm:$0xf] }
 0x1c8   : > { %7175 = vmatmul.msk.bf16.gmra.mxu3 %vm1036_vm9, %v2763_v38  ;;  %v2505_v38 = vld [vmem:[#allocation2 + $0x84] sm:$0x1]  ;;  %v2969_v59 = vsel %vm8620_vm12, %v7190_v15, %v2968_v5  ;;  %v2726_v32 = vshll.u32 %v2510_v34, 16  ;;  %v7191_v15 = vrot.slane %v2886_v9, 9 }
 0x1c9   : > { %v1455_v27 = vpop.f32.mrf.mxu2  ;;  %v2764_v10 = vpack.c.b16 %v2754_v16, %v2753_v61  ;;  %v3004_v53 = vunpack.c.l.b16 %v2969_v59  ;;  %v2712_v61 = vshll.u32 %v2508_v6, 16  ;;  %v2723_v16 = vshrl.u32 %v2510_v34, 16 }
 0x1ca   : > { %v1485_v49 = vadd.f32 %v1455_v27, %v1219_v41  ;;  %v7123_v27 = vld [vmem:[#allocation2 + $0x70] sm:$0xf]  ;;  %v2972_v5 = vrot.slane %v2505_v38, 5  ;;  %v2728_v11 = vrot.slane %v2726_v32, 5  ;;  %v2889_v32 = vld [vmem:[#allocation2 + $0x98] sm:$0xe] }
 0x1cb   : > { %v1629_v35 = vpop.f32.mrf.mxu3 }
 0x1cc   : > { %v1656_v0 = vadd.f32 %v1626_v3, %v1485_v49  ;;  %v2683_v3 = vrot.slane %v2681_v26, 4  ;;  %v3014_v26 = vpack.c.b16 %v3004_v53, %v3003_v57 }
 0x1ce   : > { %7149 = vmatmul.msk.bf16.gmra.mxu2 %vm1036_vm9, %v7120_v55  ;;  %v8941_v8 = vadd.f32 %v2020_v4, %v1656_v0  ;;  %v2023_v14 = vpop.f32.mrf.mxu0  ;;  %v2507_v4 = vld [vmem:[#allocation2 + $0x8c] sm:$0x1]  ;;  %v2687_v12 = vor.u32 %v2686_v23, %v2683_v3  ;;  %v7124_v55 = vor.u32 %v7824_v43, %v7123_v27  ;;  %v2702_v0 = vrot.slane %v2701_v44, 4  ;;  %v2511_v27 = vld [vmem:[#allocation2 + $0x9c] sm:$0x1] }
 0x1cf   : > { %v2704_v47 = vshll.u32 %v2507_v4, 16  ;;  %v2976_v31 = vrot.slane %v2507_v4, 5  ;;  %v7127_v4 = vld [vmem:[#allocation2 + $0x80] sm:$0xf] }
 0x1d0   : > { %v2688_v22 = vrot.slane %v2687_v12, 4  ;;  %v2509_v12 = vld [vmem:[#allocation2 + $0x94] sm:$0x1] }
 0x1d1   : > { %v1458_v52 = vpop.f32.mrf.mxu2  ;;  %7217 = vmatmul.msk.bf16.gmra.mxu0 %vm1036_vm9, %v3013_v45  ;;  %v2718_v53 = vshll.u32 %v2509_v12, 16 }
 0x1d2   : > { %v1486_v25 = vadd.f32 %v1458_v52, %v8725_v58  ;;  %v2690_v58 = vshll.u32 %v2505_v38, 16  ;;  %v2973_v38 = vsel %vm8620_vm12, %v7191_v15, %v2972_v5 }
 0x1d3   : > { %v8947_v40 = vpop.f32.mrf.mxu3 }
 0x1d4   : > { %v1657_v28 = vadd.f32 %v1629_v35, %v1486_v25  ;;  %v2692_v33 = vrot.slane %v2690_v58, 5  ;;  %v2706_v35 = vrot.slane %v2704_v47, 5  ;;  %v7192_v25 = vrot.slane %v2887_v13, 9 }
 0x1d6   : > { %v8953_v41 = vadd.f32 %v2023_v14, %v1657_v28  ;;  %v8955_v46 = vpop.f32.mrf.mxu0  ;;  %v2693_v42 = vsel %vm8526_vm8, %v2688_v22, %v2692_v33  ;;  %v2707_v45 = vsel %vm8526_vm8, %v2702_v0, %v2706_v35  ;;  %v2709_v14 = vshrl.u32 %v2508_v6, 16 }
 0x1d7   : > { %v2755_v52 = vunpack.c.l.b16 %v2693_v42  ;;  %v2756_v23 = vunpack.c.l.b16 %v2707_v45  ;;  %v2714_v28 = vrot.slane %v2712_v61, 5  ;;  %v2732_v33 = vshll.u32 %v2511_v27, 16 }
 0x1d8   : > { %7176 = vmatmul.msk.bf16.gmra.mxu3 %vm1036_vm9, %v2764_v10  ;;  %v2711_v50 = vrot.slane %v2709_v14, 4  ;;  %v2725_v10 = vrot.slane %v2723_v16, 4  ;;  %v3005_v6 = vunpack.c.l.b16 %v2973_v38  ;;  %v2888_v16 = vld [vmem:[#allocation2 + $0x90] sm:$0xe]  ;;  %v7826_v38 = vld [vmem:[#allocation2 + $0x94] sm:$0xf0] }
 0x1d9   : > { %v8957_v49 = vpop.f32.mrf.mxu2  ;;  %v2765_v44 = vpack.c.b16 %v2756_v23, %v2755_v52  ;;  %v2734_v45 = vrot.slane %v2732_v33, 5  ;;  %v2980_v23 = vrot.slane %v2509_v12, 5 }
 0x1da   : > { %v2715_v57 = vor.u32 %v2714_v28, %v2711_v50  ;;  %v2729_v22 = vor.u32 %v2728_v11, %v2725_v10 }
 0x1db   : > { %v1634_v39 = vpop.f32.mrf.mxu3 }
 0x1dc   : > { %v2730_v42 = vrot.slane %v2729_v22, 4 }
 0x1de   : > { %7150 = vmatmul.msk.bf16.gmra.mxu2 %vm1036_vm9, %v7124_v55  ;;  %v2028_v54 = vpop.f32.mrf.mxu0  ;;  %v7825_v55 = vld [vmem:[#allocation2 + $0x84] sm:$0xf0]  ;;  %v2735_v61 = vsel %vm8526_vm8, %v2730_v42, %v2734_v45 }
 0x1df   : > { %v7128_v35 = vor.u32 %v7825_v55, %v7127_v4  ;;  %v2758_v5 = vunpack.c.l.b16 %v2735_v61 }
 0x1e1   : > { %v1463_v18 = vpop.f32.mrf.mxu2  ;;  %7218 = vmatmul.msk.bf16.gmra.mxu0 %vm1036_vm9, %v3014_v26  ;;  %v2720_v26 = vrot.slane %v2718_v53, 5 }
 0x1e2   : > { %v1488_v3 = vadd.f32 %v1463_v18, %v8753_v2  ;;  %v2977_v2 = vsel %vm8620_vm12, %v7192_v25, %v2976_v31  ;;  %v7194_v25 = vrot.slane %v2889_v32, 9  ;;  %v2984_v31 = vrot.slane %v2511_v27, 5 }
 0x1e3   : > { %v8967_v43 = vpop.f32.mrf.mxu3  ;;  %v3006_v34 = vunpack.c.l.b16 %v2977_v2 }
 0x1e4   : > { %v1659_v59 = vadd.f32 %v1634_v39, %v1488_v3  ;;  %v2716_v39 = vrot.slane %v2715_v57, 4  ;;  %v7193_v3 = vrot.slane %v2888_v16, 9 }
 0x1e6   : > { %v8969_v58 = vadd.f32 %v2028_v54, %v1659_v59  ;;  %v8975_v47 = vpop.f32.mrf.mxu0  ;;  %v3015_v54 = vpack.c.b16 %v3006_v34, %v3005_v6  ;;  %v2721_v14 = vsel %vm8526_vm8, %v2716_v39, %v2720_v26  ;;  %v2981_v2 = vsel %vm8620_vm12, %v7193_v3, %v2980_v23 }
 0x1e7   : > { %v2757_v15 = vunpack.c.l.b16 %v2721_v14  ;;  %v3007_v27 = vunpack.c.l.b16 %v2981_v2 }
 0x1e8   : > { %7177 = vmatmul.msk.bf16.gmra.mxu3 %vm1036_vm9, %v2765_v44  ;;  %v7131_v44 = vld [vmem:[#allocation2 + $0x90] sm:$0xf] }
 0x1e9   : > { %v8977_v0 = vpop.f32.mrf.mxu2  ;;  %v2766_v11 = vpack.c.b16 %v2758_v5, %v2757_v15  ;;  %v7132_v12 = vor.u32 %v7826_v38, %v7131_v44  ;;  %v2265_v15 = vpop.f32.mrf.mxu1 }
 0x1eb   : > { %v1639_v9 = vpop.f32.mrf.mxu3 }
 0x1ee   : > { %7151 = vmatmul.msk.bf16.gmra.mxu2 %vm1036_vm9, %v7128_v35  ;;  %v2033_v13 = vpop.f32.mrf.mxu0 }
 0x1f1   : > { %v1468_v18 = vpop.f32.mrf.mxu2  ;;  %7219 = vmatmul.msk.bf16.gmra.mxu0 %vm1036_vm9, %v3015_v54 }
 0x1f2   : > { %v1490_v52 = vadd.f32 %v1468_v18, %v8783_v20  ;;  %v2985_v20 = vsel %vm8620_vm12, %v7194_v25, %v2984_v31 }
 0x1f3   : > { %v8987_v28 = vpop.f32.mrf.mxu3  ;;  %v3008_v55 = vunpack.c.l.b16 %v2985_v20 }
 0x1f4   : > { %v1661_v50 = vadd.f32 %v1639_v9, %v1490_v52 }
 0x1f5   : > { %v3016_v53 = vpack.c.b16 %v3008_v55, %v3007_v27 }
 0x1f6   : > { %v8989_v10 = vadd.f32 %v2033_v13, %v1661_v50  ;;  %v8991_v59 = vpop.f32.mrf.mxu0 }
 0x1f8   : > { %7178 = vmatmul.msk.bf16.gmra.mxu3 %vm1036_vm9, %v2766_v11 }
 0x1f9   : > { %v8997_v4 = vpop.f32.mrf.mxu2 }
 0x1fb   : > { %v1644_v57 = vpop.f32.mrf.mxu3 }
 0x1fe   : > { %7152 = vmatmul.msk.bf16.gmra.mxu2 %vm1036_vm9, %v7132_v12  ;;  %v2038_v22 = vpop.f32.mrf.mxu0 }
 0x201   : > { %v1473_v33 = vpop.f32.mrf.mxu2  ;;  %7220 = vmatmul.msk.bf16.gmra.mxu0 %vm1036_vm9, %v3016_v53 }
 0x202   : > { %v1492_v35 = vadd.f32 %v1473_v33, %v8810_v19 }
 0x203   : > { %v9003_v34 = vpop.f32.mrf.mxu3 }
 0x204   : > { %v1663_v6 = vadd.f32 %v1644_v57, %v1492_v35  ;;  %10369 = vst [vmem:[#allocation13_spill] sm:$0xff] %v9003_v34 }
 0x206   : > { %v9005_v39 = vadd.f32 %v2038_v22, %v1663_v6  ;;  %v9007_v26 = vpop.f32.mrf.mxu0 }
 0x207   : > { %10371 = vst [vmem:[#allocation15_spill] sm:$0xff] %v9007_v26 }
 0x208   : > { %10370 = vst [vmem:[#allocation14_spill] sm:$0xff] %v9005_v39  ;;  %v2296_v39 = vadd.f32 %v8882_v29, %v8885_v56 }
 0x209   : > { %v9009_v42 = vpop.f32.mrf.mxu2 }
 0x20a   : > { %10372 = vst [vmem:[#allocation16_spill] sm:$0xff] %v9009_v42 }
 0x20b   : > { %v2818_v45 = vpop.f32.mrf.mxu3 }
 0x20e   : > { %v3068_v9 = vpop.f32.mrf.mxu0 }
 0x211   : > { %v2424_v54 = vpop.f32.mrf.mxu2 }
 0x212   : > { %v2464_v13 = vadd.f32 %v2424_v54, %v8853_v1  ;;  %v2268_v1 = vpop.f32.mrf.mxu1 }
 0x213   : > { %v2820_v61 = vpop.f32.mrf.mxu3  ;;  %v2299_v29 = vadd.f32 %v2268_v1, %v8927_v36 }
 0x214   : > { %v2858_v14 = vadd.f32 %v2818_v45, %v2464_v13  ;;  %v7855_v45 = vld [vmem:[%s8273_s19 + $0x58] sm:$0xff] }
 0x215   : > { %3937 = vmatpush.bf16.msra.mxu1 %v7855_v45 }
 0x216   : > { %v9012_v16 = vadd.f32 %v3068_v9, %v2858_v14  ;;  %v3070_v32 = vpop.f32.mrf.mxu0 }
 0x219   : > { %v2426_v19 = vpop.f32.mrf.mxu2 }
 0x21a   : > { %v2270_v12 = vpop.f32.mrf.mxu1  ;;  %v2465_v17 = vadd.f32 %v2426_v19, %v2294_v7  ;;  %v1489_v7 = vadd.f32 %v8977_v0, %v8763_v37  ;;  %v1491_v37 = vadd.f32 %v8997_v4, %v8797_v51 }
 0x21b   : > { %v2823_v18 = vpop.f32.mrf.mxu3 }
 0x21e   : > { %v3073_v52 = vpop.f32.mrf.mxu0 }
 0x221   : > { %v2429_v5 = vpop.f32.mrf.mxu2 }
 0x222   : > { %v2466_v3 = vadd.f32 %v2429_v5, %v8879_v62  ;;  %v2273_v33 = vpop.f32.mrf.mxu1 }
 0x223   : > { %v2825_v25 = vpop.f32.mrf.mxu3 }
 0x224   : > { %v2860_v23 = vadd.f32 %v2823_v18, %v2466_v3 }
 0x226   : > { %v9015_v31 = vadd.f32 %v3073_v52, %v2860_v23  ;;  %v3075_v50 = vpop.f32.mrf.mxu0 }
 0x229   : > { %v2431_v11 = vpop.f32.mrf.mxu2 }
 0x22b   : > { %v2828_v44 = vpop.f32.mrf.mxu3 }
 0x22e   : > { %v3078_v38 = vpop.f32.mrf.mxu0 }
 0x231   : > { %v2434_v2 = vpop.f32.mrf.mxu2 }
 0x232   : > { %v2468_v20 = vadd.f32 %v2434_v2, %v8907_v30  ;;  %v2275_v30 = vpop.f32.mrf.mxu1 }
 0x233   : > { %v2830_v55 = vpop.f32.mrf.mxu3 }
 0x234   : > { %v2862_v27 = vadd.f32 %v2828_v44, %v2468_v20 }
 0x236   : > { %v9018_v57 = vadd.f32 %v3078_v38, %v2862_v27  ;;  %v9020_v53 = vpop.f32.mrf.mxu0  ;;  %v7854_v38 = vld [vmem:[%s8273_s19 + $0x50] sm:$0xff] }
 0x237   : > { %3938 = vmatpush.bf16.msra.mxu1 %v7854_v38  ;;  %v2859_v38 = vadd.f32 %v2820_v61, %v2465_v17  ;;  %v2301_v61 = vadd.f32 %v2273_v33, %v8953_v41 }
 0x239   : > { %v2436_v62 = vpop.f32.mrf.mxu2  ;;  %v9054_v63 = vadd.f32 %v3070_v32, %v2859_v38 }
 0x23a   : > { %v2278_v5 = vpop.f32.mrf.mxu1 }
 0x23b   : > { %v2833_v22 = vpop.f32.mrf.mxu3  ;;  %v3154_v0 = vmul.f32 %v9054_v63, %v9054_v63  ;;  %v3124_v51 = vadd.f32 %v9054_v63, %v9012_v16 }
 0x23e   : > { %v9022_v35 = vpop.f32.mrf.mxu0 }
 0x241   : > { %v2439_v6 = vpop.f32.mrf.mxu2 }
 0x242   : > { %v2280_v2 = vpop.f32.mrf.mxu1 }
 0x243   : > { %v2835_v9 = vpop.f32.mrf.mxu3 }
 0x246   : > { %v9025_v54 = vpop.f32.mrf.mxu0 }
 0x249   : > { %v2441_v13 = vpop.f32.mrf.mxu2 }
 0x24a   : > { %v2283_v34 = vpop.f32.mrf.mxu1 }
 0x24b   : > { %v9027_v14 = vpop.f32.mrf.mxu3 }
 0x24e   : > { %v9029_v18 = vpop.f32.mrf.mxu0 }
 0x24f   : > { %10373 = vst [vmem:[#allocation17_spill] sm:$0xff] %v9029_v18 }
 0x251   : > { %v2444_v52 = vpop.f32.mrf.mxu2 }
 0x253   : > { %v9031_v3 = vpop.f32.mrf.mxu3 }
 0x256   : > { %v9033_v23 = vpop.f32.mrf.mxu0 }
 0x257   : > { %10374 = vst [vmem:[#allocation18_spill] sm:$0xff] %v9033_v23  ;;  %v1487_v23 = vadd.f32 %v8957_v49, %v8737_v21  ;;  %v2300_v21 = vadd.f32 %v2270_v12, %v8941_v8  ;;  %v2470_v49 = vadd.f32 %v2439_v6, %v2299_v29  ;;  %v3125_v12 = vadd.f32 %v3124_v51, %v9015_v31  ;;  %v10383_v51 = vld [vmem:[#allocation14_spill] sm:$0xff] }
 0x258   : > { %v2303_v6 = vadd.f32 %v2278_v5, %v8969_v58 }
 0x259   : > { %v2446_v44 = vpop.f32.mrf.mxu2  ;;  %v1658_v48 = vadd.f32 %v8947_v40, %v1487_v23  ;;  %v2285_v40 = vpop.f32.mrf.mxu1  ;;  %v2471_v8 = vadd.f32 %v2441_v13, %v2300_v21  ;;  %v2864_v4 = vadd.f32 %v2833_v22, %v2470_v49 }
 0x25b   : > { %v9036_v20 = vpop.f32.mrf.mxu3  ;;  %v2052_v17 = vadd.f32 %v8955_v46, %v1658_v48  ;;  %v3153_v48 = vmul.f32 %v9012_v16, %v9012_v16  ;;  %v3155_v46 = vmul.f32 %v9015_v31, %v9015_v31 }
 0x25c   : > { %10375 = vst [vmem:[#allocation19_spill] sm:$0xff] %v9036_v20  ;;  %v2467_v20 = vadd.f32 %v2431_v11, %v2296_v39  ;;  %v1662_v11 = vadd.f32 %v8987_v28, %v1491_v37  ;;  %v9090_v28 = vadd.f32 %v9022_v35, %v2864_v4 }
 0x25d   : > { %v3169_v41 = vadd.f32 %v3154_v0, %v3153_v48 }
 0x25e   : > { %v9038_v27 = vpop.f32.mrf.mxu0  ;;  %v2861_v24 = vadd.f32 %v2825_v25, %v2467_v20  ;;  %v2472_v25 = vadd.f32 %v2444_v52, %v2301_v61  ;;  %v3159_v21 = vmul.f32 %v9090_v28, %v9090_v28 }
 0x25f   : > { %10376 = vst [vmem:[#allocation20_spill] sm:$0xff] %v9038_v27  ;;  %v2298_v27 = vadd.f32 %v2265_v15, %v8911_v60  ;;  %v1660_v60 = vadd.f32 %v8967_v43, %v1489_v7  ;;  %v2302_v43 = vadd.f32 %v2275_v30, %v2052_v17  ;;  %v3170_v30 = vadd.f32 %v3169_v41, %v3155_v46  ;;  %v10379_v17 = vld [vmem:[#allocation17_spill] sm:$0xff] }
 0x260   : > { %v9068_v36 = vadd.f32 %v3075_v50, %v2861_v24  ;;  %v2866_v13 = vadd.f32 %v9027_v14, %v2472_v25  ;;  %v2305_v14 = vadd.f32 %v2283_v34, %v8989_v10  ;;  %v10378_v24 = vld [vmem:[#allocation16_spill] sm:$0xff] }
 0x261   : > { %v2449_v45 = vpop.f32.mrf.mxu2  ;;  %v2469_v56 = vadd.f32 %v2436_v62, %v2298_v27  ;;  %v2054_v50 = vadd.f32 %v8975_v47, %v1660_v60  ;;  %v2865_v62 = vadd.f32 %v2835_v9, %v2471_v8  ;;  %v2473_v33 = vadd.f32 %v2446_v44, %v2302_v43  ;;  %v2288_v7 = vpop.f32.mrf.mxu1 }
 0x262   : > { %v3156_v1 = vmul.f32 %v9068_v36, %v9068_v36  ;;  %v3126_v22 = vadd.f32 %v3125_v12, %v9068_v36  ;;  %v3157_v47 = vmul.f32 %v9018_v57, %v9018_v57  ;;  %v2474_v9 = vadd.f32 %v2449_v45, %v2303_v6 }
 0x263   : > { %v9042_v26 = vpop.f32.mrf.mxu3  ;;  %v2863_v32 = vadd.f32 %v2830_v55, %v2469_v56  ;;  %v2304_v23 = vadd.f32 %v2280_v2, %v2054_v50  ;;  %v9098_v5 = vadd.f32 %v9025_v54, %v2865_v62  ;;  %v2867_v27 = vadd.f32 %v9031_v3, %v2473_v33  ;;  %v10377_v2 = vld [vmem:[#allocation12_spill] sm:$0xff]  ;;  %v10380_v3 = vld [vmem:[#allocation19_spill] sm:$0xff] }
 0x264   : > { %v3171_v20 = vadd.f32 %v3170_v30, %v3156_v1  ;;  %v3127_v44 = vadd.f32 %v3126_v22, %v9018_v57  ;;  %v9108_v54 = vadd.f32 %v10379_v17, %v2866_v13  ;;  %v2868_v60 = vadd.f32 %v10380_v3, %v2474_v9 }
 0x265   : > { %v9083_v55 = vadd.f32 %v9020_v53, %v2863_v32  ;;  %v2056_v53 = vadd.f32 %v8991_v59, %v1662_v11  ;;  %v1493_v59 = vadd.f32 %v10378_v24, %v10377_v2  ;;  %v3160_v34 = vmul.f32 %v9098_v5, %v9098_v5  ;;  %v10382_v32 = vld [vmem:[#allocation13_spill] sm:$0xff] }
 0x266   : > { %v9048_v18 = vpop.f32.mrf.mxu0  ;;  %v3172_v45 = vadd.f32 %v3171_v20, %v3157_v47  ;;  %v2307_v4 = vadd.f32 %v2288_v7, %v10383_v51  ;;  %v10384_v25 = vld [vmem:[#allocation20_spill] sm:$0xff]  ;;  %v8126_v22 = vmov 128.0   ;;  %v10385_v47 = vld [vmem:[#allocation15_spill] sm:$0xff] }
 0x267   : > { %v3158_v58 = vmul.f32 %v9083_v55, %v9083_v55  ;;  %v3128_v56 = vadd.f32 %v3127_v44, %v9083_v55  ;;  %v2306_v49 = vadd.f32 %v2285_v40, %v2056_v53  ;;  %v1664_v8 = vadd.f32 %v10382_v32, %v1493_v59 }
 0x268   : > { %v9124_v50 = vadd.f32 %v10384_v25, %v2868_v60  ;;  %8000 = vrcp.f32 %v8126_v22 }
 0x269   : > { %v2451_v42 = vpop.f32.mrf.mxu2  ;;  %v3173_v0 = vadd.f32 %v3172_v45, %v3158_v58  ;;  %v3129_v10 = vadd.f32 %v3128_v56, %v9090_v28  ;;  %v2058_v13 = vadd.f32 %v10385_v47, %v1664_v8 }
 0x26a   : > { %v2475_v29 = vadd.f32 %v2451_v42, %v2304_v23  ;;  %v10381_v42 = vld [vmem:[#allocation18_spill] sm:$0xff]  ;;  %v3163_v9 = vmul.f32 %v9124_v50, %v9124_v50 }
 0x26b   : > { %v9057_v19 = vpop.f32.mrf.mxu3  ;;  %v9115_v61 = vadd.f32 %v10381_v42, %v2867_v27  ;;  %v3174_v43 = vadd.f32 %v3173_v0, %v3159_v21  ;;  %v3130_v40 = vadd.f32 %v3129_v10, %v9098_v5 }
 0x26c   : > { %v2869_v48 = vadd.f32 %v9042_v26, %v2475_v29 }
 0x26d   : > { %v3175_v41 = vadd.f32 %v3174_v43, %v3160_v34  ;;  %v3131_v1 = vadd.f32 %v3130_v40, %v9108_v54  ;;  %v3162_v26 = vmul.f32 %v9115_v61, %v9115_v61 }
 0x26e   : > { %v9061_v39 = vpop.f32.mrf.mxu0  ;;  %v9131_v33 = vadd.f32 %v9048_v18, %v2869_v48  ;;  %v8001_v7 = vpop.eup %8000 }
 0x26f   : > { %v3132_v20 = vadd.f32 %v3131_v1, %v9115_v61  ;;  %vm3150_vm13 = vweird.f32 %v8001_v7 }
 0x270   : > { %v3164_v27 = vmul.f32 %v9131_v33, %v9131_v33 }
 0x271   : > { %v2454_v15 = vpop.f32.mrf.mxu2 }
 0x272   : > { %v2476_v37 = vadd.f32 %v2454_v15, %v2305_v14  ;;  %v3161_v15 = vmul.f32 %v9108_v54, %v9108_v54 }
 0x273   : > { %v2850_v52 = vpop.f32.mrf.mxu3 }
 0x274   : > { %v2870_v11 = vadd.f32 %v9057_v19, %v2476_v37  ;;  %v3176_v23 = vadd.f32 %v3175_v41, %v3161_v15  ;;  %v2290_v19 = vpop.f32.mrf.mxu1 }
 0x275   : > { %v2308_v14 = vadd.f32 %v2290_v19, %v2058_v13  ;;  %v7849_v13 = vld [vmem:[%s8273_s19 + $0x28] sm:$0xff] }
 0x276   : > { %v3100_v35 = vpop.f32.mrf.mxu0  ;;  %v9138_v44 = vadd.f32 %v9061_v39, %v2870_v11  ;;  %v3177_v18 = vadd.f32 %v3176_v23, %v3162_v26  ;;  %v7875_v23 = vld [vmem:[%s8273_s19 + $0xb8] sm:$0xff]  ;;  %4086 = vmatpush.bf16.msrb.mxu2 %v7849_v13 }
 0x277   : > { %4538 = vmatpush.bf16.msrb.mxu0 %v7875_v23 }
 0x278   : > { %v3178_v2 = vadd.f32 %v3177_v18, %v3163_v9  ;;  %v3165_v59 = vmul.f32 %v9138_v44, %v9138_v44  ;;  %v7874_v18 = vld [vmem:[%s8273_s19 + $0xb0] sm:$0xff] }
 0x279   : > { %v2456_v38 = vpop.f32.mrf.mxu2 }
 0x27a   : > { %v2477_v46 = vadd.f32 %v2456_v38, %v2306_v49  ;;  %v3179_v45 = vadd.f32 %v3178_v2, %v3164_v27  ;;  %v3146_v49 = vmul.f32 128.0, %v8001_v7  ;;  %v7873_v2 = vld [vmem:[%s8273_s19 + $0xa8] sm:$0xff] }
 0x27b   : > { %v2853_v62 = vpop.f32.mrf.mxu3  ;;  %4539 = vmatpush.bf16.msrb.mxu0 %v7874_v18 }
 0x27c   : > { %v2871_v6 = vadd.f32 %v2850_v52, %v2477_v46  ;;  %v3133_v52 = vadd.f32 %v3132_v20, %v9124_v50  ;;  %v3180_v3 = vadd.f32 %v3179_v45, %v3165_v59  ;;  %v3147_v8 = vsub.f32 1.0, %v3146_v49  ;;  %v7846_v59 = vld [vmem:[%s8273_s19 + $0x10] sm:$0xff]  ;;  %v7859_v45 = vld [vmem:[%s8273_s19 + $0x78] sm:$0xff]  ;;  %v7852_v49 = vld [vmem:[%s8273_s19 + $0x40] sm:$0xff] }
 0x27e   : > { %v3103_v53 = vpop.f32.mrf.mxu0  ;;  %v9143_v38 = vadd.f32 %v3100_v35, %v2871_v6  ;;  %v3134_v24 = vadd.f32 %v3133_v52, %v9131_v33  ;;  %v3148_v51 = vmul.f32 %v8001_v7, %v3147_v8  ;;  %v7861_v52 = vld [vmem:[%s8273_s19 + $0x88] sm:$0xff] }
 0x27f   : > { %4344 = vmatpush.bf16.msrb.mxu3 %v7861_v52  ;;  %4540 = vmatpush.bf16.msrb.mxu0 %v7873_v2 }
 0x280   : > { %v3135_v56 = vadd.f32 %v3134_v24, %v9138_v44  ;;  %v3166_v21 = vmul.f32 %v9143_v38, %v9143_v38  ;;  %v3149_v1 = vadd.f32 %v8001_v7, %v3148_v51  ;;  %v7860_v24 = vld [vmem:[%s8273_s19 + $0x80] sm:$0xff] }
 0x281   : > { %v2459_v12 = vpop.f32.mrf.mxu2 }
 0x282   : > { %v2478_v30 = vadd.f32 %v2459_v12, %v2307_v4  ;;  %v3136_v60 = vadd.f32 %v3135_v56, %v9143_v38  ;;  %v3181_v34 = vadd.f32 %v3180_v3, %v3166_v21  ;;  %v7853_v56 = vld [vmem:[%s8273_s19 + $0x48] sm:$0xff]  ;;  %v7858_v3 = vld [vmem:[%s8273_s19 + $0x70] sm:$0xff] }
 0x283   : > { %v2855_v35 = vpop.f32.mrf.mxu3  ;;  %4345 = vmatpush.bf16.msrb.mxu3 %v7860_v24  ;;  %v7845_v21 = vld [vmem:[%s8273_s19 + $0x8] sm:$0xff]  ;;  %3939 = vmatpush.bf16.msra.mxu1 %v7853_v56 }
 0x284   : > { %v2872_v58 = vadd.f32 %v2853_v62, %v2478_v30  ;;  %v9162_v30 = vsel %vm3150_vm13, %v8001_v7, %v3149_v1  ;;  %v7847_v7 = vld [vmem:[%s8273_s19 + $0x18] sm:$0xff] }
 0x286   : > { %v9148_v29 = vadd.f32 %v3103_v53, %v2872_v58  ;;  %v3105_v10 = vpop.f32.mrf.mxu0  ;;  %v7848_v58 = vld [vmem:[%s8273_s19 + $0x20] sm:$0xff] }
 0x287   : > { %4087 = vmatpush.bf16.msrb.mxu2 %v7848_v58  ;;  %4346 = vmatpush.bf16.msrb.mxu3 %v7859_v45  ;;  %v9229_v58 = vld [vmem:[#allocation3] sm:$0xf] }
 0x288   : > { %v3167_v37 = vmul.f32 %v9148_v29, %v9148_v29  ;;  %v3137_v42 = vadd.f32 %v3136_v60, %v9148_v29  ;;  %3940 = vmatpush.bf16.msra.mxu1 %v7852_v49  ;;  %v3617_v49 = vshll.u32 %v9229_v58, 16 }
 0x289   : > { %v2461_v39 = vpop.f32.mrf.mxu2 }
 0x28a   : > { %v2479_v17 = vadd.f32 %v2461_v39, %v2308_v14  ;;  %v3182_v48 = vadd.f32 %v3181_v34, %v3167_v37  ;;  %v7872_v39 = vld [vmem:[%s8273_s19 + $0xa0] sm:$0xff]  ;;  %v7857_v34 = vld [vmem:[%s8273_s19 + $0x68] sm:$0xff] }
 0x28b   : > { %4088 = vmatpush.bf16.msrb.mxu2 %v7847_v7  ;;  %4541 = vmatpush.bf16.msrb.mxu0 %v7872_v39  ;;  %v7844_v37 = vld [vmem:[%s8273_s19] sm:$0xff] }
 0x28c   : > { %v2873_v0 = vadd.f32 %v2855_v35, %v2479_v17  ;;  %v7871_v17 = vld [vmem:[%s8273_s19 + $0x98] sm:$0xff]  ;;  %4347 = vmatpush.bf16.msrb.mxu3 %v7858_v3  ;;  %v7881_v3 = vld [vmem:[%s8273_s19 + $0xe8] sm:$0xff] }
 0x28e   : > { %v9157_v32 = vadd.f32 %v3105_v10, %v2873_v0  ;;  %v7870_v0 = vld [vmem:[%s8273_s19 + $0x90] sm:$0xff] }
 0x28f   : > { %4089 = vmatpush.bf16.msrb.mxu2 %v7846_v59  ;;  %4542 = vmatpush.bf16.msrb.mxu0 %v7871_v17 }
 0x290   : > { %v3138_v46 = vadd.f32 %v3137_v42, %v9157_v32  ;;  %v3168_v43 = vmul.f32 %v9157_v32, %v9157_v32  ;;  %v7851_v42 = vld [vmem:[%s8273_s19 + $0x38] sm:$0xff]  ;;  %4348 = vmatpush.bf16.msrb.mxu3 %v7857_v34 }
 0x291   : > { %3941 = vmatpush.bf16.msra.mxu1 %v7851_v42 }
 0x292   : > { %v3139_v40 = vrot.slane %v3138_v46, 4  ;;  %v3183_v15 = vadd.f32 %v3182_v48, %v3168_v43 }
 0x293   : > { %4090 = vmatpush.bf16.msrb.mxu2 %v7845_v21  ;;  %4543 = vmatpush.bf16.msrb.mxu0 %v7870_v0 }
 0x294   : > { %v3140_v4 = vadd.f32 %v3139_v40, %v3138_v46  ;;  %v3184_v25 = vrot.slane %v3183_v15, 4  ;;  %v7850_v46 = vld [vmem:[%s8273_s19 + $0x30] sm:$0xff] }
 0x295   : > { %3942 = vmatpush.bf16.msra.mxu1 %v7850_v46 }
 0x296   : > { %v3141_v11 = vrot.slane %v3140_v4, 2  ;;  %v3185_v41 = vadd.f32 %v3184_v25, %v3183_v15  ;;  %v9194_v15 = vld [vmem:[%s8284_s12] ss:$0 sm:$0xff] }
 0x297   : > { %4091 = vmatpush.bf16.msrb.mxu2 %v7844_v37  ;;  %v7856_v25 = vld [vmem:[%s8273_s19 + $0x60] sm:$0xff] }
 0x298   : > { %v3142_v26 = vadd.f32 %v3141_v11, %v3140_v4  ;;  %v3186_v12 = vrot.slane %v3185_v41, 2  ;;  %4349 = vmatpush.bf16.msrb.mxu3 %v7856_v25 }
 0x299   : > { %4956 = vmatpush.bf16.msrb.mxu1 %v7881_v3  ;;  %v3597_v3 = vld [vmem:[#allocation3 + $0x4] sm:$0x1] }
 0x29a   : > { %v3143_v62 = vrot.slane %v3142_v26, 1  ;;  %v3187_v6 = vadd.f32 %v3186_v12, %v3185_v41  ;;  %v9211_v12 = vld [vmem:[%s8289_s21] ss:$0 sm:$0xff] }
 0x29c   : > { %v3144_v22 = vadd.f32 %v3143_v62, %v3142_v26  ;;  %v3188_v47 = vrot.slane %v3187_v6, 1 }
 0x29e   : > { %v9167_v53 = vmul.f32 %v9162_v30, %v3144_v22  ;;  %v3189_v19 = vadd.f32 %v3188_v47, %v3187_v6 }
 0x2a0   : > { %v3190_v20 = vmul.f32 %v3189_v19, %v9162_v30  ;;  %v3191_v9 = vmul.f32 %v9167_v53, %v9167_v53  ;;  %v3208_v40 = vsub.f32 %v9157_v32, %v9167_v53  ;;  %v3193_v51 = vsub.f32 %v9012_v16, %v9167_v53 }
 0x2a1   : > { %v3194_v4 = vsub.f32 %v9054_v63, %v9167_v53  ;;  %v3195_v41 = vsub.f32 %v9015_v31, %v9167_v53  ;;  %v3196_v1 = vsub.f32 %v9068_v36, %v9167_v53  ;;  %v3197_v32 = vsub.f32 %v9018_v57, %v9167_v53 }
 0x2a2   : > { %v3192_v27 = vsub.f32 %v3190_v20, %v3191_v9  ;;  %v3198_v36 = vsub.f32 %v9083_v55, %v9167_v53 }
 0x2a4   : > { %v3209_v14 = vadd.f32 1e-05, %v3192_v27 }
 0x2a6   : > { %8002 = vrsqrt.f32 %v3209_v14  ;;  %vm3216_vm15 = vweird.f32 %v3209_v14 }
 0x2ac   : > { %v8003_v35 = vpop.eup %8002 }
 0x2ad   : > { %v3211_v60 = vmul.f32 %v8003_v35, %v3209_v14  ;;  %vm3217_vm14 = vweird.f32 %v8003_v35 }
 0x2ae   : > { %vm3218_vm0 = vmor %vm3216_vm15, %vm3217_vm14 }
 0x2af   : > { %v3212_v10 = vmul.f32 %v8003_v35, %v3211_v60 }
 0x2b1   : > { %v3213_v8 = vmul.f32 0.5, %v3212_v10 }
 0x2b3   : > { %v3214_v48 = vsub.f32 1.5, %v3213_v8 }
 0x2b5   : > { %v3215_v43 = vmul.f32 %v8003_v35, %v3214_v48  ;;  %v3563_v48 = vld [vmem:[#allocation3 + $0x90] sm:$0xf] }
 0x2b7   : > { %v9201_v11 = vsel %vm3218_vm0, %v8003_v35, %v3215_v43  ;;  %v3614_v35 = vshrl.u32 %v9229_v58, 16 }
 0x2b8   : > { %v3235_v26 = vmul.f32 %v9201_v11, %v3208_v40  ;;  %v3220_v16 = vmul.f32 %v9201_v11, %v3193_v51  ;;  %v3221_v63 = vmul.f32 %v9201_v11, %v3194_v4  ;;  %v3222_v62 = vmul.f32 %v9201_v11, %v3195_v41  ;;  %v3566_v41 = vld [vmem:[#allocation3 + $0x94] sm:$0x1] }
 0x2b9   : > { %v3223_v31 = vmul.f32 %v9201_v11, %v3196_v1  ;;  %v3224_v47 = vmul.f32 %v9201_v11, %v3197_v32  ;;  %v3225_v27 = vmul.f32 %v9201_v11, %v3198_v36 }
 0x2ba   : > { %v3254_v6 = vmul.f32 %v9194_v15, %v3235_v26  ;;  %v3239_v57 = vmul.f32 %v9194_v15, %v3220_v16  ;;  %v3240_v22 = vmul.f32 %v9194_v15, %v3221_v63  ;;  %v3241_v13 = vmul.f32 %v9194_v15, %v3222_v62  ;;  %v3470_v63 = vld [vmem:[#allocation3 + $0x8] sm:$0xf] }
 0x2bb   : > { %v3242_v23 = vmul.f32 %v9194_v15, %v3223_v31  ;;  %v3243_v9 = vmul.f32 %v9194_v15, %v3224_v47  ;;  %v3244_v45 = vmul.f32 %v9194_v15, %v3225_v27 }
 0x2bc   : > { %v3273_v19 = vadd.f32 %v9211_v12, %v3254_v6  ;;  %v3258_v20 = vadd.f32 %v9211_v12, %v3239_v57  ;;  %v3259_v55 = vadd.f32 %v9211_v12, %v3240_v22  ;;  %v3260_v18 = vadd.f32 %v9211_v12, %v3241_v13 }
 0x2bd   : > { %v3261_v52 = vadd.f32 %v9211_v12, %v3242_v23  ;;  %v3262_v24 = vadd.f32 %v9211_v12, %v3243_v9  ;;  %v3263_v8 = vadd.f32 %v9211_v12, %v3244_v45  ;;  %v3479_v23 = vld [vmem:[#allocation3 + $0x10] sm:$0xf]  ;;  %v3619_v45 = vrot.slane %v3617_v49, 5 }
 0x2be   : > { %v3289_v14 = vmax.f32 %v3273_v19, 0.0  ;;  %v3274_v7 = vmax.f32 %v3258_v20, 0.0  ;;  %v3275_v2 = vmax.f32 %v3259_v55, 0.0  ;;  %v3276_v59 = vmax.f32 %v3260_v18, 0.0  ;;  %v3476_v20 = vld [vmem:[#allocation3 + $0xc] sm:$0x1] }
 0x2bf   : > { %v3277_v39 = vmax.f32 %v3261_v52, 0.0  ;;  %v3278_v0 = vmax.f32 %v3262_v24, 0.0  ;;  %v3279_v58 = vmax.f32 %v3263_v8, 0.0  ;;  %v3199_v24 = vsub.f32 %v9090_v28, %v9167_v53 }
 0x2c0   : > { %v3305_v56 = vpack.c.bf16 %v3289_v14, %v3289_v14  ;;  %v3290_v21 = vpack.c.bf16 %v3274_v7, %v3274_v7  ;;  %v3291_v17 = vpack.c.bf16 %v3275_v2, %v3275_v2  ;;  %v3292_v60 = vpack.c.bf16 %v3276_v59, %v3276_v59  ;;  %v3485_v14 = vld [vmem:[#allocation3 + $0x18] sm:$0xf]  ;;  %v3491_v7 = vld [vmem:[#allocation3 + $0x20] sm:$0xf]  ;;  %v3482_v2 = vld [vmem:[#allocation3 + $0x14] sm:$0x1] }
 0x2c1   : > { %v3293_v37 = vpack.c.bf16 %v3277_v39, %v3277_v39  ;;  %v9252_v6 = vpack.c.bf16 %v3278_v0, %v3278_v0  ;;  %v3616_v39 = vrot.slane %v3614_v35, 4  ;;  %v4133_v0 = vld [vmem:[#allocation3] sm:$0xe]  ;;  %v3226_v35 = vmul.f32 %v9201_v11, %v3199_v24 }
 0x2c2   : > { %v3427_v10 = vshrl.u32 %v3305_v56, 16  ;;  %v3430_v34 = vshll.u32 %v3305_v56, 16  ;;  %v3307_v42 = vshrl.u32 %v3290_v21, 16  ;;  %v3310_v46 = vshll.u32 %v3290_v21, 16  ;;  %v3488_v21 = vld [vmem:[#allocation3 + $0x1c] sm:$0x1] }
 0x2c3   : > { %v3315_v43 = vshrl.u32 %v3291_v17, 16  ;;  %v3318_v40 = vshll.u32 %v3291_v17, 16  ;;  %v3323_v51 = vshrl.u32 %v3292_v60, 16  ;;  %v3326_v32 = vshll.u32 %v3292_v60, 16 }
 0x2c4   : > { %v3429_v4 = vrot.slane %v3427_v10, 7  ;;  %v3309_v1 = vrot.slane %v3307_v42, 7  ;;  %v3331_v26 = vshrl.u32 %v3293_v37, 16  ;;  %v3334_v36 = vshll.u32 %v3293_v37, 16 }
 0x2c5   : > { %v3317_v62 = vrot.slane %v3315_v43, 7  ;;  %v3325_v31 = vrot.slane %v3323_v51, 7  ;;  %v3339_v10 = vshrl.u32 %v9252_v6, 16  ;;  %v3620_v42 = vor.u32 %v3619_v45, %v3616_v39  ;;  %v3503_v45 = vld [vmem:[#allocation3 + $0x30] sm:$0xf] }
 0x2c6   : > { %v3432_v57 = vor.u32 %v3430_v34, %v3429_v4  ;;  %v3433_v22 = vrot.slane %v3429_v4, 4  ;;  %v3312_v47 = vor.u32 %v3310_v46, %v3309_v1  ;;  %v3313_v13 = vrot.slane %v3309_v1, 4  ;;  %v7267_v1 = vld [vmem:[#allocation3] sm:$0xf] }
 0x2c7   : > { %v3320_v19 = vor.u32 %v3318_v40, %v3317_v62  ;;  %v3328_v55 = vor.u32 %v3326_v32, %v3325_v31  ;;  %v9254_v9 = vrot.slane %v3331_v26, 7  ;;  %v3329_v60 = vrot.slane %v3325_v31, 4 }
 0x2c8   : > { %v3564_v18 = vsel %vm9242_vm5, %v3432_v57, %v3563_v48  ;;  %v3567_v52 = vsel %vm9248_vm6, %v3433_v22, %v3566_v41  ;;  %v3471_v27 = vsel %vm9242_vm5, %v3312_v47, %v3470_v63  ;;  %v3477_v17 = vsel %vm9248_vm6, %v3313_v13, %v3476_v20 }
 0x2c9   : > { %3565 = vst [vmem:[#allocation3 + $0x90] sm:$0xf] %v3564_v18  ;;  %v3480_v59 = vsel %vm9242_vm5, %v3320_v19, %v3479_v23  ;;  %v3336_v56 = vor.u32 %v3334_v36, %v9254_v9  ;;  %v3321_v37 = vrot.slane %v3317_v62, 4  ;;  %v3486_v28 = vsel %vm9242_vm5, %v3328_v55, %v3485_v14 }
 0x2ca   : > { %3568 = vst [vmem:[#allocation3 + $0x94] sm:$0x1] %v3567_v52  ;;  %v3295_v34 = vpack.c.bf16 %v3279_v58, %v3279_v58  ;;  %v3623_v8 = vshll.u32 %v3597_v3, 16  ;;  %v7329_v43 = vrot.slane %v4133_v0, 9  ;;  %v4183_v40 = vrot.slane %v3597_v3, 5 }
 0x2cb   : > { %3472 = vst [vmem:[#allocation3 + $0x8] sm:$0xf] %v3471_v27  ;;  %v3492_v49 = vsel %vm9242_vm5, %v3336_v56, %v3491_v7  ;;  %v3483_v48 = vsel %vm9248_vm6, %v3321_v37, %v3482_v2  ;;  %v3489_v51 = vsel %vm9248_vm6, %v3329_v60, %v3488_v21  ;;  %v9279_v4 = vrot.slane %v3339_v10, 7  ;;  %v3497_v2 = vld [vmem:[#allocation3 + $0x28] sm:$0xf] }
 0x2cc   : > { %3481 = vst [vmem:[#allocation3 + $0x10] sm:$0xf] %v3480_v59  ;;  %v3347_v46 = vshrl.u32 %v3295_v34, 16  ;;  %v3245_v41 = vmul.f32 %v9194_v15, %v3226_v35  ;;  %v3621_v26 = vrot.slane %v3620_v42, 4  ;;  %v3625_v63 = vrot.slane %v3623_v8, 5 }
 0x2cd   : > { %3478 = vst [vmem:[#allocation3 + $0xc] sm:$0x1] %v3477_v17  ;;  %v3342_v62 = vshll.u32 %v9252_v6, 16  ;;  %v3350_v31 = vshll.u32 %v3295_v34, 16  ;;  %v4184_v13 = vsel %vm8620_vm12, %v7329_v43, %v4183_v40  ;;  %v3200_v23 = vsub.f32 %v9098_v5, %v9167_v53  ;;  %v3494_v37 = vld [vmem:[#allocation3 + $0x24] sm:$0x1] }
 0x2ce   : > { %3487 = vst [vmem:[#allocation3 + $0x18] sm:$0xf] %v3486_v28  ;;  %v9282_v32 = vrot.slane %v3347_v46, 7  ;;  %v3264_v52 = vadd.f32 %v9211_v12, %v3245_v41  ;;  %v3337_v5 = vrot.slane %v9254_v9, 4  ;;  %v3201_v56 = vsub.f32 %v9108_v54, %v9167_v53  ;;  %v3500_v34 = vld [vmem:[#allocation3 + $0x2c] sm:$0x1] }
 0x2cf   : > { %3493 = vst [vmem:[#allocation3 + $0x20] sm:$0xf] %v3492_v49  ;;  %v3344_v18 = vor.u32 %v3342_v62, %v9279_v4  ;;  %v4258_v21 = vunpack.c.l.b16 %v4184_v13  ;;  %v3345_v60 = vrot.slane %v9279_v4, 4  ;;  %v3626_v10 = vsel %vm8526_vm8, %v3621_v26, %v3625_v63 }
 0x2d0   : > { %3484 = vst [vmem:[#allocation3 + $0x14] sm:$0x1] %v3483_v48  ;;  %v3352_v24 = vor.u32 %v3350_v31, %v9282_v32  ;;  %v3280_v35 = vmax.f32 %v3264_v52, 0.0  ;;  %v3202_v26 = vsub.f32 %v9115_v61, %v9167_v53 }
 0x2d1   : > { %3490 = vst [vmem:[#allocation3 + $0x1c] sm:$0x1] %v3489_v51  ;;  %v3498_v9 = vsel %vm9242_vm5, %v3344_v18, %v3497_v2  ;;  %v3228_v18 = vmul.f32 %v9201_v11, %v3201_v56  ;;  %v3353_v56 = vrot.slane %v9282_v32, 4 }
 0x2d2   : > { %v7836_v36 = vld [vmem:[#allocation3 + $0x4] sm:$0xf0]  ;;  %v3504_v48 = vsel %vm9242_vm5, %v3352_v24, %v3503_v45  ;;  %3499 = vst [vmem:[#allocation3 + $0x28] sm:$0xf] %v3498_v9 }
 0x2d3   : > { %v7403_v57 = vld [vmem:[#allocation3 + $0x8] sm:$0xf]  ;;  %v7268_v19 = vor.u32 %v7836_v36, %v7267_v1  ;;  %v7862_v20 = vld [vmem:[#allocation3 + $0xc] sm:$0xf0]  ;;  %v3495_v1 = vsel %vm9248_vm6, %v3337_v5, %v3494_v37  ;;  %3505 = vst [vmem:[#allocation3 + $0x30] sm:$0xf] %v3504_v48 }
 0x2d4   : > { %v4134_v22 = vld [vmem:[#allocation3 + $0x8] sm:$0xe]  ;;  %v7404_v27 = vor.u32 %v7862_v20, %v7403_v57  ;;  %v3598_v6 = vld [vmem:[#allocation3 + $0xc] sm:$0x1]  ;;  %v3571_v8 = vld [vmem:[#allocation3 + $0x10] sm:$0xf]  ;;  %v3501_v57 = vsel %vm9248_vm6, %v3345_v60, %v3500_v34 }
 0x2d5   : > { %v7330_v55 = vrot.slane %v4134_v22, 9  ;;  %v3570_v58 = vld [vmem:[#allocation3 + $0x8] sm:$0xf]  ;;  %7321 = vmatmul.msk.bf16.vlgmr.msrb.gmra.mxu2 %vm3910_vm7, %v7268_v19  ;;  %v4187_v59 = vrot.slane %v3598_v6, 5  ;;  %v3637_v39 = vshll.u32 %v3598_v6, 16  ;;  %v3642_v4 = vshrl.u32 %v3571_v8, 16 }
 0x2d6   : > { %v3628_v14 = vshrl.u32 %v3570_v58, 16  ;;  %v3631_v7 = vshll.u32 %v3570_v58, 16  ;;  %7457 = vmatmul.msk.bf16.vlgmr.msrb.gmra.mxu0 %vm3910_vm7, %v7404_v27  ;;  %v4135_v43 = vld [vmem:[#allocation3 + $0x10] sm:$0xe]  ;;  %v4136_v40 = vld [vmem:[#allocation3 + $0x18] sm:$0xe]  ;;  %v3850_v22 = vunpack.c.l.b16 %v3626_v10  ;;  %v3296_v58 = vpack.c.bf16 %v3280_v35, %v3280_v35 }
 0x2d7   : > { %v4188_v0 = vsel %vm8620_vm12, %v7330_v55, %v4187_v59  ;;  %v3639_v42 = vrot.slane %v3637_v39, 5  ;;  %v9306_v46 = vld [vmem:[#allocation3 + $0x14] sm:$0x1]  ;;  %v3572_v51 = vld [vmem:[#allocation3 + $0x18] sm:$0xf]  ;;  %v3645_v41 = vshll.u32 %v3571_v8, 16  ;;  %v3227_v55 = vmul.f32 %v9201_v11, %v3200_v23 }
 0x2d8   : > { %v3630_v17 = vrot.slane %v3628_v14, 4  ;;  %v3633_v3 = vrot.slane %v3631_v7, 5  ;;  %v4259_v54 = vunpack.c.l.b16 %v4188_v0  ;;  %v9312_v31 = vld [vmem:[#allocation3 + $0x1c] sm:$0x1]  ;;  %v3656_v36 = vshrl.u32 %v3572_v51, 16  ;;  %v7880_v20 = vld [vmem:[%s8273_s19 + $0xe0] sm:$0xff] }
 0x2d9   : > { %v3644_v13 = vrot.slane %v3642_v4, 4  ;;  %v3647_v19 = vrot.slane %v3645_v41, 5  ;;  %3496 = vst [vmem:[#allocation3 + $0x24] sm:$0x1] %v3495_v1  ;;  %v3659_v6 = vshll.u32 %v3572_v51, 16  ;;  %4957 = vmatpush.bf16.msrb.mxu1 %v7880_v20  ;;  %v3229_v14 = vmul.f32 %v9201_v11, %v3202_v26 }
 0x2da   : > { %v3634_v49 = vor.u32 %v3633_v3, %v3630_v17  ;;  %v4274_v63 = vpack.c.b16 %v4259_v54, %v4258_v21  ;;  %v3658_v27 = vrot.slane %v3656_v36, 4  ;;  %3502 = vst [vmem:[#allocation3 + $0x2c] sm:$0x1] %v3501_v57  ;;  %v7331_v7 = vrot.slane %v4135_v43, 9  ;;  %v7271_v39 = vld [vmem:[#allocation3 + $0x10] sm:$0xf] }
 0x2db   : > { %v4191_v2 = vrot.slane %v9306_v46, 5  ;;  %v7332_v23 = vrot.slane %v4136_v40, 9  ;;  %v4195_v24 = vrot.slane %v9312_v31, 5  ;;  %v7837_v5 = vld [vmem:[#allocation3 + $0x14] sm:$0xf0]  ;;  %v3648_v45 = vor.u32 %v3647_v19, %v3644_v13 }
 0x2dc   : > { %v3635_v62 = vrot.slane %v3634_v49, 4  ;;  %7381 = vmatmul.msk.bf16.vlgmr.msrb.gmra.mxu3 %vm3910_vm7, %v4274_v63  ;;  %v3661_v21 = vrot.slane %v3659_v6, 5  ;;  %v3573_v17 = vld [vmem:[#allocation3 + $0x20] sm:$0xf]  ;;  %v3355_v3 = vshrl.u32 %v3296_v58, 16  ;;  %v3246_v60 = vmul.f32 %v9194_v15, %v3227_v55 }
 0x2dd   : > { %v3506_v37 = vld [vmem:[#allocation3 + $0x34] sm:$0x1]  ;;  %v3203_v0 = vsub.f32 %v9124_v50, %v9167_v53  ;;  %v7407_v10 = vld [vmem:[#allocation3 + $0x18] sm:$0xf]  ;;  %v7863_v9 = vld [vmem:[#allocation3 + $0x1c] sm:$0xf0]  ;;  %v3247_v54 = vmul.f32 %v9194_v15, %v3228_v18  ;;  %v3248_v49 = vmul.f32 %v9194_v15, %v3229_v14  ;;  %v7272_v32 = vor.u32 %v7837_v5, %v7271_v39 }
 0x2de   : > { %v3640_v61 = vsel %vm8526_vm8, %v3635_v62, %v3639_v42  ;;  %v3651_v34 = vshll.u32 %v9306_v46, 16  ;;  %v3662_v35 = vor.u32 %v3661_v21, %v3658_v27  ;;  %v4192_v42 = vsel %vm8620_vm12, %v7331_v7, %v4191_v2  ;;  %v3574_v43 = vld [vmem:[#allocation3 + $0x28] sm:$0xf]  ;;  %v3512_v6 = vld [vmem:[#allocation3 + $0x3c] sm:$0x1] }
 0x2df   : > { %v3851_v52 = vunpack.c.l.b16 %v3640_v61  ;;  %v4196_v8 = vsel %vm8620_vm12, %v7332_v23, %v4195_v24  ;;  %v3665_v50 = vshll.u32 %v9312_v31, 16  ;;  %v3649_v48 = vrot.slane %v3648_v45, 4  ;;  %v4137_v2 = vld [vmem:[#allocation3 + $0x20] sm:$0xe] }
 0x2e0   : > { %v3670_v40 = vshrl.u32 %v3573_v17, 16  ;;  %v3673_v51 = vshll.u32 %v3573_v17, 16  ;;  %v3507_v46 = vsel %vm9248_vm6, %v3353_v56, %v3506_v37  ;;  %v7408_v4 = vor.u32 %v7863_v9, %v7407_v10  ;;  %v3601_v7 = vld [vmem:[#allocation3 + $0x24] sm:$0x1] }
 0x2e1   : > { %v3866_v59 = vpack.c.b16 %v3851_v52, %v3850_v22  ;;  %v3663_v41 = vrot.slane %v3662_v35, 4  ;;  %v3357_v1 = vrot.slane %v3355_v3, 7  ;;  %v3265_v26 = vadd.f32 %v9211_v12, %v3246_v60  ;;  %v3509_v22 = vld [vmem:[#allocation3 + $0x38] sm:$0xf]  ;;  %3508 = vst [vmem:[#allocation3 + $0x34] sm:$0x1] %v3507_v46 }
 0x2e2   : > { %v4260_v63 = vunpack.c.l.b16 %v4192_v42  ;;  %v4261_v62 = vunpack.c.l.b16 %v4196_v8  ;;  %v3653_v36 = vrot.slane %v3651_v34, 5  ;;  %v3358_v57 = vshll.u32 %v3296_v58, 16  ;;  %v3602_v17 = vld [vmem:[#allocation3 + $0x2c] sm:$0x1]  ;;  %v4138_v3 = vld [vmem:[#allocation3 + $0x28] sm:$0xe] }
 0x2e3   : > { %7257 = vmatmul.msk.bf16.vlgmr.msra.gmra.mxu1 %vm3910_vm7, %v3866_v59  ;;  %v3667_v31 = vrot.slane %v3665_v50, 5  ;;  %v3684_v13 = vshrl.u32 %v3574_v43, 16  ;;  %v3687_v19 = vshll.u32 %v3574_v43, 16  ;;  %v3266_v20 = vadd.f32 %v9211_v12, %v3247_v54  ;;  %v7879_v34 = vld [vmem:[%s8273_s19 + $0xd8] sm:$0xff]  ;;  %v7275_v8 = vld [vmem:[#allocation3 + $0x20] sm:$0xf] }
 0x2e4   : > { %v3654_v55 = vsel %vm8526_vm8, %v3649_v48, %v3653_v36  ;;  %v3672_v61 = vrot.slane %v3670_v40, 4  ;;  %v3675_v18 = vrot.slane %v3673_v51, 5  ;;  %v3360_v52 = vor.u32 %v3358_v57, %v3357_v1  ;;  %v7838_v50 = vld [vmem:[#allocation3 + $0x24] sm:$0xf0]  ;;  %4958 = vmatpush.bf16.msrb.mxu1 %v7879_v34 }
 0x2e5   : > { %7322 = vmatmul.msk.bf16.gmra.mxu2 %vm3910_vm7, %v7272_v32  ;;  %v3668_v27 = vsel %vm8526_vm8, %v3663_v41, %v3667_v31  ;;  %v3230_v58 = vmul.f32 %v9201_v11, %v3203_v0  ;;  %v4275_v14 = vpack.c.b16 %v4261_v62, %v4260_v63  ;;  %v3361_v23 = vrot.slane %v3357_v1, 4  ;;  %v3575_v1 = vld [vmem:[#allocation3 + $0x30] sm:$0xf] }
 0x2e6   : > { %7458 = vmatmul.msk.bf16.gmra.mxu0 %vm3910_vm7, %v7408_v4  ;;  %v3510_v24 = vsel %vm9242_vm5, %v3360_v52, %v3509_v22  ;;  %v3267_v59 = vadd.f32 %v9211_v12, %v3248_v49  ;;  %v3852_v39 = vunpack.c.l.b16 %v3654_v55  ;;  %v3686_v5 = vrot.slane %v3684_v13, 4  ;;  %v7411_v4 = vld [vmem:[#allocation3 + $0x28] sm:$0xf]  ;;  %v7864_v62 = vld [vmem:[#allocation3 + $0x2c] sm:$0xf0] }
 0x2e7   : > { %v3689_v45 = vrot.slane %v3687_v19, 5  ;;  %3511 = vst [vmem:[#allocation3 + $0x38] sm:$0xf] %v3510_v24  ;;  %v3281_v21 = vmax.f32 %v3265_v26, 0.0  ;;  %v3853_v56 = vunpack.c.l.b16 %v3668_v27  ;;  %v3676_v60 = vor.u32 %v3675_v18, %v3672_v61 }
 0x2e8   : > { %v3513_v37 = vsel %vm9248_vm6, %v3361_v23, %v3512_v6  ;;  %v3282_v0 = vmax.f32 %v3266_v20, 0.0  ;;  %v7333_v10 = vrot.slane %v4137_v2, 9  ;;  %v3249_v35 = vmul.f32 %v9194_v15, %v3230_v58  ;;  %v3515_v20 = vld [vmem:[#allocation3 + $0x40] sm:$0xf]  ;;  %v4139_v23 = vld [vmem:[#allocation3 + $0x30] sm:$0xe] }
 0x2e9   : > { %v3297_v9 = vpack.c.bf16 %v3281_v21, %v3281_v21  ;;  %3514 = vst [vmem:[#allocation3 + $0x3c] sm:$0x1] %v3513_v37  ;;  %v4199_v54 = vrot.slane %v3601_v7, 5  ;;  %v3679_v49 = vshll.u32 %v3601_v7, 16  ;;  %v3283_v42 = vmax.f32 %v3267_v59, 0.0 }
 0x2ea   : > { %v3298_v32 = vpack.c.bf16 %v3282_v0, %v3282_v0  ;;  %v7334_v48 = vrot.slane %v4138_v3, 9  ;;  %v4203_v43 = vrot.slane %v3602_v17, 5  ;;  %v3690_v40 = vor.u32 %v3689_v45, %v3686_v5  ;;  %v3603_v37 = vld [vmem:[#allocation3 + $0x34] sm:$0x1] }
 0x2eb   : > { %v3363_v51 = vshrl.u32 %v3297_v9, 16  ;;  %v3867_v46 = vpack.c.b16 %v3853_v56, %v3852_v39  ;;  %v3677_v41 = vrot.slane %v3676_v60, 4  ;;  %v3204_v26 = vsub.f32 %v9131_v33, %v9167_v53  ;;  %v3521_v39 = vld [vmem:[#allocation3 + $0x58] sm:$0xf] }
 0x2ec   : > { %7382 = vmatmul.msk.bf16.gmra.mxu3 %vm3910_vm7, %v4275_v14  ;;  %v3205_v63 = vsub.f32 %v9138_v44, %v9167_v53  ;;  %v3693_v36 = vshll.u32 %v3602_v17, 16  ;;  %v3366_v22 = vshll.u32 %v3297_v9, 16  ;;  %v3371_v31 = vshrl.u32 %v3298_v32, 16  ;;  %v3524_v9 = vld [vmem:[#allocation3 + $0x5c] sm:$0x1] }
 0x2ed   : > { %v9361_v57 = vrot.slane %v3363_v51, 7  ;;  %v4200_v13 = vsel %vm8620_vm12, %v7333_v10, %v4199_v54  ;;  %v3681_v19 = vrot.slane %v3679_v49, 5  ;;  %v3299_v55 = vpack.c.bf16 %v3283_v42, %v3283_v42 }
 0x2ee   : > { %v3231_v61 = vmul.f32 %v9201_v11, %v3204_v26  ;;  %v4204_v33 = vsel %vm8620_vm12, %v7334_v48, %v4203_v43  ;;  %v3691_v44 = vrot.slane %v3690_v40, 4  ;;  %v3698_v52 = vshrl.u32 %v3575_v1, 16  ;;  %v3576_v21 = vld [vmem:[#allocation3 + $0x38] sm:$0xf]  ;;  %v3530_v43 = vld [vmem:[#allocation3 + $0x64] sm:$0x1] }
 0x2ef   : > { %v3368_v18 = vor.u32 %v3366_v22, %v9361_v57  ;;  %v7276_v27 = vor.u32 %v7838_v50, %v7275_v8  ;;  %v7412_v6 = vor.u32 %v7864_v62, %v7411_v4  ;;  %v3682_v58 = vsel %vm8526_vm8, %v3677_v41, %v3681_v19  ;;  %v4140_v62 = vld [vmem:[#allocation3 + $0x38] sm:$0xe] }
 0x2f0   : > { %v3701_v14 = vshll.u32 %v3575_v1, 16  ;;  %v3695_v7 = vrot.slane %v3693_v36, 5  ;;  %v3373_v24 = vrot.slane %v3371_v31, 7  ;;  %v3374_v59 = vshll.u32 %v3298_v32, 16  ;;  %v3527_v32 = vld [vmem:[#allocation3 + $0x60] sm:$0xf] }
 0x2f1   : > { %v3516_v2 = vsel %vm9242_vm5, %v3368_v18, %v3515_v20  ;;  %v4262_v5 = vunpack.c.l.b16 %v4200_v13  ;;  %v4263_v45 = vunpack.c.l.b16 %v4204_v33  ;;  %v3379_v56 = vshrl.u32 %v3299_v55, 16  ;;  %v3604_v26 = vld [vmem:[#allocation3 + $0x3c] sm:$0x1] }
 0x2f2   : > { %3517 = vst [vmem:[#allocation3 + $0x40] sm:$0xf] %v3516_v2  ;;  %v3268_v17 = vadd.f32 %v9211_v12, %v3249_v35  ;;  %v3696_v3 = vsel %vm8526_vm8, %v3691_v44, %v3695_v7  ;;  %v3854_v60 = vunpack.c.l.b16 %v3682_v58  ;;  %v3700_v0 = vrot.slane %v3698_v52, 4  ;;  %v7839_v7 = vld [vmem:[#allocation3 + $0x34] sm:$0xf0] }
 0x2f3   : > { %7258 = vmatmul.msk.bf16.gmra.mxu1 %vm3910_vm7, %v3867_v46  ;;  %v3376_v10 = vor.u32 %v3374_v59, %v3373_v24  ;;  %v3703_v34 = vrot.slane %v3701_v14, 5  ;;  %v3377_v54 = vrot.slane %v3373_v24, 4  ;;  %v3381_v49 = vrot.slane %v3379_v56, 7  ;;  %v7279_v14 = vld [vmem:[#allocation3 + $0x30] sm:$0xf] }
 0x2f4   : > { %v3250_v42 = vmul.f32 %v9194_v15, %v3231_v61  ;;  %v3712_v8 = vshrl.u32 %v3576_v21, 16  ;;  %v3715_v50 = vshll.u32 %v3576_v21, 16  ;;  %v3382_v48 = vshll.u32 %v3299_v55, 16  ;;  %v7415_v21 = vld [vmem:[#allocation3 + $0x38] sm:$0xf] }
 0x2f5   : > { %7323 = vmatmul.msk.bf16.gmra.mxu2 %vm3910_vm7, %v7276_v27  ;;  %v3522_v35 = vsel %vm9242_vm5, %v3376_v10, %v3521_v39  ;;  %v7335_v40 = vrot.slane %v4139_v23, 9  ;;  %v4207_v51 = vrot.slane %v3603_v37, 5  ;;  %v3385_v46 = vrot.slane %v3381_v49, 4 }
 0x2f6   : > { %7459 = vmatmul.msk.bf16.gmra.mxu0 %vm3910_vm7, %v7412_v6  ;;  %3523 = vst [vmem:[#allocation3 + $0x58] sm:$0xf] %v3522_v35  ;;  %v3525_v4 = vsel %vm9248_vm6, %v3377_v54, %v3524_v9  ;;  %v4276_v41 = vpack.c.b16 %v4263_v45, %v4262_v5  ;;  %v3855_v1 = vunpack.c.l.b16 %v3696_v3  ;;  %v3384_v36 = vor.u32 %v3382_v48, %v3381_v49  ;;  %v3577_v9 = vld [vmem:[#allocation3 + $0x50] sm:$0xf] }
 0x2f7   : > { %3526 = vst [vmem:[#allocation3 + $0x5c] sm:$0x1] %v3525_v4  ;;  %v3232_v22 = vmul.f32 %v9201_v11, %v3205_v63  ;;  %v3704_v31 = vor.u32 %v3703_v34, %v3700_v0  ;;  %v3284_v13 = vmax.f32 %v3268_v17, 0.0  ;;  %v3269_v19 = vadd.f32 %v9211_v12, %v3250_v42  ;;  %v3533_v42 = vld [vmem:[#allocation3 + $0x68] sm:$0xf] }
 0x2f8   : > { %v3531_v20 = vsel %vm9248_vm6, %v3385_v46, %v3530_v43  ;;  %v3707_v55 = vshll.u32 %v3603_v37, 16  ;;  %v3714_v61 = vrot.slane %v3712_v8, 4  ;;  %v3717_v33 = vrot.slane %v3715_v50, 5 }
 0x2f9   : > { %v3528_v44 = vsel %vm9242_vm5, %v3384_v36, %v3527_v32  ;;  %3532 = vst [vmem:[#allocation3 + $0x64] sm:$0x1] %v3531_v20  ;;  %v7336_v18 = vrot.slane %v4140_v62, 9  ;;  %v4211_v52 = vrot.slane %v3604_v26, 5  ;;  %v3300_v63 = vpack.c.bf16 %v3284_v13, %v3284_v13  ;;  %v7865_v56 = vld [vmem:[#allocation3 + $0x3c] sm:$0xf0] }
 0x2fa   : > { %3529 = vst [vmem:[#allocation3 + $0x60] sm:$0xf] %v3528_v44  ;;  %v3285_v27 = vmax.f32 %v3269_v19, 0.0  ;;  %v3868_v6 = vpack.c.b16 %v3855_v1, %v3854_v60  ;;  %v3251_v58 = vmul.f32 %v9194_v15, %v3232_v22  ;;  %v4208_v2 = vsel %vm8620_vm12, %v7335_v40, %v4207_v51  ;;  %v7878_v60 = vld [vmem:[%s8273_s19 + $0xd0] sm:$0xff] }
 0x2fb   : > { %v3705_v23 = vrot.slane %v3704_v31, 4  ;;  %v3387_v24 = vshrl.u32 %v3300_v63, 16  ;;  %v3718_v39 = vor.u32 %v3717_v33, %v3714_v61  ;;  %v3721_v5 = vshll.u32 %v3604_v26, 16  ;;  %4959 = vmatpush.bf16.msrb.mxu1 %v7878_v60  ;;  %v3539_v13 = vld [vmem:[#allocation3 + $0x70] sm:$0xf] }
 0x2fc   : > { %7383 = vmatmul.msk.bf16.gmra.mxu3 %vm3910_vm7, %v4276_v41  ;;  %v3301_v59 = vpack.c.bf16 %v3285_v27, %v3285_v27  ;;  %v3206_v45 = vsub.f32 %v9143_v38, %v9167_v53  ;;  %v4212_v17 = vsel %vm8620_vm12, %v7336_v18, %v4211_v52  ;;  %v3709_v3 = vrot.slane %v3707_v55, 5  ;;  %v3542_v33 = vld [vmem:[#allocation3 + $0x74] sm:$0x1] }
 0x2fd   : > { %v3207_v37 = vsub.f32 %v9148_v29, %v9167_v53  ;;  %v7280_v0 = vor.u32 %v7839_v7, %v7279_v14  ;;  %v4264_v10 = vunpack.c.l.b16 %v4208_v2  ;;  %v3270_v34 = vadd.f32 %v9211_v12, %v3251_v58  ;;  %v3578_v29 = vld [vmem:[#allocation3 + $0x58] sm:$0xf]  ;;  %v3536_v53 = vld [vmem:[#allocation3 + $0x6c] sm:$0x1]  ;;  %v4141_v58 = vld [vmem:[#allocation3 + $0x50] sm:$0xe] }
 0x2fe   : > { %v3233_v54 = vmul.f32 %v9201_v11, %v3206_v45  ;;  %v3710_v38 = vsel %vm8526_vm8, %v3705_v23, %v3709_v3  ;;  %v3389_v49 = vrot.slane %v3387_v24, 7  ;;  %v3390_v32 = vshll.u32 %v3300_v63, 16  ;;  %v3605_v63 = vld [vmem:[#allocation3 + $0x54] sm:$0x1]  ;;  %v3606_v45 = vld [vmem:[#allocation3 + $0x5c] sm:$0x1] }
 0x2ff   : > { %v3395_v8 = vshrl.u32 %v3301_v59, 16  ;;  %v7416_v50 = vor.u32 %v7865_v56, %v7415_v21  ;;  %v4265_v35 = vunpack.c.l.b16 %v4212_v17  ;;  %v3719_v48 = vrot.slane %v3718_v39, 4 }
 0x300   : > { %v3723_v43 = vrot.slane %v3721_v5, 5  ;;  %v3726_v40 = vshrl.u32 %v3577_v9, 16  ;;  %v3729_v51 = vshll.u32 %v3577_v9, 16  ;;  %v3392_v46 = vor.u32 %v3390_v32, %v3389_v49  ;;  %v3545_v32 = vld [vmem:[#allocation3 + $0x78] sm:$0xf] }
 0x301   : > { %v3393_v4 = vrot.slane %v3389_v49, 4  ;;  %v3397_v41 = vrot.slane %v3395_v8, 7  ;;  %v3398_v1 = vshll.u32 %v3301_v59, 16  ;;  %v3286_v26 = vmax.f32 %v3270_v34, 0.0  ;;  %v4142_v59 = vld [vmem:[#allocation3 + $0x58] sm:$0xe] }
 0x302   : > { %v3252_v62 = vmul.f32 %v9194_v15, %v3233_v54  ;;  %v3740_v36 = vshrl.u32 %v3578_v29, 16  ;;  %v3743_v22 = vshll.u32 %v3578_v29, 16  ;;  %v3534_v31 = vsel %vm9242_vm5, %v3392_v46, %v3533_v42  ;;  %v7283_v42 = vld [vmem:[#allocation3 + $0x50] sm:$0xf]  ;;  %v7840_v8 = vld [vmem:[#allocation3 + $0x54] sm:$0xf0] }
 0x303   : > { %7259 = vmatmul.msk.bf16.gmra.mxu1 %vm3910_vm7, %v3868_v6  ;;  %v3537_v19 = vsel %vm9248_vm6, %v3393_v4, %v3536_v53  ;;  %v3724_v20 = vsel %vm8526_vm8, %v3719_v48, %v3723_v43  ;;  %3535 = vst [vmem:[#allocation3 + $0x68] sm:$0xf] %v3534_v31  ;;  %v3400_v55 = vor.u32 %v3398_v1, %v3397_v41  ;;  %v3401_v61 = vrot.slane %v3397_v41, 4  ;;  %v7866_v43 = vld [vmem:[#allocation3 + $0x5c] sm:$0xf0] }
 0x304   : > { %v3234_v44 = vmul.f32 %v9201_v11, %v3207_v37  ;;  %v4277_v18 = vpack.c.b16 %v4265_v35, %v4264_v10  ;;  %v3856_v52 = vunpack.c.l.b16 %v3710_v38  ;;  %v3728_v27 = vrot.slane %v3726_v40, 4  ;;  %3538 = vst [vmem:[#allocation3 + $0x6c] sm:$0x1] %v3537_v19  ;;  %v3548_v41 = vld [vmem:[#allocation3 + $0x7c] sm:$0x1] }
 0x305   : > { %7324 = vmatmul.msk.bf16.gmra.mxu2 %vm3910_vm7, %v7280_v0  ;;  %v3731_v6 = vrot.slane %v3729_v51, 5  ;;  %v3735_v14 = vshll.u32 %v3605_v63, 16  ;;  %v3540_v7 = vsel %vm9242_vm5, %v3400_v55, %v3539_v13  ;;  %v3302_v2 = vpack.c.bf16 %v3286_v26, %v3286_v26  ;;  %v3551_v13 = vld [vmem:[#allocation3 + $0x80] sm:$0xf] }
 0x306   : > { %7460 = vmatmul.msk.bf16.gmra.mxu0 %vm3910_vm7, %v7416_v50  ;;  %v3271_v23 = vadd.f32 %v9211_v12, %v3252_v62  ;;  %v3857_v24 = vunpack.c.l.b16 %v3724_v20  ;;  %v3742_v39 = vrot.slane %v3740_v36, 4  ;;  %v3745_v5 = vrot.slane %v3743_v22, 5  ;;  %3541 = vst [vmem:[#allocation3 + $0x70] sm:$0xf] %v3540_v7  ;;  %v3579_v62 = vld [vmem:[#allocation3 + $0x60] sm:$0xf] }
 0x307   : > { %v3543_v11 = vsel %vm9248_vm6, %v3401_v61, %v3542_v33  ;;  %v3403_v21 = vshrl.u32 %v3302_v2, 16  ;;  %v3253_v17 = vmul.f32 %v9194_v15, %v3234_v44  ;;  %v7337_v3 = vrot.slane %v4141_v58, 9  ;;  %v7419_v15 = vld [vmem:[#allocation3 + $0x58] sm:$0xf] }
 0x308   : > { %v3287_v56 = vmax.f32 %v3271_v23, 0.0  ;;  %3544 = vst [vmem:[#allocation3 + $0x74] sm:$0x1] %v3543_v11  ;;  %v4215_v60 = vrot.slane %v3605_v63, 5  ;;  %v3732_v37 = vor.u32 %v3731_v6, %v3728_v27  ;;  %v3406_v10 = vshll.u32 %v3302_v2, 16  ;;  %v7877_v58 = vld [vmem:[%s8273_s19 + $0xc8] sm:$0xff] }
 0x309   : > { %v3405_v0 = vrot.slane %v3403_v21, 7  ;;  %v3869_v34 = vpack.c.b16 %v3857_v24, %v3856_v52  ;;  %v7338_v54 = vrot.slane %v4142_v59, 9  ;;  %v4219_v38 = vrot.slane %v3606_v45, 5  ;;  %4960 = vmatpush.bf16.msrb.mxu1 %v7877_v58  ;;  %v3607_v21 = vld [vmem:[#allocation3 + $0x64] sm:$0x1]  ;;  %v7885_v58 = vld [vmem:[%s8273_s19 + $0x108] sm:$0xff] }
 0x30a   : > { %v3303_v9 = vpack.c.bf16 %v3287_v56, %v3287_v56  ;;  %v3746_v49 = vor.u32 %v3745_v5, %v3742_v39  ;;  %v3737_v50 = vrot.slane %v3735_v14, 5  ;;  %v3272_v48 = vadd.f32 %v9211_v12, %v3253_v17  ;;  %v3580_v61 = vld [vmem:[#allocation3 + $0x68] sm:$0xf] }
 0x30b   : > { %v3408_v35 = vor.u32 %v3406_v10, %v3405_v0  ;;  %v4216_v29 = vsel %vm8620_vm12, %v7337_v3, %v4215_v60  ;;  %v3733_v53 = vrot.slane %v3732_v37, 4  ;;  %v3749_v40 = vshll.u32 %v3606_v45, 16  ;;  %v4143_v3 = vld [vmem:[#allocation3 + $0x60] sm:$0xe]  ;;  %v4144_v60 = vld [vmem:[#allocation3 + $0x68] sm:$0xe] }
 0x30c   : > { %7384 = vmatmul.msk.bf16.gmra.mxu3 %vm3910_vm7, %v4277_v18  ;;  %v3409_v51 = vrot.slane %v3405_v0, 4  ;;  %v3411_v4 = vshrl.u32 %v3303_v9, 16  ;;  %v7284_v1 = vor.u32 %v7840_v8, %v7283_v42  ;;  %v4220_v26 = vsel %vm8620_vm12, %v7338_v54, %v4219_v38  ;;  %v3554_v18 = vld [vmem:[#allocation3 + $0x84] sm:$0x1]  ;;  %v3608_v0 = vld [vmem:[#allocation3 + $0x6c] sm:$0x1] }
 0x30d   : > { %v3546_v46 = vsel %vm9242_vm5, %v3408_v35, %v3545_v32  ;;  %v3747_v12 = vrot.slane %v3746_v49, 4  ;;  %v7420_v36 = vor.u32 %v7866_v43, %v7419_v15  ;;  %v4266_v22 = vunpack.c.l.b16 %v4216_v29  ;;  %v7907_v54 = vld [vmem:[%s8273_s19 + $0x178] sm:$0xff] }
 0x30e   : > { %3547 = vst [vmem:[#allocation3 + $0x78] sm:$0xf] %v3546_v46  ;;  %v3413_v31 = vrot.slane %v3411_v4, 7  ;;  %v3288_v19 = vmax.f32 %v3272_v48, 0.0  ;;  %v3738_v20 = vsel %vm8526_vm8, %v3733_v53, %v3737_v50  ;;  %v3751_v55 = vrot.slane %v3749_v40, 5  ;;  %5843 = vmatpush.bf16.msra.mxu0 %v7907_v54  ;;  %v7904_v54 = vld [vmem:[%s8273_s19 + $0x160] sm:$0xff] }
 0x30f   : > { %v3414_v33 = vshll.u32 %v3303_v9, 16  ;;  %v3549_v44 = vsel %vm9248_vm6, %v3409_v51, %v3548_v41  ;;  %v4267_v52 = vunpack.c.l.b16 %v4220_v26  ;;  %v3754_v63 = vshrl.u32 %v3579_v62, 16  ;;  %v3557_v35 = vld [vmem:[#allocation3 + $0x88] sm:$0xf]  ;;  %v3560_v48 = vld [vmem:[#allocation3 + $0x8c] sm:$0x1] }
 0x310   : > { %v3757_v27 = vshll.u32 %v3579_v62, 16  ;;  %v3417_v6 = vrot.slane %v3413_v31, 4  ;;  %3550 = vst [vmem:[#allocation3 + $0x7c] sm:$0x1] %v3549_v44  ;;  %v3752_v14 = vsel %vm8526_vm8, %v3747_v12, %v3751_v55  ;;  %v3768_v2 = vshrl.u32 %v3580_v61, 16  ;;  %v7886_v26 = vld [vmem:[%s8273_s19 + $0x110] sm:$0xff] }
 0x311   : > { %v3416_v7 = vor.u32 %v3414_v33, %v3413_v31  ;;  %v3771_v23 = vshll.u32 %v3580_v61, 16  ;;  %v3304_v24 = vpack.c.bf16 %v3288_v19, %v3288_v19  ;;  %v3858_v39 = vunpack.c.l.b16 %v3738_v20  ;;  %v7287_v40 = vld [vmem:[#allocation3 + $0x60] sm:$0xf]  ;;  %v7841_v51 = vld [vmem:[#allocation3 + $0x64] sm:$0xf0] }
 0x312   : > { %v3555_v59 = vsel %vm9248_vm6, %v3417_v6, %v3554_v18  ;;  %v4278_v11 = vpack.c.b16 %v4267_v52, %v4266_v22  ;;  %v3859_v45 = vunpack.c.l.b16 %v3752_v14  ;;  %v3756_v56 = vrot.slane %v3754_v63, 4  ;;  %v7423_v46 = vld [vmem:[#allocation3 + $0x68] sm:$0xf]  ;;  %v7867_v41 = vld [vmem:[#allocation3 + $0x6c] sm:$0xf0] }
 0x313   : > { %7260 = vmatmul.msk.bf16.gmra.mxu1 %vm3910_vm7, %v3869_v34  ;;  %v3552_v5 = vsel %vm9242_vm5, %v3416_v7, %v3551_v13  ;;  %3556 = vst [vmem:[#allocation3 + $0x84] sm:$0x1] %v3555_v59  ;;  %v3759_v17 = vrot.slane %v3757_v27, 5  ;;  %v3419_v37 = vshrl.u32 %v3304_v24, 16  ;;  %v3770_v10 = vrot.slane %v3768_v2, 4  ;;  %v7887_v34 = vld [vmem:[%s8273_s19 + $0x118] sm:$0xff] }
 0x314   : > { %3553 = vst [vmem:[#allocation3 + $0x80] sm:$0xf] %v3552_v5  ;;  %v3773_v9 = vrot.slane %v3771_v23, 5  ;;  %v3422_v49 = vshll.u32 %v3304_v24, 16  ;;  %v3870_v32 = vpack.c.b16 %v3859_v45, %v3858_v39  ;;  %v7339_v42 = vrot.slane %v4143_v3, 9  ;;  %5230 = vmatpush.bf16.msra.mxu2 %v7887_v34  ;;  %v7906_v12 = vld [vmem:[%s8273_s19 + $0x170] sm:$0xff] }
 0x315   : > { %7325 = vmatmul.msk.bf16.gmra.mxu2 %vm3910_vm7, %v7284_v1  ;;  %v3421_v38 = vrot.slane %v3419_v37, 7  ;;  %v4223_v8 = vrot.slane %v3607_v21, 5  ;;  %v3760_v50 = vor.u32 %v3759_v17, %v3756_v56  ;;  %v7340_v15 = vrot.slane %v4144_v60, 9  ;;  %v7901_v13 = vld [vmem:[%s8273_s19 + $0x148] sm:$0xff]  ;;  %5844 = vmatpush.bf16.msra.mxu0 %v7906_v12  ;;  %v3581_v44 = vld [vmem:[#allocation3 + $0x70] sm:$0xf] }
 0x316   : > { %7461 = vmatmul.msk.bf16.gmra.mxu0 %vm3910_vm7, %v7420_v36  ;;  %v4227_v43 = vrot.slane %v3608_v0, 5  ;;  %v3774_v4 = vor.u32 %v3773_v9, %v3770_v10  ;;  %v3763_v1 = vshll.u32 %v3607_v21, 16  ;;  %v3777_v31 = vshll.u32 %v3608_v0, 16  ;;  %5425 = vmatpush.bf16.msra.mxu3 %v7901_v13  ;;  %v3582_v52 = vld [vmem:[#allocation3 + $0x78] sm:$0xf]  ;;  %v7900_v7 = vld [vmem:[%s8273_s19 + $0x140] sm:$0xff] }
 0x317   : > { %v3424_v29 = vor.u32 %v3422_v49, %v3421_v38  ;;  %v3425_v53 = vrot.slane %v3421_v38, 4  ;;  %v4224_v22 = vsel %vm8620_vm12, %v7339_v42, %v4223_v8  ;;  %v7288_v19 = vor.u32 %v7841_v51, %v7287_v40  ;;  %v7905_v14 = vld [vmem:[%s8273_s19 + $0x168] sm:$0xff]  ;;  %v3609_v45 = vld [vmem:[#allocation3 + $0x74] sm:$0x1]  ;;  %v4145_v21 = vld [vmem:[#allocation3 + $0x70] sm:$0xe] }
 0x318   : > { %v4228_v20 = vsel %vm8620_vm12, %v7340_v15, %v4227_v43  ;;  %v3761_v55 = vrot.slane %v3760_v50, 4  ;;  %5231 = vmatpush.bf16.msra.mxu2 %v7886_v26  ;;  %v7424_v61 = vor.u32 %v7867_v41, %v7423_v46  ;;  %v3775_v33 = vrot.slane %v3774_v4, 4  ;;  %v3610_v3 = vld [vmem:[#allocation3 + $0x7c] sm:$0x1]  ;;  %v4146_v60 = vld [vmem:[#allocation3 + $0x78] sm:$0xe] }
 0x319   : > { %v3558_v62 = vsel %vm9242_vm5, %v3424_v29, %v3557_v35  ;;  %v3561_v36 = vsel %vm9248_vm6, %v3425_v53, %v3560_v48  ;;  %v3765_v18 = vrot.slane %v3763_v1, 5  ;;  %v4268_v63 = vunpack.c.l.b16 %v4224_v22  ;;  %5845 = vmatpush.bf16.msra.mxu0 %v7905_v14  ;;  %v7884_v34 = vld [vmem:[%s8273_s19 + $0x100] sm:$0xff]  ;;  %v7899_v49 = vld [vmem:[%s8273_s19 + $0x138] sm:$0xff]  ;;  %v7898_v43 = vld [vmem:[%s8273_s19 + $0x130] sm:$0xff] }
 0x31a   : > { %3559 = vst [vmem:[#allocation3 + $0x88] sm:$0xf] %v3558_v62  ;;  %v4269_v27 = vunpack.c.l.b16 %v4228_v20  ;;  %v3779_v6 = vrot.slane %v3777_v31, 5  ;;  %v3782_v23 = vshrl.u32 %v3581_v44, 16  ;;  %v3785_v59 = vshll.u32 %v3581_v44, 16  ;;  %5426 = vmatpush.bf16.msra.mxu3 %v7900_v7  ;;  %v7876_v38 = vld [vmem:[%s8273_s19 + $0xc0] sm:$0xff] }
 0x31b   : > { %3562 = vst [vmem:[#allocation3 + $0x8c] sm:$0x1] %v3561_v36  ;;  %v3766_v2 = vsel %vm8526_vm8, %v3761_v55, %v3765_v18  ;;  %v3796_v39 = vshrl.u32 %v3582_v52, 16  ;;  %v3799_v5 = vshll.u32 %v3582_v52, 16  ;;  %v7883_v42 = vld [vmem:[%s8273_s19 + $0xf8] sm:$0xff]  ;;  %v4231_v35 = vrot.slane %v3609_v45, 5  ;;  %4961 = vmatpush.bf16.msrb.mxu1 %v7876_v38 }
 0x31c   : > { %7385 = vmatmul.msk.bf16.gmra.mxu3 %vm3910_vm7, %v4278_v11  ;;  %v3780_v24 = vsel %vm8526_vm8, %v3775_v33, %v3779_v6  ;;  %5232 = vmatpush.bf16.msra.mxu2 %v7885_v58  ;;  %v4279_v11 = vpack.c.b16 %v4269_v27, %v4268_v63  ;;  %v3860_v56 = vunpack.c.l.b16 %v3766_v2  ;;  %v3784_v37 = vrot.slane %v3782_v23, 4  ;;  %v7903_v8 = vld [vmem:[%s8273_s19 + $0x158] sm:$0xff]  ;;  %v7291_v29 = vld [vmem:[#allocation3 + $0x70] sm:$0xf]  ;;  %v7868_v4 = vld [vmem:[#allocation3 + $0x7c] sm:$0xf0] }
 0x31d   : > { %v3861_v17 = vunpack.c.l.b16 %v3780_v24  ;;  %v3787_v0 = vrot.slane %v3785_v59, 5  ;;  %v3798_v10 = vrot.slane %v3796_v39, 4  ;;  %v3801_v9 = vrot.slane %v3799_v5, 5  ;;  %5846 = vmatpush.bf16.msra.mxu0 %v7904_v54  ;;  %v7842_v53 = vld [vmem:[#allocation3 + $0x74] sm:$0xf0]  ;;  %v7882_v22 = vld [vmem:[%s8273_s19 + $0xf0] sm:$0xff] }
 0x31e   : > { %v7342_v48 = vrot.slane %v4146_v60, 9  ;;  %v4235_v15 = vrot.slane %v3610_v3, 5  ;;  %5427 = vmatpush.bf16.msra.mxu3 %v7899_v49  ;;  %v7427_v46 = vld [vmem:[#allocation3 + $0x78] sm:$0xf]  ;;  %v3791_v41 = vshll.u32 %v3609_v45, 16  ;;  %v3805_v1 = vshll.u32 %v3610_v3, 16 }
 0x31f   : > { %v3871_v50 = vpack.c.b16 %v3861_v17, %v3860_v56  ;;  %v3788_v40 = vor.u32 %v3787_v0, %v3784_v37  ;;  %v3802_v51 = vor.u32 %v3801_v9, %v3798_v10  ;;  %v3583_v26 = vld [vmem:[#allocation3 + $0x80] sm:$0xf]  ;;  %v7292_v12 = vor.u32 %v7842_v53, %v7291_v29  ;;  %v7897_v13 = vld [vmem:[%s8273_s19 + $0x128] sm:$0xff]  ;;  %v5488_v6 = vld [vmem:[#allocation3 + $0x10] sm:$0xf] }
 0x320   : > { %5233 = vmatpush.bf16.msra.mxu2 %v7884_v34  ;;  %v4236_v36 = vsel %vm8620_vm12, %v7342_v48, %v4235_v15  ;;  %v7902_v31 = vld [vmem:[%s8273_s19 + $0x150] sm:$0xff]  ;;  %v3810_v33 = vshrl.u32 %v3583_v26, 16  ;;  %v3813_v44 = vshll.u32 %v3583_v26, 16  ;;  %v3793_v63 = vrot.slane %v3791_v41, 5  ;;  %v7896_v58 = vld [vmem:[%s8273_s19 + $0x120] sm:$0xff] }
 0x321   : > { %5847 = vmatpush.bf16.msra.mxu0 %v7903_v8  ;;  %v3789_v20 = vrot.slane %v3788_v40, 4  ;;  %v3803_v55 = vrot.slane %v3802_v51, 4  ;;  %v4271_v52 = vunpack.c.l.b16 %v4236_v36  ;;  %v3807_v27 = vrot.slane %v3805_v1, 5  ;;  %v3611_v24 = vld [vmem:[#allocation3 + $0x84] sm:$0x1] }
 0x322   : > { %5428 = vmatpush.bf16.msra.mxu3 %v7898_v43  ;;  %v4147_v59 = vld [vmem:[#allocation3 + $0x80] sm:$0xe]  ;;  %v3812_v39 = vrot.slane %v3810_v33, 4  ;;  %v3815_v5 = vrot.slane %v3813_v44, 5  ;;  %v9491_v45 = vld [vmem:[#allocation3 + $0x8] sm:$0xe] }
 0x323   : > { %7261 = vmatmul.msk.bf16.gmra.mxu1 %vm3910_vm7, %v3870_v32  ;;  %v7341_v32 = vrot.slane %v4145_v21, 9  ;;  %v3794_v14 = vsel %vm8526_vm8, %v3789_v20, %v3793_v63  ;;  %v3808_v7 = vsel %vm8526_vm8, %v3803_v55, %v3807_v27  ;;  %v5490_v21 = vld [vmem:[#allocation3 + $0x18] sm:$0xf]  ;;  %v5521_v56 = vshrl.u32 %v5488_v6, 16  ;;  %v3612_v37 = vld [vmem:[#allocation3 + $0x8c] sm:$0x1] }
 0x324   : > { %5234 = vmatpush.bf16.msra.mxu2 %v7883_v42  ;;  %v5524_v17 = vshll.u32 %v5488_v6, 16  ;;  %v3862_v3 = vunpack.c.l.b16 %v3794_v14  ;;  %v3863_v60 = vunpack.c.l.b16 %v3808_v7  ;;  %v4148_v0 = vld [vmem:[#allocation3 + $0x88] sm:$0xe]  ;;  %v7343_v10 = vrot.slane %v4147_v59, 9  ;;  %v9494_v38 = vld [vmem:[#allocation3 + $0xc] sm:$0x1] }
 0x325   : > { %7326 = vmatmul.msk.bf16.gmra.mxu2 %vm3910_vm7, %v7288_v19  ;;  %v4232_v62 = vsel %vm8620_vm12, %v7341_v32, %v4231_v35  ;;  %v7428_v19 = vor.u32 %v7868_v4, %v7427_v46  ;;  %5848 = vmatpush.bf16.msra.mxu0 %v7902_v31  ;;  %v4239_v9 = vrot.slane %v3611_v24, 5  ;;  %v3816_v49 = vor.u32 %v3815_v5, %v3812_v39  ;;  %v9496_v32 = vld [vmem:[#allocation3 + $0x14] sm:$0x1]  ;;  %v5020_v15 = vld [vmem:[#allocation3 + $0x10] sm:$0xe]  ;;  %v7913_v20 = vld [vmem:[%s8273_s19 + $0x1a8] sm:$0xff] }
 0x326   : > { %7462 = vmatmul.msk.bf16.gmra.mxu0 %vm3910_vm7, %v7424_v61  ;;  %v3584_v61 = vld [vmem:[#allocation3 + $0x88] sm:$0xf]  ;;  %v4270_v18 = vunpack.c.l.b16 %v4232_v62  ;;  %5429 = vmatpush.bf16.msra.mxu3 %v7897_v13  ;;  %v7509_v42 = vrot.slane %v9491_v45, 9  ;;  %v5535_v8 = vshrl.u32 %v5490_v21, 16  ;;  %v7344_v35 = vrot.slane %v4148_v0, 9 }
 0x327   : > { %v3824_v2 = vshrl.u32 %v3584_v61, 16  ;;  %v3827_v23 = vshll.u32 %v3584_v61, 16  ;;  %v4243_v48 = vrot.slane %v3612_v37, 5  ;;  %v5523_v43 = vrot.slane %v5521_v56, 4  ;;  %v7869_v40 = vld [vmem:[#allocation3 + $0x8c] sm:$0xf0]  ;;  %6117 = vmatpush.bf16.msra.mxu1 %v7913_v20 }
 0x328   : > { %5235 = vmatpush.bf16.msra.mxu2 %v7882_v22  ;;  %v5526_v29 = vrot.slane %v5524_v17, 5  ;;  %v3872_v53 = vpack.c.b16 %v3863_v60, %v3862_v3  ;;  %v3819_v51 = vshll.u32 %v3611_v24, 16  ;;  %v5069_v46 = vrot.slane %v9494_v38, 5  ;;  %v5489_v4 = vld [vmem:[#allocation3 + $0x14] sm:$0x1] }
 0x329   : > { %v3826_v34 = vrot.slane %v3824_v2, 4  ;;  %v3829_v54 = vrot.slane %v3827_v23, 5  ;;  %v4601_v41 = vld [vmem:[#allocation3 + $0x8] sm:$0xf]  ;;  %v7295_v1 = vld [vmem:[#allocation3 + $0x80] sm:$0xf]  ;;  %v4240_v62 = vsel %vm8620_vm12, %v7343_v10, %v4239_v9  ;;  %v4244_v55 = vsel %vm8620_vm12, %v7344_v35, %v4243_v48 }
 0x32a   : > { %5430 = vmatpush.bf16.msra.mxu3 %v7896_v58  ;;  %v7843_v26 = vld [vmem:[#allocation3 + $0x84] sm:$0xf0]  ;;  %v3817_v22 = vrot.slane %v3816_v49, 4  ;;  %v3833_v31 = vshll.u32 %v3612_v37, 16  ;;  %v5537_v13 = vrot.slane %v5535_v8, 4  ;;  %v7510_v61 = vrot.slane %v5020_v15, 9 }
 0x32b   : > { %v3830_v36 = vor.u32 %v3829_v54, %v3826_v34  ;;  %v5073_v33 = vrot.slane %v9496_v32, 5  ;;  %v5491_v44 = vld [vmem:[#allocation3 + $0x1c] sm:$0x1]  ;;  %v3821_v63 = vrot.slane %v3819_v51, 5  ;;  %v4603_v27 = vld [vmem:[#allocation3 + $0x10] sm:$0xf]  ;;  %v4272_v7 = vunpack.c.l.b16 %v4240_v62 }
 0x32c   : > { %7386 = vmatmul.msk.bf16.gmra.mxu3 %vm3910_vm7, %v4279_v11  ;;  %v4280_v11 = vpack.c.b16 %v4271_v52, %v4270_v18  ;;  %v5527_v18 = vor.u32 %v5526_v29, %v5523_v43  ;;  %v7296_v52 = vor.u32 %v7843_v26, %v7295_v1  ;;  %v4634_v6 = vshrl.u32 %v4601_v41, 16  ;;  %v5492_v10 = vld [vmem:[#allocation3 + $0x20] sm:$0xf]  ;;  %v5494_v8 = vld [vmem:[#allocation3 + $0x28] sm:$0xf] }
 0x32d   : > { %v4637_v58 = vshll.u32 %v4601_v41, 16  ;;  %v3831_v2 = vrot.slane %v3830_v36, 4  ;;  %v5530_v23 = vshll.u32 %v5489_v4, 16  ;;  %v4273_v24 = vunpack.c.l.b16 %v4244_v55  ;;  %v5021_v20 = vld [vmem:[#allocation3 + $0x18] sm:$0xe] }
 0x32e   : > { %v3822_v59 = vsel %vm8526_vm8, %v3817_v22, %v3821_v63  ;;  %v3835_v39 = vrot.slane %v3833_v31, 5  ;;  %v5544_v45 = vshll.u32 %v5491_v44, 16  ;;  %v4651_v56 = vshll.u32 %v4603_v27, 16  ;;  %v9525_v31 = vld [vmem:[#allocation3 + $0x1c] sm:$0x1] }
 0x32f   : > { %v4636_v17 = vrot.slane %v4634_v6, 4  ;;  %v4639_v3 = vrot.slane %v4637_v58, 5  ;;  %v5070_v37 = vsel %vm8620_vm12, %v7509_v42, %v5069_v46  ;;  %v5532_v0 = vrot.slane %v5530_v23, 5  ;;  %v5022_v44 = vld [vmem:[#allocation3 + $0x20] sm:$0xe] }
 0x330   : > { %v3836_v60 = vsel %vm8526_vm8, %v3831_v2, %v3835_v39  ;;  %v4281_v9 = vpack.c.b16 %v4273_v24, %v4272_v7  ;;  %v3864_v34 = vunpack.c.l.b16 %v3822_v59  ;;  %v5074_v54 = vsel %vm8620_vm12, %v7510_v61, %v5073_v33  ;;  %v4605_v6 = vld [vmem:[#allocation3 + $0x18] sm:$0xf]  ;;  %v4607_v23 = vld [vmem:[#allocation3 + $0x20] sm:$0xf] }
 0x331   : > { %v5546_v35 = vrot.slane %v5544_v45, 5  ;;  %v4653_v15 = vrot.slane %v4651_v56, 5  ;;  %v3865_v43 = vunpack.c.l.b16 %v3836_v60  ;;  %v4640_v29 = vor.u32 %v4639_v3, %v4636_v17 }
 0x332   : > { %v3369_v42 = vrot.slane %v9361_v57, 4  ;;  %v5563_v51 = vshrl.u32 %v5494_v8, 16  ;;  %v5566_v46 = vshll.u32 %v5494_v8, 16  ;;  %v5144_v4 = vunpack.c.l.b16 %v5070_v37 }
 0x333   : > { %7262 = vmatmul.msk.bf16.gmra.mxu1 %vm3910_vm7, %v3871_v50  ;;  %v5538_v50 = vshll.u32 %v5490_v21, 16  ;;  %v4648_v21 = vshrl.u32 %v4603_v27, 16  ;;  %v5145_v41 = vunpack.c.l.b16 %v5074_v54  ;;  %v4643_v26 = vshll.u32 %v9494_v38, 16 }
 0x334   : > { %v4657_v22 = vshll.u32 %v9496_v32, 16  ;;  %v3873_v57 = vpack.c.b16 %v3865_v43, %v3864_v34  ;;  %v5568_v63 = vrot.slane %v5566_v46, 5  ;;  %v7511_v7 = vrot.slane %v5021_v20, 9  ;;  %v7888_v34 = vld [vmem:[#allocation3 + $0x14] sm:$0xf0]  ;;  %v7912_v46 = vld [vmem:[%s8273_s19 + $0x1a0] sm:$0xff] }
 0x335   : > { %7327 = vmatmul.msk.bf16.gmra.mxu2 %vm3910_vm7, %v7292_v12  ;;  %v7431_v12 = vld [vmem:[#allocation3 + $0x88] sm:$0xf]  ;;  %v4650_v48 = vrot.slane %v4648_v21, 4  ;;  %v5160_v32 = vpack.c.b16 %v5145_v41, %v5144_v4  ;;  %v4645_v27 = vrot.slane %v4643_v26, 5  ;;  %v5077_v2 = vrot.slane %v9525_v31, 5  ;;  %6118 = vmatpush.bf16.msra.mxu1 %v7912_v46 }
 0x336   : > { %7463 = vmatmul.msk.bf16.gmra.mxu0 %vm3910_vm7, %v7428_v19  ;;  %v5540_v19 = vrot.slane %v5538_v50, 5  ;;  %v7432_v14 = vor.u32 %v7869_v40, %v7431_v12  ;;  %v5552_v40 = vshll.u32 %v5492_v10, 16  ;;  %v3518_v12 = vld [vmem:[#allocation3 + $0x44] sm:$0x1]  ;;  %v7512_v59 = vrot.slane %v5022_v44, 9 }
 0x337   : > { %v4654_v36 = vor.u32 %v4653_v15, %v4650_v48  ;;  %v3519_v38 = vsel %vm9248_vm6, %v3369_v42, %v3518_v12  ;;  %v4662_v56 = vshrl.u32 %v4605_v6, 16  ;;  %v4665_v17 = vshll.u32 %v4605_v6, 16  ;;  %v5024_v20 = vld [vmem:[#allocation3 + $0x30] sm:$0xe] }
 0x338   : > { %v5541_v5 = vor.u32 %v5540_v19, %v5537_v13  ;;  %v9527_v13 = vld [vmem:[#allocation3 + $0x24] sm:$0x1]  ;;  %v4641_v19 = vrot.slane %v4640_v29, 4  ;;  %v5554_v61 = vrot.slane %v5552_v40, 5  ;;  %3520 = vst [vmem:[#allocation3 + $0x44] sm:$0x1] %v3519_v38 }
 0x339   : > { %v4655_v58 = vrot.slane %v4654_v36, 4  ;;  %v5081_v39 = vrot.slane %v9527_v13, 5  ;;  %v4676_v60 = vshrl.u32 %v4607_v23, 16  ;;  %v4679_v37 = vshll.u32 %v4607_v23, 16  ;;  %v5023_v36 = vld [vmem:[#allocation3 + $0x28] sm:$0xe] }
 0x33a   : > { %v5542_v49 = vrot.slane %v5541_v5, 4  ;;  %v4646_v24 = vsel %vm8526_vm8, %v4641_v19, %v4645_v27  ;;  %v5495_v5 = vld [vmem:[#allocation3 + $0x2c] sm:$0x1]  ;;  %v4664_v15 = vrot.slane %v4662_v56, 4  ;;  %v4667_v43 = vrot.slane %v4665_v17, 5 }
 0x33b   : > { %v4870_v54 = vunpack.c.l.b16 %v4646_v24  ;;  %v4678_v40 = vrot.slane %v4676_v60, 4  ;;  %v4681_v42 = vrot.slane %v4679_v37, 5  ;;  %v9550_v19 = vld [vmem:[#allocation3 + $0x2c] sm:$0x1]  ;;  %v4671_v27 = vshll.u32 %v9525_v31, 16 }
 0x33c   : > { %7387 = vmatmul.msk.bf16.gmra.mxu3 %vm3910_vm7, %v4280_v11  ;;  %v5528_v11 = vrot.slane %v5527_v18, 4  ;;  %v5547_v1 = vsel %vm8526_vm8, %v5542_v49, %v5546_v35  ;;  %v5493_v18 = vld [vmem:[#allocation3 + $0x24] sm:$0x1]  ;;  %v5078_v49 = vsel %vm8620_vm12, %v7511_v7, %v5077_v2  ;;  %v5082_v35 = vsel %vm8620_vm12, %v7512_v59, %v5081_v39  ;;  %v4609_v59 = vld [vmem:[#allocation3 + $0x28] sm:$0xf] }
 0x33d   : > { %v5758_v33 = vunpack.c.l.b16 %v5547_v1  ;;  %v5558_v3 = vshll.u32 %v5493_v18, 16  ;;  %v5498_v1 = vld [vmem:[#allocation3 + $0x38] sm:$0xf]  ;;  %v5146_v26 = vunpack.c.l.b16 %v5078_v49  ;;  %v5147_v12 = vunpack.c.l.b16 %v5082_v35  ;;  %v9552_v18 = vld [vmem:[#allocation3 + $0x34] sm:$0x1] }
 0x33e   : > { %v5533_v50 = vsel %vm8526_vm8, %v5528_v11, %v5532_v0  ;;  %v4682_v44 = vor.u32 %v4681_v42, %v4678_v40  ;;  %v4685_v6 = vshll.u32 %v9527_v13, 16  ;;  %v5085_v23 = vrot.slane %v9550_v19, 5  ;;  %v4611_v60 = vld [vmem:[#allocation3 + $0x30] sm:$0xf]  ;;  %v5499_v35 = vld [vmem:[#allocation3 + $0x3c] sm:$0x1] }
 0x33f   : > { %v5757_v62 = vunpack.c.l.b16 %v5533_v50  ;;  %v7514_v24 = vrot.slane %v5024_v20, 9  ;;  %v4690_v37 = vshrl.u32 %v4609_v59, 16  ;;  %v7587_v42 = vld [vmem:[#allocation3 + $0x20] sm:$0xf] }
 0x340   : > { %v4683_v31 = vrot.slane %v4682_v44, 4 }
 0x341   : > { %v5773_v45 = vpack.c.b16 %v5758_v33, %v5757_v62  ;;  %v4692_v46 = vrot.slane %v4690_v37, 4 }
 0x343   : > { %7263 = vmatmul.msk.bf16.gmra.mxu1 %vm3910_vm7, %v3872_v53  ;;  %v5549_v53 = vshrl.u32 %v5492_v10, 16  ;;  %v5572_v10 = vshll.u32 %v5495_v5, 16 }
 0x345   : > { %7328 = vmatmul.msk.bf16.gmra.mxu2 %vm3910_vm7, %v7296_v52  ;;  %v5551_v55 = vrot.slane %v5549_v53, 4  ;;  %v5565_v52 = vrot.slane %v5563_v51, 4  ;;  %v5560_v53 = vrot.slane %v5558_v3, 5  ;;  %v5496_v51 = vld [vmem:[#allocation3 + $0x30] sm:$0xf]  ;;  %v5574_v41 = vrot.slane %v5572_v10, 5 }
 0x346   : > { %7464 = vmatmul.msk.bf16.gmra.mxu0 %vm3910_vm7, %v7432_v14  ;;  %v4659_v14 = vrot.slane %v4657_v22, 5  ;;  %v4673_v3 = vrot.slane %v4671_v27, 5  ;;  %v5161_v10 = vpack.c.b16 %v5147_v12, %v5146_v26  ;;  %v7889_v26 = vld [vmem:[#allocation3 + $0x24] sm:$0xf0] }
 0x347   : > { %v5555_v11 = vor.u32 %v5554_v61, %v5551_v55  ;;  %v5569_v21 = vor.u32 %v5568_v63, %v5565_v52  ;;  %v5577_v55 = vshrl.u32 %v5496_v51, 16  ;;  %v5580_v61 = vshll.u32 %v5496_v51, 16 }
 0x348   : > { %v4660_v0 = vsel %vm8526_vm8, %v4655_v58, %v4659_v14  ;;  %v5591_v52 = vshrl.u32 %v5498_v1, 16  ;;  %v5594_v63 = vshll.u32 %v5498_v1, 16  ;;  %v7513_v58 = vrot.slane %v5023_v36, 9  ;;  %v5500_v36 = vld [vmem:[#allocation3 + $0x40] sm:$0xf] }
 0x349   : > { %v5556_v8 = vrot.slane %v5555_v11, 4  ;;  %v5570_v48 = vrot.slane %v5569_v21, 4  ;;  %v4871_v29 = vunpack.c.l.b16 %v4660_v0  ;;  %v5089_v11 = vrot.slane %v9552_v18, 5 }
 0x34a   : > { %v5582_v21 = vrot.slane %v5580_v61, 5  ;;  %v5593_v13 = vrot.slane %v5591_v52, 4  ;;  %v5596_v17 = vrot.slane %v5594_v63, 5  ;;  %v4693_v0 = vshll.u32 %v4609_v59, 16 }
 0x34b   : > { %v5561_v62 = vsel %vm8526_vm8, %v5556_v8, %v5560_v53  ;;  %v5575_v22 = vsel %vm8526_vm8, %v5570_v48, %v5574_v41  ;;  %v4886_v33 = vpack.c.b16 %v4871_v29, %v4870_v54  ;;  %v5497_v54 = vld [vmem:[#allocation3 + $0x34] sm:$0x1]  ;;  %v5086_v8 = vsel %vm8620_vm12, %v7513_v58, %v5085_v23  ;;  %v9573_v58 = vld [vmem:[#allocation3 + $0x3c] sm:$0x1] }
 0x34c   : > { %7388 = vmatmul.msk.bf16.gmra.mxu3 %vm3910_vm7, %v4281_v9  ;;  %v7583_v9 = vld [vmem:[#allocation3 + $0x10] sm:$0xf]  ;;  %v5760_v2 = vunpack.c.l.b16 %v5575_v22  ;;  %v4704_v29 = vshrl.u32 %v4611_v60, 16  ;;  %v4707_v53 = vshll.u32 %v4611_v60, 16  ;;  %v5586_v51 = vshll.u32 %v5497_v54, 16 }
 0x34d   : > { %v7584_v4 = vor.u32 %v7888_v34, %v7583_v9  ;;  %v4687_v34 = vrot.slane %v4685_v6, 5  ;;  %v5148_v12 = vunpack.c.l.b16 %v5086_v8  ;;  %v5608_v23 = vshll.u32 %v5500_v36, 16 }
 0x34e   : > { %v4706_v63 = vrot.slane %v4704_v29, 4  ;;  %v5588_v27 = vrot.slane %v5586_v51, 5  ;;  %v9584_v29 = vld [vmem:[#allocation3 + $0x30] sm:$0xf] }
 0x353   : > { %7264 = vmatmul.msk.bf16.gmra.mxu1 %vm3910_vm7, %v3873_v57  ;;  %v4668_v57 = vor.u32 %v4667_v43, %v4664_v15  ;;  %v4688_v15 = vsel %vm8526_vm8, %v4683_v31, %v4687_v34  ;;  %v5597_v43 = vor.u32 %v5596_v17, %v5593_v13  ;;  %v4713_v17 = vshll.u32 %v9552_v18, 16  ;;  %v9586_v18 = vld [vmem:[#allocation3 + $0x34] sm:$0xf0] }
 0x354   : > { %v4873_v20 = vunpack.c.l.b16 %v4688_v15 }
 0x355   : > { %7561 = vmatmul.msk.bf16.vlgmr.msra.gmra.mxu2 %vm3910_vm7, %v5160_v32  ;;  %v5759_v32 = vunpack.c.l.b16 %v5561_v62  ;;  %v4669_v5 = vrot.slane %v4668_v57, 4  ;;  %v5600_v62 = vshll.u32 %v5499_v35, 16  ;;  %v5598_v52 = vrot.slane %v5597_v43, 4  ;;  %v4615_v35 = vld [vmem:[#allocation3 + $0x40] sm:$0xf] }
 0x356   : > { %7681 = vmatmul.msk.bf16.vlgmr.msra.gmra.mxu0 %vm3910_vm7, %v5773_v45  ;;  %v5579_v45 = vrot.slane %v5577_v55, 4 }
 0x357   : > { %v5774_v9 = vpack.c.b16 %v5760_v2, %v5759_v32  ;;  %v4674_v49 = vsel %vm8526_vm8, %v4669_v5, %v4673_v3  ;;  %v7588_v32 = vor.u32 %v7889_v26, %v7587_v42  ;;  %v5025_v2 = vld [vmem:[#allocation3 + $0x38] sm:$0xe] }
 0x358   : > { %v4093_v50 = vpop.f32.mrf.mxu2  ;;  %v5583_v48 = vor.u32 %v5582_v21, %v5579_v45  ;;  %v4872_v57 = vunpack.c.l.b16 %v4674_v49  ;;  %v7911_v45 = vld [vmem:[%s8273_s19 + $0x198] sm:$0xff]  ;;  %v5610_v49 = vrot.slane %v5608_v23, 5 }
 0x359   : > { %v4613_v3 = vld [vmem:[#allocation3 + $0x38] sm:$0xf]  ;;  %6119 = vmatpush.bf16.msra.mxu1 %v7911_v45 }
 0x35a   : > { %v5584_v61 = vrot.slane %v5583_v48, 4  ;;  %v4721_v42 = vshll.u32 %v4613_v3, 16 }
 0x35c   : > { %7637 = vmatmul.msk.bf16.vlgmr.msra.gmra.mxu3 %vm3910_vm7, %v7584_v4  ;;  %v4695_v4 = vrot.slane %v4693_v0, 5  ;;  %v5589_v21 = vsel %vm8526_vm8, %v5584_v61, %v5588_v27  ;;  %v5026_v0 = vld [vmem:[#allocation3 + $0x40] sm:$0xe] }
 0x35d   : > { %v5761_v15 = vunpack.c.l.b16 %v5589_v21 }
 0x35e   : > { %v4696_v6 = vor.u32 %v4695_v4, %v4692_v46 }
 0x35f   : > { %v4351_v7 = vpop.f32.mrf.mxu3 }
 0x360   : > { %v3944_v38 = vpop.f32.mrf.mxu1  ;;  %v4095_v39 = vpop.f32.mrf.mxu2  ;;  %v4697_v37 = vrot.slane %v4696_v6, 4 }
 0x361   : > { %v4094_v14 = vadd.f32 %v4093_v50, %v3944_v38  ;;  %v5090_v50 = vsel %vm8620_vm12, %v7514_v24, %v5089_v11  ;;  %v4709_v38 = vrot.slane %v4707_v53, 5  ;;  %v4699_v11 = vshll.u32 %v9550_v19, 16  ;;  %v5503_v53 = vld [vmem:[#allocation3 + $0x4c] sm:$0x1] }
 0x362   : > { %v5149_v55 = vunpack.c.l.b16 %v5090_v50  ;;  %v5628_v61 = vshll.u32 %v5503_v53, 16 }
 0x363   : > { %v9558_v56 = vadd.f32 %v4351_v7, %v4094_v14  ;;  %7501 = vmatmul.msk.bf16.vlgmr.msrb.gmra.mxu1 %vm3910_vm7, %v4886_v33  ;;  %v5502_v33 = vld [vmem:[#allocation3 + $0x48] sm:$0xf]  ;;  %v5605_v14 = vshrl.u32 %v5500_v36, 16  ;;  %v5602_v7 = vrot.slane %v5600_v62, 5  ;;  %v4710_v13 = vor.u32 %v4709_v38, %v4706_v63  ;;  %v5501_v62 = vld [vmem:[#allocation3 + $0x44] sm:$0x1] }
 0x364   : > { %v5619_v24 = vshrl.u32 %v5502_v33, 16  ;;  %v5622_v59 = vshll.u32 %v5502_v33, 16  ;;  %v5162_v5 = vpack.c.b16 %v5149_v55, %v5148_v12  ;;  %v4701_v46 = vrot.slane %v4699_v11, 5 }
 0x365   : > { %7562 = vmatmul.msk.bf16.gmra.mxu2 %vm3910_vm7, %v5161_v10  ;;  %v5603_v31 = vsel %vm8526_vm8, %v5598_v52, %v5602_v7  ;;  %v7515_v10 = vrot.slane %v5025_v2, 9  ;;  %v5607_v34 = vrot.slane %v5605_v14, 4  ;;  %v4711_v4 = vrot.slane %v4710_v13, 4  ;;  %v5506_v13 = vld [vmem:[#allocation3 + $0x68] sm:$0xf] }
 0x366   : > { %7682 = vmatmul.msk.bf16.gmra.mxu0 %vm3910_vm7, %v5774_v9  ;;  %v5093_v9 = vrot.slane %v9573_v58, 5  ;;  %v5621_v8 = vrot.slane %v5619_v24, 4  ;;  %v5624_v50 = vrot.slane %v5622_v59, 5  ;;  %v5762_v43 = vunpack.c.l.b16 %v5603_v31  ;;  %v5504_v59 = vld [vmem:[#allocation3 + $0x60] sm:$0xf] }
 0x367   : > { %v4353_v1 = vpop.f32.mrf.mxu3  ;;  %v7516_v12 = vrot.slane %v5026_v0, 9  ;;  %v4732_v36 = vshrl.u32 %v4615_v35, 16  ;;  %v4723_v38 = vrot.slane %v4721_v42, 5  ;;  %v5614_v6 = vshll.u32 %v5501_v62, 16  ;;  %v9609_v31 = vld [vmem:[#allocation3 + $0x5c] sm:$0x1] }
 0x368   : > { %v3946_v40 = vpop.f32.mrf.mxu1  ;;  %v4098_v22 = vpop.f32.mrf.mxu2  ;;  %v9595_v26 = vsel %vm8620_vm12, %v7515_v10, %v5093_v9  ;;  %v5625_v55 = vor.u32 %v5624_v50, %v5621_v8  ;;  %v5775_v33 = vpack.c.b16 %v5762_v43, %v5761_v15  ;;  %v5630_v21 = vrot.slane %v5628_v61, 5  ;;  %v9616_v9 = vld [vmem:[#allocation3 + $0x64] sm:$0x1]  ;;  %v4617_v61 = vld [vmem:[#allocation3 + $0x58] sm:$0xf] }
 0x369   : > { %v4096_v41 = vadd.f32 %v4095_v39, %v3946_v40  ;;  %v4887_v39 = vpack.c.b16 %v4873_v20, %v4872_v57  ;;  %v4718_v40 = vshrl.u32 %v4613_v3, 16  ;;  %v4702_v57 = vsel %vm8526_vm8, %v4697_v37, %v4701_v46  ;;  %v9613_v37 = vld [vmem:[#allocation3 + $0x40] sm:$0xf] }
 0x36a   : > { %v5611_v20 = vor.u32 %v5610_v49, %v5607_v34  ;;  %v9606_v7 = vunpack.c.l.b16 %v4702_v57  ;;  %v5150_v2 = vunpack.c.l.b16 %v9595_v26  ;;  %v4734_v23 = vrot.slane %v4732_v36, 4  ;;  %v5027_v34 = vld [vmem:[#allocation3 + $0x58] sm:$0xe]  ;;  %v5028_v49 = vld [vmem:[#allocation3 + $0x60] sm:$0xe] }
 0x36b   : > { %v9571_v44 = vadd.f32 %v4353_v1, %v4096_v41  ;;  %v4715_v41 = vrot.slane %v4713_v17, 5  ;;  %v9591_v1 = vld [vmem:[#allocation3 + $0x44] sm:$0x1]  ;;  %v4720_v63 = vrot.slane %v4718_v40, 4  ;;  %v5626_v45 = vrot.slane %v5625_v55, 4 }
 0x36c   : > { %7638 = vmatmul.msk.bf16.gmra.mxu3 %vm3910_vm7, %v7588_v32  ;;  %v5097_v52 = vrot.slane %v9591_v1, 5  ;;  %v7592_v32 = vor.u32 %v9586_v18, %v9584_v29  ;;  %v4727_v10 = vshll.u32 %v9573_v58, 16  ;;  %v5633_v8 = vshrl.u32 %v5504_v59, 16 }
 0x36d   : > { %v4716_v27 = vsel %vm8526_vm8, %v4711_v4, %v4715_v41  ;;  %v4724_v0 = vor.u32 %v4723_v38, %v4720_v63  ;;  %v5636_v50 = vshll.u32 %v5504_v59, 16  ;;  %v4741_v15 = vshll.u32 %v9591_v1, 16 }
 0x36e   : > { %v4875_v3 = vunpack.c.l.b16 %v4716_v27  ;;  %v5647_v43 = vshrl.u32 %v5506_v13, 16  ;;  %v5650_v29 = vshll.u32 %v5506_v13, 16  ;;  %v5631_v53 = vsel %vm8526_vm8, %v5626_v45, %v5630_v21  ;;  %v4619_v27 = vld [vmem:[#allocation3 + $0x60] sm:$0xf] }
 0x36f   : > { %v4356_v54 = vpop.f32.mrf.mxu3  ;;  %v7517_v40 = vrot.slane %v5027_v34, 9  ;;  %v4725_v42 = vrot.slane %v4724_v0, 4  ;;  %v5101_v46 = vrot.slane %v9609_v31, 5  ;;  %v7518_v4 = vrot.slane %v5028_v49, 9  ;;  %v7910_v13 = vld [vmem:[%s8273_s19 + $0x190] sm:$0xff] }
 0x370   : > { %v3949_v60 = vpop.f32.mrf.mxu1  ;;  %v4100_v48 = vpop.f32.mrf.mxu2  ;;  %v5105_v41 = vrot.slane %v9616_v9, 5  ;;  %v4888_v1 = vpack.c.b16 %v4875_v3, %v9606_v7  ;;  %v5638_v62 = vrot.slane %v5636_v50, 5  ;;  %v5652_v55 = vrot.slane %v5650_v29, 5  ;;  %6120 = vmatpush.bf16.msra.mxu1 %v7910_v13  ;;  %v5029_v13 = vld [vmem:[#allocation3 + $0x68] sm:$0xe] }
 0x371   : > { %v4099_v19 = vadd.f32 %v4098_v22, %v3949_v60  ;;  %v4735_v22 = vshll.u32 %v4615_v35, 16  ;;  %v5098_v60 = vsel %vm8620_vm12, %v7516_v12, %v5097_v52  ;;  %v9620_v35 = vld [vmem:[#allocation3 + $0x44] sm:$0xf0]  ;;  %v5635_v12 = vrot.slane %v5633_v8, 4 }
 0x372   : > { %v5151_v18 = vunpack.c.l.b16 %v5098_v60  ;;  %v7596_v26 = vor.u32 %v9620_v35, %v9613_v37  ;;  %v5764_v38 = vunpack.c.l.b16 %v5631_v53  ;;  %v5106_v59 = vsel %vm8620_vm12, %v7518_v4, %v5105_v41 }
 0x373   : > { %v9588_v51 = vadd.f32 %v4356_v54, %v4099_v19  ;;  %7502 = vmatmul.msk.bf16.gmra.mxu1 %vm3910_vm7, %v4887_v39  ;;  %v4737_v24 = vrot.slane %v4735_v22, 5  ;;  %v5616_v54 = vrot.slane %v5614_v6, 5  ;;  %v4729_v22 = vrot.slane %v4727_v10, 5  ;;  %v9633_v6 = vpop.f32.mrf.mxu0 }
 0x374   : > { %v5163_v7 = vpack.c.b16 %v5151_v18, %v5150_v2  ;;  %v5639_v45 = vor.u32 %v5638_v62, %v5635_v12  ;;  %v4746_v21 = vshrl.u32 %v4617_v61, 16  ;;  %v4749_v2 = vshll.u32 %v4617_v61, 16 }
 0x375   : > { %7563 = vmatmul.msk.bf16.gmra.mxu2 %vm3910_vm7, %v5162_v5  ;;  %v5612_v5 = vrot.slane %v5611_v20, 4  ;;  %v5649_v20 = vrot.slane %v5647_v43, 4  ;;  %v4760_v0 = vshrl.u32 %v4619_v27, 16  ;;  %v4763_v10 = vshll.u32 %v4619_v27, 16 }
 0x376   : > { %7683 = vmatmul.msk.bf16.gmra.mxu0 %vm3910_vm7, %v5775_v33  ;;  %v5153_v50 = vunpack.c.l.b16 %v5106_v59  ;;  %v4748_v53 = vrot.slane %v4746_v21, 4  ;;  %v4755_v4 = vshll.u32 %v9609_v31, 16 }
 0x377   : > { %v4358_v11 = vpop.f32.mrf.mxu3  ;;  %v5617_v58 = vsel %vm8526_vm8, %v5612_v5, %v5616_v54  ;;  %v5653_v60 = vor.u32 %v5652_v55, %v5649_v20  ;;  %v4762_v41 = vrot.slane %v4760_v0, 4 }
 0x378   : > { %v3951_v14 = vpop.f32.mrf.mxu1  ;;  %v4103_v17 = vpop.f32.mrf.mxu2  ;;  %v5763_v63 = vunpack.c.l.b16 %v5617_v58  ;;  %v5640_v58 = vrot.slane %v5639_v45, 4  ;;  %v9676_v45 = vrot.slane %v4755_v4, 5 }
 0x379   : > { %v4101_v39 = vadd.f32 %v4100_v48, %v3951_v14  ;;  %v4738_v48 = vor.u32 %v4737_v24, %v4734_v23  ;;  %v4730_v23 = vsel %vm8526_vm8, %v4725_v42, %v4729_v22  ;;  %v5102_v24 = vsel %vm8620_vm12, %v7517_v40, %v5101_v46 }
 0x37a   : > { %v5776_v34 = vpack.c.b16 %v5764_v38, %v5763_v63  ;;  %v9651_v54 = vunpack.c.l.b16 %v4730_v23  ;;  %v5152_v49 = vunpack.c.l.b16 %v5102_v24  ;;  %v4751_v40 = vrot.slane %v4749_v2, 5  ;;  %v4621_v63 = vld [vmem:[#allocation3 + $0x68] sm:$0xf]  ;;  %v4623_v23 = vld [vmem:[#allocation3 + $0x70] sm:$0xf] }
 0x37b   : > { %v9618_v19 = vadd.f32 %v4358_v11, %v4101_v39  ;;  %v4739_v57 = vrot.slane %v4738_v48, 4  ;;  %v9641_v39 = vld [vmem:[#allocation3 + $0x64] sm:$0x1]  ;;  %v9643_v11 = vld [vmem:[#allocation3 + $0x6c] sm:$0x1]  ;;  %v5654_v46 = vrot.slane %v5653_v60, 4  ;;  %v9672_v24 = vpop.f32.mrf.mxu0 }
 0x37c   : > { %7639 = vmatmul.msk.bf16.gmra.mxu3 %vm3910_vm7, %v7592_v32  ;;  %v4743_v32 = vrot.slane %v4741_v15, 5  ;;  %v5642_v8 = vshll.u32 %v9641_v39, 16  ;;  %v5656_v48 = vshll.u32 %v9643_v11, 16  ;;  %v5510_v15 = vld [vmem:[#allocation3 + $0x78] sm:$0xf]  ;;  %v9660_v55 = vpack.c.b16 %v5153_v50, %v5152_v49 }
 0x37d   : > { %v5675_v22 = vshrl.u32 %v5510_v15, 16  ;;  %v4752_v27 = vor.u32 %v4751_v40, %v4748_v53  ;;  %v4769_v2 = vshll.u32 %v9616_v9, 16  ;;  %v4791_v50 = vshll.u32 %v4623_v23, 16  ;;  %v9687_v40 = vld [vmem:[#allocation3 + $0x7c] sm:$0x1] }
 0x37e   : > { %v4744_v3 = vsel %vm8526_vm8, %v4739_v57, %v4743_v32  ;;  %v5678_v57 = vshll.u32 %v5510_v15, 16  ;;  %v5658_v61 = vrot.slane %v5656_v48, 5  ;;  %v7519_v9 = vrot.slane %v5029_v13, 9 }
 0x37f   : > { %v4361_v52 = vpop.f32.mrf.mxu3  ;;  %v9656_v18 = vunpack.c.l.b16 %v4744_v3  ;;  %v9679_v3 = vld [vmem:[#allocation3 + $0x74] sm:$0x1]  ;;  %v5677_v60 = vrot.slane %v5675_v22, 4  ;;  %v4753_v15 = vrot.slane %v4752_v27, 4 }
 0x380   : > { %v3954_v36 = vpop.f32.mrf.mxu1  ;;  %v4105_v14 = vpop.f32.mrf.mxu2  ;;  %v5659_v59 = vsel %vm8526_vm8, %v5654_v46, %v5658_v61  ;;  %v5680_v0 = vrot.slane %v5678_v57, 5  ;;  %v5670_v37 = vshll.u32 %v9679_v3, 16 }
 0x381   : > { %v4104_v33 = vadd.f32 %v4103_v17, %v3954_v36  ;;  %v5508_v17 = vld [vmem:[#allocation3 + $0x70] sm:$0xf]  ;;  %v5644_v36 = vrot.slane %v5642_v8, 5  ;;  %v4889_v32 = vpack.c.b16 %v9656_v18, %v9651_v54  ;;  %v4788_v8 = vshrl.u32 %v4623_v23, 16 }
 0x382   : > { %v5661_v43 = vshrl.u32 %v5508_v17, 16  ;;  %v5664_v29 = vshll.u32 %v5508_v17, 16  ;;  %v5030_v17 = vld [vmem:[#allocation3 + $0x70] sm:$0xe]  ;;  %v5766_v48 = vunpack.c.l.b16 %v5659_v59  ;;  %v5672_v23 = vrot.slane %v5670_v37, 5 }
 0x383   : > { %v9645_v5 = vadd.f32 %v4361_v52, %v4104_v33  ;;  %7503 = vmatmul.msk.bf16.gmra.mxu1 %vm3910_vm7, %v4888_v1  ;;  %v4765_v1 = vrot.slane %v4763_v10, 5  ;;  %v5645_v31 = vsel %vm8526_vm8, %v5640_v58, %v5644_v36  ;;  %v4774_v10 = vshrl.u32 %v4621_v63, 16 }
 0x384   : > { %v5663_v33 = vrot.slane %v5661_v43, 4  ;;  %v5666_v52 = vrot.slane %v5664_v29, 5  ;;  %v5765_v54 = vunpack.c.l.b16 %v5645_v31  ;;  %v7520_v58 = vrot.slane %v5030_v17, 9  ;;  %v9705_v17 = vpop.f32.mrf.mxu0 }
 0x385   : > { %7564 = vmatmul.msk.bf16.gmra.mxu2 %vm3910_vm7, %v5163_v7  ;;  %v9670_v7 = vld [vmem:[#allocation3 + $0x74] sm:$0x1]  ;;  %v4766_v21 = vor.u32 %v4765_v1, %v4762_v41  ;;  %v4776_v46 = vrot.slane %v4774_v10, 4  ;;  %v4771_v1 = vrot.slane %v4769_v2, 5  ;;  %v4793_v36 = vrot.slane %v4791_v50, 5 }
 0x386   : > { %7684 = vmatmul.msk.bf16.gmra.mxu0 %vm3910_vm7, %v5776_v34  ;;  %v4777_v34 = vshll.u32 %v4621_v63, 16  ;;  %v5667_v49 = vor.u32 %v5666_v52, %v5663_v33  ;;  %v5113_v53 = vrot.slane %v9670_v7, 5  ;;  %v5777_v57 = vpack.c.b16 %v5766_v48, %v5765_v54  ;;  %v7599_v52 = vld [vmem:[#allocation3 + $0x60] sm:$0xf]  ;;  %v7892_v63 = vld [vmem:[#allocation3 + $0x64] sm:$0xf0] }
 0x387   : > { %v4363_v62 = vpop.f32.mrf.mxu3  ;;  %v4767_v18 = vrot.slane %v4766_v21, 4  ;;  %v5684_v33 = vshll.u32 %v9687_v40, 16  ;;  %v4758_v31 = vsel %vm8526_vm8, %v4753_v15, %v9676_v45  ;;  %v4797_v13 = vshll.u32 %v9670_v7, 16 }
 0x388   : > { %v3956_v42 = vpop.f32.mrf.mxu1  ;;  %v4108_v20 = vpop.f32.mrf.mxu2  ;;  %v4779_v4 = vrot.slane %v4777_v34, 5  ;;  %v5114_v27 = vsel %vm8620_vm12, %v7520_v58, %v5113_v53  ;;  %v7600_v34 = vor.u32 %v7892_v63, %v7599_v52  ;;  %v9716_v7 = vunpack.c.l.b16 %v4758_v31  ;;  %v9735_v63 = vld [vmem:[#allocation3 + $0x74] sm:$0xf0] }
 0x389   : > { %v4106_v12 = vadd.f32 %v4105_v14, %v3956_v42  ;;  %v9668_v14 = vld [vmem:[#allocation3 + $0x6c] sm:$0x1]  ;;  %v5681_v42 = vor.u32 %v5680_v0, %v5677_v60  ;;  %v5686_v54 = vrot.slane %v5684_v33, 5  ;;  %v5155_v15 = vunpack.c.l.b16 %v5114_v27 }
 0x38a   : > { %v5109_v43 = vrot.slane %v9668_v14, 5  ;;  %v4783_v59 = vshll.u32 %v9668_v14, 16  ;;  %v4780_v2 = vor.u32 %v4779_v4, %v4776_v46  ;;  %v4799_v4 = vrot.slane %v4797_v13, 5 }
 0x38b   : > { %v9662_v38 = vadd.f32 %v4363_v62, %v4106_v12  ;;  %v5668_v12 = vrot.slane %v5667_v49, 4  ;;  %v4790_v62 = vrot.slane %v4788_v8, 4  ;;  %v5682_v21 = vrot.slane %v5681_v42, 4  ;;  %v9711_v49 = vld [vmem:[#allocation3 + $0x7c] sm:$0x1] }
 0x38c   : > { %7640 = vmatmul.msk.bf16.gmra.mxu3 %vm3910_vm7, %v7596_v26  ;;  %v5110_v61 = vsel %vm8620_vm12, %v7519_v9, %v5109_v43  ;;  %v9713_v8 = vld [vmem:[#allocation3 + $0x84] sm:$0x1]  ;;  %v4785_v9 = vrot.slane %v4783_v59, 5  ;;  %v5031_v43 = vld [vmem:[#allocation3 + $0x78] sm:$0xe]  ;;  %v4781_v37 = vrot.slane %v4780_v2, 4 }
 0x38d   : > { %v5673_v60 = vsel %vm8526_vm8, %v5668_v12, %v5672_v23  ;;  %v4794_v0 = vor.u32 %v4793_v36, %v4790_v62  ;;  %v5154_v14 = vunpack.c.l.b16 %v5110_v61  ;;  %v5687_v58 = vsel %vm8526_vm8, %v5682_v21, %v5686_v54 }
 0x38e   : > { %v9722_v53 = vunpack.c.l.b16 %v5673_v60  ;;  %v9733_v52 = vunpack.c.l.b16 %v5687_v58  ;;  %v5117_v31 = vrot.slane %v9711_v49, 5  ;;  %v5121_v23 = vrot.slane %v9713_v8, 5 }
 0x38f   : > { %v4366_v26 = vpop.f32.mrf.mxu3  ;;  %v4795_v46 = vrot.slane %v4794_v0, 4  ;;  %v4786_v59 = vsel %vm8526_vm8, %v4781_v37, %v4785_v9  ;;  %v5165_v2 = vpack.c.b16 %v5155_v15, %v5154_v14  ;;  %v5914_v9 = vld [vmem:[#allocation3 + $0x60] sm:$0xe] }
 0x390   : > { %v3959_v29 = vpop.f32.mrf.mxu1  ;;  %v4110_v41 = vpop.f32.mrf.mxu2  ;;  %v9756_v14 = vunpack.c.l.b16 %v4786_v59 }
 0x391   : > { %v4109_v35 = vadd.f32 %v4108_v20, %v3959_v29  ;;  %v5512_v20 = vld [vmem:[#allocation3 + $0x80] sm:$0xf]  ;;  %v5514_v29 = vld [vmem:[#allocation3 + $0x88] sm:$0xf]  ;;  %v4800_v13 = vsel %vm8526_vm8, %v4795_v46, %v4799_v4  ;;  %v5916_v46 = vld [vmem:[#allocation3 + $0x70] sm:$0xe] }
 0x392   : > { %v5689_v45 = vshrl.u32 %v5512_v20, 16  ;;  %v5692_v10 = vshll.u32 %v5512_v20, 16  ;;  %v5703_v61 = vshrl.u32 %v5514_v29, 16  ;;  %v5706_v33 = vshll.u32 %v5514_v29, 16  ;;  %v7909_v20 = vld [vmem:[%s8273_s19 + $0x188] sm:$0xff] }
 0x393   : > { %v9690_v22 = vadd.f32 %v4366_v26, %v4109_v35  ;;  %7504 = vmatmul.msk.bf16.gmra.mxu1 %vm3910_vm7, %v4889_v32  ;;  %v4772_v32 = vsel %vm8526_vm8, %v4767_v18, %v4771_v1  ;;  %v5032_v35 = vld [vmem:[#allocation3 + $0x80] sm:$0xe]  ;;  %v9724_v26 = vld [vmem:[#allocation3 + $0x84] sm:$0x1]  ;;  %v9726_v1 = vld [vmem:[#allocation3 + $0x8c] sm:$0x1]  ;;  %v9766_v58 = vunpack.c.l.b16 %v4800_v13 }
 0x394   : > { %v9718_v48 = vunpack.c.l.b16 %v4772_v32  ;;  %v5691_v12 = vrot.slane %v5689_v45, 4  ;;  %v5694_v62 = vrot.slane %v5692_v10, 5  ;;  %v7522_v27 = vrot.slane %v5032_v35, 9  ;;  %6121 = vmatpush.bf16.msra.mxu1 %v7909_v20  ;;  %v5919_v13 = vld [vmem:[#allocation3 + $0x88] sm:$0xe] }
 0x395   : > { %7565 = vmatmul.msk.bf16.gmra.mxu2 %vm3910_vm7, %v9660_v55  ;;  %v5698_v32 = vshll.u32 %v9724_v26, 16  ;;  %v5712_v21 = vshll.u32 %v9726_v1, 16  ;;  %v5705_v10 = vrot.slane %v5703_v61, 4  ;;  %v5708_v54 = vrot.slane %v5706_v33, 5  ;;  %v5917_v33 = vld [vmem:[#allocation3 + $0x78] sm:$0xe] }
 0x396   : > { %7685 = vmatmul.msk.bf16.gmra.mxu0 %vm3910_vm7, %v5777_v57  ;;  %v7521_v57 = vrot.slane %v5031_v43, 9  ;;  %v5695_v60 = vor.u32 %v5694_v62, %v5691_v12  ;;  %v4890_v0 = vpack.c.b16 %v9718_v48, %v9716_v7  ;;  %v9752_v43 = vpop.f32.mrf.mxu0  ;;  %v9764_v7 = vsel %vm8620_vm12, %v7522_v27, %v5121_v23  ;;  %v5915_v48 = vld [vmem:[#allocation3 + $0x68] sm:$0xe]  ;;  %v5918_v27 = vld [vmem:[#allocation3 + $0x80] sm:$0xe] }
 0x397   : > { %v4368_v55 = vpop.f32.mrf.mxu3  ;;  %v9768_v37 = vrot.slane %v5698_v32, 5  ;;  %v9770_v35 = vrot.slane %v5712_v21, 5  ;;  %v5988_v61 = vrot.slane %v9641_v39, 5  ;;  %v5709_v20 = vor.u32 %v5708_v54, %v5705_v10  ;;  %v9788_v10 = vld [vmem:[#allocation3 + $0x94] sm:$0x1] }
 0x398   : > { %v3961_v50 = vpop.f32.mrf.mxu1  ;;  %v4113_v42 = vpop.f32.mrf.mxu2  ;;  %v9760_v15 = vsel %vm8620_vm12, %v7521_v57, %v5117_v31  ;;  %v9774_v12 = vrot.slane %v5695_v60, 4  ;;  %v7697_v57 = vrot.slane %v5914_v9, 9  ;;  %v7698_v31 = vrot.slane %v5915_v48, 9 }
 0x399   : > { %v4111_v18 = vadd.f32 %v4110_v41, %v3961_v50  ;;  %v9730_v41 = vld [vmem:[#allocation3 + $0x70] sm:$0xf]  ;;  %v9750_v50 = vld [vmem:[#allocation3 + $0x78] sm:$0xf]  ;;  %v5992_v32 = vrot.slane %v9643_v11, 5  ;;  %v7699_v21 = vrot.slane %v5916_v46, 9 }
 0x39a   : > { %v7604_v45 = vor.u32 %v9735_v63, %v9730_v41  ;;  %v4802_v62 = vshrl.u32 %v9750_v50, 16  ;;  %v5989_v59 = vsel %vm8620_vm12, %v7697_v57, %v5988_v61  ;;  %v5996_v9 = vrot.slane %v9679_v3, 5  ;;  %v5920_v3 = vld [vmem:[#allocation3 + $0x90] sm:$0xe]  ;;  %v5921_v46 = vld [vmem:[#allocation3 + $0x98] sm:$0xe] }
 0x39b   : > { %v9728_v36 = vadd.f32 %v4368_v55, %v4111_v18  ;;  %v6039_v60 = vunpack.c.l.b16 %v5989_v59  ;;  %v5993_v54 = vsel %vm8620_vm12, %v7698_v31, %v5992_v32  ;;  %v6004_v48 = vrot.slane %v9724_v26, 5  ;;  %v9798_v61 = vld [vmem:[#allocation3 + $0x9c] sm:$0x1] }
 0x39c   : > { %7641 = vmatmul.msk.bf16.gmra.mxu3 %vm3910_vm7, %v7600_v34  ;;  %v5778_v34 = vpack.c.b16 %v9733_v52, %v9722_v53  ;;  %v9772_v53 = vld [vmem:[#allocation3 + $0x80] sm:$0xf]  ;;  %v4805_v52 = vshll.u32 %v9750_v50, 16  ;;  %v6000_v50 = vrot.slane %v9687_v40, 5  ;;  %v5710_v11 = vrot.slane %v5709_v20, 4 }
 0x39d   : > { %v4816_v23 = vshrl.u32 %v9772_v53, 16  ;;  %v4819_v39 = vshll.u32 %v9772_v53, 16  ;;  %v7702_v53 = vrot.slane %v5919_v13, 9  ;;  %v4891_v41 = vpack.c.b16 %v9766_v58, %v9756_v14 }
 0x39e   : > { %v5156_v63 = vunpack.c.l.b16 %v9760_v15 }
 0x39f   : > { %v4371_v55 = vpop.f32.mrf.mxu3 }
 0x3a0   : > { %v3964_v29 = vpop.f32.mrf.mxu1  ;;  %v4115_v4 = vpop.f32.mrf.mxu2 }
 0x3a1   : > { %v4114_v18 = vadd.f32 %v4113_v42, %v3964_v29  ;;  %v7701_v29 = vrot.slane %v5918_v27, 9 }
 0x3a3   : > { %v9778_v42 = vadd.f32 %v4371_v55, %v4114_v18  ;;  %7505 = vmatmul.msk.bf16.gmra.mxu1 %vm3910_vm7, %v4890_v0  ;;  %v7700_v0 = vrot.slane %v5917_v33, 9  ;;  %v6040_v18 = vunpack.c.l.b16 %v5993_v54  ;;  %v5997_v55 = vsel %vm8620_vm12, %v7699_v21, %v5996_v9  ;;  %v9807_v21 = vpop.f32.mrf.mxu0 }
 0x3a4   : > { %v6041_v33 = vunpack.c.l.b16 %v5997_v55  ;;  %v6005_v26 = vsel %vm8620_vm12, %v7701_v29, %v6004_v48  ;;  %v7703_v9 = vrot.slane %v5920_v3, 9  ;;  %v7704_v54 = vrot.slane %v5921_v46, 9  ;;  %v5516_v29 = vld [vmem:[#allocation3 + $0x90] sm:$0xf] }
 0x3a5   : > { %7566 = vmatmul.msk.bf16.gmra.mxu2 %vm3910_vm7, %v5165_v2  ;;  %v6001_v40 = vsel %vm8620_vm12, %v7700_v0, %v6000_v50  ;;  %v6008_v2 = vrot.slane %v9726_v1, 5  ;;  %v9805_v27 = vpack.c.b16 %v6040_v18, %v6039_v60  ;;  %v6043_v32 = vunpack.c.l.b16 %v6005_v26 }
 0x3a6   : > { %7686 = vmatmul.msk.bf16.gmra.mxu0 %vm3910_vm7, %v5778_v34  ;;  %v6042_v59 = vunpack.c.l.b16 %v6001_v40  ;;  %v6012_v0 = vrot.slane %v9788_v10, 5  ;;  %v6016_v60 = vrot.slane %v9798_v61, 5  ;;  %v4804_v48 = vrot.slane %v4802_v62, 4 }
 0x3a7   : > { %v4373_v31 = vpop.f32.mrf.mxu3  ;;  %v6009_v13 = vsel %vm8620_vm12, %v7702_v53, %v6008_v2  ;;  %v4807_v18 = vrot.slane %v4805_v52, 5  ;;  %v4818_v55 = vrot.slane %v4816_v23, 4  ;;  %v4821_v3 = vrot.slane %v4819_v39, 5  ;;  %v7908_v23 = vld [vmem:[%s8273_s19 + $0x180] sm:$0xff] }
 0x3a8   : > { %v3966_v57 = vpop.f32.mrf.mxu1  ;;  %v4118_v34 = vpop.f32.mrf.mxu2  ;;  %v9814_v1 = vpack.c.b16 %v6042_v59, %v6041_v33  ;;  %v6013_v53 = vsel %vm8620_vm12, %v7703_v9, %v6012_v0  ;;  %v6017_v46 = vsel %vm8620_vm12, %v7704_v54, %v6016_v60  ;;  %v5701_v62 = vsel %vm8526_vm8, %v9774_v12, %v9768_v37  ;;  %6122 = vmatpush.bf16.msra.mxu1 %v7908_v23  ;;  %v4629_v23 = vld [vmem:[#allocation3 + $0x88] sm:$0xf] }
 0x3a9   : > { %v4116_v20 = vadd.f32 %v4115_v4, %v3966_v57  ;;  %v6044_v4 = vunpack.c.l.b16 %v6009_v13  ;;  %v5518_v57 = vld [vmem:[#allocation3 + $0x98] sm:$0xf]  ;;  %v6045_v26 = vunpack.c.l.b16 %v6013_v53  ;;  %v5717_v52 = vshrl.u32 %v5516_v29, 16  ;;  %v5034_v53 = vld [vmem:[#allocation3 + $0x90] sm:$0xe] }
 0x3aa   : > { %v6046_v33 = vunpack.c.l.b16 %v6017_v46  ;;  %v5715_v39 = vsel %vm8526_vm8, %v5710_v11, %v9770_v35  ;;  %v5720_v2 = vshll.u32 %v5516_v29, 16  ;;  %v4808_v13 = vor.u32 %v4807_v18, %v4804_v48  ;;  %v9850_v48 = vld [vmem:[#allocation3 + $0x94] sm:$0x1] }
 0x3ab   : > { %v9812_v50 = vadd.f32 %v4373_v31, %v4116_v20  ;;  %v9819_v40 = vpack.c.b16 %v6044_v4, %v6043_v32  ;;  %v5731_v20 = vshrl.u32 %v5518_v57, 16  ;;  %v5734_v31 = vshll.u32 %v5518_v57, 16  ;;  %v9846_v60 = vpop.f32.mrf.mxu0  ;;  %v5033_v57 = vld [vmem:[#allocation3 + $0x88] sm:$0xe] }
 0x3ac   : > { %7642 = vmatmul.msk.bf16.gmra.mxu3 %vm3910_vm7, %v7604_v45  ;;  %v5157_v45 = vunpack.c.l.b16 %v9764_v7  ;;  %v9839_v37 = vpack.c.b16 %v6046_v33, %v6045_v26  ;;  %v4811_v9 = vshll.u32 %v9711_v49, 16  ;;  %v4822_v35 = vor.u32 %v4821_v3, %v4818_v55  ;;  %v4631_v33 = vld [vmem:[#allocation3 + $0x90] sm:$0xf] }
 0x3ad   : > { %v5769_v0 = vunpack.c.l.b16 %v5701_v62  ;;  %v5770_v54 = vunpack.c.l.b16 %v5715_v39  ;;  %v4825_v29 = vshll.u32 %v9713_v8, 16  ;;  %v5719_v4 = vrot.slane %v5717_v52, 4 }
 0x3ae   : > { %v5722_v15 = vrot.slane %v5720_v2, 5  ;;  %v5733_v7 = vrot.slane %v5731_v20, 4  ;;  %v5736_v58 = vrot.slane %v5734_v31, 5  ;;  %v5166_v49 = vpack.c.b16 %v5157_v45, %v5156_v63  ;;  %v7607_v45 = vld [vmem:[#allocation3 + $0x80] sm:$0xf] }
 0x3af   : > { %v4376_v32 = vpop.f32.mrf.mxu3  ;;  %v4809_v18 = vrot.slane %v4808_v13, 4  ;;  %v4823_v55 = vrot.slane %v4822_v35, 4  ;;  %v5779_v8 = vpack.c.b16 %v5770_v54, %v5769_v0  ;;  %v4813_v3 = vrot.slane %v4811_v9, 5 }
 0x3b0   : > { %v3969_v59 = vpop.f32.mrf.mxu1  ;;  %v4120_v11 = vpop.f32.mrf.mxu2  ;;  %v4827_v46 = vrot.slane %v4825_v29, 5  ;;  %v5723_v26 = vor.u32 %v5722_v15, %v5719_v4  ;;  %v5737_v62 = vor.u32 %v5736_v58, %v5733_v7  ;;  %v5740_v52 = vshll.u32 %v9798_v61, 16 }
 0x3b1   : > { %v4119_v12 = vadd.f32 %v4118_v34, %v3969_v59  ;;  %v9848_v34 = vld [vmem:[#allocation3 + $0x8c] sm:$0x1]  ;;  %v7523_v2 = vrot.slane %v5033_v57, 9  ;;  %v7524_v31 = vrot.slane %v5034_v53, 9  ;;  %v5129_v59 = vrot.slane %v9850_v48, 5 }
 0x3b2   : > { %v5125_v20 = vrot.slane %v9848_v34, 5  ;;  %v4828_v61 = vsel %vm8526_vm8, %v4823_v55, %v4827_v46  ;;  %v5726_v13 = vshll.u32 %v9788_v10, 16  ;;  %v4830_v35 = vshrl.u32 %v4629_v23, 16 }
 0x3b3   : > { %v9843_v14 = vadd.f32 %v4376_v32, %v4119_v12  ;;  %7506 = vmatmul.msk.bf16.gmra.mxu1 %vm3910_vm7, %v4891_v41  ;;  %v7894_v12 = vld [vmem:[#allocation3 + $0x84] sm:$0xf0]  ;;  %v4814_v32 = vsel %vm8526_vm8, %v4809_v18, %v4813_v3  ;;  %v4833_v0 = vshll.u32 %v4629_v23, 16  ;;  %v4844_v54 = vshrl.u32 %v4631_v33, 16  ;;  %v9868_v53 = vpop.f32.mrf.mxu0 }
 0x3b4   : > { %v4847_v29 = vshll.u32 %v4631_v33, 16  ;;  %v5724_v15 = vrot.slane %v5723_v26, 4  ;;  %v5742_v7 = vrot.slane %v5740_v52, 5  ;;  %v7608_v58 = vor.u32 %v7894_v12, %v7607_v45 }
 0x3b5   : > { %7567 = vmatmul.msk.bf16.gmra.mxu2 %vm3910_vm7, %v5166_v49  ;;  %v5126_v49 = vsel %vm8620_vm12, %v7523_v2, %v5125_v20  ;;  %v4882_v18 = vunpack.c.l.b16 %v4814_v32  ;;  %v4883_v57 = vunpack.c.l.b16 %v4828_v61  ;;  %v5130_v55 = vsel %vm8620_vm12, %v7524_v31, %v5129_v59 }
 0x3b6   : > { %7687 = vmatmul.msk.bf16.gmra.mxu0 %vm3910_vm7, %v5779_v8  ;;  %v5728_v10 = vrot.slane %v5726_v13, 5  ;;  %v4832_v8 = vrot.slane %v4830_v35, 4  ;;  %v4835_v3 = vrot.slane %v4833_v0, 5  ;;  %v4846_v46 = vrot.slane %v4844_v54, 4 }
 0x3b7   : > { %v4378_v63 = vpop.f32.mrf.mxu3  ;;  %v4849_v26 = vrot.slane %v4847_v29, 5  ;;  %v4892_v2 = vpack.c.b16 %v4883_v57, %v4882_v18  ;;  %v5158_v20 = vunpack.c.l.b16 %v5126_v49  ;;  %v5159_v31 = vunpack.c.l.b16 %v5130_v55  ;;  %v7611_v18 = vld [vmem:[#allocation3 + $0x90] sm:$0xf]  ;;  %v7895_v57 = vld [vmem:[#allocation3 + $0x94] sm:$0xf0] }
 0x3b8   : > { %v3971_v39 = vpop.f32.mrf.mxu1  ;;  %v4123_v9 = vpop.f32.mrf.mxu2  ;;  %v4836_v45 = vor.u32 %v4835_v3, %v4832_v8  ;;  %v4839_v61 = vshll.u32 %v9848_v34, 16  ;;  %v4853_v13 = vshll.u32 %v9850_v48, 16  ;;  %v7612_v8 = vor.u32 %v7895_v57, %v7611_v18 }
 0x3b9   : > { %v4121_v41 = vadd.f32 %v4120_v11, %v3971_v39  ;;  %v5738_v11 = vrot.slane %v5737_v62, 4  ;;  %v5729_v62 = vsel %vm8526_vm8, %v5724_v15, %v5728_v10  ;;  %v4850_v12 = vor.u32 %v4849_v26, %v4846_v46 }
 0x3ba   : > { %v5167_v35 = vpack.c.b16 %v5159_v31, %v5158_v20  ;;  %v5907_v20 = vld [vmem:[#allocation3 + $0x18] sm:$0xe]  ;;  %v8012_v31 = vld [vmem:[#allocation3 + $0x14] sm:$0x1] }
 0x3bb   : > { %v9862_v4 = vadd.f32 %v4378_v63, %v4121_v41  ;;  %v5743_v52 = vsel %vm8526_vm8, %v5738_v11, %v5742_v7  ;;  %v5771_v41 = vunpack.c.l.b16 %v5729_v62  ;;  %v4851_v54 = vrot.slane %v4850_v12, 4  ;;  %v9881_v29 = vpop.f32.mrf.mxu0 }
 0x3bc   : > { %7643 = vmatmul.msk.bf16.gmra.mxu3 %vm3910_vm7, %v7608_v58  ;;  %v5772_v63 = vunpack.c.l.b16 %v5743_v52  ;;  %v4841_v11 = vrot.slane %v4839_v61, 5  ;;  %v4855_v7 = vrot.slane %v4853_v13, 5 }
 0x3be   : > { %v5780_v0 = vpack.c.b16 %v5772_v63, %v5771_v41  ;;  %v4856_v55 = vsel %vm8526_vm8, %v4851_v54, %v4855_v7  ;;  %v7690_v41 = vrot.slane %v5907_v20, 9  ;;  %v8013_v63 = vld [vmem:[#allocation3 + $0x1c] sm:$0x1]  ;;  %v4585_v7 = vadd.f32 %v9633_v6, %v9558_v56 }
 0x3bf   : > { %v4381_v39 = vpop.f32.mrf.mxu3  ;;  %v4885_v46 = vunpack.c.l.b16 %v4856_v55  ;;  %v5908_v55 = vld [vmem:[#allocation3 + $0x20] sm:$0xe]  ;;  %v4586_v6 = vadd.f32 %v9672_v24, %v9571_v44  ;;  %v4587_v44 = vadd.f32 %v9705_v17, %v9588_v51  ;;  %v4588_v51 = vadd.f32 %v9752_v43, %v9618_v19 }
 0x3c0   : > { %v3974_v23 = vpop.f32.mrf.mxu1  ;;  %v4125_v59 = vpop.f32.mrf.mxu2 }
 0x3c1   : > { %v4124_v33 = vadd.f32 %v4123_v9, %v3974_v23  ;;  %v4837_v9 = vrot.slane %v4836_v45, 4  ;;  %v5960_v45 = vrot.slane %v8013_v63, 5 }
 0x3c3   : > { %v9875_v32 = vadd.f32 %v4381_v39, %v4124_v33  ;;  %7507 = vmatmul.msk.bf16.gmra.mxu1 %vm3910_vm7, %v4892_v2  ;;  %v4842_v48 = vsel %vm8526_vm8, %v4837_v9, %v4841_v11  ;;  %v5906_v2 = vld [vmem:[#allocation3 + $0x10] sm:$0xe]  ;;  %v5961_v9 = vsel %vm8620_vm12, %v7690_v41, %v5960_v45 }
 0x3c4   : > { %v4884_v3 = vunpack.c.l.b16 %v4842_v48  ;;  %v7689_v28 = vrot.slane %v5906_v2, 9  ;;  %v6032_v11 = vunpack.c.l.b16 %v5961_v9 }
 0x3c5   : > { %7568 = vmatmul.msk.bf16.gmra.mxu2 %vm3910_vm7, %v5167_v35 }
 0x3c6   : > { %7688 = vmatmul.msk.bf16.gmra.mxu0 %vm3910_vm7, %v5780_v0  ;;  %v4893_v23 = vpack.c.b16 %v4885_v46, %v4884_v3 }
 0x3c7   : > { %v4383_v49 = vpop.f32.mrf.mxu3 }
 0x3c8   : > { %v3976_v15 = vpop.f32.mrf.mxu1  ;;  %v4128_v34 = vpop.f32.mrf.mxu2 }
 0x3c9   : > { %v4126_v58 = vadd.f32 %v4125_v59, %v3976_v15  ;;  %v5956_v59 = vrot.slane %v8012_v31, 5 }
 0x3cb   : > { %v9888_v10 = vadd.f32 %v4383_v49, %v4126_v58  ;;  %v5957_v0 = vsel %vm8620_vm12, %v7689_v28, %v5956_v59 }
 0x3cc   : > { %7644 = vmatmul.msk.bf16.gmra.mxu3 %vm3910_vm7, %v7612_v8  ;;  %v6031_v15 = vunpack.c.l.b16 %v5957_v0  ;;  %v5909_v8 = vld [vmem:[#allocation3 + $0x28] sm:$0xe] }
 0x3ce   : > { %v6047_v57 = vpack.c.b16 %v6032_v11, %v6031_v15  ;;  %v5910_v11 = vld [vmem:[#allocation3 + $0x30] sm:$0xe] }
 0x3cf   : > { %v4386_v52 = vpop.f32.mrf.mxu3 }
 0x3d0   : > { %v3979_v26 = vpop.f32.mrf.mxu1  ;;  %v4130_v33 = vpop.f32.mrf.mxu2 }
 0x3d1   : > { %v4129_v62 = vadd.f32 %v4128_v34, %v3979_v26  ;;  %v9902_v34 = vpop.f32.mrf.mxu0  ;;  %v7691_v26 = vrot.slane %v5908_v55, 9  ;;  %v8017_v55 = vld [vmem:[#allocation3 + $0x3c] sm:$0x1] }
 0x3d2   : > { %v4593_v47 = vadd.f32 %v9902_v34, %v9778_v42 }
 0x3d3   : > { %v9891_v39 = vadd.f32 %v4386_v52, %v4129_v62  ;;  %7508 = vmatmul.msk.bf16.gmra.mxu1 %vm3910_vm7, %v4893_v23  ;;  %v8014_v62 = vld [vmem:[#allocation3 + $0x24] sm:$0x1]  ;;  %v7692_v23 = vrot.slane %v5909_v8, 9  ;;  %v5976_v8 = vrot.slane %v8017_v55, 5 }
 0x3d4   : > { %v5964_v52 = vrot.slane %v8014_v62, 5 }
 0x3d6   : > { %v5965_v31 = vsel %vm8620_vm12, %v7691_v26, %v5964_v52 }
 0x3d7   : > { %v4388_v13 = vpop.f32.mrf.mxu3 }
 0x3d8   : > { %v3981_v12 = vpop.f32.mrf.mxu1  ;;  %v5237_v35 = vpop.f32.mrf.mxu2 }
 0x3d9   : > { %v4131_v61 = vadd.f32 %v4130_v33, %v3981_v12  ;;  %v8015_v33 = vld [vmem:[#allocation3 + $0x2c] sm:$0x1]  ;;  %v9913_v63 = vpop.f32.mrf.mxu0  ;;  %v6033_v12 = vunpack.c.l.b16 %v5965_v31 }
 0x3da   : > { %v5968_v56 = vrot.slane %v8015_v33, 5 }
 0x3db   : > { %v9898_v54 = vadd.f32 %v4388_v13, %v4131_v61 }
 0x3dc   : > { %v5969_v59 = vsel %vm8620_vm12, %v7692_v23, %v5968_v56 }
 0x3dd   : > { %v6034_v61 = vunpack.c.l.b16 %v5969_v59 }
 0x3df   : > { %v5432_v18 = vpop.f32.mrf.mxu3  ;;  %v6048_v9 = vpack.c.b16 %v6034_v61, %v6033_v12  ;;  %v5912_v61 = vld [vmem:[#allocation3 + $0x40] sm:$0xe] }
 0x3e0   : > { %v4963_v58 = vpop.f32.mrf.mxu1  ;;  %v5239_v3 = vpop.f32.mrf.mxu2 }
 0x3e1   : > { %v5003_v49 = vadd.f32 %v4963_v58, %v4585_v7  ;;  %v5911_v7 = vld [vmem:[#allocation3 + $0x38] sm:$0xe] }
 0x3e3   : > { %v5277_v48 = vadd.f32 %v5237_v35, %v5003_v49  ;;  %7741 = vmatmul.msk.bf16.vlgmr.msra.gmra.mxu1 %vm3910_vm7, %v6047_v57  ;;  %v7693_v49 = vrot.slane %v5910_v11, 9  ;;  %v8019_v11 = vld [vmem:[#allocation3 + $0x4c] sm:$0x1] }
 0x3e5   : > { %v9905_v46 = vadd.f32 %v5432_v18, %v5277_v48  ;;  %v8016_v18 = vld [vmem:[#allocation3 + $0x34] sm:$0x1]  ;;  %v7694_v48 = vrot.slane %v5911_v7, 9  ;;  %v5984_v7 = vrot.slane %v8019_v11, 5 }
 0x3e6   : > { %v5972_v57 = vrot.slane %v8016_v18, 5 }
 0x3e7   : > { %v5434_v28 = vpop.f32.mrf.mxu3  ;;  %v5977_v33 = vsel %vm8620_vm12, %v7694_v48, %v5976_v8 }
 0x3e8   : > { %v4965_v2 = vpop.f32.mrf.mxu1  ;;  %v5242_v13 = vpop.f32.mrf.mxu2  ;;  %v5973_v23 = vsel %vm8620_vm12, %v7693_v49, %v5972_v57 }
 0x3e9   : > { %v5004_v20 = vadd.f32 %v4965_v2, %v4586_v6  ;;  %v6035_v2 = vunpack.c.l.b16 %v5973_v23 }
 0x3eb   : > { %v5278_v41 = vadd.f32 %v5239_v3, %v5004_v20  ;;  %v4570_v3 = vpop.f32.mrf.mxu0  ;;  %v6036_v20 = vunpack.c.l.b16 %v5977_v33 }
 0x3ed   : > { %v9915_v45 = vadd.f32 %v5434_v28, %v5278_v41  ;;  %v4589_v28 = vadd.f32 %v9807_v21, %v9645_v5  ;;  %v6049_v43 = vpack.c.b16 %v6036_v20, %v6035_v2  ;;  %v4590_v5 = vadd.f32 %v9846_v60, %v9662_v38 }
 0x3ee   : > { %v4592_v60 = vadd.f32 %v9881_v29, %v9728_v36  ;;  %v4595_v29 = vadd.f32 %v4570_v3, %v9843_v14 }
 0x3ef   : > { %v5437_v0 = vpop.f32.mrf.mxu3 }
 0x3f0   : > { %v4968_v24 = vpop.f32.mrf.mxu1  ;;  %v5244_v17 = vpop.f32.mrf.mxu2 }
 0x3f1   : > { %v5005_v35 = vadd.f32 %v4968_v24, %v4587_v44 }
 0x3f3   : > { %v5279_v15 = vadd.f32 %v5242_v13, %v5005_v35  ;;  %7742 = vmatmul.msk.bf16.gmra.mxu1 %vm3910_vm7, %v6048_v9  ;;  %v4572_v59 = vpop.f32.mrf.mxu0  ;;  %v5913_v13 = vld [vmem:[#allocation3 + $0x48] sm:$0xe]  ;;  %v7695_v35 = vrot.slane %v5912_v61, 9 }
 0x3f4   : > { %v4596_v34 = vadd.f32 %v4572_v59, %v9862_v4 }
 0x3f5   : > { %v9920_v58 = vadd.f32 %v5437_v0, %v5279_v15  ;;  %v8018_v0 = vld [vmem:[#allocation3 + $0x44] sm:$0x1]  ;;  %v7696_v15 = vrot.slane %v5913_v13, 9 }
 0x3f6   : > { %v5980_v9 = vrot.slane %v8018_v0, 5 }
 0x3f7   : > { %v5439_v52 = vpop.f32.mrf.mxu3  ;;  %v5985_v57 = vsel %vm8620_vm12, %v7696_v15, %v5984_v7 }
 0x3f8   : > { %v4970_v26 = vpop.f32.mrf.mxu1  ;;  %v5247_v41 = vpop.f32.mrf.mxu2  ;;  %v5981_v18 = vsel %vm8620_vm12, %v7695_v35, %v5980_v9  ;;  %v6038_v8 = vunpack.c.l.b16 %v5985_v57 }
 0x3f9   : > { %v5006_v62 = vadd.f32 %v4970_v26, %v4588_v51  ;;  %v6037_v55 = vunpack.c.l.b16 %v5981_v18  ;;  %v4591_v51 = vadd.f32 %v9868_v53, %v9690_v22  ;;  %v4594_v22 = vadd.f32 %v9913_v63, %v9812_v50 }
 0x3fb   : > { %v5280_v56 = vadd.f32 %v5244_v17, %v5006_v62  ;;  %v4575_v48 = vpop.f32.mrf.mxu0  ;;  %v6050_v62 = vpack.c.b16 %v6038_v8, %v6037_v55 }
 0x3fc   : > { %v4597_v50 = vadd.f32 %v4575_v48, %v9875_v32 }
 0x3fd   : > { %v9928_v6 = vadd.f32 %v5439_v52, %v5280_v56 }
 0x3ff   : > { %v5442_v44 = vpop.f32.mrf.mxu3 }
 0x400   : > { %v4973_v31 = vpop.f32.mrf.mxu1 }
 0x401   : > { %v5007_v19 = vadd.f32 %v4973_v31, %v4589_v28 }
 0x403   : > { %v5281_v12 = vadd.f32 %v5247_v41, %v5007_v19  ;;  %7743 = vmatmul.msk.bf16.gmra.mxu1 %vm3910_vm7, %v6049_v43  ;;  %v4577_v38 = vpop.f32.mrf.mxu0 }
 0x404   : > { %v4598_v14 = vadd.f32 %v4577_v38, %v9888_v10 }
 0x405   : > { %v5476_v24 = vadd.f32 %v5442_v44, %v5281_v12 }
 0x408   : > { %v4975_v21 = vpop.f32.mrf.mxu1 }
 0x409   : > { %v9935_v49 = vadd.f32 %v4975_v21, %v4590_v5  ;;  %v5249_v5 = vpop.f32.mrf.mxu2  ;;  %v5444_v21 = vpop.f32.mrf.mxu3 }
 0x40b   : > { %v4580_v33 = vpop.f32.mrf.mxu0 }
 0x40c   : > { %v4599_v4 = vadd.f32 %v4580_v33, %v9891_v39 }
 0x410   : > { %v4978_v17 = vpop.f32.mrf.mxu1 }
 0x411   : > { %v9943_v26 = vadd.f32 %v4978_v17, %v4591_v51  ;;  %v5252_v48 = vpop.f32.mrf.mxu2 }
 0x413   : > { %7744 = vmatmul.msk.bf16.gmra.mxu1 %vm3910_vm7, %v6050_v62  ;;  %v4582_v36 = vpop.f32.mrf.mxu0 }
 0x414   : > { %v4600_v32 = vadd.f32 %v4582_v36, %v9898_v54 }
 0x418   : > { %v4980_v52 = vpop.f32.mrf.mxu1 }
 0x419   : > { %v9948_v23 = vadd.f32 %v4980_v52, %v4592_v60 }
 0x41b   : > { %v5850_v42 = vpop.f32.mrf.mxu0 }
 0x41c   : > { %v5890_v0 = vadd.f32 %v5850_v42, %v9905_v46 }
 0x420   : > { %v4983_v56 = vpop.f32.mrf.mxu1 }
 0x421   : > { %v9952_v2 = vadd.f32 %v4983_v56, %v4593_v47 }
 0x423   : > { %7745 = vmatmul.msk.bf16.gmra.mxu1 %vm3910_vm7, %v9805_v27  ;;  %v5852_v43 = vpop.f32.mrf.mxu0 }
 0x424   : > { %v5891_v39 = vadd.f32 %v5852_v43, %v9915_v45 }
 0x428   : > { %v4985_v53 = vpop.f32.mrf.mxu1 }
 0x429   : > { %v9958_v20 = vadd.f32 %v4985_v53, %v4594_v22  ;;  %v5254_v22 = vpop.f32.mrf.mxu2  ;;  %v5282_v53 = vadd.f32 %v5249_v5, %v9935_v49 }
 0x42b   : > { %v5855_v3 = vpop.f32.mrf.mxu0 }
 0x430   : > { %v4988_v28 = vpop.f32.mrf.mxu1 }
 0x431   : > { %v9961_v31 = vadd.f32 %v4988_v28, %v4595_v29  ;;  %v5477_v28 = vadd.f32 %v5444_v21, %v5282_v53 }
 0x433   : > { %7746 = vmatmul.msk.bf16.gmra.mxu1 %vm3910_vm7, %v9814_v1  ;;  %v5857_v13 = vpop.f32.mrf.mxu0 }
 0x434   : > { %v5893_v8 = vadd.f32 %v5857_v13, %v9928_v6 }
 0x438   : > { %v4990_v19 = vpop.f32.mrf.mxu1 }
 0x439   : > { %v9966_v27 = vadd.f32 %v4990_v19, %v4596_v34 }
 0x440   : > { %v4993_v63 = vpop.f32.mrf.mxu1 }
 0x441   : > { %v9969_v41 = vadd.f32 %v4993_v63, %v4597_v50  ;;  %v5283_v50 = vadd.f32 %v5252_v48, %v9943_v26 }
 0x443   : > { %7747 = vmatmul.msk.bf16.gmra.mxu1 %vm3910_vm7, %v9819_v40  ;;  %v5860_v40 = vpop.f32.mrf.mxu0 }
 0x444   : > { %v5894_v10 = vadd.f32 %v5860_v40, %v5476_v24 }
 0x448   : > { %v4995_v12 = vpop.f32.mrf.mxu1 }
 0x449   : > { %v9974_v1 = vadd.f32 %v4995_v12, %v4598_v14  ;;  %v5257_v14 = vpop.f32.mrf.mxu2 }
 0x44b   : > { %v5862_v57 = vpop.f32.mrf.mxu0 }
 0x44c   : > { %v5895_v63 = vadd.f32 %v5862_v57, %v5477_v28 }
 0x450   : > { %v4998_v59 = vpop.f32.mrf.mxu1 }
 0x451   : > { %v9977_v61 = vadd.f32 %v4998_v59, %v4599_v4  ;;  %v5259_v26 = vpop.f32.mrf.mxu2 }
 0x453   : > { %7748 = vmatmul.msk.bf16.gmra.mxu1 %vm3910_vm7, %v9839_v37  ;;  %v5892_v37 = vadd.f32 %v5855_v3, %v9920_v58  ;;  %v5447_v58 = vpop.f32.mrf.mxu3  ;;  %v5865_v33 = vpop.f32.mrf.mxu0 }
 0x454   : > { %v5478_v49 = vadd.f32 %v5447_v58, %v5283_v50 }
 0x456   : > { %v5896_v40 = vadd.f32 %v5865_v33, %v5478_v49 }
 0x458   : > { %v5000_v44 = vpop.f32.mrf.mxu1 }
 0x459   : > { %v9982_v35 = vadd.f32 %v5000_v44, %v4600_v32  ;;  %v5284_v44 = vadd.f32 %v5254_v22, %v9948_v23 }
 0x45b   : > { %v5449_v29 = vpop.f32.mrf.mxu3  ;;  %v5867_v43 = vpop.f32.mrf.mxu0 }
 0x460   : > { %v6124_v9 = vpop.f32.mrf.mxu1 }
 0x461   : > { %v9985_v15 = vadd.f32 %v6124_v9, %v5890_v0 }
 0x463   : > { %v6202_v24 = vmul.f32 %v9985_v15, %v9985_v15  ;;  %v5452_v13 = vpop.f32.mrf.mxu3 }
 0x468   : > { %v6126_v11 = vpop.f32.mrf.mxu1 }
 0x469   : > { %v9988_v7 = vadd.f32 %v6126_v11, %v5891_v39  ;;  %v5479_v39 = vadd.f32 %v5449_v29, %v5284_v44 }
 0x46b   : > { %v6203_v46 = vmul.f32 %v9988_v7, %v9988_v7  ;;  %v6180_v45 = vadd.f32 %v9988_v7, %v9985_v15  ;;  %v5897_v57 = vadd.f32 %v5867_v43, %v5479_v39 }
 0x46d   : > { %v6218_v17 = vadd.f32 %v6203_v46, %v6202_v24 }
 0x470   : > { %v6129_v54 = vpop.f32.mrf.mxu1 }
 0x471   : > { %v9991_v18 = vadd.f32 %v6129_v54, %v5892_v37  ;;  %v5454_v37 = vpop.f32.mrf.mxu3  ;;  %v5285_v54 = vadd.f32 %v5257_v14, %v9952_v2 }
 0x473   : > { %v6204_v55 = vmul.f32 %v9991_v18, %v9991_v18  ;;  %v6181_v62 = vadd.f32 %v6180_v45, %v9991_v18  ;;  %v5480_v24 = vadd.f32 %v5452_v13, %v5285_v54 }
 0x475   : > { %v6219_v60 = vadd.f32 %v6218_v17, %v6204_v55 }
 0x478   : > { %v6131_v51 = vpop.f32.mrf.mxu1 }
 0x479   : > { %v10003_v38 = vadd.f32 %v6131_v51, %v5893_v8  ;;  %v5262_v8 = vpop.f32.mrf.mxu2  ;;  %v5286_v51 = vadd.f32 %v5259_v26, %v9958_v20 }
 0x47b   : > { %v6182_v52 = vadd.f32 %v6181_v62, %v10003_v38  ;;  %v6205_v47 = vmul.f32 %v10003_v38, %v10003_v38  ;;  %v5457_v62 = vpop.f32.mrf.mxu3  ;;  %v5481_v2 = vadd.f32 %v5454_v37, %v5286_v51 }
 0x47d   : > { %v6220_v56 = vadd.f32 %v6219_v60, %v6205_v47 }
 0x480   : > { %v6134_v36 = vpop.f32.mrf.mxu1 }
 0x481   : > { %v10009_v6 = vadd.f32 %v6134_v36, %v5894_v10  ;;  %v5870_v10 = vpop.f32.mrf.mxu0  ;;  %v5264_v53 = vpop.f32.mrf.mxu2  ;;  %v5287_v36 = vadd.f32 %v5262_v8, %v9961_v31 }
 0x482   : > { %v5898_v17 = vadd.f32 %v5870_v10, %v5480_v24  ;;  %v5288_v14 = vadd.f32 %v5264_v53, %v9966_v27 }
 0x483   : > { %v6183_v42 = vadd.f32 %v6182_v52, %v10009_v6  ;;  %v6206_v34 = vmul.f32 %v10009_v6, %v10009_v6  ;;  %v5459_v20 = vpop.f32.mrf.mxu3 }
 0x484   : > { %v5483_v31 = vadd.f32 %v5459_v20, %v5288_v14 }
 0x485   : > { %v6221_v19 = vadd.f32 %v6220_v56, %v6206_v34  ;;  %v5482_v34 = vadd.f32 %v5457_v62, %v5287_v36 }
 0x488   : > { %v6136_v3 = vpop.f32.mrf.mxu1 }
 0x489   : > { %v10015_v12 = vadd.f32 %v6136_v3, %v5895_v63  ;;  %v5872_v23 = vpop.f32.mrf.mxu0  ;;  %v5267_v49 = vpop.f32.mrf.mxu2 }
 0x48a   : > { %v5899_v29 = vadd.f32 %v5872_v23, %v5481_v2  ;;  %v5289_v10 = vadd.f32 %v5267_v49, %v9969_v41 }
 0x48b   : > { %v6184_v4 = vadd.f32 %v6183_v42, %v10015_v12  ;;  %v6207_v59 = vmul.f32 %v10015_v12, %v10015_v12  ;;  %v5462_v44 = vpop.f32.mrf.mxu3 }
 0x48d   : > { %v6222_v32 = vadd.f32 %v6221_v19, %v6207_v59 }
 0x490   : > { %v6139_v0 = vpop.f32.mrf.mxu1 }
 0x491   : > { %v10021_v9 = vadd.f32 %v6139_v0, %v5896_v40  ;;  %v5875_v56 = vpop.f32.mrf.mxu0  ;;  %v5269_v27 = vpop.f32.mrf.mxu2 }
 0x492   : > { %v5900_v3 = vadd.f32 %v5875_v56, %v5482_v34 }
 0x493   : > { %v6185_v11 = vadd.f32 %v6184_v4, %v10021_v9  ;;  %v6208_v5 = vmul.f32 %v10021_v9, %v10021_v9 }
 0x495   : > { %v6223_v21 = vadd.f32 %v6222_v32, %v6208_v5  ;;  %v5484_v5 = vadd.f32 %v5462_v44, %v5289_v10 }
 0x498   : > { %v6141_v48 = vpop.f32.mrf.mxu1 }
 0x499   : > { %v10027_v46 = vadd.f32 %v6141_v48, %v5897_v57  ;;  %v5877_v63 = vpop.f32.mrf.mxu0  ;;  %v5464_v57 = vpop.f32.mrf.mxu3  ;;  %v5290_v48 = vadd.f32 %v5269_v27, %v9974_v1 }
 0x49a   : > { %v5901_v0 = vadd.f32 %v5877_v63, %v5483_v31  ;;  %v5272_v51 = vpop.f32.mrf.mxu2 }
 0x49b   : > { %v6186_v45 = vadd.f32 %v6185_v11, %v10027_v46  ;;  %v6209_v55 = vmul.f32 %v10027_v46, %v10027_v46  ;;  %v5291_v62 = vadd.f32 %v5272_v51, %v9977_v61 }
 0x49d   : > { %v6224_v58 = vadd.f32 %v6223_v21, %v6209_v55  ;;  %v5485_v55 = vadd.f32 %v5464_v57, %v5290_v48 }
 0x4a0   : > { %v6144_v60 = vpop.f32.mrf.mxu1 }
 0x4a1   : > { %v10033_v52 = vadd.f32 %v6144_v60, %v5898_v17  ;;  %v5880_v26 = vpop.f32.mrf.mxu0  ;;  %v5467_v2 = vpop.f32.mrf.mxu3 }
 0x4a2   : > { %v5902_v23 = vadd.f32 %v5880_v26, %v5484_v5  ;;  %v5486_v1 = vadd.f32 %v5467_v2, %v5291_v62 }
 0x4a3   : > { %v6187_v47 = vadd.f32 %v6186_v45, %v10033_v52  ;;  %v6210_v33 = vmul.f32 %v10033_v52, %v10033_v52 }
 0x4a5   : > { %v6225_v22 = vadd.f32 %v6224_v58, %v6210_v33 }
 0x4a8   : > { %v6146_v28 = vpop.f32.mrf.mxu1 }
 0x4a9   : > { %v10039_v42 = vadd.f32 %v6146_v28, %v5899_v29  ;;  %v5882_v41 = vpop.f32.mrf.mxu0  ;;  %v5274_v29 = vpop.f32.mrf.mxu2 }
 0x4aa   : > { %v5903_v60 = vadd.f32 %v5882_v41, %v5485_v55  ;;  %v5292_v28 = vadd.f32 %v5274_v29, %v9982_v35  ;;  %v5469_v61 = vpop.f32.mrf.mxu3 }
 0x4ab   : > { %v6188_v19 = vadd.f32 %v6187_v47, %v10039_v42  ;;  %v6211_v43 = vmul.f32 %v10039_v42, %v10039_v42 }
 0x4ad   : > { %v6226_v50 = vadd.f32 %v6225_v22, %v6211_v43  ;;  %v5487_v43 = vadd.f32 %v5469_v61, %v5292_v28 }
 0x4b0   : > { %v6149_v4 = vpop.f32.mrf.mxu1 }
 0x4b1   : > { %v10045_v59 = vadd.f32 %v6149_v4, %v5900_v3  ;;  %v5885_v53 = vpop.f32.mrf.mxu0 }
 0x4b2   : > { %v5904_v20 = vadd.f32 %v5885_v53, %v5486_v1 }
 0x4b3   : > { %v6189_v13 = vadd.f32 %v6188_v19, %v10045_v59  ;;  %v6212_v32 = vmul.f32 %v10045_v59, %v10045_v59 }
 0x4b5   : > { %v6227_v40 = vadd.f32 %v6226_v50, %v6212_v32 }
 0x4b8   : > { %v6151_v39 = vpop.f32.mrf.mxu1 }
 0x4b9   : > { %v10051_v11 = vadd.f32 %v6151_v39, %v5901_v0  ;;  %v5887_v3 = vpop.f32.mrf.mxu0 }
 0x4ba   : > { %v5905_v49 = vadd.f32 %v5887_v3, %v5487_v43 }
 0x4bb   : > { %v6190_v21 = vadd.f32 %v6189_v13, %v10051_v11  ;;  %v6213_v37 = vmul.f32 %v10051_v11, %v10051_v11 }
 0x4bd   : > { %v6228_v54 = vadd.f32 %v6227_v40, %v6213_v37 }
 0x4c0   : > { %v6154_v24 = vpop.f32.mrf.mxu1 }
 0x4c1   : > { %v10057_v45 = vadd.f32 %v6154_v24, %v5902_v23 }
 0x4c3   : > { %v6191_v8 = vadd.f32 %v6190_v21, %v10057_v45  ;;  %v6214_v58 = vmul.f32 %v10057_v45, %v10057_v45 }
 0x4c5   : > { %v6229_v17 = vadd.f32 %v6228_v54, %v6214_v58 }
 0x4c8   : > { %v6156_v47 = vpop.f32.mrf.mxu1 }
 0x4c9   : > { %v10063_v33 = vadd.f32 %v6156_v47, %v5903_v60 }
 0x4cb   : > { %v6192_v56 = vadd.f32 %v6191_v8, %v10063_v33  ;;  %v6215_v22 = vmul.f32 %v10063_v33, %v10063_v33 }
 0x4cd   : > { %v6230_v36 = vadd.f32 %v6229_v17, %v6215_v22 }
 0x4d0   : > { %v6159_v34 = vpop.f32.mrf.mxu1 }
 0x4d1   : > { %v10069_v19 = vadd.f32 %v6159_v34, %v5904_v20 }
 0x4d3   : > { %v6193_v50 = vadd.f32 %v6192_v56, %v10069_v19  ;;  %v6216_v63 = vmul.f32 %v10069_v19, %v10069_v19 }
 0x4d5   : > { %v6231_v14 = vadd.f32 %v6230_v36, %v6216_v63 }
 0x4d8   : > { %v6161_v4 = vpop.f32.mrf.mxu1 }
 0x4d9   : > { %v10074_v31 = vadd.f32 %v6161_v4, %v5905_v49 }
 0x4db   : > { %v6194_v13 = vadd.f32 %v6193_v50, %v10074_v31  ;;  %v6217_v35 = vmul.f32 %v10074_v31, %v10074_v31 }
 0x4dd   : > { %v6195_v32 = vrot.slane %v6194_v13, 4  ;;  %v6232_v44 = vadd.f32 %v6231_v14, %v6217_v35 }
 0x4df   : > { %v6196_v40 = vadd.f32 %v6195_v32, %v6194_v13  ;;  %v6233_v10 = vrot.slane %v6232_v44, 4 }
 0x4e1   : > { %v6197_v0 = vrot.slane %v6196_v40, 2  ;;  %v6234_v26 = vadd.f32 %v6233_v10, %v6232_v44 }
 0x4e3   : > { %v6198_v39 = vadd.f32 %v6197_v0, %v6196_v40  ;;  %v6235_v27 = vrot.slane %v6234_v26, 2 }
 0x4e5   : > { %v6199_v5 = vrot.slane %v6198_v39, 1  ;;  %v6236_v21 = vadd.f32 %v6235_v27, %v6234_v26 }
 0x4e7   : > { %v6200_v37 = vadd.f32 %v6199_v5, %v6198_v39  ;;  %v6237_v54 = vrot.slane %v6236_v21, 1 }
 0x4e9   : > { %v6201_v57 = vmul.f32 %v6200_v37, %v9162_v30  ;;  %v6238_v48 = vadd.f32 %v6237_v54, %v6236_v21 }
 0x4eb   : > { %v6239_v23 = vmul.f32 %v6238_v48, %v9162_v30  ;;  %v6240_v24 = vmul.f32 %v6201_v57, %v6201_v57  ;;  %v6244_v41 = vsub.f32 %v9991_v18, %v6201_v57  ;;  %v6245_v55 = vsub.f32 %v10003_v38, %v6201_v57 }
 0x4ec   : > { %v6246_v8 = vsub.f32 %v10009_v6, %v6201_v57  ;;  %v6247_v58 = vsub.f32 %v10015_v12, %v6201_v57  ;;  %v6248_v17 = vsub.f32 %v10021_v9, %v6201_v57  ;;  %v6249_v62 = vsub.f32 %v10027_v46, %v6201_v57 }
 0x4ed   : > { %v6241_v51 = vsub.f32 %v6239_v23, %v6240_v24  ;;  %v6250_v60 = vsub.f32 %v10033_v52, %v6201_v57  ;;  %v6251_v2 = vsub.f32 %v10039_v42, %v6201_v57  ;;  %v6252_v30 = vsub.f32 %v10045_v59, %v6201_v57 }
 0x4ee   : > { %v6253_v47 = vsub.f32 %v10051_v11, %v6201_v57  ;;  %v6254_v18 = vsub.f32 %v10057_v45, %v6201_v57  ;;  %v6255_v38 = vsub.f32 %v10063_v33, %v6201_v57  ;;  %v6256_v6 = vsub.f32 %v10069_v19, %v6201_v57 }
 0x4ef   : > { %v6257_v12 = vsub.f32 %v10074_v31, %v6201_v57  ;;  %v6258_v1 = vadd.f32 1e-05, %v6241_v51  ;;  %v6242_v59 = vsub.f32 %v9985_v15, %v6201_v57  ;;  %v6243_v11 = vsub.f32 %v9988_v7, %v6201_v57  ;;  %v8020_v7 = vld [vmem:[%s8284_s12] ss:$0 sm:$0xff] }
 0x4f0   : > { %v8021_v57 = vld [vmem:[%s8289_s21] ss:$0 sm:$0xff] }
 0x4f1   : > { %8004 = vrsqrt.f32 %v6258_v1  ;;  %vm6265_vm9 = vweird.f32 %v6258_v1 }
 0x4f7   : > { %v8005_v9 = vpop.eup %8004 }
 0x4f8   : > { %v6260_v46 = vmul.f32 %v8005_v9, %v6258_v1  ;;  %vm6266_vm8 = vweird.f32 %v8005_v9 }
 0x4f9   : > { %vm6267_vm10 = vmor %vm6265_vm9, %vm6266_vm8 }
 0x4fa   : > { %v6261_v56 = vmul.f32 %v8005_v9, %v6260_v46 }
 0x4fc   : > { %v6262_v52 = vmul.f32 0.5, %v6261_v56 }
 0x4fe   : > { %v6263_v22 = vsub.f32 1.5, %v6262_v52 }
 0x500   : > { %v6264_v42 = vmul.f32 %v8005_v9, %v6263_v22 }
 0x502   : > { %v6268_v45 = vsel %vm6267_vm10, %v8005_v9, %v6264_v42 }
 0x503   : > { %v6269_v33 = vmul.f32 %v6268_v45, %v6242_v59  ;;  %v6270_v53 = vmul.f32 %v6268_v45, %v6243_v11  ;;  %v6271_v36 = vmul.f32 %v6268_v45, %v6244_v41  ;;  %v6272_v29 = vmul.f32 %v6268_v45, %v6245_v55 }
 0x504   : > { %v6273_v28 = vmul.f32 %v6268_v45, %v6246_v8  ;;  %v6274_v20 = vmul.f32 %v6268_v45, %v6247_v58  ;;  %v6275_v34 = vmul.f32 %v6268_v45, %v6248_v17  ;;  %v6276_v19 = vmul.f32 %v6268_v45, %v6249_v62 }
 0x505   : > { %v6277_v61 = vmul.f32 %v6268_v45, %v6250_v60  ;;  %v6278_v43 = vmul.f32 %v6268_v45, %v6251_v2  ;;  %v6279_v50 = vmul.f32 %v6268_v45, %v6252_v30  ;;  %v6280_v63 = vmul.f32 %v6268_v45, %v6253_v47 }
 0x506   : > { %v6281_v14 = vmul.f32 %v6268_v45, %v6254_v18  ;;  %v6282_v3 = vmul.f32 %v6268_v45, %v6255_v38  ;;  %v6283_v15 = vmul.f32 %v6268_v45, %v6256_v6  ;;  %v6284_v49 = vmul.f32 %v6268_v45, %v6257_v12 }
 0x507   : > { %v6285_v4 = vmul.f32 %v8020_v7, %v6269_v33  ;;  %v6286_v31 = vmul.f32 %v8020_v7, %v6270_v53  ;;  %v6287_v13 = vmul.f32 %v8020_v7, %v6271_v36  ;;  %v6288_v35 = vmul.f32 %v8020_v7, %v6272_v29 }
 0x508   : > { %v6289_v32 = vmul.f32 %v8020_v7, %v6273_v28  ;;  %v6290_v44 = vmul.f32 %v8020_v7, %v6274_v20  ;;  %v6291_v40 = vmul.f32 %v8020_v7, %v6275_v34  ;;  %v6292_v10 = vmul.f32 %v8020_v7, %v6276_v19 }
 0x509   : > { %v6293_v0 = vmul.f32 %v8020_v7, %v6277_v61  ;;  %v6294_v26 = vmul.f32 %v8020_v7, %v6278_v43  ;;  %v6295_v39 = vmul.f32 %v8020_v7, %v6279_v50  ;;  %v6296_v27 = vmul.f32 %v8020_v7, %v6280_v63 }
 0x50a   : > { %v6297_v5 = vmul.f32 %v8020_v7, %v6281_v14  ;;  %v6298_v21 = vmul.f32 %v8020_v7, %v6282_v3  ;;  %v6299_v37 = vmul.f32 %v8020_v7, %v6283_v15  ;;  %v6300_v54 = vmul.f32 %v8020_v7, %v6284_v49 }
 0x50b   : > { %v6301_v48 = vadd.f32 %v8021_v57, %v6285_v4  ;;  %v6302_v23 = vadd.f32 %v8021_v57, %v6286_v31  ;;  %v6303_v24 = vadd.f32 %v8021_v57, %v6287_v13  ;;  %v6304_v41 = vadd.f32 %v8021_v57, %v6288_v35 }
 0x50c   : > { %v6305_v55 = vadd.f32 %v8021_v57, %v6289_v32  ;;  %v6306_v8 = vadd.f32 %v8021_v57, %v6290_v44  ;;  %v6307_v58 = vadd.f32 %v8021_v57, %v6291_v40  ;;  %v6308_v51 = vadd.f32 %v8021_v57, %v6292_v10 }
 0x50d   : > { %v6309_v17 = vadd.f32 %v8021_v57, %v6293_v0  ;;  %v6310_v62 = vadd.f32 %v8021_v57, %v6294_v26  ;;  %v6311_v60 = vadd.f32 %v8021_v57, %v6295_v39  ;;  %v6312_v2 = vadd.f32 %v8021_v57, %v6296_v27 }
 0x50e   : > { %v6313_v30 = vadd.f32 %v8021_v57, %v6297_v5  ;;  %v6314_v47 = vadd.f32 %v8021_v57, %v6298_v21  ;;  %v6315_v18 = vadd.f32 %v8021_v57, %v6299_v37  ;;  %v6316_v38 = vadd.f32 %v8021_v57, %v6300_v54  ;;  %6336 = sbr.rel (%p7749_p7) target bundleno = 1340 (0x53c), region = 64 }
 0x50f   : > { %v10099_v6 = vmax.f32 %v6301_v48, 0.0  ;;  %v10101_v12 = vmax.f32 %v6302_v23, 0.0  ;;  %v10103_v1 = vmax.f32 %v6303_v24, 0.0  ;;  %v10105_v9 = vmax.f32 %v6304_v41, 0.0 }
 0x510   : > { %v10107_v46 = vmax.f32 %v6305_v55, 0.0  ;;  %v10109_v56 = vmax.f32 %v6306_v8, 0.0  ;;  %v10111_v52 = vmax.f32 %v6307_v58, 0.0  ;;  %v10113_v22 = vmax.f32 %v6308_v51, 0.0 }
 0x511   : > { %v10115_v42 = vmax.f32 %v6309_v17, 0.0  ;;  %v10117_v59 = vmax.f32 %v6310_v62, 0.0  ;;  %v10119_v11 = vmax.f32 %v6311_v60, 0.0  ;;  %v10121_v45 = vmax.f32 %v6312_v2, 0.0 }
 0x512   : > { %v10123_v33 = vmax.f32 %v6313_v30, 0.0  ;;  %v10125_v53 = vmax.f32 %v6314_v47, 0.0  ;;  %v10127_v36 = vmax.f32 %v6315_v18, 0.0  ;;  %v10129_v29 = vmax.f32 %v6316_v38, 0.0 }
 0x513   : > { %v6337_v28 = vpack.c.bf16 %v10099_v6, %v10099_v6  ;;  %v6338_v20 = vpack.c.bf16 %v10101_v12, %v10101_v12  ;;  %v6339_v34 = vpack.c.bf16 %v10103_v1, %v10103_v1  ;;  %v6340_v19 = vpack.c.bf16 %v10105_v9, %v10105_v9  ;;  %v6513_v49 = vld [vmem:[#allocation2 + $0x8] sm:$0xf]  ;;  %v6516_v7 = vld [vmem:[#allocation2 + $0xc] sm:$0x1]  ;;  %v6519_v4 = vld [vmem:[#allocation2 + $0x10] sm:$0xf] }
 0x514   : > { %v6341_v61 = vpack.c.bf16 %v10107_v46, %v10107_v46  ;;  %v6342_v43 = vpack.c.bf16 %v10109_v56, %v10109_v56  ;;  %v10146_v50 = vpack.c.bf16 %v10111_v52, %v10111_v52  ;;  %v6522_v10 = vld [vmem:[#allocation2 + $0x14] sm:$0x1]  ;;  %v6344_v26 = vpack.c.bf16 %v10113_v22, %v10113_v22  ;;  %v6525_v27 = vld [vmem:[#allocation2 + $0x18] sm:$0xf]  ;;  %v6528_v24 = vld [vmem:[#allocation2 + $0x1c] sm:$0x1] }
 0x515   : > { %v6354_v63 = vshrl.u32 %v6337_v28, 16  ;;  %v6357_v14 = vshll.u32 %v6337_v28, 16  ;;  %v6362_v3 = vshrl.u32 %v6338_v20, 16  ;;  %v6365_v15 = vshll.u32 %v6338_v20, 16  ;;  %v6531_v41 = vld [vmem:[#allocation2 + $0x20] sm:$0xf] }
 0x516   : > { %v6370_v31 = vshrl.u32 %v6339_v34, 16  ;;  %v6373_v13 = vshll.u32 %v6339_v34, 16  ;;  %v6378_v35 = vshrl.u32 %v6340_v19, 16  ;;  %v6381_v32 = vshll.u32 %v6340_v19, 16  ;;  %v6534_v17 = vld [vmem:[#allocation2 + $0x24] sm:$0x1] }
 0x517   : > { %v6356_v44 = vrot.slane %v6354_v63, 7  ;;  %v6364_v40 = vrot.slane %v6362_v3, 7  ;;  %v6386_v0 = vshrl.u32 %v6341_v61, 16  ;;  %v6389_v21 = vshll.u32 %v6341_v61, 16  ;;  %v6537_v20 = vld [vmem:[#allocation2 + $0x28] sm:$0xf] }
 0x518   : > { %v6372_v39 = vrot.slane %v6370_v31, 7  ;;  %v6380_v5 = vrot.slane %v6378_v35, 7  ;;  %v6394_v37 = vshrl.u32 %v6342_v43, 16  ;;  %v6397_v30 = vshll.u32 %v6342_v43, 16  ;;  %v6540_v34 = vld [vmem:[#allocation2 + $0x2c] sm:$0x1] }
 0x519   : > { %v6359_v54 = vor.u32 %v6357_v14, %v6356_v44  ;;  %v6360_v57 = vrot.slane %v6356_v44, 4  ;;  %v6367_v48 = vor.u32 %v6365_v15, %v6364_v40  ;;  %v6368_v23 = vrot.slane %v6364_v40, 4  ;;  %v6543_v19 = vld [vmem:[#allocation2 + $0x30] sm:$0xf]  ;;  %v6546_v35 = vld [vmem:[#allocation2 + $0x34] sm:$0x1] }
 0x51a   : > { %v6375_v55 = vor.u32 %v6373_v13, %v6372_v39  ;;  %v6376_v8 = vrot.slane %v6372_v39, 4  ;;  %v6383_v58 = vor.u32 %v6381_v32, %v6380_v5  ;;  %v6384_v51 = vrot.slane %v6380_v5, 4  ;;  %v6549_v32 = vld [vmem:[#allocation2 + $0x38] sm:$0xf]  ;;  %v6552_v5 = vld [vmem:[#allocation2 + $0x3c] sm:$0x1] }
 0x51b   : > { %v6514_v62 = vsel %vm9242_vm5, %v6359_v54, %v6513_v49  ;;  %v6517_v60 = vsel %vm9248_vm6, %v6360_v57, %v6516_v7  ;;  %v6520_v2 = vsel %vm9242_vm5, %v6367_v48, %v6519_v4  ;;  %v6523_v47 = vsel %vm9248_vm6, %v6368_v23, %v6522_v10  ;;  %v6555_v48 = vld [vmem:[#allocation2 + $0x40] sm:$0xf] }
 0x51c   : > { %6515 = vst [vmem:[#allocation2 + $0x8] sm:$0xf] %v6514_v62  ;;  %v6526_v18 = vsel %vm9242_vm5, %v6375_v55, %v6525_v27  ;;  %v6529_v38 = vsel %vm9248_vm6, %v6376_v8, %v6528_v24  ;;  %v6532_v28 = vsel %vm9242_vm5, %v6383_v58, %v6531_v41  ;;  %v6535_v61 = vsel %vm9248_vm6, %v6384_v51, %v6534_v17  ;;  %v6558_v24 = vld [vmem:[#allocation2 + $0x44] sm:$0x1] }
 0x51d   : > { %6518 = vst [vmem:[#allocation2 + $0xc] sm:$0x1] %v6517_v60  ;;  %v6388_v43 = vrot.slane %v6386_v0, 7  ;;  %v6396_v63 = vrot.slane %v6394_v37, 7  ;;  %v6402_v14 = vshrl.u32 %v10146_v50, 16  ;;  %v6405_v3 = vshll.u32 %v10146_v50, 16 }
 0x51e   : > { %6521 = vst [vmem:[#allocation2 + $0x10] sm:$0xf] %v6520_v2  ;;  %v6410_v15 = vshrl.u32 %v6344_v26, 16  ;;  %v6413_v49 = vshll.u32 %v6344_v26, 16  ;;  %v6345_v7 = vpack.c.bf16 %v10115_v42, %v10115_v42  ;;  %v6346_v44 = vpack.c.bf16 %v10117_v59, %v10117_v59  ;;  %v6561_v60 = vld [vmem:[#allocation2 + $0x58] sm:$0xf] }
 0x51f   : > { %6524 = vst [vmem:[#allocation2 + $0x14] sm:$0x1] %v6523_v47  ;;  %v6391_v4 = vor.u32 %v6389_v21, %v6388_v43  ;;  %v6392_v31 = vrot.slane %v6388_v43, 4  ;;  %v6399_v13 = vor.u32 %v6397_v30, %v6396_v63  ;;  %v6400_v40 = vrot.slane %v6396_v63, 4  ;;  %v6564_v2 = vld [vmem:[#allocation2 + $0x5c] sm:$0x1] }
 0x520   : > { %6527 = vst [vmem:[#allocation2 + $0x18] sm:$0xf] %v6526_v18  ;;  %v6404_v10 = vrot.slane %v6402_v14, 7  ;;  %v6412_v0 = vrot.slane %v6410_v15, 7  ;;  %v6418_v39 = vshrl.u32 %v6345_v7, 16  ;;  %v6421_v21 = vshll.u32 %v6345_v7, 16 }
 0x521   : > { %6530 = vst [vmem:[#allocation2 + $0x1c] sm:$0x1] %v6529_v38  ;;  %v6538_v50 = vsel %vm9242_vm5, %v6391_v4, %v6537_v20  ;;  %v6541_v26 = vsel %vm9248_vm6, %v6392_v31, %v6540_v34  ;;  %v6544_v27 = vsel %vm9242_vm5, %v6399_v13, %v6543_v19  ;;  %v6426_v55 = vshrl.u32 %v6346_v44, 16  ;;  %v6570_v15 = vld [vmem:[#allocation2 + $0x64] sm:$0x1] }
 0x522   : > { %6533 = vst [vmem:[#allocation2 + $0x20] sm:$0xf] %v6532_v28  ;;  %v6407_v37 = vor.u32 %v6405_v3, %v6404_v10  ;;  %v6408_v54 = vrot.slane %v6404_v10, 4  ;;  %v6415_v57 = vor.u32 %v6413_v49, %v6412_v0  ;;  %v6416_v23 = vrot.slane %v6412_v0, 4  ;;  %v6567_v28 = vld [vmem:[#allocation2 + $0x60] sm:$0xf] }
 0x523   : > { %6536 = vst [vmem:[#allocation2 + $0x24] sm:$0x1] %v6535_v61  ;;  %v6420_v41 = vrot.slane %v6418_v39, 7  ;;  %v6429_v8 = vshll.u32 %v6346_v44, 16  ;;  %v6347_v58 = vpack.c.bf16 %v10119_v11, %v10119_v11  ;;  %v6547_v51 = vsel %vm9248_vm6, %v6400_v40, %v6546_v35  ;;  %v6573_v7 = vld [vmem:[#allocation2 + $0x68] sm:$0xf] }
 0x524   : > { %6539 = vst [vmem:[#allocation2 + $0x28] sm:$0xf] %v6538_v50  ;;  %v6550_v17 = vsel %vm9242_vm5, %v6407_v37, %v6549_v32  ;;  %v6553_v62 = vsel %vm9248_vm6, %v6408_v54, %v6552_v5  ;;  %v6428_v18 = vrot.slane %v6426_v55, 7  ;;  %v6348_v34 = vpack.c.bf16 %v10121_v45, %v10121_v45  ;;  %v6576_v44 = vld [vmem:[#allocation2 + $0x6c] sm:$0x1] }
 0x525   : > { %6542 = vst [vmem:[#allocation2 + $0x2c] sm:$0x1] %v6541_v26  ;;  %v6423_v30 = vor.u32 %v6421_v21, %v6420_v41  ;;  %v6424_v47 = vrot.slane %v6420_v41, 4  ;;  %v6434_v38 = vshrl.u32 %v6347_v58, 16  ;;  %v6437_v20 = vshll.u32 %v6347_v58, 16 }
 0x526   : > { %6545 = vst [vmem:[#allocation2 + $0x30] sm:$0xf] %v6544_v27  ;;  %v6349_v19 = vpack.c.bf16 %v10123_v33, %v10123_v33  ;;  %v6350_v61 = vpack.c.bf16 %v10125_v53, %v10125_v53  ;;  %v6556_v43 = vsel %vm9242_vm5, %v6415_v57, %v6555_v48  ;;  %v6559_v63 = vsel %vm9248_vm6, %v6416_v23, %v6558_v24  ;;  %v6579_v5 = vld [vmem:[#allocation2 + $0x70] sm:$0xf]  ;;  %v6582_v24 = vld [vmem:[#allocation2 + $0x74] sm:$0x1] }
 0x527   : > { %6548 = vst [vmem:[#allocation2 + $0x34] sm:$0x1] %v6547_v51  ;;  %v6431_v14 = vor.u32 %v6429_v8, %v6428_v18  ;;  %v6432_v3 = vrot.slane %v6428_v18, 4  ;;  %v6436_v49 = vrot.slane %v6434_v38, 7  ;;  %v6442_v4 = vshrl.u32 %v6348_v34, 16 }
 0x528   : > { %6551 = vst [vmem:[#allocation2 + $0x38] sm:$0xf] %v6550_v17  ;;  %v6445_v31 = vshll.u32 %v6348_v34, 16  ;;  %v6450_v13 = vshrl.u32 %v6349_v19, 16  ;;  %v6562_v35 = vsel %vm9242_vm5, %v6423_v30, %v6561_v60  ;;  %v6565_v32 = vsel %vm9248_vm6, %v6424_v47, %v6564_v2  ;;  %v6585_v58 = vld [vmem:[#allocation2 + $0x78] sm:$0xf] }
 0x529   : > { %6554 = vst [vmem:[#allocation2 + $0x3c] sm:$0x1] %v6553_v62  ;;  %v6453_v40 = vshll.u32 %v6349_v19, 16  ;;  %v6458_v10 = vshrl.u32 %v6350_v61, 16  ;;  %v6439_v0 = vor.u32 %v6437_v20, %v6436_v49  ;;  %v6440_v39 = vrot.slane %v6436_v49, 4 }
 0x52a   : > { %6557 = vst [vmem:[#allocation2 + $0x40] sm:$0xf] %v6556_v43  ;;  %v6444_v50 = vrot.slane %v6442_v4, 7  ;;  %v6452_v26 = vrot.slane %v6450_v13, 7  ;;  %v6568_v27 = vsel %vm9242_vm5, %v6431_v14, %v6567_v28  ;;  %v6461_v37 = vshll.u32 %v6350_v61, 16 }
 0x52b   : > { %6560 = vst [vmem:[#allocation2 + $0x44] sm:$0x1] %v6559_v63  ;;  %v6460_v21 = vrot.slane %v6458_v10, 7  ;;  %v6351_v54 = vpack.c.bf16 %v10127_v36, %v10127_v36  ;;  %v6571_v57 = vsel %vm9248_vm6, %v6432_v3, %v6570_v15  ;;  %v6352_v41 = vpack.c.bf16 %v10129_v29, %v10129_v29  ;;  %v6588_v51 = vld [vmem:[#allocation2 + $0x7c] sm:$0x1] }
 0x52c   : > { %6563 = vst [vmem:[#allocation2 + $0x58] sm:$0xf] %v6562_v35  ;;  %v6447_v48 = vor.u32 %v6445_v31, %v6444_v50  ;;  %v6448_v23 = vrot.slane %v6444_v50, 4  ;;  %v6574_v55 = vsel %vm9242_vm5, %v6439_v0, %v6573_v7  ;;  %v6455_v8 = vor.u32 %v6453_v40, %v6452_v26  ;;  %v6591_v18 = vld [vmem:[#allocation2 + $0x80] sm:$0xf] }
 0x52d   : > { %6566 = vst [vmem:[#allocation2 + $0x5c] sm:$0x1] %v6565_v32  ;;  %v6577_v17 = vsel %vm9248_vm6, %v6440_v39, %v6576_v44  ;;  %v6456_v62 = vrot.slane %v6452_v26, 4  ;;  %v6466_v60 = vshrl.u32 %v6351_v54, 16  ;;  %v6469_v2 = vshll.u32 %v6351_v54, 16 }
 0x52e   : > { %6569 = vst [vmem:[#allocation2 + $0x60] sm:$0xf] %v6568_v27  ;;  %v6580_v30 = vsel %vm9242_vm5, %v6447_v48, %v6579_v5  ;;  %v6463_v47 = vor.u32 %v6461_v37, %v6460_v21  ;;  %v6464_v38 = vrot.slane %v6460_v21, 4  ;;  %v6583_v28 = vsel %vm9248_vm6, %v6448_v23, %v6582_v24  ;;  %v6594_v43 = vld [vmem:[#allocation2 + $0x84] sm:$0x1] }
 0x52f   : > { %6572 = vst [vmem:[#allocation2 + $0x64] sm:$0x1] %v6571_v57  ;;  %v6468_v20 = vrot.slane %v6466_v60, 7  ;;  %v6474_v34 = vshrl.u32 %v6352_v41, 16  ;;  %v6477_v19 = vshll.u32 %v6352_v41, 16  ;;  %v6586_v61 = vsel %vm9242_vm5, %v6455_v8, %v6585_v58 }
 0x530   : > { %6575 = vst [vmem:[#allocation2 + $0x68] sm:$0xf] %v6574_v55  ;;  %v6589_v63 = vsel %vm9248_vm6, %v6456_v62, %v6588_v51  ;;  %v6597_v3 = vld [vmem:[#allocation2 + $0x88] sm:$0xf]  ;;  %v6592_v7 = vsel %vm9242_vm5, %v6463_v47, %v6591_v18  ;;  %v6600_v4 = vld [vmem:[#allocation2 + $0x8c] sm:$0x1]  ;;  %v6595_v31 = vsel %vm9248_vm6, %v6464_v38, %v6594_v43 }
 0x531   : > { %6578 = vst [vmem:[#allocation2 + $0x6c] sm:$0x1] %v6577_v17  ;;  %v6471_v14 = vor.u32 %v6469_v2, %v6468_v20  ;;  %v6472_v15 = vrot.slane %v6468_v20, 4  ;;  %v6476_v49 = vrot.slane %v6474_v34, 7  ;;  %v6603_v35 = vld [vmem:[#allocation2 + $0x90] sm:$0xf] }
 0x532   : > { %6581 = vst [vmem:[#allocation2 + $0x70] sm:$0xf] %v6580_v30  ;;  %v6606_v40 = vld [vmem:[#allocation2 + $0x94] sm:$0x1] }
 0x533   : > { %6584 = vst [vmem:[#allocation2 + $0x74] sm:$0x1] %v6583_v28  ;;  %v6479_v13 = vor.u32 %v6477_v19, %v6476_v49  ;;  %v6480_v32 = vrot.slane %v6476_v49, 4  ;;  %v6598_v44 = vsel %vm9242_vm5, %v6471_v14, %v6597_v3  ;;  %v6601_v10 = vsel %vm9248_vm6, %v6472_v15, %v6600_v4 }
 0x534   : > { %6587 = vst [vmem:[#allocation2 + $0x78] sm:$0xf] %v6586_v61 }
 0x535   : > { %6590 = vst [vmem:[#allocation2 + $0x7c] sm:$0x1] %v6589_v63  ;;  %v6604_v0 = vsel %vm9242_vm5, %v6479_v13, %v6603_v35  ;;  %v6607_v39 = vsel %vm9248_vm6, %v6480_v32, %v6606_v40 }
 0x536   : > { %6593 = vst [vmem:[#allocation2 + $0x80] sm:$0xf] %v6592_v7 }
 0x537   : > { %6596 = vst [vmem:[#allocation2 + $0x84] sm:$0x1] %v6595_v31 }
 0x538   : > { %6599 = vst [vmem:[#allocation2 + $0x88] sm:$0xf] %v6598_v44 }
 0x539   : > { %6602 = vst [vmem:[#allocation2 + $0x8c] sm:$0x1] %v6601_v10 }
 0x53a   : > { %6605 = vst [vmem:[#allocation2 + $0x90] sm:$0xf] %v6604_v0 }
 0x53b   : > { %6608 = vst [vmem:[#allocation2 + $0x94] sm:$0x1] %v6607_v39 }
 0x53c PF: > { %p7750_p2 = scmp.ne.s32.totalorder %s8186_s28, 3 }
 0x53e   : > { %6612 = sbr.rel (%p7750_p2) target bundleno = 1532 (0x5fc), region = 68 }
 0x543   : > { %v7919_v50 = vld [vmem:[%s10344_s5 + $0x28] sm:$0xff]  ;;  %v7918_v25 = vld [vmem:[%s10344_s5 + $0x20] sm:$0xff]  ;;  %v7917_v16 = vld [vmem:[%s10344_s5 + $0x18] sm:$0xff]  ;;  %v6613_v21 = vpack.c.bf16 %v10101_v12, %v10099_v6  ;;  %v6615_v37 = vpack.c.bf16 %v10109_v56, %v10107_v46  ;;  %v6617_v54 = vpack.c.bf16 %v10117_v59, %v10115_v42  ;;  %v6619_v57 = vpack.c.bf16 %v10125_v53, %v10123_v33 }
 0x544   : > { %6699 = vmatpush.bf16.msra.mxu0 %v7919_v50  ;;  %7926 = vmatpush.bf16.msra.mxu1 %v7919_v50  ;;  %v7916_v26 = vld [vmem:[%s10344_s5 + $0x10] sm:$0xff]  ;;  %v7915_v27 = vld [vmem:[%s10344_s5 + $0x8] sm:$0xff]  ;;  %v7914_v5 = vld [vmem:[%s10344_s5] sm:$0xff]  ;;  %v6614_v6 = vpack.c.bf16 %v10105_v9, %v10103_v1  ;;  %v6616_v12 = vpack.c.bf16 %v10113_v22, %v10111_v52  ;;  %v6618_v46 = vpack.c.bf16 %v10121_v45, %v10119_v11 }
 0x545   : > { %7927 = vmatpush.bf16.msra.mxu2 %v7919_v50  ;;  %7928 = vmatpush.bf16.msra.mxu3 %v7919_v50  ;;  %v6620_v56 = vpack.c.bf16 %v10129_v29, %v10127_v36  ;;  %v8022_v1 = vld [vmem:[%s10345_s6] ss:$0 sm:$0xff] }
 0x548   : > { %6700 = vmatpush.bf16.msra.mxu0 %v7918_v25  ;;  %7929 = vmatpush.bf16.msra.mxu1 %v7918_v25 }
 0x549   : > { %7930 = vmatpush.bf16.msra.mxu2 %v7918_v25  ;;  %7931 = vmatpush.bf16.msra.mxu3 %v7918_v25 }
 0x54c   : > { %6701 = vmatpush.bf16.msra.mxu0 %v7917_v16  ;;  %7932 = vmatpush.bf16.msra.mxu1 %v7917_v16 }
 0x54d   : > { %7933 = vmatpush.bf16.msra.mxu2 %v7917_v16  ;;  %7934 = vmatpush.bf16.msra.mxu3 %v7917_v16 }
 0x550   : > { %6702 = vmatpush.bf16.msra.mxu0 %v7916_v26  ;;  %7935 = vmatpush.bf16.msra.mxu1 %v7916_v26 }
 0x551   : > { %7936 = vmatpush.bf16.msra.mxu2 %v7916_v26  ;;  %7937 = vmatpush.bf16.msra.mxu3 %v7916_v26 }
 0x554   : > { %6703 = vmatpush.bf16.msra.mxu0 %v7915_v27  ;;  %7938 = vmatpush.bf16.msra.mxu1 %v7915_v27 }
 0x555   : > { %7939 = vmatpush.bf16.msra.mxu2 %v7915_v27  ;;  %7940 = vmatpush.bf16.msra.mxu3 %v7915_v27 }
 0x558   : > { %6704 = vmatpush.bf16.msra.mxu0 %v7914_v5  ;;  %7941 = vmatpush.bf16.msra.mxu1 %v7914_v5 }
 0x559   : > { %7942 = vmatpush.bf16.msra.mxu2 %v7914_v5  ;;  %7943 = vmatpush.bf16.msra.mxu3 %v7914_v5 }
 0x55b   : > { %7775 = vmatmul.msk.bf16.vlgmr.msra.gmra.mxu0 %vm3910_vm7, %v6613_v21  ;;  %7777 = vmatmul.msk.bf16.vlgmr.msra.gmra.mxu1 %vm3910_vm7, %v6615_v37 }
 0x55c   : > { %7779 = vmatmul.msk.bf16.vlgmr.msra.gmra.mxu2 %vm3910_vm7, %v6617_v54  ;;  %7781 = vmatmul.msk.bf16.vlgmr.msra.gmra.mxu3 %vm3910_vm7, %v6619_v57 }
 0x56b   : > { %7776 = vmatmul.msk.bf16.gmra.mxu0 %vm3910_vm7, %v6614_v6  ;;  %7778 = vmatmul.msk.bf16.gmra.mxu1 %vm3910_vm7, %v6616_v12 }
 0x56c   : > { %7780 = vmatmul.msk.bf16.gmra.mxu2 %vm3910_vm7, %v6618_v46  ;;  %7782 = vmatmul.msk.bf16.gmra.mxu3 %vm3910_vm7, %v6620_v56 }
 0x5d8   : > { %v6706_v9 = vpop.f32.mrf.mxu0  ;;  %v6716_v52 = vpop.f32.mrf.mxu1 }
 0x5d9   : > { %v6707_v22 = vadd.f32 %v8022_v1, %v6706_v9  ;;  %v6717_v42 = vadd.f32 %v8022_v1, %v6716_v52 }
 0x5db   : > { %6746 = vst [vmem:[%s10346_s7] sm:$0xff] %v6707_v22 }
 0x5dc   : > { %6750 = vst [vmem:[%s10346_s7 + $0x20] sm:$0xff] %v6717_v42 }
 0x5df   : > { %v6726_v59 = vpop.f32.mrf.mxu2  ;;  %v6736_v11 = vpop.f32.mrf.mxu3 }
 0x5e0   : > { %v6727_v45 = vadd.f32 %v8022_v1, %v6726_v59  ;;  %v6737_v33 = vadd.f32 %v8022_v1, %v6736_v11  ;;  %v6708_v53 = vpop.f32.mrf.mxu0  ;;  %v6718_v36 = vpop.f32.mrf.mxu1 }
 0x5e1   : > { %v6709_v29 = vadd.f32 %v8022_v1, %v6708_v53  ;;  %v6719_v48 = vadd.f32 %v8022_v1, %v6718_v36 }
 0x5e2   : > { %6754 = vst [vmem:[%s10346_s7 + $0x40] sm:$0xff] %v6727_v45 }
 0x5e3   : > { %6758 = vst [vmem:[%s10346_s7 + $0x60] sm:$0xff] %v6737_v33 }
 0x5e4   : > { %6747 = vst [vmem:[%s10346_s7 + $0x8] sm:$0xff] %v6709_v29 }
 0x5e5   : > { %6751 = vst [vmem:[%s10346_s7 + $0x28] sm:$0xff] %v6719_v48 }
 0x5e7   : > { %v6728_v23 = vpop.f32.mrf.mxu2  ;;  %v6738_v24 = vpop.f32.mrf.mxu3 }
 0x5e8   : > { %v6729_v41 = vadd.f32 %v8022_v1, %v6728_v23  ;;  %v6739_v55 = vadd.f32 %v8022_v1, %v6738_v24  ;;  %v6711_v8 = vpop.f32.mrf.mxu0  ;;  %v6721_v58 = vpop.f32.mrf.mxu1 }
 0x5e9   : > { %v6712_v51 = vadd.f32 %v8022_v1, %v6711_v8  ;;  %v6722_v17 = vadd.f32 %v8022_v1, %v6721_v58 }
 0x5ea   : > { %6755 = vst [vmem:[%s10346_s7 + $0x48] sm:$0xff] %v6729_v41 }
 0x5eb   : > { %6759 = vst [vmem:[%s10346_s7 + $0x68] sm:$0xff] %v6739_v55 }
 0x5ec   : > { %6748 = vst [vmem:[%s10346_s7 + $0x10] sm:$0xff] %v6712_v51 }
 0x5ed   : > { %6752 = vst [vmem:[%s10346_s7 + $0x30] sm:$0xff] %v6722_v17 }
 0x5ef   : > { %v6731_v62 = vpop.f32.mrf.mxu2  ;;  %v6741_v60 = vpop.f32.mrf.mxu3 }
 0x5f0   : > { %v6732_v2 = vadd.f32 %v8022_v1, %v6731_v62  ;;  %v6742_v30 = vadd.f32 %v8022_v1, %v6741_v60  ;;  %v6713_v47 = vpop.f32.mrf.mxu0  ;;  %v6723_v18 = vpop.f32.mrf.mxu1 }
 0x5f1   : > { %v6714_v38 = vadd.f32 %v8022_v1, %v6713_v47  ;;  %v6724_v28 = vadd.f32 %v8022_v1, %v6723_v18 }
 0x5f2   : > { %6756 = vst [vmem:[%s10346_s7 + $0x50] sm:$0xff] %v6732_v2 }
 0x5f3   : > { %6760 = vst [vmem:[%s10346_s7 + $0x70] sm:$0xff] %v6742_v30 }
 0x5f4   : > { %6749 = vst [vmem:[%s10346_s7 + $0x18] sm:$0xff] %v6714_v38 }
 0x5f5   : > { %6753 = vst [vmem:[%s10346_s7 + $0x38] sm:$0xff] %v6724_v28 }
 0x5f7   : > { %v6733_v20 = vpop.f32.mrf.mxu2  ;;  %v6743_v34 = vpop.f32.mrf.mxu3 }
 0x5f8   : > { %v6734_v19 = vadd.f32 %v8022_v1, %v6733_v20  ;;  %v6744_v61 = vadd.f32 %v8022_v1, %v6743_v34 }
 0x5fa   : > { %6757 = vst [vmem:[%s10346_s7 + $0x58] sm:$0xff] %v6734_v19 }
 0x5fb   : > { %6761 = vst [vmem:[%s10346_s7 + $0x78] sm:$0xff] %v6744_v61 }
 0x5fc PF: > { %p20_p3 = scmp.ge.s32.totalorder %s8189_s29, 6   ;;  %s10392_s24 = smov %s8113_s25 }
 0x5fd   : > { %s10393_s25 = smov %s8117_s26  ;;  %s10394_s26 = smov %s8199_s9 }
 0x5fe   : > { %s10395_s27 = smov %s8189_s29  ;;  %22 = sbr.rel (!%p20_p3) target bundleno = 7 (0x7), region = 136 }
 0x603   :  { %6773 = vsyncpa [#allocation5], 1 }
 0x604   :  { %6775 = vsyncpa [#allocation5 + $0x1], 1 }
 0x605   :  { %6776 = vsyncpa [#allocation7], 1 }
 0x606   :  { %6778 = vsyncpa [#allocation7 + $0x1], 1 }

</bundles_post_ra>
